<compile_context>
chip_gen: v7x
topology: tpu7x:2x2x1
jax: 0.10.0
libtpu: 0.0.40
codegen_flags: <defaults>
</compile_context>

<pallas_src>
import math
import functools

import jax
import jax.numpy as jnp
from jax.experimental import pallas as pl
from jax.experimental.pallas import tpu as pltpu


# ----------------------------- glue (plain JAX) -----------------------------

def linear_position_embedding_sine(x, dim, normalize_factor=1.0 / 200.0):
    """Matches FlowFormer's LinearPositionEmbeddingSine (pe='linear').
    x: (..., 2) coordinates -> (..., dim) encoding."""
    freq = jnp.linspace(0.0, dim // 4 - 1, dim // 4, dtype=jnp.float32)
    a = 3.14 * x[..., -2:-1] * freq * normalize_factor
    b = 3.14 * x[..., -1:] * freq * normalize_factor
    return jnp.concatenate([jnp.sin(a), jnp.cos(a), jnp.sin(b), jnp.cos(b)], axis=-1)


# --------------------------- in-kernel helpers ------------------------------

def _layernorm(x, g, b, eps=1e-5):
    mu = jnp.mean(x, axis=-1, keepdims=True)
    xc = x - mu
    var = jnp.mean(xc * xc, axis=-1, keepdims=True)
    return xc * jax.lax.rsqrt(var + eps) * g + b


def _erf(x):
    # Abramowitz & Stegun 7.1.26 (|err| <= 1.5e-7).  The divide goes to the
    # EUP via pl.reciprocal, exp also hits the EUP slot.
    a1, a2, a3, a4, a5 = 0.254829592, -0.284496736, 1.421413741, -1.453152027, 1.061405429
    p = 0.3275911
    sgn = jnp.where(x >= 0.0, 1.0, -1.0)
    ax = jnp.abs(x)
    t = pl.reciprocal(1.0 + p * ax, approx=True)
    poly = ((((a5 * t + a4) * t + a3) * t + a2) * t + a1) * t
    return sgn * (1.0 - poly * jnp.exp(-ax * ax))


def _gelu_exact(x):
    return 0.5 * x * (1.0 + _erf(x * (1.0 / math.sqrt(2.0))))


# ------------------------------- the kernel ---------------------------------

def _cgsa_kernel(tb, n1, n2, num_heads,
                 x_ref, peq_ref, mem_ref, vec_ref, bkv_ref,
                 wq_ref, wkv_ref, wp_ref, wf1_ref, wf2_ref,
                 xo_ref, kvo_ref, o_scr):
    bf16 = jnp.bfloat16
    x = x_ref[...]          # (tb*n1, C1) f32  query tokens (short_cut), flattened
    mem = mem_ref[...]      # (tb*n2, C2) f32  memory tokens, flattened
    c1 = x.shape[-1]
    hd = c1 // num_heads

    # Stacked resident gains/biases (one (8, C1) slab).
    g1 = vec_ref[0:1, :]
    b1 = vec_ref[1:2, :]
    bp = vec_ref[2:3, :]
    g2 = vec_ref[3:4, :]
    b2 = vec_ref[4:5, :]
    bf1 = vec_ref[5:6, :]
    bf2 = vec_ref[6:7, :]

    # norm1 + q projection.  Softmax scale and the positional-encoding / q-bias
    # contribution are folded into wq_ref / peq_ref outside the kernel.
    xn = _layernorm(x, g1, b1)
    q_flat = jnp.dot(xn.astype(bf16), wq_ref[...],
                     preferred_element_type=jnp.float32)          # (tb*n1, C1)
    q3 = q_flat.reshape(tb, n1, c1) + peq_ref[...].reshape(tb, 1, c1)

    # kv projection: a single dot and a single lane-dense output slab.
    kv = jnp.dot(mem.astype(bf16), wkv_ref[...],
                 preferred_element_type=jnp.float32) + bkv_ref[...]  # (tb*n2, C2)
    kvo_ref[...] = kv

    # Per-head attention, batched over the tb token-batches of this block.
    # Head outputs land in the (tb*n1, C1) VMEM scratch slab so the output
    # projection is a single K=C1 dot (no per-head dots / accumulation).
    q16 = q3.astype(bf16)                              # (tb, n1, C1)
    kv16 = kv.reshape(tb, n2, 2 * c1).astype(bf16)     # (tb, n2, C2)
    for h in range(num_heads):
        qh = q16[:, :, h * hd:(h + 1) * hd]                       # (tb, n1, hd)
        kh = kv16[:, :, h * hd:(h + 1) * hd]                      # (tb, n2, hd)
        vh = kv16[:, :, c1 + h * hd:c1 + (h + 1) * hd]            # (tb, n2, hd)

        s = jnp.einsum('bqd,bkd->bqk', qh, kh,
                       preferred_element_type=jnp.float32)        # (tb, n1, n2)
        m = jnp.max(s, axis=-1, keepdims=True)
        e = jnp.exp(s - m)
        p = e * pl.reciprocal(jnp.sum(e, axis=-1, keepdims=True), approx=True)
        oh = jnp.einsum('bqk,bkd->bqd', p.astype(bf16), vh,
                        preferred_element_type=jnp.float32)       # (tb, n1, hd)
        o_scr[:, h * hd:(h + 1) * hd] = oh.reshape(tb * n1, hd)

    attn_out = jnp.dot(o_scr[...].astype(bf16), wp_ref[...],
                       preferred_element_type=jnp.float32) + bp
    x1 = x + attn_out

    # FFN: Linear -> GELU(exact-ish) -> Linear on norm2(x1), plus residual.
    xn2 = _layernorm(x1, g2, b2)
    h1 = _gelu_exact(jnp.dot(xn2.astype(bf16), wf1_ref[...],
                             preferred_element_type=jnp.float32) + bf1)
    h2 = jnp.dot(h1.astype(bf16), wf2_ref[...],
                 preferred_element_type=jnp.float32) + bf2
    xo_ref[...] = x1 + h2


# ------------------------------- the wrapper ---------------------------------

def _choose_block_batch(b1, n1, n2, c1, c2, max_rows=1024, budget_bytes=16 << 20):
    """Per-grid-step token-batch count tb.

    Constraints: divides b1; keeps >= 2 grid steps (both v7x TensorCores busy);
    tb % 8 == 0 (8-row sublane alignment of every blocked operand); tb*n1 rows
    per step capped at ~1024; double-buffered per-step block set well inside
    VMEM (conservative for v7x's 64 MiB).  Falls back to one full-size step.
    """
    def step_bytes(tb):
        io = tb * (2 * n1 * c1 + 2 * n2 * c2 + c1) * 4   # in + out blocks (f32)
        return 2 * io + 6 * tb * n1 * c1 * 4             # double-buffer + live temps

    best = None
    for tb in range(8, b1 // 2 + 1, 8):
        if b1 % tb:
            continue
        if tb * n1 > max_rows or step_bytes(tb) > budget_bytes:
            continue
        best = tb
    return best if best is not None else b1


def cross_global_subsample_attn(params, query, memory, query_coord, num_heads,
                                block_batch=None):
    """Equivalent of CrossGlobalSubSampleAttn.forward for sr_ratio=1, pe='linear',
    add_flow_token=True.  (`key`, `value`, `patch_size`, `size_h3w3`, `size` of
    the PyTorch signature are unused in this configuration and omitted.)
    Returns (x, k, v) with PyTorch layouts."""
    B, _, H1, W1 = query_coord.shape
    B1, N1, C1 = query.shape
    B2, N2, C2 = memory.shape
    assert B1 == B * H1 * W1 and B1 == B2
    hd = C1 // num_heads
    assert C2 == 2 * C1 and C2 // 2 // num_heads == hd
    scale = hd ** (-0.5)

    (g1, b1, wq, bq, wkv, bkv, wp, bp, g2, b2, wf1, bf1, wf2, bf2) = params

    # ---- one-time host-side prep (outside the hot kernel) -------------------
    # Fold the softmax scale into the q projection, and fold the positional
    # encoding (constant over the N1 tokens of a token-batch) plus the q bias
    # into one (B1, C1) bias so the kernel never reads an N1x-broadcast pe.
    wq_s = (wq * scale).astype(jnp.float32)
    qc = query_coord.reshape(B, 2, H1 * W1).transpose(0, 2, 1).reshape(B1, 2)
    pe = linear_position_embedding_sine(qc, dim=C1).astype(jnp.float32)   # (B1, C1)
    pe_bias = pe @ wq_s + bq * scale                                      # (B1, C1)

    # Stack all (1, C1) gains/biases into one resident slab (single DMA).
    vec8 = jnp.concatenate([g1, b1, bp, g2, b2, bf1, bf2, jnp.zeros_like(g1)],
                           axis=0).astype(jnp.float32)                    # (8, C1)

    # MXU operands in bf16 (f32 accumulation via preferred_element_type).
    w_bf = [w.astype(jnp.bfloat16) for w in (wq_s, wkv, wp, wf1, wf2)]

    x_flat = query.reshape(B1 * N1, C1).astype(jnp.float32)
    m_flat = memory.reshape(B1 * N2, C2).astype(jnp.float32)
    bkv_f = bkv.astype(jnp.float32)

    tb = _choose_block_batch(B1, N1, N2, C1, C2) if block_batch is None else block_batch
    assert B1 % tb == 0
    grid = (B1 // tb,)

    def _resident(w):
        nd = w.ndim
        return pl.BlockSpec(w.shape, lambda b, nd=nd: (0,) * nd)

    kernel = functools.partial(_cgsa_kernel, tb, N1, N2, num_heads)

    grid_spec = pltpu.PrefetchScalarGridSpec(
        num_scalar_prefetch=0,
        grid=grid,
        in_specs=(
            [pl.BlockSpec((tb * N1, C1), lambda b: (b, 0)),   # x
             pl.BlockSpec((tb, C1), lambda b: (b, 0)),        # pe@wq + bq (per token-batch)
             pl.BlockSpec((tb * N2, C2), lambda b: (b, 0)),   # memory
             _resident(vec8), _resident(bkv_f)]
            + [_resident(w) for w in w_bf]
        ),
        out_specs=[
            pl.BlockSpec((tb * N1, C1), lambda b: (b, 0)),    # x out
            pl.BlockSpec((tb * N2, C2), lambda b: (b, 0)),    # kv projection slab
        ],
        scratch_shapes=[pltpu.VMEM((tb * N1, C1), jnp.float32)],
    )

    out_shape = (
        jax.ShapeDtypeStruct((B1 * N1, C1), jnp.float32),
        jax.ShapeDtypeStruct((B1 * N2, C2), jnp.float32),
    )

    flops = 2 * B1 * (N1 * C1 * C1                     # q projection
                      + N2 * C2 * C2                   # kv projection
                      + 2 * num_heads * N1 * N2 * hd   # scores + attn@v
                      + N1 * C1 * C1                   # output projection
                      + 2 * N1 * C1 * C1)              # FFN
    transcendentals = B1 * (num_heads * N1 * N2 + num_heads * N1 + 2 * N1 * C1)
    bytes_accessed = (4 * (x_flat.size + pe_bias.size + m_flat.size
                           + vec8.size + bkv_f.size
                           + B1 * N1 * C1 + B1 * N2 * C2)
                      + 2 * sum(int(w.size) for w in w_bf))

    fn = pl.pallas_call(
        kernel,
        out_shape=out_shape,
        grid_spec=grid_spec,
        compiler_params=pltpu.CompilerParams(dimension_semantics=("parallel",)),
        cost_estimate=pl.CostEstimate(flops=int(flops),
                                      transcendentals=int(transcendentals),
                                      bytes_accessed=int(bytes_accessed)),
    )
    xo, kvo = fn(x_flat, pe_bias, m_flat, vec8, bkv_f, *w_bf)

    x_out = xo.reshape(B1, N1, C1)
    # Split the kv slab into k / v with the PyTorch (B1, H, N2, hd) layout.
    # (If the consumer accepts the flat (B1, N2, 2, H, hd) layout, these two
    # XLA transposes can be dropped to save kv HBM re-write traffic.)
    kv5 = kvo.reshape(B1, N2, 2, num_heads, hd)
    k = jnp.transpose(kv5[:, :, 0], (0, 2, 1, 3))
    v = jnp.transpose(kv5[:, :, 1], (0, 2, 1, 3))
    return x_out, k, v


# ---------------------------- parameter init ---------------------------------

def init_params(key, dim, tgt_token_dim):
    """Deterministic synthetic parameters.  Linear weights are stored already
    transposed to (in, out) so the kernel does `x @ W + b`."""
    ks = jax.random.split(key, 16)

    def lin(kw, kb, din, dout):
        w = jax.random.normal(kw, (din, dout), jnp.float32) / math.sqrt(din)
        b = 0.02 * jax.random.normal(kb, (1, dout), jnp.float32)
        return w, b

    wq, bq = lin(ks[0], ks[1], dim, dim)
    wkv, bkv = lin(ks[2], ks[3], tgt_token_dim, tgt_token_dim)
    wp, bp = lin(ks[4], ks[5], dim, dim)
    wf1, bf1 = lin(ks[6], ks[7], dim, dim)
    wf2, bf2 = lin(ks[8], ks[9], dim, dim)
    g1 = 1.0 + 0.05 * jax.random.normal(ks[10], (1, dim), jnp.float32)
    b1 = 0.02 * jax.random.normal(ks[11], (1, dim), jnp.float32)
    g2 = 1.0 + 0.05 * jax.random.normal(ks[12], (1, dim), jnp.float32)
    b2 = 0.02 * jax.random.normal(ks[13], (1, dim), jnp.float32)
    return (g1, b1, wq, bq, wkv, bkv, wp, bp, g2, b2, wf1, bf1, wf2, bf2)


# ----------------------------------- main -------------------------------------

if __name__ == "__main__":
    # TODO(synk): sr_ratio > 1 (strided Conv2d + extra LayerNorm on memory) is not
    # instantiated here (module default sr_ratio=1 => self.sr is None).
    B, H1, W1 = 2, 4, 4
    dim = 32                 # query channel dim C1
    tgt_token_dim = 64       # memory channel dim C2 = 2*dim (kv head_dim == q head_dim)
    num_heads = 4
    N1, N2 = 8, 16
    B1 = B * H1 * W1

    root = jax.random.PRNGKey(0)
    k_q, k_m, k_c, k_p = jax.random.split(root, 4)

    query = jax.random.normal(k_q, (B1, N1, dim), jnp.float32)
    memory = jax.random.normal(k_m, (B1, N2, tgt_token_dim), jnp.float32)

    # pixel-coordinate grid + small perturbation (coords + flow stand-in)
    ys, xs = jnp.meshgrid(jnp.arange(H1, dtype=jnp.float32),
                          jnp.arange(W1, dtype=jnp.float32), indexing="ij")
    coords = jnp.tile(jnp.stack([xs, ys], axis=0)[None], (B, 1, 1, 1))  # (B,2,H1,W1)
    query_coord = coords + 0.1 * jax.random.normal(k_c, (B, 2, H1, W1), jnp.float32)

    params = init_params(k_p, dim, tgt_token_dim)

    x, k, v = cross_global_subsample_attn(params, query, memory, query_coord, num_heads)
    jax.block_until_ready((x, k, v))

    hd = dim // num_heads
    assert x.shape == (B1, N1, dim)
    assert k.shape == (B1, num_heads, N2, hd)
    assert v.shape == (B1, num_heads, N2, hd)
    assert bool(jnp.all(jnp.isfinite(x)))
    assert bool(jnp.all(jnp.isfinite(k))) and bool(jnp.all(jnp.isfinite(v)))
    print("KERNEL_OK")
</pallas_src>

<mosaic_0001>
module attributes {stable_mosaic.version = 11 : i64} {
  func.func @_cgsa_kernel(%arg0: i32, %arg1: memref<128x32xf32, #tpu.memory_space<vmem>>, %arg2: memref<16x32xf32, #tpu.memory_space<vmem>>, %arg3: memref<256x64xf32, #tpu.memory_space<vmem>>, %arg4: memref<8x32xf32, #tpu.memory_space<vmem>>, %arg5: memref<1x64xf32, #tpu.memory_space<vmem>>, %arg6: memref<32x32xbf16, #tpu.memory_space<vmem>>, %arg7: memref<64x64xbf16, #tpu.memory_space<vmem>>, %arg8: memref<32x32xbf16, #tpu.memory_space<vmem>>, %arg9: memref<32x32xbf16, #tpu.memory_space<vmem>>, %arg10: memref<32x32xbf16, #tpu.memory_space<vmem>>, %arg11: memref<128x32xf32, #tpu.memory_space<vmem>>, %arg12: memref<256x64xf32, #tpu.memory_space<vmem>>, %arg13: memref<128x32xf32, #tpu.memory_space<vmem>>) attributes {dimension_semantics = [#tpu.dimension_semantics<parallel>], iteration_bounds = array<i64: 2>, scalar_prefetch = 0 : i64, scratch_operands = 1 : i64, tpu.core_type = #tpu.core_type<tc>, window_params = [{transform_indices = @transform_0, window_bounds = array<i64: 128, 32>}, {transform_indices = @transform_1, window_bounds = array<i64: 16, 32>}, {transform_indices = @transform_2, window_bounds = array<i64: 256, 64>}, {pipeline_mode = #tpu.pipeline_mode<synchronous>, transform_indices = @transform_3, window_bounds = array<i64: 8, 32>}, {pipeline_mode = #tpu.pipeline_mode<synchronous>, transform_indices = @transform_4, window_bounds = array<i64: 1, 64>}, {pipeline_mode = #tpu.pipeline_mode<synchronous>, transform_indices = @transform_5, window_bounds = array<i64: 32, 32>}, {pipeline_mode = #tpu.pipeline_mode<synchronous>, transform_indices = @transform_6, window_bounds = array<i64: 64, 64>}, {pipeline_mode = #tpu.pipeline_mode<synchronous>, transform_indices = @transform_7, window_bounds = array<i64: 32, 32>}, {pipeline_mode = #tpu.pipeline_mode<synchronous>, transform_indices = @transform_8, window_bounds = array<i64: 32, 32>}, {pipeline_mode = #tpu.pipeline_mode<synchronous>, transform_indices = @transform_9, window_bounds = array<i64: 32, 32>}, {transform_indices = @transform_10, window_bounds = array<i64: 128, 32>}, {transform_indices = @transform_11, window_bounds = array<i64: 256, 64>}]} {
    %c0 = arith.constant 0 : index
    %c0_0 = arith.constant 0 : index
    %0 = vector.load %arg1[%c0, %c0_0] : memref<128x32xf32, #tpu.memory_space<vmem>>, vector<128x32xf32>
    %c0_1 = arith.constant 0 : index
    %c0_2 = arith.constant 0 : index
    %1 = vector.load %arg3[%c0_1, %c0_2] : memref<256x64xf32, #tpu.memory_space<vmem>>, vector<256x64xf32>
    %c0_3 = arith.constant 0 : index
    %c0_4 = arith.constant 0 : index
    %2 = vector.load %arg4[%c0_3, %c0_4] : memref<8x32xf32, #tpu.memory_space<vmem>>, vector<1x32xf32>
    %c1 = arith.constant 1 : index
    %c0_5 = arith.constant 0 : index
    %3 = vector.load %arg4[%c1, %c0_5] : memref<8x32xf32, #tpu.memory_space<vmem>>, vector<1x32xf32>
    %c2 = arith.constant 2 : index
    %c0_6 = arith.constant 0 : index
    %4 = vector.load %arg4[%c2, %c0_6] : memref<8x32xf32, #tpu.memory_space<vmem>>, vector<1x32xf32>
    %c3 = arith.constant 3 : index
    %c0_7 = arith.constant 0 : index
    %5 = vector.load %arg4[%c3, %c0_7] : memref<8x32xf32, #tpu.memory_space<vmem>>, vector<1x32xf32>
    %c4 = arith.constant 4 : index
    %c0_8 = arith.constant 0 : index
    %6 = vector.load %arg4[%c4, %c0_8] : memref<8x32xf32, #tpu.memory_space<vmem>>, vector<1x32xf32>
    %c5 = arith.constant 5 : index
    %c0_9 = arith.constant 0 : index
    %7 = vector.load %arg4[%c5, %c0_9] : memref<8x32xf32, #tpu.memory_space<vmem>>, vector<1x32xf32>
    %c6 = arith.constant 6 : index
    %c0_10 = arith.constant 0 : index
    %8 = vector.load %arg4[%c6, %c0_10] : memref<8x32xf32, #tpu.memory_space<vmem>>, vector<1x32xf32>
    %cst = arith.constant dense<0.000000e+00> : vector<128xf32>
    %9 = vector.multi_reduction <add>, %0, %cst [1] : vector<128x32xf32> to vector<128xf32>
    %10 = vector.shape_cast %9 : vector<128xf32> to vector<128x1xf32>
    %cst_11 = arith.constant 3.200000e+01 : f32
    %11 = vector.broadcast %cst_11 : f32 to vector<128x1xf32>
    %12 = arith.divf %10, %11 : vector<128x1xf32>
    %13 = vector.broadcast %12 : vector<128x1xf32> to vector<128x32xf32>
    %14 = arith.subf %0, %13 : vector<128x32xf32>
    %15 = arith.mulf %14, %14 : vector<128x32xf32>
    %cst_12 = arith.constant dense<0.000000e+00> : vector<128xf32>
    %16 = vector.multi_reduction <add>, %15, %cst_12 [1] : vector<128x32xf32> to vector<128xf32>
    %17 = vector.shape_cast %16 : vector<128xf32> to vector<128x1xf32>
    %cst_13 = arith.constant 3.200000e+01 : f32
    %18 = vector.broadcast %cst_13 : f32 to vector<128x1xf32>
    %19 = arith.divf %17, %18 : vector<128x1xf32>
    %cst_14 = arith.constant 9.99999974E-6 : f32
    %20 = vector.broadcast %cst_14 : f32 to vector<128x1xf32>
    %21 = arith.addf %19, %20 : vector<128x1xf32>
    %22 = math.rsqrt %21 : vector<128x1xf32>
    %23 = vector.broadcast %22 : vector<128x1xf32> to vector<128x32xf32>
    %24 = arith.mulf %14, %23 : vector<128x32xf32>
    %25 = vector.broadcast %2 : vector<1x32xf32> to vector<128x32xf32>
    %26 = arith.mulf %24, %25 : vector<128x32xf32>
    %27 = vector.broadcast %3 : vector<1x32xf32> to vector<128x32xf32>
    %28 = arith.addf %26, %27 : vector<128x32xf32>
    %29 = arith.truncf %28 : vector<128x32xf32> to vector<128x32xbf16>
    %c0_15 = arith.constant 0 : index
    %c0_16 = arith.constant 0 : index
    %30 = vector.load %arg6[%c0_15, %c0_16] : memref<32x32xbf16, #tpu.memory_space<vmem>>, vector<32x32xbf16>
    %cst_17 = arith.constant dense<0.000000e+00> : vector<128x32xf32>
    %31 = tpu.matmul %29, %30, %cst_17 {dimension_numbers = #tpu.dot_dimension_numbers<[1], [0], [0], [1], [0, 0, 1, 1], [], []>} : vector<128x32xbf16>, vector<32x32xbf16>, vector<128x32xf32> -> vector<128x32xf32>
    %32 = vector.shape_cast %31 : vector<128x32xf32> to vector<16x8x32xf32>
    %c0_18 = arith.constant 0 : index
    %c0_19 = arith.constant 0 : index
    %33 = vector.load %arg2[%c0_18, %c0_19] : memref<16x32xf32, #tpu.memory_space<vmem>>, vector<16x32xf32>
    %34 = vector.shape_cast %33 : vector<16x32xf32> to vector<16x1x32xf32>
    %35 = vector.broadcast %34 : vector<16x1x32xf32> to vector<16x8x32xf32>
    %36 = arith.addf %32, %35 : vector<16x8x32xf32>
    %37 = arith.truncf %1 : vector<256x64xf32> to vector<256x64xbf16>
    %c0_20 = arith.constant 0 : index
    %c0_21 = arith.constant 0 : index
    %38 = vector.load %arg7[%c0_20, %c0_21] : memref<64x64xbf16, #tpu.memory_space<vmem>>, vector<64x64xbf16>
    %cst_22 = arith.constant dense<0.000000e+00> : vector<256x64xf32>
    %39 = tpu.matmul %37, %38, %cst_22 {dimension_numbers = #tpu.dot_dimension_numbers<[1], [0], [0], [1], [0, 0, 1, 1], [], []>} : vector<256x64xbf16>, vector<64x64xbf16>, vector<256x64xf32> -> vector<256x64xf32>
    %c0_23 = arith.constant 0 : index
    %c0_24 = arith.constant 0 : index
    %40 = vector.load %arg5[%c0_23, %c0_24] : memref<1x64xf32, #tpu.memory_space<vmem>>, vector<1x64xf32>
    %41 = vector.broadcast %40 : vector<1x64xf32> to vector<256x64xf32>
    %42 = arith.addf %39, %41 : vector<256x64xf32>
    %c0_25 = arith.constant 0 : index
    %c0_26 = arith.constant 0 : index
    %43 = vector.load %arg12[%c0_25, %c0_26] : memref<256x64xf32, #tpu.memory_space<vmem>>, vector<256x64xf32>
    tpu.vector_store %arg12[%c0_25, %c0_26], %42 {strides = array<i32>} : memref<256x64xf32, #tpu.memory_space<vmem>>, vector<256x64xf32>,
    %44 = arith.truncf %36 : vector<16x8x32xf32> to vector<16x8x32xbf16>
    %45 = vector.shape_cast %42 : vector<256x64xf32> to vector<16x16x64xf32>
    %46 = arith.truncf %45 : vector<16x16x64xf32> to vector<16x16x64xbf16>
    %47 = vector.extract_strided_slice %44 {offsets = [0, 0, 0], sizes = [16, 8, 8], strides = [1, 1, 1]} : vector<16x8x32xbf16> to vector<16x8x8xbf16>
    %48 = vector.extract_strided_slice %46 {offsets = [0, 0, 0], sizes = [16, 16, 8], strides = [1, 1, 1]} : vector<16x16x64xbf16> to vector<16x16x8xbf16>
    %49 = vector.extract_strided_slice %46 {offsets = [0, 0, 32], sizes = [16, 16, 8], strides = [1, 1, 1]} : vector<16x16x64xbf16> to vector<16x16x8xbf16>
    "tpu.trace_start"() <{level = 10 : i32, message = "bqd,bkd->bqk"}> : () -> ()
    %cst_27 = arith.constant dense<0.000000e+00> : vector<16x8x16xf32>
    %50 = tpu.matmul %47, %48, %cst_27 {dimension_numbers = #tpu.dot_dimension_numbers<[2], [2], [1], [1], [0, 0, 0, 1, 1, 1], [0], [0]>} : vector<16x8x8xbf16>, vector<16x16x8xbf16>, vector<16x8x16xf32> -> vector<16x8x16xf32>
    "tpu.trace_stop"() : () -> ()
    %cst_28 = arith.constant dense<0xFF800000> : vector<16x8xf32>
    %51 = vector.multi_reduction <maximumf>, %50, %cst_28 [2] : vector<16x8x16xf32> to vector<16x8xf32>
    %52 = vector.shape_cast %51 : vector<16x8xf32> to vector<16x8x1xf32>
    %53 = vector.broadcast %52 : vector<16x8x1xf32> to vector<16x8x16xf32>
    %54 = arith.subf %50, %53 : vector<16x8x16xf32>
    %55 = math.exp %54 : vector<16x8x16xf32>
    %cst_29 = arith.constant dense<0.000000e+00> : vector<16x8xf32>
    %56 = vector.multi_reduction <add>, %55, %cst_29 [2] : vector<16x8x16xf32> to vector<16x8xf32>
    %57 = vector.shape_cast %56 : vector<16x8xf32> to vector<16x8x1xf32>
    %58 = tpu.reciprocal %57 {approx = true} : vector<16x8x1xf32> -> vector<16x8x1xf32>
    %59 = vector.broadcast %58 : vector<16x8x1xf32> to vector<16x8x16xf32>
    %60 = arith.mulf %55, %59 : vector<16x8x16xf32>
    %61 = arith.truncf %60 : vector<16x8x16xf32> to vector<16x8x16xbf16>
    "tpu.trace_start"() <{level = 10 : i32, message = "bqk,bkd->bqd"}> : () -> ()
    %cst_30 = arith.constant dense<0.000000e+00> : vector<16x8x8xf32>
    %62 = tpu.matmul %61, %49, %cst_30 {dimension_numbers = #tpu.dot_dimension_numbers<[2], [1], [1], [2], [0, 0, 0, 1, 1, 2], [0], [0]>} : vector<16x8x16xbf16>, vector<16x16x8xbf16>, vector<16x8x8xf32> -> vector<16x8x8xf32>
    "tpu.trace_stop"() : () -> ()
    %63 = vector.shape_cast %62 : vector<16x8x8xf32> to vector<128x8xf32>
    %c0_31 = arith.constant 0 : index
    %c0_32 = arith.constant 0 : index
    %64 = vector.load %arg13[%c0_31, %c0_32] : memref<128x32xf32, #tpu.memory_space<vmem>>, vector<128x8xf32>
    tpu.vector_store %arg13[%c0_31, %c0_32], %63 {strides = array<i32>} : memref<128x32xf32, #tpu.memory_space<vmem>>, vector<128x8xf32>,
    %65 = vector.extract_strided_slice %44 {offsets = [0, 0, 8], sizes = [16, 8, 8], strides = [1, 1, 1]} : vector<16x8x32xbf16> to vector<16x8x8xbf16>
    %66 = vector.extract_strided_slice %46 {offsets = [0, 0, 8], sizes = [16, 16, 8], strides = [1, 1, 1]} : vector<16x16x64xbf16> to vector<16x16x8xbf16>
    %67 = vector.extract_strided_slice %46 {offsets = [0, 0, 40], sizes = [16, 16, 8], strides = [1, 1, 1]} : vector<16x16x64xbf16> to vector<16x16x8xbf16>
    "tpu.trace_start"() <{level = 10 : i32, message = "bqd,bkd->bqk"}> : () -> ()
    %cst_33 = arith.constant dense<0.000000e+00> : vector<16x8x16xf32>
    %68 = tpu.matmul %65, %66, %cst_33 {dimension_numbers = #tpu.dot_dimension_numbers<[2], [2], [1], [1], [0, 0, 0, 1, 1, 1], [0], [0]>} : vector<16x8x8xbf16>, vector<16x16x8xbf16>, vector<16x8x16xf32> -> vector<16x8x16xf32>
    "tpu.trace_stop"() : () -> ()
    %cst_34 = arith.constant dense<0xFF800000> : vector<16x8xf32>
    %69 = vector.multi_reduction <maximumf>, %68, %cst_34 [2] : vector<16x8x16xf32> to vector<16x8xf32>
    %70 = vector.shape_cast %69 : vector<16x8xf32> to vector<16x8x1xf32>
    %71 = vector.broadcast %70 : vector<16x8x1xf32> to vector<16x8x16xf32>
    %72 = arith.subf %68, %71 : vector<16x8x16xf32>
    %73 = math.exp %72 : vector<16x8x16xf32>
    %cst_35 = arith.constant dense<0.000000e+00> : vector<16x8xf32>
    %74 = vector.multi_reduction <add>, %73, %cst_35 [2] : vector<16x8x16xf32> to vector<16x8xf32>
    %75 = vector.shape_cast %74 : vector<16x8xf32> to vector<16x8x1xf32>
    %76 = tpu.reciprocal %75 {approx = true} : vector<16x8x1xf32> -> vector<16x8x1xf32>
    %77 = vector.broadcast %76 : vector<16x8x1xf32> to vector<16x8x16xf32>
    %78 = arith.mulf %73, %77 : vector<16x8x16xf32>
    %79 = arith.truncf %78 : vector<16x8x16xf32> to vector<16x8x16xbf16>
    "tpu.trace_start"() <{level = 10 : i32, message = "bqk,bkd->bqd"}> : () -> ()
    %cst_36 = arith.constant dense<0.000000e+00> : vector<16x8x8xf32>
    %80 = tpu.matmul %79, %67, %cst_36 {dimension_numbers = #tpu.dot_dimension_numbers<[2], [1], [1], [2], [0, 0, 0, 1, 1, 2], [0], [0]>} : vector<16x8x16xbf16>, vector<16x16x8xbf16>, vector<16x8x8xf32> -> vector<16x8x8xf32>
    "tpu.trace_stop"() : () -> ()
    %81 = vector.shape_cast %80 : vector<16x8x8xf32> to vector<128x8xf32>
    %c0_37 = arith.constant 0 : index
    %c8 = arith.constant 8 : index
    %82 = vector.load %arg13[%c0_37, %c8] : memref<128x32xf32, #tpu.memory_space<vmem>>, vector<128x8xf32>
    tpu.vector_store %arg13[%c0_37, %c8], %81 {strides = array<i32>} : memref<128x32xf32, #tpu.memory_space<vmem>>, vector<128x8xf32>,
    %83 = vector.extract_strided_slice %44 {offsets = [0, 0, 16], sizes = [16, 8, 8], strides = [1, 1, 1]} : vector<16x8x32xbf16> to vector<16x8x8xbf16>
    %84 = vector.extract_strided_slice %46 {offsets = [0, 0, 16], sizes = [16, 16, 8], strides = [1, 1, 1]} : vector<16x16x64xbf16> to vector<16x16x8xbf16>
    %85 = vector.extract_strided_slice %46 {offsets = [0, 0, 48], sizes = [16, 16, 8], strides = [1, 1, 1]} : vector<16x16x64xbf16> to vector<16x16x8xbf16>
    "tpu.trace_start"() <{level = 10 : i32, message = "bqd,bkd->bqk"}> : () -> ()
    %cst_38 = arith.constant dense<0.000000e+00> : vector<16x8x16xf32>
    %86 = tpu.matmul %83, %84, %cst_38 {dimension_numbers = #tpu.dot_dimension_numbers<[2], [2], [1], [1], [0, 0, 0, 1, 1, 1], [0], [0]>} : vector<16x8x8xbf16>, vector<16x16x8xbf16>, vector<16x8x16xf32> -> vector<16x8x16xf32>
    "tpu.trace_stop"() : () -> ()
    %cst_39 = arith.constant dense<0xFF800000> : vector<16x8xf32>
    %87 = vector.multi_reduction <maximumf>, %86, %cst_39 [2] : vector<16x8x16xf32> to vector<16x8xf32>
    %88 = vector.shape_cast %87 : vector<16x8xf32> to vector<16x8x1xf32>
    %89 = vector.broadcast %88 : vector<16x8x1xf32> to vector<16x8x16xf32>
    %90 = arith.subf %86, %89 : vector<16x8x16xf32>
    %91 = math.exp %90 : vector<16x8x16xf32>
    %cst_40 = arith.constant dense<0.000000e+00> : vector<16x8xf32>
    %92 = vector.multi_reduction <add>, %91, %cst_40 [2] : vector<16x8x16xf32> to vector<16x8xf32>
    %93 = vector.shape_cast %92 : vector<16x8xf32> to vector<16x8x1xf32>
    %94 = tpu.reciprocal %93 {approx = true} : vector<16x8x1xf32> -> vector<16x8x1xf32>
    %95 = vector.broadcast %94 : vector<16x8x1xf32> to vector<16x8x16xf32>
    %96 = arith.mulf %91, %95 : vector<16x8x16xf32>
    %97 = arith.truncf %96 : vector<16x8x16xf32> to vector<16x8x16xbf16>
    "tpu.trace_start"() <{level = 10 : i32, message = "bqk,bkd->bqd"}> : () -> ()
    %cst_41 = arith.constant dense<0.000000e+00> : vector<16x8x8xf32>
    %98 = tpu.matmul %97, %85, %cst_41 {dimension_numbers = #tpu.dot_dimension_numbers<[2], [1], [1], [2], [0, 0, 0, 1, 1, 2], [0], [0]>} : vector<16x8x16xbf16>, vector<16x16x8xbf16>, vector<16x8x8xf32> -> vector<16x8x8xf32>
    "tpu.trace_stop"() : () -> ()
    %99 = vector.shape_cast %98 : vector<16x8x8xf32> to vector<128x8xf32>
    %c0_42 = arith.constant 0 : index
    %c16 = arith.constant 16 : index
    %100 = vector.load %arg13[%c0_42, %c16] : memref<128x32xf32, #tpu.memory_space<vmem>>, vector<128x8xf32>
    tpu.vector_store %arg13[%c0_42, %c16], %99 {strides = array<i32>} : memref<128x32xf32, #tpu.memory_space<vmem>>, vector<128x8xf32>,
    %101 = vector.extract_strided_slice %44 {offsets = [0, 0, 24], sizes = [16, 8, 8], strides = [1, 1, 1]} : vector<16x8x32xbf16> to vector<16x8x8xbf16>
    %102 = vector.extract_strided_slice %46 {offsets = [0, 0, 24], sizes = [16, 16, 8], strides = [1, 1, 1]} : vector<16x16x64xbf16> to vector<16x16x8xbf16>
    %103 = vector.extract_strided_slice %46 {offsets = [0, 0, 56], sizes = [16, 16, 8], strides = [1, 1, 1]} : vector<16x16x64xbf16> to vector<16x16x8xbf16>
    "tpu.trace_start"() <{level = 10 : i32, message = "bqd,bkd->bqk"}> : () -> ()
    %cst_43 = arith.constant dense<0.000000e+00> : vector<16x8x16xf32>
    %104 = tpu.matmul %101, %102, %cst_43 {dimension_numbers = #tpu.dot_dimension_numbers<[2], [2], [1], [1], [0, 0, 0, 1, 1, 1], [0], [0]>} : vector<16x8x8xbf16>, vector<16x16x8xbf16>, vector<16x8x16xf32> -> vector<16x8x16xf32>
    "tpu.trace_stop"() : () -> ()
    %cst_44 = arith.constant dense<0xFF800000> : vector<16x8xf32>
    %105 = vector.multi_reduction <maximumf>, %104, %cst_44 [2] : vector<16x8x16xf32> to vector<16x8xf32>
    %106 = vector.shape_cast %105 : vector<16x8xf32> to vector<16x8x1xf32>
    %107 = vector.broadcast %106 : vector<16x8x1xf32> to vector<16x8x16xf32>
    %108 = arith.subf %104, %107 : vector<16x8x16xf32>
    %109 = math.exp %108 : vector<16x8x16xf32>
    %cst_45 = arith.constant dense<0.000000e+00> : vector<16x8xf32>
    %110 = vector.multi_reduction <add>, %109, %cst_45 [2] : vector<16x8x16xf32> to vector<16x8xf32>
    %111 = vector.shape_cast %110 : vector<16x8xf32> to vector<16x8x1xf32>
    %112 = tpu.reciprocal %111 {approx = true} : vector<16x8x1xf32> -> vector<16x8x1xf32>
    %113 = vector.broadcast %112 : vector<16x8x1xf32> to vector<16x8x16xf32>
    %114 = arith.mulf %109, %113 : vector<16x8x16xf32>
    %115 = arith.truncf %114 : vector<16x8x16xf32> to vector<16x8x16xbf16>
    "tpu.trace_start"() <{level = 10 : i32, message = "bqk,bkd->bqd"}> : () -> ()
    %cst_46 = arith.constant dense<0.000000e+00> : vector<16x8x8xf32>
    %116 = tpu.matmul %115, %103, %cst_46 {dimension_numbers = #tpu.dot_dimension_numbers<[2], [1], [1], [2], [0, 0, 0, 1, 1, 2], [0], [0]>} : vector<16x8x16xbf16>, vector<16x16x8xbf16>, vector<16x8x8xf32> -> vector<16x8x8xf32>
    "tpu.trace_stop"() : () -> ()
    %117 = vector.shape_cast %116 : vector<16x8x8xf32> to vector<128x8xf32>
    %c0_47 = arith.constant 0 : index
    %c24 = arith.constant 24 : index
    %118 = vector.load %arg13[%c0_47, %c24] : memref<128x32xf32, #tpu.memory_space<vmem>>, vector<128x8xf32>
    tpu.vector_store %arg13[%c0_47, %c24], %117 {strides = array<i32>} : memref<128x32xf32, #tpu.memory_space<vmem>>, vector<128x8xf32>,
    %c0_48 = arith.constant 0 : index
    %c0_49 = arith.constant 0 : index
    %119 = vector.load %arg13[%c0_48, %c0_49] : memref<128x32xf32, #tpu.memory_space<vmem>>, vector<128x32xf32>
    %120 = arith.truncf %119 : vector<128x32xf32> to vector<128x32xbf16>
    %c0_50 = arith.constant 0 : index
    %c0_51 = arith.constant 0 : index
    %121 = vector.load %arg8[%c0_50, %c0_51] : memref<32x32xbf16, #tpu.memory_space<vmem>>, vector<32x32xbf16>
    %cst_52 = arith.constant dense<0.000000e+00> : vector<128x32xf32>
    %122 = tpu.matmul %120, %121, %cst_52 {dimension_numbers = #tpu.dot_dimension_numbers<[1], [0], [0], [1], [0, 0, 1, 1], [], []>} : vector<128x32xbf16>, vector<32x32xbf16>, vector<128x32xf32> -> vector<128x32xf32>
    %123 = vector.broadcast %4 : vector<1x32xf32> to vector<128x32xf32>
    %124 = arith.addf %122, %123 : vector<128x32xf32>
    %125 = arith.addf %0, %124 : vector<128x32xf32>
    %cst_53 = arith.constant dense<0.000000e+00> : vector<128xf32>
    %126 = vector.multi_reduction <add>, %125, %cst_53 [1] : vector<128x32xf32> to vector<128xf32>
    %127 = vector.shape_cast %126 : vector<128xf32> to vector<128x1xf32>
    %cst_54 = arith.constant 3.200000e+01 : f32
    %128 = vector.broadcast %cst_54 : f32 to vector<128x1xf32>
    %129 = arith.divf %127, %128 : vector<128x1xf32>
    %130 = vector.broadcast %129 : vector<128x1xf32> to vector<128x32xf32>
    %131 = arith.subf %125, %130 : vector<128x32xf32>
    %132 = arith.mulf %131, %131 : vector<128x32xf32>
    %cst_55 = arith.constant dense<0.000000e+00> : vector<128xf32>
    %133 = vector.multi_reduction <add>, %132, %cst_55 [1] : vector<128x32xf32> to vector<128xf32>
    %134 = vector.shape_cast %133 : vector<128xf32> to vector<128x1xf32>
    %cst_56 = arith.constant 3.200000e+01 : f32
    %135 = vector.broadcast %cst_56 : f32 to vector<128x1xf32>
    %136 = arith.divf %134, %135 : vector<128x1xf32>
    %cst_57 = arith.constant 9.99999974E-6 : f32
    %137 = vector.broadcast %cst_57 : f32 to vector<128x1xf32>
    %138 = arith.addf %136, %137 : vector<128x1xf32>
    %139 = math.rsqrt %138 : vector<128x1xf32>
    %140 = vector.broadcast %139 : vector<128x1xf32> to vector<128x32xf32>
    %141 = arith.mulf %131, %140 : vector<128x32xf32>
    %142 = vector.broadcast %5 : vector<1x32xf32> to vector<128x32xf32>
    %143 = arith.mulf %141, %142 : vector<128x32xf32>
    %144 = vector.broadcast %6 : vector<1x32xf32> to vector<128x32xf32>
    %145 = arith.addf %143, %144 : vector<128x32xf32>
    %146 = arith.truncf %145 : vector<128x32xf32> to vector<128x32xbf16>
    %c0_58 = arith.constant 0 : index
    %c0_59 = arith.constant 0 : index
    %147 = vector.load %arg9[%c0_58, %c0_59] : memref<32x32xbf16, #tpu.memory_space<vmem>>, vector<32x32xbf16>
    %cst_60 = arith.constant dense<0.000000e+00> : vector<128x32xf32>
    %148 = tpu.matmul %146, %147, %cst_60 {dimension_numbers = #tpu.dot_dimension_numbers<[1], [0], [0], [1], [0, 0, 1, 1], [], []>} : vector<128x32xbf16>, vector<32x32xbf16>, vector<128x32xf32> -> vector<128x32xf32>
    %149 = vector.broadcast %7 : vector<1x32xf32> to vector<128x32xf32>
    %150 = arith.addf %148, %149 : vector<128x32xf32>
    %cst_61 = arith.constant 5.000000e-01 : f32
    %151 = vector.broadcast %cst_61 : f32 to vector<128x32xf32>
    %152 = arith.mulf %151, %150 : vector<128x32xf32>
    %cst_62 = arith.constant 0.707106769 : f32
    %153 = vector.broadcast %cst_62 : f32 to vector<128x32xf32>
    %154 = arith.mulf %150, %153 : vector<128x32xf32>
    %cst_63 = arith.constant 0.000000e+00 : f32
    %155 = vector.broadcast %cst_63 : f32 to vector<128x32xf32>
    %156 = arith.cmpf oge, %154, %155 : vector<128x32xf32>
    %cst_64 = arith.constant 1.000000e+00 : f32
    %cst_65 = arith.constant -1.000000e+00 : f32
    %157 = vector.broadcast %cst_64 : f32 to vector<128x32xf32>
    %158 = vector.broadcast %cst_65 : f32 to vector<128x32xf32>
    %159 = arith.select %156, %157, %158 : vector<128x32xi1>, vector<128x32xf32>
    %160 = math.absf %154 : vector<128x32xf32>
    %cst_66 = arith.constant 0.327591091 : f32
    %161 = vector.broadcast %cst_66 : f32 to vector<128x32xf32>
    %162 = arith.mulf %161, %160 : vector<128x32xf32>
    %cst_67 = arith.constant 1.000000e+00 : f32
    %163 = vector.broadcast %cst_67 : f32 to vector<128x32xf32>
    %164 = arith.addf %163, %162 : vector<128x32xf32>
    %165 = tpu.reciprocal %164 {approx = true} : vector<128x32xf32> -> vector<128x32xf32>
    %cst_68 = arith.constant 1.06140542 : f32
    %166 = vector.broadcast %cst_68 : f32 to vector<128x32xf32>
    %167 = arith.mulf %166, %165 : vector<128x32xf32>
    %cst_69 = arith.constant -1.45315206 : f32
    %168 = vector.broadcast %cst_69 : f32 to vector<128x32xf32>
    %169 = arith.addf %167, %168 : vector<128x32xf32>
    %170 = arith.mulf %169, %165 : vector<128x32xf32>
    %cst_70 = arith.constant 1.42141378 : f32
    %171 = vector.broadcast %cst_70 : f32 to vector<128x32xf32>
    %172 = arith.addf %170, %171 : vector<128x32xf32>
    %173 = arith.mulf %172, %165 : vector<128x32xf32>
    %cst_71 = arith.constant -0.284496725 : f32
    %174 = vector.broadcast %cst_71 : f32 to vector<128x32xf32>
    %175 = arith.addf %173, %174 : vector<128x32xf32>
    %176 = arith.mulf %175, %165 : vector<128x32xf32>
    %cst_72 = arith.constant 0.254829586 : f32
    %177 = vector.broadcast %cst_72 : f32 to vector<128x32xf32>
    %178 = arith.addf %176, %177 : vector<128x32xf32>
    %179 = arith.mulf %178, %165 : vector<128x32xf32>
    %cst_73 = arith.constant 0.000000e+00 : f32
    %180 = vector.broadcast %cst_73 : f32 to vector<128x32xf32>
    %181 = arith.subf %180, %160 : vector<128x32xf32>
    %182 = arith.mulf %181, %160 : vector<128x32xf32>
    %183 = math.exp %182 : vector<128x32xf32>
    %184 = arith.mulf %179, %183 : vector<128x32xf32>
    %cst_74 = arith.constant 1.000000e+00 : f32
    %185 = vector.broadcast %cst_74 : f32 to vector<128x32xf32>
    %186 = arith.subf %185, %184 : vector<128x32xf32>
    %187 = arith.mulf %159, %186 : vector<128x32xf32>
    %cst_75 = arith.constant 1.000000e+00 : f32
    %188 = vector.broadcast %cst_75 : f32 to vector<128x32xf32>
    %189 = arith.addf %188, %187 : vector<128x32xf32>
    %190 = arith.mulf %152, %189 : vector<128x32xf32>
    %191 = arith.truncf %190 : vector<128x32xf32> to vector<128x32xbf16>
    %c0_76 = arith.constant 0 : index
    %c0_77 = arith.constant 0 : index
    %192 = vector.load %arg10[%c0_76, %c0_77] : memref<32x32xbf16, #tpu.memory_space<vmem>>, vector<32x32xbf16>
    %cst_78 = arith.constant dense<0.000000e+00> : vector<128x32xf32>
    %193 = tpu.matmul %191, %192, %cst_78 {dimension_numbers = #tpu.dot_dimension_numbers<[1], [0], [0], [1], [0, 0, 1, 1], [], []>} : vector<128x32xbf16>, vector<32x32xbf16>, vector<128x32xf32> -> vector<128x32xf32>
    %194 = vector.broadcast %8 : vector<1x32xf32> to vector<128x32xf32>
    %195 = arith.addf %193, %194 : vector<128x32xf32>
    %196 = arith.addf %125, %195 : vector<128x32xf32>
    %c0_79 = arith.constant 0 : index
    %c0_80 = arith.constant 0 : index
    %197 = vector.load %arg11[%c0_79, %c0_80] : memref<128x32xf32, #tpu.memory_space<vmem>>, vector<128x32xf32>
    tpu.vector_store %arg11[%c0_79, %c0_80], %196 {strides = array<i32>} : memref<128x32xf32, #tpu.memory_space<vmem>>, vector<128x32xf32>,
    return
  }
  func.func @transform_0(%arg0: i32) -> (i32, i32) {
    %c0_i32 = arith.constant 0 : i32
    %c0_i32_0 = arith.constant 0 : i32
    return %arg0, %c0_i32 : i32, i32
  }
  func.func @transform_1(%arg0: i32) -> (i32, i32) {
    %c0_i32 = arith.constant 0 : i32
    %c0_i32_0 = arith.constant 0 : i32
    return %arg0, %c0_i32 : i32, i32
  }
  func.func @transform_2(%arg0: i32) -> (i32, i32) {
    %c0_i32 = arith.constant 0 : i32
    %c0_i32_0 = arith.constant 0 : i32
    return %arg0, %c0_i32 : i32, i32
  }
  func.func @transform_3(%arg0: i32) -> (i32, i32) {
    %c0_i32 = arith.constant 0 : i32
    %c0_i32_0 = arith.constant 0 : i32
    %c0_i32_1 = arith.constant 0 : i32
    return %c0_i32, %c0_i32_0 : i32, i32
  }
  func.func @transform_4(%arg0: i32) -> (i32, i32) {
    %c0_i32 = arith.constant 0 : i32
    %c0_i32_0 = arith.constant 0 : i32
    %c0_i32_1 = arith.constant 0 : i32
    return %c0_i32, %c0_i32_0 : i32, i32
  }
  func.func @transform_5(%arg0: i32) -> (i32, i32) {
    %c0_i32 = arith.constant 0 : i32
    %c0_i32_0 = arith.constant 0 : i32
    %c0_i32_1 = arith.constant 0 : i32
    return %c0_i32, %c0_i32_0 : i32, i32
  }
  func.func @transform_6(%arg0: i32) -> (i32, i32) {
    %c0_i32 = arith.constant 0 : i32
    %c0_i32_0 = arith.constant 0 : i32
    %c0_i32_1 = arith.constant 0 : i32
    return %c0_i32, %c0_i32_0 : i32, i32
  }
  func.func @transform_7(%arg0: i32) -> (i32, i32) {
    %c0_i32 = arith.constant 0 : i32
    %c0_i32_0 = arith.constant 0 : i32
    %c0_i32_1 = arith.constant 0 : i32
    return %c0_i32, %c0_i32_0 : i32, i32
  }
  func.func @transform_8(%arg0: i32) -> (i32, i32) {
    %c0_i32 = arith.constant 0 : i32
    %c0_i32_0 = arith.constant 0 : i32
    %c0_i32_1 = arith.constant 0 : i32
    return %c0_i32, %c0_i32_0 : i32, i32
  }
  func.func @transform_9(%arg0: i32) -> (i32, i32) {
    %c0_i32 = arith.constant 0 : i32
    %c0_i32_0 = arith.constant 0 : i32
    %c0_i32_1 = arith.constant 0 : i32
    return %c0_i32, %c0_i32_0 : i32, i32
  }
  func.func @transform_10(%arg0: i32) -> (i32, i32) {
    %c0_i32 = arith.constant 0 : i32
    %c0_i32_0 = arith.constant 0 : i32
    return %arg0, %c0_i32 : i32, i32
  }
  func.func @transform_11(%arg0: i32) -> (i32, i32) {
    %c0_i32 = arith.constant 0 : i32
    %c0_i32_0 = arith.constant 0 : i32
    return %arg0, %c0_i32 : i32, i32
  }
}

</mosaic_0001>

<bundles_post_ra>
// kernel: tpu_custom_call.1
= control target key start
LH: loop header
LB: loop body
LE: loop exit
PB: predicated region body
PF: predicated region fallthrough
CT: control target
= control target key end

     0   :  { %s11797_s17 = smov 0   ;;  %s14972_s0 = inlined_call_operand.vmem [shape: f32[256,32], index: 0, kind: input, shape index: {}]   ;;  %s14973_s1 = inlined_call_operand.vmem [shape: f32[32,32], index: 1, kind: input, shape index: {}]   ;;  %s14974_s2 = inlined_call_operand.vmem [shape: f32[512,64], index: 2, kind: input, shape index: {}]   ;;  %s14975_s3 = inlined_call_operand.vmem [shape: f32[8,32], index: 3, kind: input, shape index: {}]   ;;  %s14976_s4 = inlined_call_operand.vmem [shape: f32[1,64], index: 4, kind: input, shape index: {}]   ;;  %s14977_s5 = inlined_call_operand.vmem [shape: bf16[32,32], index: 5, kind: input, shape index: {}]   ;;  %s14978_s6 = inlined_call_operand.vmem [shape: bf16[64,64], index: 6, kind: input, shape index: {}]   ;;  %s14979_s7 = inlined_call_operand.vmem [shape: bf16[32,32], index: 7, kind: input, shape index: {}]   ;;  %s14980_s8 = inlined_call_operand.vmem [shape: bf16[32,32], index: 8, kind: input, shape index: {}]   ;;  %s14981_s9 = inlined_call_operand.vmem [shape: bf16[32,32], index: 9, kind: input, shape index: {}]   ;;  %s14982_s10 = inlined_call_operand.vmem [shape: f32[256,32], index: 10, kind: output, shape index: {0}]   ;;  %s14983_s11 = inlined_call_operand.vmem [shape: f32[512,64], index: 11, kind: output, shape index: {1}]  }
   0x1 LB: > { %s11803_s18 = sadd.s32 4294967295, %s11721_s17   ;;  %p9860_p0 = scmp.ge.s32.totalorder %s11721_s17, 1  ;;  %s11721_s17 = sphi %s11797_s17, %s22_s17  }
   0x2   : > { %p363_p1 = scmp.lt.s32.totalorder %s11721_s17, 3 }
   0x4   : > { %p364_p2 = pnand %p9860_p0, %p363_p1 }
   0x6   : > { %367 = sbr.rel (%p364_p2) target bundleno = 4588 (0x11ec), region = 60 }
   0xd   : > { %s9861_s19 = sshll.u32 %s11803_s18, 4  ;;  %vm504_vm0 = vcmask 261120   ;;  %v11901_v32 = vld [vmem:[%s14978_s6] sm:$0xff]   ;;  %v11906_v33 = vld [vmem:[%s14978_s6 + $0x8] sm:$0xff]   ;;  %s9865_s28 = sshll.u32 %s11803_s18, 5  ;;  %v11917_v34 = vld [vmem:[%s14978_s6 + $0x10] sm:$0xff]  }
   0xe   : > { %p419_p3 = scmp.lt.s32.totalorder %s9861_s19, 31  ;;  %p431_p4 = scmp.lt.s32.totalorder %s9865_s28, 63  ;;  %11273 = vmatprep.subr.bf16.mxu1 %v11901_v32  ;;  %vm1152_vm1 = vcmask 523264   ;;  %v11934_v37 = vld [vmem:[%s14978_s6 + $0x18] sm:$0xff]   ;;  %vm1426_vm2 = vcmask 64512   ;;  %vm11726_vm3 = vmmov 0  }
   0xf   : > { %11277 = vmatpush3.bf16.msra.mxu1 %v11901_v32  ;;  %s9863_s24 = sshll.u32 %s11803_s18, 1  ;;  %vm2163_vm4 = vcmask 130048   ;;  %s11727_s18 = smov 120   ;;  %vm4932_vm5 = vcmask 130112   ;;  %vm6741_vm6 = vcmask 195712   ;;  %vm8550_vm7 = vcmask 261312  }
  0x10   : > { %s15070_s19 = smov (!%p419_p3, %s9861_s19), 31  ;;  %s15072_s28 = smov (!%p431_p4, %s9865_s28), 63  ;;  %11274 = vmatprep.subr.bf16.mxu1 %v11906_v33 }
  0x11   : > { %s9862_s20 = sshll.u32 %s15070_s19, 3  ;;  %s9866_s12 = sshll.u32 %s15072_s28, 3 }
  0x12   : > { %s11816_s23 = scalar_lea.vmem %s14972_s0, %s9862_s20  ;;  %s11925_s15 = scalar_lea.vmem %s14974_s2, %s9866_s12 }
  0x13   : > { %v11819_v0 = vld [vmem:[%s11816_s23] sm:$0xff]  ;;  %v11822_v1 = vld [vmem:[%s11816_s23 + $0x10] sm:$0xff]  ;;  %v11825_v2 = vld [vmem:[%s11816_s23 + $0x8] sm:$0xff]  ;;  %11278 = vmatpush3.bf16.msra.mxu1 %v11906_v33  ;;  %s12093_s14 = scalar_lea.vmem %s14983_s11, %s9866_s12  ;;  %s11724_s28 = smov 96  }
  0x14   : > { %v505_v3 = vsel %vm504_vm0, %v11819_v0, 0.0  ;;  %v511_v4 = vsel %vm504_vm0, %v11822_v1, 0.0  ;;  %v11832_v5 = vld [vmem:[%s11816_s23 + $0x18] sm:$0xff]  ;;  %v508_v6 = vsel %vm504_vm0, %v11825_v2, 0.0  ;;  %v11839_v8 = vld [vmem:[%s11816_s23 + $0x20] sm:$0xff]  ;;  %v11842_v9 = vld [vmem:[%s11816_s23 + $0x28] sm:$0xff]  ;;  %11275 = vmatprep.subr.bf16.mxu1 %v11917_v34 }
  0x15   : > { %506 = vadd.xlane.f32.xlu0 %v505_v3  ;;  %512 = vadd.xlane.f32.xlu1 %v511_v4  ;;  %v514_v7 = vsel %vm504_vm0, %v11832_v5, 0.0  ;;  %v517_v10 = vsel %vm504_vm0, %v11839_v8, 0.0  ;;  %v520_v11 = vsel %vm504_vm0, %v11842_v9, 0.0  ;;  %v11849_v12 = vld [vmem:[%s11816_s23 + $0x30] sm:$0xff]  ;;  %v11852_v13 = vld [vmem:[%s11816_s23 + $0x38] sm:$0xff]  ;;  %v11859_v16 = vld [vmem:[%s11816_s23 + $0x40] sm:$0xff] }
  0x16   : > { %v523_v14 = vsel %vm504_vm0, %v11849_v12, 0.0  ;;  %v526_v15 = vsel %vm504_vm0, %v11852_v13, 0.0  ;;  %v11862_v17 = vld [vmem:[%s11816_s23 + $0x48] sm:$0xff]  ;;  %v529_v18 = vsel %vm504_vm0, %v11859_v16, 0.0  ;;  %v11869_v20 = vld [vmem:[%s11816_s23 + $0x50] sm:$0xff]  ;;  %v11872_v21 = vld [vmem:[%s11816_s23 + $0x58] sm:$0xff] }
  0x17   : > { %v532_v19 = vsel %vm504_vm0, %v11862_v17, 0.0  ;;  %v535_v22 = vsel %vm504_vm0, %v11869_v20, 0.0  ;;  %v538_v23 = vsel %vm504_vm0, %v11872_v21, 0.0  ;;  %v11879_v24 = vld [vmem:[%s11816_s23 + $0x60] sm:$0xff]  ;;  %v11882_v25 = vld [vmem:[%s11816_s23 + $0x68] sm:$0xff]  ;;  %v11889_v28 = vld [vmem:[%s11816_s23 + $0x70] sm:$0xff]  ;;  %11279 = vmatpush3.bf16.msra.mxu1 %v11917_v34 }
  0x18   : > { %v541_v26 = vsel %vm504_vm0, %v11879_v24, 0.0  ;;  %v544_v27 = vsel %vm504_vm0, %v11882_v25, 0.0  ;;  %v11892_v29 = vld [vmem:[%s11816_s23 + $0x78] sm:$0xff]  ;;  %v547_v30 = vsel %vm504_vm0, %v11889_v28, 0.0  ;;  %v469_v35 = vld [vmem:[%s11925_s15 + $0x20] sm:$0xff]  ;;  %v470_v36 = vld [vmem:[%s11925_s15 + $0x28] sm:$0xff]  ;;  %11276 = vmatprep.subr.bf16.mxu1 %v11934_v37 }
  0x19   : > { %509 = vadd.xlane.f32.xlu0 %v508_v6  ;;  %515 = vadd.xlane.f32.xlu1 %v514_v7  ;;  %v550_v31 = vsel %vm504_vm0, %v11892_v29, 0.0  ;;  %v1099_v38 = vpack.c.bf16 %v470_v36, %v469_v35  ;;  %v471_v39 = vld [vmem:[%s11925_s15 + $0x30] sm:$0xff]  ;;  %v472_v40 = vld [vmem:[%s11925_s15 + $0x38] sm:$0xff]  ;;  %v473_v41 = vld [vmem:[%s11925_s15 + $0x40] sm:$0xff]  ;;  %p425_p5 = scmp.lt.s32.totalorder %s9863_s24, 3  ;;  %s11729_s30 = smov 112  }
  0x1a   : > { %v474_v42 = vld [vmem:[%s11925_s15 + $0x48] sm:$0xff]  ;;  %v1100_v43 = vpack.c.bf16 %v472_v40, %v471_v39  ;;  %v475_v45 = vld [vmem:[%s11925_s15 + $0x50] sm:$0xff]  ;;  %v476_v46 = vld [vmem:[%s11925_s15 + $0x58] sm:$0xff]  ;;  %s11730_s13 = smov 80   ;;  %s11733_s12 = smov 8  }
  0x1b   : > { %10417 = vmatprep.mubr.msk.bf16.mxu1 %vm1152_vm1, %v1099_v38  ;;  %11280 = vmatpush3.bf16.msra.mxu1 %v11934_v37  ;;  %v1101_v44 = vpack.c.bf16 %v474_v42, %v473_v41  ;;  %v477_v47 = vld [vmem:[%s11925_s15 + $0x60] sm:$0xff]  ;;  %v478_v48 = vld [vmem:[%s11925_s15 + $0x68] sm:$0xff]  ;;  %v1102_v49 = vpack.c.bf16 %v476_v46, %v475_v45  ;;  %v479_v51 = vld [vmem:[%s11925_s15 + $0x70] sm:$0xff]  ;;  %s15074_s24 = smov (!%p425_p5, %s9863_s24), 3  ;;  %s11734_s16 = smov 16  }
  0x1c   : > { %v1103_v50 = vpack.c.bf16 %v478_v48, %v477_v47  ;;  %v480_v52 = vld [vmem:[%s11925_s15 + $0x78] sm:$0xff]  ;;  %s9864_s25 = sshll.u32 %s15074_s24, 3  ;;  %s11735_s21 = smov 24  }
  0x1d   : > { %518 = vadd.xlane.f32.xlu0 %v517_v10  ;;  %521 = vadd.xlane.f32.xlu1 %v520_v11  ;;  %v1104_v53 = vpack.c.bf16 %v480_v52, %v479_v51  ;;  %s428_s29 = scalar_lea.vmem %s14973_s1, %s9864_s25 }
  0x1e   : > { %10418 = vmatmul.mubr.msk.bf16.vlgmr.msra.gmra.mrb[0].mxu1 %vm1152_vm1, %v1100_v43 }
  0x1f   : > { %10421 = vmatprep.mubr.msk.bf16.mxu1 %vm1152_vm1, %v1101_v44 }
  0x21   : > { %524 = vadd.xlane.f32.xlu0 %v523_v14  ;;  %527 = vadd.xlane.f32.xlu1 %v526_v15 }
  0x25   : > { %530 = vadd.xlane.f32.xlu0 %v529_v18  ;;  %533 = vadd.xlane.f32.xlu1 %v532_v19 }
  0x26   : > { %10422 = vmatmul.mubr.msk.bf16.gmra.mrb[4].mxu1 %vm1152_vm1, %v1102_v49 }
  0x27   : > { %10425 = vmatprep.mubr.msk.bf16.mxu1 %vm1152_vm1, %v1103_v50 }
  0x29   : > { %536 = vadd.xlane.f32.xlu0 %v535_v22  ;;  %539 = vadd.xlane.f32.xlu1 %v538_v23 }
  0x2d   : > { %542 = vadd.xlane.f32.xlu0 %v541_v26  ;;  %545 = vadd.xlane.f32.xlu1 %v544_v27 }
  0x2e   : > { %10426 = vmatmul.mubr.msk.bf16.gmra.mrb[8].mxu1 %vm1152_vm1, %v1104_v53 }
  0x31   : > { %548 = vadd.xlane.f32.xlu0 %v547_v30  ;;  %551 = vadd.xlane.f32.xlu1 %v550_v31 }
  0xa2   : > { %v507_v54 = vpop.xlane.xlu0 %506  ;;  %v513_v55 = vpop.xlane.xlu1 %512 }
  0xa3   : > { %v554_v56 = vmul.f32 0.03125, %v507_v54  ;;  %v556_v57 = vmul.f32 0.03125, %v513_v55 }
  0xa5   : > { %v11956_v58 = vsub.f32 %v11819_v0, %v554_v56  ;;  %v11959_v59 = vsub.f32 %v11822_v1, %v556_v57 }
  0xa6   : > { %v510_v60 = vpop.xlane.xlu0 %509  ;;  %v516_v61 = vpop.xlane.xlu1 %515 }
  0xa7   : > { %v555_v62 = vmul.f32 0.03125, %v510_v60  ;;  %v557_v63 = vmul.f32 0.03125, %v516_v61  ;;  %v586_v3 = vmul.f32 %v11956_v58, %v11956_v58  ;;  %v588_v4 = vmul.f32 %v11959_v59, %v11959_v59 }
  0xa9   : > { %v11966_v6 = vsub.f32 %v11825_v2, %v555_v62  ;;  %v11969_v7 = vsub.f32 %v11832_v5, %v557_v63  ;;  %v602_v0 = vsel %vm504_vm0, %v586_v3, 0.0  ;;  %v608_v11 = vsel %vm504_vm0, %v588_v4, 0.0 }
  0xaa   : > { %603 = vadd.xlane.f32.xlu0 %v602_v0  ;;  %v519_v1 = vpop.xlane.xlu0 %518  ;;  %v522_v10 = vpop.xlane.xlu1 %521 }
  0xab   : > { %v558_v14 = vmul.f32 0.03125, %v519_v1  ;;  %v559_v15 = vmul.f32 0.03125, %v522_v10  ;;  %v587_v18 = vmul.f32 %v11966_v6, %v11966_v6  ;;  %v589_v19 = vmul.f32 %v11969_v7, %v11969_v7 }
  0xad   : > { %v11978_v2 = vsub.f32 %v11839_v8, %v558_v14  ;;  %v11981_v5 = vsub.f32 %v11842_v9, %v559_v15  ;;  %v605_v22 = vsel %vm504_vm0, %v587_v18, 0.0  ;;  %v611_v27 = vsel %vm504_vm0, %v589_v19, 0.0 }
  0xae   : > { %609 = vadd.xlane.f32.xlu0 %v608_v11  ;;  %606 = vadd.xlane.f32.xlu1 %v605_v22  ;;  %v525_v23 = vpop.xlane.xlu0 %524  ;;  %v528_v26 = vpop.xlane.xlu1 %527 }
  0xaf   : > { %v560_v30 = vmul.f32 0.03125, %v525_v23  ;;  %v561_v31 = vmul.f32 0.03125, %v528_v26  ;;  %v590_v35 = vmul.f32 %v11978_v2, %v11978_v2  ;;  %v591_v8 = vmul.f32 %v11981_v5, %v11981_v5  ;;  %v11307_v26 = vld [vmem:[%s14977_s5] sm:$0xff]  }
  0xb0   : > { %10385 = vmatprep.subr.bf16.mxu0 %v11307_v26 }
  0xb1   : > { %v11990_v36 = vsub.f32 %v11849_v12, %v560_v30  ;;  %v11993_v9 = vsub.f32 %v11852_v13, %v561_v31  ;;  %v614_v38 = vsel %vm504_vm0, %v590_v35, 0.0  ;;  %v617_v41 = vsel %vm504_vm0, %v591_v8, 0.0  ;;  %10386 = vmatpush3.bf16.msra.mxu0 %v11307_v26  ;;  %v481_v30 = vld [vmem:[%s11925_s15 + $0x80] sm:$0xff]  ;;  %v482_v31 = vld [vmem:[%s11925_s15 + $0x88] sm:$0xff]  ;;  %v483_v8 = vld [vmem:[%s11925_s15 + $0x90] sm:$0xff] }
  0xb2   : > { %612 = vadd.xlane.f32.xlu1 %v611_v27  ;;  %615 = vadd.xlane.f32.xlu0 %v614_v38  ;;  %v531_v39 = vpop.xlane.xlu0 %530  ;;  %v534_v40 = vpop.xlane.xlu1 %533  ;;  %v11308_v27 = vld [vmem:[%s14977_s5 + $0x8] sm:$0xff]   ;;  %v1105_v35 = vpack.c.bf16 %v482_v31, %v481_v30  ;;  %v484_v38 = vld [vmem:[%s11925_s15 + $0x98] sm:$0xff] }
  0xb3   : > { %v562_v42 = vmul.f32 0.03125, %v531_v39  ;;  %v563_v43 = vmul.f32 0.03125, %v534_v40  ;;  %v592_v44 = vmul.f32 %v11990_v36, %v11990_v36  ;;  %v593_v12 = vmul.f32 %v11993_v9, %v11993_v9  ;;  %10387 = vmatprep.subr.bf16.mxu0 %v11308_v27  ;;  %v485_v40 = vld [vmem:[%s11925_s15 + $0xa0] sm:$0xff] }
  0xb4   : > { %v1106_v39 = vpack.c.bf16 %v484_v38, %v483_v8  ;;  %10429 = vmatprep.mubr.msk.bf16.mxu1 %vm1152_vm1, %v1105_v35 }
  0xb5   : > { %v12002_v45 = vsub.f32 %v11859_v16, %v562_v42  ;;  %v12005_v13 = vsub.f32 %v11862_v17, %v563_v43  ;;  %v620_v46 = vsel %vm504_vm0, %v592_v44, 0.0  ;;  %v623_v49 = vsel %vm504_vm0, %v593_v12, 0.0  ;;  %10388 = vmatpush3.bf16.msra.mxu0 %v11308_v27  ;;  %v487_v42 = vld [vmem:[%s11925_s15 + $0xb0] sm:$0xff]  ;;  %v488_v44 = vld [vmem:[%s11925_s15 + $0xb8] sm:$0xff] }
  0xb6   : > { %618 = vadd.xlane.f32.xlu1 %v617_v41  ;;  %621 = vadd.xlane.f32.xlu0 %v620_v46  ;;  %v537_v47 = vpop.xlane.xlu0 %536  ;;  %v540_v48 = vpop.xlane.xlu1 %539  ;;  %v486_v41 = vld [vmem:[%s11925_s15 + $0xa8] sm:$0xff]  ;;  %v1108_v12 = vpack.c.bf16 %v488_v44, %v487_v42  ;;  %v489_v46 = vld [vmem:[%s11925_s15 + $0xc0] sm:$0xff] }
  0xb7   : > { %v564_v50 = vmul.f32 0.03125, %v537_v47  ;;  %v565_v51 = vmul.f32 0.03125, %v540_v48  ;;  %v594_v52 = vmul.f32 %v12002_v45, %v12002_v45  ;;  %v595_v16 = vmul.f32 %v12005_v13, %v12005_v13  ;;  %10405 = vmatprep.subr.bf16.mxu0 %v11901_v32  ;;  %10430 = vmatmul.mubr.msk.bf16.gmra.mrb[12].mxu1 %vm1152_vm1, %v1106_v39  ;;  %v490_v47 = vld [vmem:[%s11925_s15 + $0xc8] sm:$0xff]  ;;  %v491_v48 = vld [vmem:[%s11925_s15 + $0xd0] sm:$0xff] }
  0xb8   : > { %v1107_v43 = vpack.c.bf16 %v486_v41, %v485_v40 }
  0xb9   : > { %v12014_v53 = vsub.f32 %v11869_v20, %v564_v50  ;;  %v12017_v17 = vsub.f32 %v11872_v21, %v565_v51  ;;  %v626_v54 = vsel %vm504_vm0, %v594_v52, 0.0  ;;  %v629_v57 = vsel %vm504_vm0, %v595_v16, 0.0  ;;  %v492_v50 = vld [vmem:[%s11925_s15 + $0xd8] sm:$0xff]  ;;  %v493_v52 = vld [vmem:[%s11925_s15 + $0xe0] sm:$0xff]  ;;  %v494_v16 = vld [vmem:[%s11925_s15 + $0xe8] sm:$0xff] }
  0xba   : > { %624 = vadd.xlane.f32.xlu1 %v623_v49  ;;  %627 = vadd.xlane.f32.xlu0 %v626_v54  ;;  %v543_v55 = vpop.xlane.xlu0 %542  ;;  %v546_v56 = vpop.xlane.xlu1 %545  ;;  %v1109_v49 = vpack.c.bf16 %v490_v47, %v489_v46  ;;  %v1110_v51 = vpack.c.bf16 %v492_v50, %v491_v48  ;;  %v495_v54 = vld [vmem:[%s11925_s15 + $0xf0] sm:$0xff] }
  0xbb   : > { %v566_v60 = vmul.f32 0.03125, %v543_v55  ;;  %v567_v61 = vmul.f32 0.03125, %v546_v56  ;;  %v596_v62 = vmul.f32 %v12014_v53, %v12014_v53  ;;  %v597_v20 = vmul.f32 %v12017_v17, %v12017_v17  ;;  %10433 = vmatprep.mubr.msk.bf16.mxu1 %vm1152_vm1, %v1107_v43  ;;  %v496_v56 = vld [vmem:[%s11925_s15 + $0xf8] sm:$0xff] }
  0xbc   : > { %v1111_v55 = vpack.c.bf16 %v494_v16, %v493_v52 }
  0xbd   : > { %v12026_v63 = vsub.f32 %v11879_v24, %v566_v60  ;;  %v12029_v21 = vsub.f32 %v11882_v25, %v567_v61  ;;  %v632_v3 = vsel %vm504_vm0, %v596_v62, 0.0  ;;  %v635_v1 = vsel %vm504_vm0, %v597_v20, 0.0  ;;  %v12086_v61 = vld [vmem:[%s14976_s4] ss:$0 sm:$0xff] }
  0xbe   : > { %630 = vadd.xlane.f32.xlu1 %v629_v57  ;;  %633 = vadd.xlane.f32.xlu0 %v632_v3  ;;  %v549_v4 = vpop.xlane.xlu0 %548  ;;  %v552_v0 = vpop.xlane.xlu1 %551  ;;  %v1112_v57 = vpack.c.bf16 %v496_v56, %v495_v54  ;;  %v14984_v60 = vmov 0.0  }
  0xbf   : > { %v568_v10 = vmul.f32 0.03125, %v549_v4  ;;  %v569_v11 = vmul.f32 0.03125, %v552_v0  ;;  %v598_v14 = vmul.f32 %v12026_v63, %v12026_v63  ;;  %v599_v24 = vmul.f32 %v12029_v21, %v12029_v21  ;;  %10434 = vmatmul.mubr.msk.bf16.gmra.mrb[16].mxu1 %vm1152_vm1, %v1108_v12  ;;  %10481 = vmatprep.subr.bf16.mxu1 %v14984_v60 }
  0xc0   : > { %10437 = vmatprep.mubr.msk.bf16.mxu1 %vm1152_vm1, %v1109_v49 }
  0xc1   : > { %v12038_v15 = vsub.f32 %v11889_v28, %v568_v10  ;;  %v12041_v25 = vsub.f32 %v11892_v29, %v569_v11  ;;  %v638_v18 = vsel %vm504_vm0, %v598_v14, 0.0  ;;  %v641_v19 = vsel %vm504_vm0, %v599_v24, 0.0 }
  0xc2   : > { %636 = vadd.xlane.f32.xlu1 %v635_v1  ;;  %639 = vadd.xlane.f32.xlu0 %v638_v18 }
  0xc3   : > { %v600_v22 = vmul.f32 %v12038_v15, %v12038_v15  ;;  %v601_v23 = vmul.f32 %v12041_v25, %v12041_v25 }
  0xc5   : > { %v644_v28 = vsel %vm504_vm0, %v600_v22, 0.0  ;;  %v647_v29 = vsel %vm504_vm0, %v601_v23, 0.0 }
  0xc6   : > { %642 = vadd.xlane.f32.xlu1 %v641_v19  ;;  %645 = vadd.xlane.f32.xlu0 %v644_v28 }
  0xc7   : > { %10438 = vmatmul.mubr.msk.bf16.gmra.mrb[20].mxu1 %vm1152_vm1, %v1110_v51 }
  0xc8   : > { %10441 = vmatprep.mubr.msk.bf16.mxu1 %vm1152_vm1, %v1111_v55 }
  0xca   : > { %648 = vadd.xlane.f32.xlu1 %v647_v29 }
  0xcf   : > { %10442 = vmatmul.mubr.msk.bf16.gmra.mrb[24].mxu1 %vm1152_vm1, %v1112_v57 }
  0xd0   : > { %10483 = vmatprep.mubr.msk.bf16.mxu1 %vm11726_vm3, %v14984_v60 }
  0xf1   : > { %v10419_v62 = vpop.f32.mrb[0].mxu1 }
  0xf2   : > { %v1260_v20 = vadd.f32 %v10419_v62, %v12086_v61  ;;  %v1251_v3 = vpop.f32.mrb[1].mxu1 }
  0xf3   : > { %v1252_v4 = vadd.f32 %v12086_v61, %v1251_v3  ;;  %v10420_v0 = vpop.f32.mrb[2].mxu1 }
  0xf4   : > { %1368 = vst.msk [vmem:[%s12093_s14 + $0x30] sm:$0xff] %vm1152_vm1, %v1260_v20  ;;  %v1263_v1 = vadd.f32 %v10420_v0, %v12086_v61  ;;  %v1254_v10 = vpop.f32.mrb[3].mxu1 }
  0xf5   : > { %1366 = vst.msk [vmem:[%s12093_s14 + $0x20] sm:$0xff] %vm1152_vm1, %v1252_v4  ;;  %v1255_v11 = vadd.f32 %v12086_v61, %v1254_v10 }
  0xf6   : > { %1369 = vst.msk [vmem:[%s12093_s14 + $0x38] sm:$0xff] %vm1152_vm1, %v1263_v1  ;;  %v12105_v14 = vpack.c.bf16 %v1263_v1, %v1260_v20 }
  0xf7   : > { %1367 = vst.msk [vmem:[%s12093_s14 + $0x28] sm:$0xff] %vm1152_vm1, %v1255_v11  ;;  %v12109_v24 = vpack.c.bf16 %v1255_v11, %v1252_v4 }
  0xf8   : > { %2498 = vrot.lane.b32.xlu1 %v12105_v14, %s11724_s28 }
  0xf9   : > { %v10423_v19 = vpop.f32.mrb[4].mxu1  ;;  %2451 = vrot.lane.b32.xlu0 %v12109_v24, %s11724_s28 }
  0xfa   : > { %v1276_v23 = vadd.f32 %v10423_v19, %v12086_v61  ;;  %v1267_v28 = vpop.f32.mrb[5].mxu1 }
  0xfb   : > { %v1268_v29 = vadd.f32 %v12086_v61, %v1267_v28  ;;  %v10424_v26 = vpop.f32.mrb[6].mxu1 }
  0xfc   : > { %1372 = vst.msk [vmem:[%s12093_s14 + $0x50] sm:$0xff] %vm1152_vm1, %v1276_v23  ;;  %v1279_v30 = vadd.f32 %v10424_v26, %v12086_v61  ;;  %v1270_v31 = vpop.f32.mrb[7].mxu1 }
  0xfd   : > { %1370 = vst.msk [vmem:[%s12093_s14 + $0x40] sm:$0xff] %vm1152_vm1, %v1268_v29  ;;  %v1271_v38 = vadd.f32 %v12086_v61, %v1270_v31 }
  0xfe   : > { %1373 = vst.msk [vmem:[%s12093_s14 + $0x58] sm:$0xff] %vm1152_vm1, %v1279_v30  ;;  %v12125_v41 = vpack.c.bf16 %v1279_v30, %v1276_v23 }
  0xff   : > { %1371 = vst.msk [vmem:[%s12093_s14 + $0x48] sm:$0xff] %vm1152_vm1, %v1271_v38  ;;  %v12129_v42 = vpack.c.bf16 %v1271_v38, %v1268_v29 }
 0x101   : > { %2545 = vrot.lane.b32.xlu0 %v12129_v42, %s11724_s28  ;;  %v10427_v49 = vpop.f32.mrb[8].mxu1 }
 0x102   : > { %v1292_v50 = vadd.f32 %v10427_v49, %v12086_v61  ;;  %v1283_v51 = vpop.f32.mrb[9].mxu1 }
 0x103   : > { %v1284_v54 = vadd.f32 %v12086_v61, %v1283_v51  ;;  %v10428_v55 = vpop.f32.mrb[10].mxu1 }
 0x104   : > { %1376 = vst.msk [vmem:[%s12093_s14 + $0x70] sm:$0xff] %vm1152_vm1, %v1292_v50  ;;  %v1295_v62 = vadd.f32 %v10428_v55, %v12086_v61  ;;  %v1286_v4 = vpop.f32.mrb[11].mxu1 }
 0x105   : > { %1374 = vst.msk [vmem:[%s12093_s14 + $0x60] sm:$0xff] %vm1152_vm1, %v1284_v54  ;;  %v1287_v1 = vadd.f32 %v12086_v61, %v1286_v4 }
 0x106   : > { %1377 = vst.msk [vmem:[%s12093_s14 + $0x78] sm:$0xff] %vm1152_vm1, %v1295_v62  ;;  %v12142_v0 = vpack.c.bf16 %v1295_v62, %v1292_v50 }
 0x107   : > { %1375 = vst.msk [vmem:[%s12093_s14 + $0x68] sm:$0xff] %vm1152_vm1, %v1287_v1  ;;  %v12148_v28 = vpack.c.bf16 %v1287_v1, %v1284_v54 }
 0x109   : > { %v1707_v30 = vsel %vm1426_vm2, %v12148_v28, 0 }
 0x10a   : > { %10482 = vmatpush3.bf16.xpose.msra.mxu1 %v1707_v30 }
 0x10b   : > { %10493 = vmatprep.subr.bf16.mxu1 %v14984_v60 }
 0x137   : > { %v604_v18 = vpop.xlane.xlu0 %603 }
 0x138   : > { %v650_v22 = vmul.f32 0.03125, %v604_v18 }
 0x13a   : > { %v666_v27 = vadd.f32 1e-05, %v650_v22 }
 0x13b   : > { %v607_v35 = vpop.xlane.xlu1 %606  ;;  %v610_v8 = vpop.xlane.xlu0 %609 }
 0x13c   : > { %11315 = vrsqrt.f32 %v666_v27  ;;  %v651_v39 = vmul.f32 0.03125, %v607_v35  ;;  %v652_v40 = vmul.f32 0.03125, %v610_v8  ;;  %v12153_v27 = vld [vmem:[%s14975_s3] ss:$0 sm:$0xff] }
 0x13e   : > { %v667_v43 = vadd.f32 1e-05, %v651_v39  ;;  %v668_v44 = vadd.f32 1e-05, %v652_v40 }
 0x13f   : > { %v613_v12 = vpop.xlane.xlu1 %612  ;;  %v616_v46 = vpop.xlane.xlu0 %615 }
 0x140   : > { %11317 = vrsqrt.f32 %v667_v43  ;;  %v653_v47 = vmul.f32 0.03125, %v613_v12  ;;  %v654_v48 = vmul.f32 0.03125, %v616_v46  ;;  %v12163_v46 = vld [vmem:[%s14975_s3 + $0x1] ss:$0 sm:$0xff] }
 0x141   : > { %11319 = vrsqrt.f32 %v668_v44 }
 0x142   : > { %v669_v52 = vadd.f32 1e-05, %v653_v47  ;;  %v670_v16 = vadd.f32 1e-05, %v654_v48 }
 0x143   : > { %v619_v56 = vpop.xlane.xlu1 %618  ;;  %v622_v57 = vpop.xlane.xlu0 %621 }
 0x144   : > { %11321 = vrsqrt.f32 %v669_v52  ;;  %v655_v20 = vmul.f32 0.03125, %v619_v56  ;;  %v656_v3 = vmul.f32 0.03125, %v622_v57 }
 0x145   : > { %11323 = vrsqrt.f32 %v670_v16 }
 0x146   : > { %v11316_v10 = vpop.eup %11315  ;;  %v671_v11 = vadd.f32 1e-05, %v655_v20  ;;  %v672_v18 = vadd.f32 1e-05, %v656_v3 }
 0x147   : > { %v625_v19 = vpop.xlane.xlu1 %624  ;;  %v628_v22 = vpop.xlane.xlu0 %627  ;;  %v698_v23 = vmul.f32 %v11316_v10, %v11956_v58 }
 0x148   : > { %11325 = vrsqrt.f32 %v671_v11  ;;  %v657_v29 = vmul.f32 0.03125, %v625_v19  ;;  %v658_v26 = vmul.f32 0.03125, %v628_v22 }
 0x149   : > { %11327 = vrsqrt.f32 %v672_v18  ;;  %v718_v43 = vmul.f32 %v12153_v27, %v698_v23 }
 0x14a   : > { %v11318_v31 = vpop.eup %11317  ;;  %v673_v35 = vadd.f32 1e-05, %v657_v29  ;;  %v674_v58 = vadd.f32 1e-05, %v658_v26 }
 0x14b   : > { %v11320_v8 = vpop.eup %11319  ;;  %v631_v38 = vpop.xlane.xlu1 %630  ;;  %v699_v40 = vmul.f32 %v11318_v31, %v11966_v6  ;;  %v738_v54 = vadd.f32 %v12163_v46, %v718_v43 }
 0x14c   : > { %v634_v39 = vpop.xlane.xlu0 %633  ;;  %11329 = vrsqrt.f32 %v673_v35  ;;  %v659_v44 = vmul.f32 0.03125, %v631_v38  ;;  %v700_v47 = vmul.f32 %v11320_v8, %v11959_v59 }
 0x14d   : > { %v660_v12 = vmul.f32 0.03125, %v634_v39  ;;  %11331 = vrsqrt.f32 %v674_v58  ;;  %v719_v48 = vmul.f32 %v12153_v27, %v699_v40 }
 0x14e   : > { %v11322_v49 = vpop.eup %11321  ;;  %v675_v50 = vadd.f32 1e-05, %v659_v44  ;;  %v720_v57 = vmul.f32 %v12153_v27, %v700_v47 }
 0x14f   : > { %v676_v6 = vadd.f32 1e-05, %v660_v12  ;;  %v11324_v51 = vpop.eup %11323  ;;  %v637_v52 = vpop.xlane.xlu1 %636  ;;  %v739_v55 = vadd.f32 %v12163_v46, %v719_v48  ;;  %v701_v56 = vmul.f32 %v11322_v49, %v11969_v7 }
 0x150   : > { %v640_v16 = vpop.xlane.xlu0 %639  ;;  %11333 = vrsqrt.f32 %v675_v50  ;;  %v661_v62 = vmul.f32 0.03125, %v637_v52  ;;  %v702_v4 = vmul.f32 %v11324_v51, %v11978_v2  ;;  %v740_v7 = vadd.f32 %v12163_v46, %v720_v57 }
 0x151   : > { %v662_v59 = vmul.f32 0.03125, %v640_v16  ;;  %11335 = vrsqrt.f32 %v676_v6  ;;  %v754_v20 = vpack.c.bf16 %v739_v55, %v738_v54  ;;  %v721_v3 = vmul.f32 %v12153_v27, %v701_v56 }
 0x152   : > { %v11326_v1 = vpop.eup %11325  ;;  %v677_v10 = vadd.f32 1e-05, %v661_v62  ;;  %v722_v26 = vmul.f32 %v12153_v27, %v702_v4 }
 0x153   : > { %v678_v11 = vadd.f32 1e-05, %v662_v59  ;;  %v11328_v18 = vpop.eup %11327  ;;  %v643_v19 = vpop.xlane.xlu1 %642  ;;  %10389 = vmatprep.mubr.msk.bf16.mxu0 %vm504_vm0, %v754_v20  ;;  %v741_v23 = vadd.f32 %v12163_v46, %v721_v3  ;;  %v703_v29 = vmul.f32 %v11326_v1, %v11981_v5 }
 0x154   : > { %v646_v22 = vpop.xlane.xlu0 %645  ;;  %11337 = vrsqrt.f32 %v677_v10  ;;  %v663_v30 = vmul.f32 0.03125, %v643_v19  ;;  %v704_v2 = vmul.f32 %v11328_v18, %v11990_v36  ;;  %v742_v5 = vadd.f32 %v12163_v46, %v722_v26 }
 0x155   : > { %v664_v31 = vmul.f32 0.03125, %v646_v22  ;;  %11339 = vrsqrt.f32 %v678_v11  ;;  %v755_v35 = vpack.c.bf16 %v741_v23, %v740_v7  ;;  %v723_v58 = vmul.f32 %v12153_v27, %v703_v29 }
 0x156   : > { %v11330_v8 = vpop.eup %11329  ;;  %v679_v38 = vadd.f32 1e-05, %v663_v30  ;;  %v724_v47 = vmul.f32 %v12153_v27, %v704_v2  ;;  %v465_v30 = vld [vmem:[%s11925_s15] sm:$0xff] }
 0x157   : > { %v680_v39 = vadd.f32 1e-05, %v664_v31  ;;  %v11332_v40 = vpop.eup %11331  ;;  %v649_v43 = vpop.xlane.xlu1 %648  ;;  %10390 = vmatmul.mubr.msk.bf16.vlgmr.msra.gmra.mrb[0].mxu0 %vm504_vm0, %v755_v35  ;;  %v743_v44 = vadd.f32 %v12163_v46, %v723_v58  ;;  %v705_v12 = vmul.f32 %v11330_v8, %v11993_v9  ;;  %v466_v31 = vld [vmem:[%s11925_s15 + $0x8] sm:$0xff] }
 0x158   : > { %11341 = vrsqrt.f32 %v679_v38  ;;  %v665_v36 = vmul.f32 0.03125, %v649_v43  ;;  %10406 = vmatpush3.bf16.msra.mxu0 %v11901_v32  ;;  %v706_v48 = vmul.f32 %v11332_v40, %v12002_v45  ;;  %v744_v9 = vadd.f32 %v12163_v46, %v724_v47  ;;  %v468_v38 = vld [vmem:[%s11925_s15 + $0x18] sm:$0xff] }
 0x159   : > { %11343 = vrsqrt.f32 %v680_v39  ;;  %v756_v49 = vpack.c.bf16 %v743_v44, %v742_v5  ;;  %v725_v50 = vmul.f32 %v12153_v27, %v705_v12  ;;  %10407 = vmatprep.subr.bf16.mxu0 %v11906_v33  ;;  %v1097_v58 = vpack.c.bf16 %v466_v31, %v465_v30  ;;  %v12236_v44 = vld [vmem:[%s428_s29] sm:$0xff] }
 0x15a   : > { %v11334_v6 = vpop.eup %11333  ;;  %v681_v51 = vadd.f32 1e-05, %v665_v36  ;;  %v726_v32 = vmul.f32 %v12153_v27, %v706_v48  ;;  %v907_v43 = vlaneseq  ;;  %v903_v47 = vcombine.high %v12236_v44, %v12236_v44 }
 0x15b   : > { %v11336_v52 = vpop.eup %11335  ;;  %10393 = vmatprep.mubr.msk.bf16.mxu0 %vm504_vm0, %v756_v49  ;;  %v745_v16 = vadd.f32 %v12163_v46, %v725_v50  ;;  %v707_v54 = vmul.f32 %v11334_v6, %v12005_v13 }
 0x15c   : > { %11345 = vrsqrt.f32 %v681_v51  ;;  %10408 = vmatpush3.bf16.msra.mxu0 %v11906_v33  ;;  %v708_v45 = vmul.f32 %v11336_v52, %v12014_v53  ;;  %v746_v59 = vadd.f32 %v12163_v46, %v726_v32  ;;  %v908_v5 = vshrl.u32 %v907_v43, 7 }
 0x15d   : > { %v757_v55 = vpack.c.bf16 %v745_v16, %v744_v9  ;;  %v727_v56 = vmul.f32 %v12153_v27, %v707_v54  ;;  %10409 = vmatprep.subr.bf16.mxu0 %v11917_v34 }
 0x15e   : > { %v11338_v57 = vpop.eup %11337  ;;  %v728_v3 = vmul.f32 %v12153_v27, %v708_v45  ;;  %v12248_v16 = vsub.s32 0, %v908_v5 }
 0x15f   : > { %v11340_v62 = vpop.eup %11339  ;;  %10394 = vmatmul.mubr.msk.bf16.gmra.mrb[4].mxu0 %vm504_vm0, %v757_v55  ;;  %v747_v13 = vadd.f32 %v12163_v46, %v727_v56  ;;  %v709_v20 = vmul.f32 %v11338_v57, %v12017_v17 }
 0x160   : > { %10410 = vmatpush3.bf16.msra.mxu0 %v11917_v34  ;;  %v710_v33 = vmul.f32 %v11340_v62, %v12026_v63  ;;  %v748_v11 = vadd.f32 %v12163_v46, %v728_v3 }
 0x161   : > { %v758_v53 = vpack.c.bf16 %v747_v13, %v746_v59  ;;  %v729_v4 = vmul.f32 %v12153_v27, %v709_v20  ;;  %10411 = vmatprep.subr.bf16.mxu0 %v11934_v37  ;;  %v900_v59 = vld [vmem:[%s428_s29 + $0x8] sm:$0xff] }
 0x162   : > { %v11342_v1 = vpop.eup %11341  ;;  %v730_v34 = vmul.f32 %v12153_v27, %v710_v33 }
 0x163   : > { %v11344_v10 = vpop.eup %11343  ;;  %10397 = vmatprep.mubr.msk.bf16.mxu0 %vm504_vm0, %v758_v53  ;;  %v749_v18 = vadd.f32 %v12163_v46, %v729_v4  ;;  %v711_v17 = vmul.f32 %v11342_v1, %v12029_v21 }
 0x164   : > { %v712_v63 = vmul.f32 %v11344_v10, %v12038_v15  ;;  %10412 = vmatpush3.bf16.msra.mxu0 %v11934_v37  ;;  %v750_v23 = vadd.f32 %v12163_v46, %v730_v34 }
 0x165   : > { %v759_v19 = vpack.c.bf16 %v749_v18, %v748_v11  ;;  %v731_v22 = vmul.f32 %v12153_v27, %v711_v17  ;;  %10445 = vmatprep.subr.bf16.mxu0 %v14984_v60 }
 0x166   : > { %v11346_v7 = vpop.eup %11345  ;;  %v732_v15 = vmul.f32 %v12153_v27, %v712_v63 }
 0x167   : > { %10398 = vmatmul.mubr.msk.bf16.gmra.mrb[8].mxu0 %vm504_vm0, %v759_v19  ;;  %v751_v21 = vadd.f32 %v12163_v46, %v731_v22  ;;  %v713_v29 = vmul.f32 %v11346_v7, %v12041_v25  ;;  %v467_v25 = vld [vmem:[%s11925_s15 + $0x10] sm:$0xff]  ;;  %v952_v7 = vcombine.high %v900_v59, %v900_v59  ;;  %s11728_s15 = smov 88  }
 0x168   : > { %v752_v2 = vadd.f32 %v12163_v46, %v732_v15  ;;  %v1098_v39 = vpack.c.bf16 %v468_v38, %v467_v25 }
 0x169   : > { %v760_v37 = vpack.c.bf16 %v751_v21, %v750_v23  ;;  %v733_v26 = vmul.f32 %v12153_v27, %v713_v29  ;;  %v11725_v27 = vmov 1966171168  }
 0x16a   : > { %v905_v40 = vunpack.c.l.s4 %v11725_v27 }
 0x16b   : > { %10401 = vmatprep.mubr.msk.bf16.mxu0 %vm504_vm0, %v760_v37  ;;  %v753_v35 = vadd.f32 %v12163_v46, %v733_v26 }
 0x16c   : > { %v906_v46 = vunpack.c.0.s8 %v905_v40 }
 0x16d   : > { %v761_v8 = vpack.c.bf16 %v753_v35, %v752_v2 }
 0x16e   : > { %v12238_v12 = vsub.s32 %v906_v46, %v908_v5 }
 0x16f   : > { %10402 = vmatmul.mubr.msk.bf16.gmra.mrb[12].mxu0 %vm504_vm0, %v761_v8 }
 0x170   : > { %10413 = vmatprep.mubr.msk.bf16.mxu0 %vm1152_vm1, %v1097_v58  ;;  %v917_v36 = vrot.slane %v903_v47, %v12238_v12  ;;  %v12275_v3 = vrot.slane %v900_v59, %v12238_v12  ;;  %v12310_v15 = vrot.slane %v952_v7, %v12238_v12 }
 0x172   : > { %v919_v49 = vcombine.high %v917_v36, %v917_v36  ;;  %v12254_v45 = vrot.slane %v917_v36, %v12238_v12  ;;  %v967_v4 = vcombine.high %v12275_v3, %v12275_v3  ;;  %v968_v30 = vcombine.high %v12310_v15, %v12310_v15 }
 0x174   : > { %v12246_v9 = vrot.slane %v919_v49, %v12238_v12  ;;  %v1020_v62 = vrot.slane %v12254_v45, %v12248_v16  ;;  %v12288_v17 = vrot.slane %v967_v4, %v12238_v12  ;;  %v12319_v8 = vrot.slane %v968_v30, %v12238_v12 }
 0x175   : > { %v949_v59 = vcombine.high %v12254_v45, %v12254_v45  ;;  %v975_v45 = vrot.slane %v12275_v3, %v12238_v12 }
 0x176   : > { %v951_v56 = vcombine.high %v12246_v9, %v12246_v9  ;;  %v1024_v33 = vrot.slane %v12246_v9, %v12248_v16  ;;  %v999_v22 = vcombine.high %v12288_v17, %v12288_v17  ;;  %v1040_v37 = vrot.slane %v12288_v17, %v12248_v16 }
 0x177   : > { %10414 = vmatmul.mubr.msk.bf16.vlgmr.msra.gmra.mrb[16].mxu0 %vm1152_vm1, %v1098_v39  ;;  %v1000_v27 = vcombine.high %v12319_v8, %v12319_v8  ;;  %v1056_v5 = vrot.slane %v12319_v8, %v12248_v16  ;;  %v982_v17 = vrot.slane %v12310_v15, %v12238_v12  ;;  %v910_v15 = vrot.slane %v12236_v44, %v12238_v12 }
 0x178   : > { %v12272_v20 = vrot.slane %v951_v56, %v12248_v16  ;;  %10447 = vmatprep.mubr.msk.bf16.mxu0 %vm11726_vm3, %v14984_v60  ;;  %v12307_v29 = vrot.slane %v999_v22, %v12248_v16 }
 0x179   : > { %v1064_v46 = vrot.slane %v1000_v27, %v12248_v16  ;;  %v926_v44 = vrot.slane %v910_v15, %v12238_v12 }
 0x18a   : > { %v10431_v48 = vpop.f32.mrb[12].mxu1 }
 0x18b   : > { %v1308_v50 = vadd.f32 %v10431_v48, %v12086_v61  ;;  %v1299_v6 = vpop.f32.mrb[13].mxu1 }
 0x18c   : > { %v1300_v51 = vadd.f32 %v12086_v61, %v1299_v6  ;;  %v10432_v52 = vpop.f32.mrb[14].mxu1 }
 0x18d   : > { %1380 = vst.msk [vmem:[%s12093_s14 + $0x90] sm:$0xff] %vm1152_vm1, %v1308_v50  ;;  %v1311_v54 = vadd.f32 %v10432_v52, %v12086_v61  ;;  %v1302_v32 = vpop.f32.mrb[15].mxu1 }
 0x18e   : > { %1378 = vst.msk [vmem:[%s12093_s14 + $0x80] sm:$0xff] %vm1152_vm1, %v1300_v51  ;;  %v1303_v55 = vadd.f32 %v12086_v61, %v1302_v32 }
 0x18f   : > { %1381 = vst.msk [vmem:[%s12093_s14 + $0x98] sm:$0xff] %vm1152_vm1, %v1311_v54  ;;  %v12263_v57 = vpack.c.bf16 %v1311_v54, %v1308_v50 }
 0x190   : > { %1379 = vst.msk [vmem:[%s12093_s14 + $0x88] sm:$0xff] %vm1152_vm1, %v1303_v55  ;;  %v12269_v13 = vpack.c.bf16 %v1303_v55, %v1300_v51 }
 0x192   : > { %v10435_v53 = vpop.f32.mrb[16].mxu1 }
 0x193   : > { %v1324_v1 = vadd.f32 %v10435_v53, %v12086_v61  ;;  %v1315_v10 = vpop.f32.mrb[17].mxu1 }
 0x194   : > { %v1316_v11 = vadd.f32 %v12086_v61, %v1315_v10  ;;  %v10436_v18 = vpop.f32.mrb[18].mxu1 }
 0x195   : > { %1384 = vst.msk [vmem:[%s12093_s14 + $0xb0] sm:$0xff] %vm1152_vm1, %v1324_v1  ;;  %v1327_v34 = vadd.f32 %v10436_v18, %v12086_v61  ;;  %v1318_v63 = vpop.f32.mrb[19].mxu1 }
 0x196   : > { %1382 = vst.msk [vmem:[%s12093_s14 + $0xa0] sm:$0xff] %vm1152_vm1, %v1316_v11  ;;  %v1319_v19 = vadd.f32 %v12086_v61, %v1318_v63 }
 0x197   : > { %1385 = vst.msk [vmem:[%s12093_s14 + $0xb8] sm:$0xff] %vm1152_vm1, %v1327_v34  ;;  %v12300_v23 = vpack.c.bf16 %v1327_v34, %v1324_v1  ;;  %v1028_v1 = vrot.slane %v949_v59, %v12248_v16 }
 0x198   : > { %1383 = vst.msk [vmem:[%s12093_s14 + $0xa8] sm:$0xff] %vm1152_vm1, %v1319_v19  ;;  %v12304_v21 = vpack.c.bf16 %v1319_v19, %v1316_v11 }
 0x19a   : > { %v10439_v26 = vpop.f32.mrb[20].mxu1 }
 0x19b   : > { %v1340_v31 = vadd.f32 %v10439_v26, %v12086_v61  ;;  %v1331_v2 = vpop.f32.mrb[21].mxu1  ;;  %v1799_v26 = vsel %vm1426_vm2, %v12269_v13, 0 }
 0x19c   : > { %v1332_v35 = vadd.f32 %v12086_v61, %v1331_v2  ;;  %v10440_v58 = vpop.f32.mrb[22].mxu1 }
 0x19d   : > { %1388 = vst.msk [vmem:[%s12093_s14 + $0xd0] sm:$0xff] %vm1152_vm1, %v1340_v31  ;;  %v1343_v25 = vadd.f32 %v10440_v58, %v12086_v61  ;;  %v1334_v38 = vpop.f32.mrb[23].mxu1 }
 0x19e   : > { %1386 = vst.msk [vmem:[%s12093_s14 + $0xc0] sm:$0xff] %vm1152_vm1, %v1332_v35  ;;  %v1335_v39 = vadd.f32 %v12086_v61, %v1334_v38  ;;  %v1891_v38 = vsel %vm1426_vm2, %v12304_v21, 0 }
 0x19f   : > { %1389 = vst.msk [vmem:[%s12093_s14 + $0xd8] sm:$0xff] %vm1152_vm1, %v1343_v25  ;;  %v12331_v40 = vpack.c.bf16 %v1343_v25, %v1340_v31  ;;  %v997_v31 = vcombine.high %v975_v45, %v975_v45 }
 0x1a0   : > { %1387 = vst.msk [vmem:[%s12093_s14 + $0xc8] sm:$0xff] %vm1152_vm1, %v1335_v39  ;;  %v12335_v43 = vpack.c.bf16 %v1335_v39, %v1332_v35 }
 0x1a1   : > { %v1044_v58 = vrot.slane %v997_v31, %v12248_v16 }
 0x1a2   : > { %15001 = vst [vmem:[#allocation3_spill] sm:$0xff] %v12335_v43  ;;  %v10443_v47 = vpop.f32.mrb[24].mxu1 }
 0x1a3   : > { %v1356_v36 = vadd.f32 %v10443_v47, %v12086_v61  ;;  %v1347_v48 = vpop.f32.mrb[25].mxu1 }
 0x1a4   : > { %v1348_v49 = vadd.f32 %v12086_v61, %v1347_v48  ;;  %v10444_v50 = vpop.f32.mrb[26].mxu1 }
 0x1a5   : > { %1392 = vst.msk [vmem:[%s12093_s14 + $0xf0] sm:$0xff] %vm1152_vm1, %v1356_v36  ;;  %v1359_v6 = vadd.f32 %v10444_v50, %v12086_v61  ;;  %v1350_v51 = vpop.f32.mrb[27].mxu1 }
 0x1a6   : > { %1390 = vst.msk [vmem:[%s12093_s14 + $0xe0] sm:$0xff] %vm1152_vm1, %v1348_v49  ;;  %v1351_v52 = vadd.f32 %v12086_v61, %v1350_v51 }
 0x1a7   : > { %1393 = vst.msk [vmem:[%s12093_s14 + $0xf8] sm:$0xff] %vm1152_vm1, %v1359_v6  ;;  %v12350_v54 = vpack.c.bf16 %v1359_v6, %v1356_v36  ;;  %v1983_v6 = vsel %vm1426_vm2, %v12335_v43, 0 }
 0x1a8   : > { %1391 = vst.msk [vmem:[%s12093_s14 + $0xe8] sm:$0xff] %vm1152_vm1, %v1351_v52  ;;  %v12354_v32 = vpack.c.bf16 %v1351_v52, %v1348_v49  ;;  %v1052_v49 = vrot.slane %v982_v17, %v12248_v16 }
 0x1aa   : > { %v2075_v31 = vsel %vm1426_vm2, %v12354_v32, 0 }
 0x22a   : > { %v12356_v55 = vpop.f32.mrb[0].mxu0 }
 0x22b   : > { %v12358_v56 = vpop.f32.mrb[1].mxu0 }
 0x22c   : > { %v12362_v53 = vpop.f32.mrb[2].mxu0 }
 0x22d   : > { %v12364_v4 = vpop.f32.mrb[3].mxu0 }
 0x232   : > { %v10395_v10 = vpop.f32.mrb[4].mxu0 }
 0x233   : > { %v1087_v11 = vadd.f32 %v10395_v10, %v1028_v1  ;;  %v852_v18 = vpop.f32.mrb[5].mxu0 }
 0x234   : > { %v12370_v34 = vadd.f32 %v1020_v62, %v852_v18  ;;  %v10396_v63 = vpop.f32.mrb[6].mxu0  ;;  %v1036_v62 = vrot.slane %v975_v45, %v12248_v16 }
 0x235   : > { %v12372_v19 = vpack.c.bf16 %v1087_v11, %v1087_v11  ;;  %v12375_v22 = vadd.f32 %v10396_v63, %v12272_v20  ;;  %v855_v7 = vpop.f32.mrb[7].mxu0 }
 0x236   : > { %v12382_v30 = vadd.f32 %v1024_v33, %v855_v7 }
 0x237   : > { %10484 = vmatmul.mubr.msk.bf16.vlgmr.msra.gmra.mrb[28].mxu1 %vm1426_vm2, %v12372_v19 }
 0x238   : > { %10494 = vmatpush3.bf16.xpose.msra.mxu1 %v1799_v26  ;;  %10495 = vmatprep.mubr.msk.bf16.mxu1 %vm11726_vm3, %v14984_v60 }
 0x239   : > { %10505 = vmatprep.subr.bf16.mxu1 %v14984_v60 }
 0x23a   : > { %v10399_v20 = vpop.f32.mrb[8].mxu0 }
 0x23b   : > { %v868_v2 = vpop.f32.mrb[9].mxu0 }
 0x23c   : > { %v1089_v9 = vadd.f32 %v1036_v62, %v868_v2  ;;  %v10400_v33 = vpop.f32.mrb[10].mxu0  ;;  %v1004_v62 = vrot.slane %v926_v44, %v12248_v16 }
 0x23d   : > { %v12393_v35 = vadd.f32 %v10400_v33, %v12307_v29  ;;  %v871_v3 = vpop.f32.mrb[11].mxu0  ;;  %v1091_v29 = vadd.f32 %v10399_v20, %v1044_v58 }
 0x23e   : > { %v12396_v8 = vpack.c.bf16 %v1089_v9, %v1089_v9  ;;  %v12401_v25 = vadd.f32 %v1040_v37, %v871_v3  ;;  %v1081_v33 = vadd.f32 %v1004_v62, %v12358_v56 }
 0x23f   : > { %v12414_v48 = vpack.c.bf16 %v1091_v29, %v1091_v29 }
 0x240   : > { %10496 = vmatmul.mubr.msk.bf16.vlgmr.msra.gmra.mrb[32].mxu1 %vm1426_vm2, %v12396_v8 }
 0x241   : > { %10506 = vmatpush3.bf16.xpose.msra.mxu1 %v1891_v38  ;;  %10507 = vmatprep.mubr.msk.bf16.mxu1 %vm11726_vm3, %v14984_v60  ;;  %v12467_v38 = vpack.c.bf16 %v1081_v33, %v1081_v33 }
 0x242   : > { %v10403_v39 = vpop.f32.mrb[12].mxu0  ;;  %10517 = vmatprep.subr.bf16.mxu1 %v14984_v60 }
 0x243   : > { %v884_v27 = vpop.f32.mrb[13].mxu0 }
 0x244   : > { %v10404_v37 = vpop.f32.mrb[14].mxu0  ;;  %v1093_v51 = vadd.f32 %v1052_v49, %v884_v27 }
 0x245   : > { %v12412_v47 = vadd.f32 %v10404_v37, %v1064_v46  ;;  %v887_v36 = vpop.f32.mrb[15].mxu0  ;;  %v998_v46 = vcombine.high %v982_v17, %v982_v17  ;;  %v1523_v37 = vsel %vm1426_vm2, %v12109_v24, 0 }
 0x246   : > { %v12417_v50 = vadd.f32 %v1056_v5, %v887_v36  ;;  %v12435_v7 = vpack.c.bf16 %v1093_v51, %v1093_v51  ;;  %v12515_v51 = vpack.c.bf16 %v12370_v34, %v12370_v34  ;;  %v1753_v34 = vsel %vm1426_vm2, %v12142_v0, 0 }
 0x247   : > { %v1060_v63 = vrot.slane %v998_v46, %v12248_v16 }
 0x248   : > { %10508 = vmatmul.mubr.msk.bf16.vlgmr.msra.gmra.mrb[36].mxu1 %vm1426_vm2, %v12414_v48  ;;  %15002 = vst [vmem:[#allocation4_spill] sm:$0xff] %v12435_v7 }
 0x249   : > { %10518 = vmatpush3.bf16.xpose.msra.mxu1 %v1983_v6  ;;  %10519 = vmatprep.mubr.msk.bf16.mxu1 %vm11726_vm3, %v14984_v60  ;;  %v1095_v2 = vadd.f32 %v10403_v39, %v1060_v63 }
 0x24a   : > { %v10415_v52 = vpop.f32.mrb[16].mxu0  ;;  %10529 = vmatprep.subr.bf16.mxu1 %v14984_v60 }
 0x24b   : > { %v1244_v5 = vadd.f32 %v10415_v52, %v12086_v61  ;;  %v1235_v59 = vpop.f32.mrb[17].mxu0  ;;  %v12465_v58 = vpack.c.bf16 %v1095_v2, %v1095_v2  ;;  %v12526_v52 = vpack.c.bf16 %v12382_v30, %v12382_v30  ;;  %v1845_v30 = vsel %vm1426_vm2, %v12263_v57, 0 }
 0x24c   : > { %v1236_v1 = vadd.f32 %v12086_v61, %v1235_v59  ;;  %v10416_v10 = vpop.f32.mrb[18].mxu0  ;;  %v12548_v59 = vpack.c.bf16 %v12401_v25, %v12401_v25  ;;  %v2029_v25 = vsel %vm1426_vm2, %v12331_v40, 0 }
 0x24d   : > { %1364 = vst.msk [vmem:[%s12093_s14 + $0x10] sm:$0xff] %vm1152_vm1, %v1244_v5  ;;  %v1247_v11 = vadd.f32 %v10416_v10, %v12086_v61  ;;  %v1238_v18 = vpop.f32.mrb[19].mxu0  ;;  %15003 = vst [vmem:[#allocation5_spill] sm:$0xff] %v12465_v58  ;;  %v12570_v10 = vpack.c.bf16 %v12417_v50, %v12417_v50  ;;  %v12587_v50 = vpop.permute.xlu0 %2451 }
 0x24e   : > { %1362 = vst.msk [vmem:[%s12093_s14] sm:$0xff] %vm1152_vm1, %v1236_v1  ;;  %v1239_v26 = vadd.f32 %v12086_v61, %v1238_v18  ;;  %v918_v61 = vcombine.high %v910_v15, %v910_v15  ;;  %v1569_v15 = vsel %vm1426_vm2, %v12105_v14, 0  ;;  %v12589_v18 = vpop.permute.xlu1 %2498 }
 0x24f   : > { %1365 = vst.msk [vmem:[%s12093_s14 + $0x18] sm:$0xff] %vm1152_vm1, %v1247_v11  ;;  %v12442_v45 = vpack.c.bf16 %v1247_v11, %v1244_v5  ;;  %v12537_v5 = vpack.c.bf16 %v12375_v22, %v12375_v22  ;;  %v1937_v22 = vsel %vm1426_vm2, %v12300_v23, 0  ;;  %v12581_v11 = vpack.c.bf16 %v12412_v47, %v12412_v47 }
 0x250   : > { %1363 = vst.msk [vmem:[%s12093_s14 + $0x8] sm:$0xff] %vm1152_vm1, %v1239_v26  ;;  %v12447_v20 = vpack.c.bf16 %v1239_v26, %v1236_v1  ;;  %10520 = vmatmul.mubr.msk.bf16.vlgmr.msra.gmra.mrb[40].mxu1 %vm1426_vm2, %v12435_v7  ;;  %v940_v3 = vrot.slane %v918_v61, %v12238_v12  ;;  %v948_v12 = vcombine.high %v926_v44, %v926_v44  ;;  %s11731_s14 = smov 104  }
 0x251   : > { %10530 = vmatpush3.bf16.xpose.msra.mxu1 %v2075_v31  ;;  %2404 = vrot.lane.b32.xlu1 %v12442_v45, %s11724_s28  ;;  %v1477_v56 = vsel %vm1426_vm2, %v12442_v45, 0  ;;  %v12559_v1 = vpack.c.bf16 %v12393_v35, %v12393_v35  ;;  %v2121_v35 = vsel %vm1426_vm2, %v12350_v54, 0  ;;  %v12591_v44 = vpop.permute.xlu0 %2545 }
 0x252   : > { %2357 = vrot.lane.b32.xlu0 %v12447_v20, %s11724_s28  ;;  %v1431_v9 = vsel %vm1426_vm2, %v12447_v20, 0  ;;  %10531 = vmatprep.mubr.msk.bf16.mxu1 %vm11726_vm3, %v14984_v60  ;;  %v1008_v29 = vrot.slane %v940_v3, %v12248_v16  ;;  %v1012_v27 = vrot.slane %v948_v12, %v12248_v16  ;;  %v950_v49 = vcombine.high %v940_v3, %v940_v3 }
 0x253   : > { %10446 = vmatpush3.bf16.xpose.msra.mxu0 %v1431_v9  ;;  %10541 = vmatprep.subr.bf16.mxu1 %v14984_v60 }
 0x254   : > { %10451 = vmatprep.subr.bf16.mxu0 %v14984_v60  ;;  %v1082_v39 = vadd.f32 %v1008_v29, %v12364_v4  ;;  %v1083_v36 = vadd.f32 %v12356_v55, %v1012_v27  ;;  %v1016_v6 = vrot.slane %v950_v49, %v12248_v16  ;;  %v1615_v16 = vsel %vm1426_vm2, %v12129_v42, 0 }
 0x256   : > { %v12483_v17 = vpack.c.bf16 %v1082_v39, %v1082_v39  ;;  %v12493_v4 = vpack.c.bf16 %v1083_v36, %v1083_v36  ;;  %v1084_v46 = vadd.f32 %v12362_v53, %v1016_v6  ;;  %v1661_v53 = vsel %vm1426_vm2, %v12125_v41, 0 }
 0x258   : > { %10532 = vmatmul.mubr.msk.bf16.vlgmr.msra.gmra.mrb[44].mxu1 %vm1426_vm2, %v12465_v58  ;;  %v12504_v55 = vpack.c.bf16 %v1084_v46, %v1084_v46 }
 0x259   : > { %10543 = vmatprep.mubr.msk.bf16.mxu1 %vm11726_vm3, %v14984_v60 }
 0x25a   : > { %10448 = vmatmul.mubr.msk.bf16.vlgmr.msra.gmra.mrb[20].mxu0 %vm1426_vm2, %v12467_v38 }
 0x25b   : > { %10452 = vmatpush3.bf16.xpose.msra.mxu0 %v1477_v56  ;;  %10453 = vmatprep.mubr.msk.bf16.mxu0 %vm11726_vm3, %v14984_v60 }
 0x25c   : > { %10457 = vmatprep.subr.bf16.mxu0 %v14984_v60 }
 0x262   : > { %10454 = vmatmul.mubr.msk.bf16.vlgmr.msra.gmra.mrb[24].mxu0 %vm1426_vm2, %v12483_v17 }
 0x263   : > { %10458 = vmatpush3.bf16.xpose.msra.mxu0 %v1523_v37  ;;  %10459 = vmatprep.mubr.msk.bf16.mxu0 %vm11726_vm3, %v14984_v60 }
 0x264   : > { %10463 = vmatprep.subr.bf16.mxu0 %v14984_v60 }
 0x26a   : > { %10460 = vmatmul.mubr.msk.bf16.vlgmr.msra.gmra.mrb[28].mxu0 %vm1426_vm2, %v12493_v4 }
 0x26b   : > { %10464 = vmatpush3.bf16.xpose.msra.mxu0 %v1569_v15  ;;  %10465 = vmatprep.mubr.msk.bf16.mxu0 %vm11726_vm3, %v14984_v60 }
 0x26c   : > { %10469 = vmatprep.subr.bf16.mxu0 %v14984_v60 }
 0x272   : > { %10466 = vmatmul.mubr.msk.bf16.vlgmr.msra.gmra.mrb[32].mxu0 %vm1426_vm2, %v12504_v55 }
 0x273   : > { %10470 = vmatpush3.bf16.xpose.msra.mxu0 %v1615_v16  ;;  %10471 = vmatprep.mubr.msk.bf16.mxu0 %vm11726_vm3, %v14984_v60 }
 0x274   : > { %10475 = vmatprep.subr.bf16.mxu0 %v14984_v60 }
 0x27a   : > { %10472 = vmatmul.mubr.msk.bf16.vlgmr.msra.gmra.mrb[36].mxu0 %vm1426_vm2, %v12515_v51 }
 0x27b   : > { %10476 = vmatpush3.bf16.xpose.msra.mxu0 %v1661_v53  ;;  %10477 = vmatprep.mubr.msk.bf16.mxu0 %vm11726_vm3, %v14984_v60 }
 0x27c   : > { %10487 = vmatprep.subr.bf16.mxu0 %v14984_v60 }
 0x282   : > { %10478 = vmatmul.mubr.msk.bf16.vlgmr.msra.gmra.mrb[40].mxu0 %vm1426_vm2, %v12526_v52 }
 0x283   : > { %10488 = vmatpush3.bf16.xpose.msra.mxu0 %v1753_v34  ;;  %10489 = vmatprep.mubr.msk.bf16.mxu0 %vm11726_vm3, %v14984_v60 }
 0x284   : > { %10499 = vmatprep.subr.bf16.mxu0 %v14984_v60 }
 0x28a   : > { %10490 = vmatmul.mubr.msk.bf16.vlgmr.msra.gmra.mrb[44].mxu0 %vm1426_vm2, %v12537_v5 }
 0x28b   : > { %10500 = vmatpush3.bf16.xpose.msra.mxu0 %v1845_v30  ;;  %10501 = vmatprep.mubr.msk.bf16.mxu0 %vm11726_vm3, %v14984_v60 }
 0x28c   : > { %10511 = vmatprep.subr.bf16.mxu0 %v14984_v60 }
 0x292   : > { %10502 = vmatmul.mubr.msk.bf16.vlgmr.msra.gmra.mrb[48].mxu0 %vm1426_vm2, %v12548_v59 }
 0x293   : > { %10512 = vmatpush3.bf16.xpose.msra.mxu0 %v1937_v22  ;;  %10513 = vmatprep.mubr.msk.bf16.mxu0 %vm11726_vm3, %v14984_v60 }
 0x294   : > { %10523 = vmatprep.subr.bf16.mxu0 %v14984_v60 }
 0x29a   : > { %10514 = vmatmul.mubr.msk.bf16.vlgmr.msra.gmra.mrb[52].mxu0 %vm1426_vm2, %v12559_v1 }
 0x29b   : > { %10524 = vmatpush3.bf16.xpose.msra.mxu0 %v2029_v25  ;;  %10525 = vmatprep.mubr.msk.bf16.mxu0 %vm11726_vm3, %v14984_v60 }
 0x29c   : > { %10535 = vmatprep.subr.bf16.mxu0 %v14984_v60 }
 0x2a2   : > { %10526 = vmatmul.mubr.msk.bf16.vlgmr.msra.gmra.mrb[56].mxu0 %vm1426_vm2, %v12570_v10 }
 0x2a3   : > { %10536 = vmatpush3.bf16.xpose.msra.mxu0 %v2121_v35  ;;  %10537 = vmatprep.mubr.msk.bf16.mxu0 %vm11726_vm3, %v14984_v60 }
 0x2a4   : > { %10547 = vmatprep.subr.bf16.mxu0 %v14984_v60 }
 0x2aa   : > { %10538 = vmatmul.mubr.msk.bf16.vlgmr.msra.gmra.mrb[60].mxu0 %vm1426_vm2, %v12581_v11 }
 0x2ab   : > { %10549 = vmatprep.mubr.msk.bf16.mxu0 %vm11726_vm3, %v14984_v60 }
 0x2c3   : > { %v2405_v63 = vpop.permute.xlu1 %2404 }
 0x2c4   : > { %10548 = vmatpush3.bf16.msra.mxu0 %v2405_v63  ;;  %v2358_v26 = vpop.permute.xlu0 %2357 }
 0x2c5   : > { %10542 = vmatpush3.bf16.msra.mxu1 %v2358_v26  ;;  %10559 = vmatprep.subr.bf16.mxu0 %v14984_v60 }
 0x2c6   : > { %10553 = vmatprep.subr.bf16.mxu1 %v14984_v60 }
 0x30a   : > { %v12595_v47 = vpop.f32.mrb[28].mxu1 }
 0x30b   : > { %v10485_v62 = vpop.f32.mrb[29].mxu1  ;;  %v2182_v31 = vsel %vm2163_vm4, %v12595_v47, -inf }
 0x30c   : > { %v1746_v61 = vpop.f32.mrb[30].mxu1  ;;  %2183 = vmax.xlane.f32.xlu0 %v2182_v31 }
 0x30d   : > { %v10486_v2 = vpop.f32.mrb[31].mxu1 }
 0x313   : > { %v12599_v9 = vpop.f32.mrb[32].mxu1 }
 0x314   : > { %v10497_v33 = vpop.f32.mrb[33].mxu1  ;;  %v2188_v3 = vsel %vm2163_vm4, %v12599_v9, -inf }
 0x315   : > { %v1838_v29 = vpop.f32.mrb[34].mxu1  ;;  %2189 = vmax.xlane.f32.xlu0 %v2188_v3 }
 0x316   : > { %v10498_v56 = vpop.f32.mrb[35].mxu1 }
 0x31b   : > { %v12603_v12 = vpop.f32.mrb[36].mxu1 }
 0x31c   : > { %v10509_v39 = vpop.f32.mrb[37].mxu1  ;;  %v2194_v27 = vsel %vm2163_vm4, %v12603_v12, -inf }
 0x31d   : > { %v1930_v37 = vpop.f32.mrb[38].mxu1  ;;  %2195 = vmax.xlane.f32.xlu0 %v2194_v27 }
 0x31e   : > { %v10510_v36 = vpop.f32.mrb[39].mxu1 }
 0x323   : > { %v12607_v49 = vpop.f32.mrb[40].mxu1 }
 0x324   : > { %v10521_v6 = vpop.f32.mrb[41].mxu1  ;;  %v2200_v15 = vsel %vm2163_vm4, %v12607_v49, -inf }
 0x325   : > { %v2022_v46 = vpop.f32.mrb[42].mxu1  ;;  %2201 = vmax.xlane.f32.xlu0 %v2200_v15 }
 0x326   : > { %v10522_v16 = vpop.f32.mrb[43].mxu1 }
 0x32b   : > { %v12611_v53 = vpop.f32.mrb[44].mxu1 }
 0x32c   : > { %v10533_v34 = vpop.f32.mrb[45].mxu1  ;;  %v2206_v30 = vsel %vm2163_vm4, %v12611_v53, -inf }
 0x32d   : > { %v2114_v22 = vpop.f32.mrb[46].mxu1  ;;  %2207 = vmax.xlane.f32.xlu0 %v2206_v30  ;;  %v12615_v25 = vpop.f32.mrb[20].mxu0 }
 0x32e   : > { %v10449_v35 = vpop.f32.mrb[21].mxu0  ;;  %v10534_v63 = vpop.f32.mrb[47].mxu1  ;;  %v2164_v31 = vsel %vm2163_vm4, %v12615_v25, -inf }
 0x32f   : > { %v1470_v26 = vpop.f32.mrb[22].mxu0 }
 0x330   : > { %v10450_v62 = vpop.f32.mrb[23].mxu0 }
 0x331   : > { %2165 = vmax.xlane.f32.xlu0 %v2164_v31 }
 0x335   : > { %v12619_v61 = vpop.f32.mrb[24].mxu0 }
 0x336   : > { %v10455_v2 = vpop.f32.mrb[25].mxu0  ;;  %v2167_v33 = vsel %vm2163_vm4, %v12619_v61, -inf }
 0x337   : > { %2168 = vmax.xlane.f32.xlu1 %v2167_v33  ;;  %v1516_v3 = vpop.f32.mrb[26].mxu0 }
 0x338   : > { %v10456_v29 = vpop.f32.mrb[27].mxu0 }
 0x33d   : > { %v12623_v56 = vpop.f32.mrb[28].mxu0 }
 0x33e   : > { %v10461_v39 = vpop.f32.mrb[29].mxu0 }
 0x33f   : > { %v1562_v27 = vpop.f32.mrb[30].mxu0  ;;  %v2170_v39 = vsel %vm2163_vm4, %v12623_v56, -inf }
 0x340   : > { %v10462_v37 = vpop.f32.mrb[31].mxu0 }
 0x345   : > { %v12625_v36 = vpop.f32.mrb[32].mxu0 }
 0x346   : > { %v10467_v6 = vpop.f32.mrb[33].mxu0 }
 0x347   : > { %2639 = vrot.lane.b32.xlu0 %v12148_v28, %s11724_s28  ;;  %v1608_v15 = vpop.f32.mrb[34].mxu0 }
 0x348   : > { %2592 = vrot.lane.b32.xlu1 %v12125_v41, %s11724_s28  ;;  %v10468_v46 = vpop.f32.mrb[35].mxu0 }
 0x349   : > { %v2173_v46 = vsel %vm2163_vm4, %v12625_v36, -inf }
 0x34d   : > { %v12631_v16 = vpop.f32.mrb[36].mxu0 }
 0x34e   : > { %v10473_v34 = vpop.f32.mrb[37].mxu0  ;;  %v2176_v15 = vsel %vm2163_vm4, %v12631_v16, -inf }
 0x34f   : > { %v1654_v30 = vpop.f32.mrb[38].mxu0 }
 0x350   : > { %v10474_v22 = vpop.f32.mrb[39].mxu0 }
 0x355   : > { %v12633_v35 = vpop.f32.mrb[40].mxu0 }
 0x356   : > { %v10479_v63 = vpop.f32.mrb[41].mxu0 }
 0x357   : > { %v1700_v26 = vpop.f32.mrb[42].mxu0  ;;  %v2179_v63 = vsel %vm2163_vm4, %v12633_v35, -inf }
 0x358   : > { %v10480_v62 = vpop.f32.mrb[43].mxu0 }
 0x35d   : > { %v12635_v31 = vpop.f32.mrb[44].mxu0 }
 0x35e   : > { %v10491_v2 = vpop.f32.mrb[45].mxu0  ;;  %v2185_v62 = vsel %vm2163_vm4, %v12635_v31, -inf }
 0x35f   : > { %v1792_v33 = vpop.f32.mrb[46].mxu0 }
 0x360   : > { %v10492_v3 = vpop.f32.mrb[47].mxu0 }
 0x365   : > { %v12637_v29 = vpop.f32.mrb[48].mxu0 }
 0x366   : > { %2171 = vmax.xlane.f32.xlu0 %v2170_v39  ;;  %v10503_v27 = vpop.f32.mrb[49].mxu0  ;;  %v2191_v39 = vsel %vm2163_vm4, %v12637_v29, -inf }
 0x367   : > { %v1884_v37 = vpop.f32.mrb[50].mxu0 }
 0x368   : > { %v10504_v6 = vpop.f32.mrb[51].mxu0 }
 0x36a   : > { %2177 = vmax.xlane.f32.xlu0 %v2176_v15 }
 0x36c   : > { %2174 = vmax.xlane.f32.xlu1 %v2173_v46 }
 0x36d   : > { %v12645_v34 = vpop.f32.mrb[52].mxu0 }
 0x36e   : > { %v10515_v30 = vpop.f32.mrb[53].mxu0  ;;  %v2197_v37 = vsel %vm2163_vm4, %v12645_v34, -inf }
 0x36f   : > { %v1976_v22 = vpop.f32.mrb[54].mxu0 }
 0x370   : > { %2180 = vmax.xlane.f32.xlu1 %v2179_v63  ;;  %v10516_v26 = vpop.f32.mrb[55].mxu0 }
 0x374   : > { %2186 = vmax.xlane.f32.xlu1 %v2185_v62 }
 0x375   : > { %v12651_v2 = vpop.f32.mrb[56].mxu0 }
 0x376   : > { %v10527_v33 = vpop.f32.mrb[57].mxu0  ;;  %v2203_v30 = vsel %vm2163_vm4, %v12651_v2, -inf }
 0x377   : > { %v2068_v3 = vpop.f32.mrb[58].mxu0 }
 0x378   : > { %2192 = vmax.xlane.f32.xlu1 %v2191_v39  ;;  %v10528_v27 = vpop.f32.mrb[59].mxu0 }
 0x37c   : > { %2198 = vmax.xlane.f32.xlu1 %v2197_v37 }
 0x37d   : > { %v12657_v6 = vpop.f32.mrb[60].mxu0 }
 0x37e   : > { %v10539_v15 = vpop.f32.mrb[61].mxu0  ;;  %v2209_v63 = vsel %vm2163_vm4, %v12657_v6, -inf }
 0x37f   : > { %v2160_v46 = vpop.f32.mrb[62].mxu0 }
 0x380   : > { %2204 = vmax.xlane.f32.xlu1 %v2203_v30  ;;  %v10540_v22 = vpop.f32.mrb[63].mxu0 }
 0x384   : > { %2210 = vmax.xlane.f32.xlu1 %v2209_v63 }
 0x399   : > { %v2184_v26 = vpop.xlane.xlu0 %2183 }
 0x39a   : > { %v2218_v62 = vsub.f32 %v12595_v47, %v2184_v26 }
 0x39c   : > { %v2240_v33 = vmul.f32 1.442695, %v2218_v62 }
 0x39e   : > { %11347 = vpow2.f32 %v2240_v33 }
 0x3a2   : > { %v2190_v3 = vpop.xlane.xlu0 %2189 }
 0x3a3   : > { %v2220_v39 = vsub.f32 %v12599_v9, %v2190_v3 }
 0x3a5   : > { %v2244_v27 = vmul.f32 1.442695, %v2220_v39 }
 0x3a7   : > { %11349 = vpow2.f32 %v2244_v27 }
 0x3a8   : > { %v12665_v37 = vpop.eup %11347 }
 0x3a9   : > { %v2278_v15 = vsel %vm2163_vm4, %v12665_v37, 0.0 }
 0x3aa   : > { %2279 = vadd.xlane.f32.xlu0 %v2278_v15  ;;  %v2196_v46 = vpop.xlane.xlu0 %2195 }
 0x3ab   : > { %v2222_v30 = vsub.f32 %v12603_v12, %v2196_v46 }
 0x3ad   : > { %v2248_v22 = vmul.f32 1.442695, %v2222_v30 }
 0x3af   : > { %11351 = vpow2.f32 %v2248_v22 }
 0x3b1   : > { %v12670_v63 = vpop.eup %11349 }
 0x3b2   : > { %v2202_v47 = vpop.xlane.xlu0 %2201  ;;  %v2284_v26 = vsel %vm2163_vm4, %v12670_v63, 0.0 }
 0x3b3   : > { %v2224_v9 = vsub.f32 %v12607_v49, %v2202_v47  ;;  %2285 = vadd.xlane.f32.xlu1 %v2284_v26 }
 0x3b5   : > { %v2252_v62 = vmul.f32 1.442695, %v2224_v9 }
 0x3b7   : > { %11353 = vpow2.f32 %v2252_v62 }
 0x3b9   : > { %v12675_v33 = vpop.eup %11351 }
 0x3ba   : > { %15004 = vst [vmem:[#allocation6_spill] sm:$0xff] %v12675_v33  ;;  %v2208_v3 = vpop.xlane.xlu0 %2207  ;;  %v2290_v39 = vsel %vm2163_vm4, %v12675_v33, 0.0 }
 0x3bb   : > { %2291 = vadd.xlane.f32.xlu1 %v2290_v39 }
 0x3be   : > { %v2166_v12 = vpop.xlane.xlu0 %2165 }
 0x3bf   : > { %v2212_v27 = vsub.f32 %v12615_v25, %v2166_v12 }
 0x3c1   : > { %v12680_v15 = vpop.eup %11353  ;;  %v2228_v46 = vmul.f32 1.442695, %v2212_v27 }
 0x3c2   : > { %15005 = vst [vmem:[#allocation7_spill] sm:$0xff] %v12680_v15  ;;  %v2296_v30 = vsel %vm2163_vm4, %v12680_v15, 0.0  ;;  %v12693_v39 = vpop.permute.xlu0 %2639 }
 0x3c3   : > { %11355 = vpow2.f32 %v2228_v46  ;;  %2297 = vadd.xlane.f32.xlu1 %v2296_v30 }
 0x3c4   : > { %v2169_v49 = vpop.xlane.xlu1 %2168 }
 0x3c5   : > { %v2213_v22 = vsub.f32 %v12619_v61, %v2169_v49 }
 0x3c7   : > { %v2230_v47 = vmul.f32 1.442695, %v2213_v22 }
 0x3c8   : > { %v12696_v61 = vpop.permute.xlu1 %2592 }
 0x3c9   : > { %11357 = vpow2.f32 %v2230_v47 }
 0x3cd   : > { %v12685_v26 = vpop.eup %11355 }
 0x3ce   : > { %v2260_v9 = vsel %vm2163_vm4, %v12685_v26, 0.0 }
 0x3cf   : > { %2261 = vadd.xlane.f32.xlu0 %v2260_v9 }
 0x3d3   : > { %v12689_v25 = vpop.eup %11357 }
 0x3d4   : > { %v2263_v62 = vsel %vm2163_vm4, %v12689_v25, 0.0 }
 0x3d5   : > { %2264 = vadd.xlane.f32.xlu1 %v2263_v62 }
 0x3f3   : > { %v2172_v12 = vpop.xlane.xlu0 %2171 }
 0x3f4   : > { %v2214_v27 = vsub.f32 %v12623_v56, %v2172_v12 }
 0x3f6   : > { %v2232_v46 = vmul.f32 1.442695, %v2214_v27 }
 0x3f7   : > { %v2178_v30 = vpop.xlane.xlu0 %2177 }
 0x3f8   : > { %11359 = vpow2.f32 %v2232_v46  ;;  %v2216_v49 = vsub.f32 %v12631_v16, %v2178_v30 }
 0x3f9   : > { %v2175_v22 = vpop.xlane.xlu1 %2174 }
 0x3fa   : > { %v2236_v47 = vmul.f32 1.442695, %v2216_v49  ;;  %v2215_v9 = vsub.f32 %v12625_v36, %v2175_v22  ;;  %v2226_v22 = vsub.f32 %v12611_v53, %v2208_v3 }
 0x3fc   : > { %11361 = vpow2.f32 %v2236_v47  ;;  %v2234_v60 = vmul.f32 1.442695, %v2215_v9  ;;  %v2256_v33 = vmul.f32 1.442695, %v2226_v22 }
 0x3fd   : > { %v2181_v16 = vpop.xlane.xlu1 %2180 }
 0x3fe   : > { %11363 = vpow2.f32 %v2234_v60  ;;  %v2217_v46 = vsub.f32 %v12633_v35, %v2181_v16 }
 0x400   : > { %v2238_v47 = vmul.f32 1.442695, %v2217_v46 }
 0x401   : > { %v2187_v60 = vpop.xlane.xlu1 %2186 }
 0x402   : > { %v12700_v62 = vpop.eup %11359  ;;  %11365 = vpow2.f32 %v2238_v47  ;;  %v2219_v58 = vsub.f32 %v12635_v31, %v2187_v60 }
 0x403   : > { %v2266_v15 = vsel %vm2163_vm4, %v12700_v62, 0.0 }
 0x404   : > { %2267 = vadd.xlane.f32.xlu0 %v2266_v15  ;;  %v2242_v35 = vmul.f32 1.442695, %v2219_v58 }
 0x405   : > { %v2193_v15 = vpop.xlane.xlu1 %2192 }
 0x406   : > { %v12704_v56 = vpop.eup %11361  ;;  %v2221_v49 = vsub.f32 %v12637_v29, %v2193_v15 }
 0x407   : > { %v2272_v12 = vsel %vm2163_vm4, %v12704_v56, 0.0 }
 0x408   : > { %v12708_v27 = vpop.eup %11363  ;;  %2273 = vadd.xlane.f32.xlu0 %v2272_v12  ;;  %v2246_v9 = vmul.f32 1.442695, %v2221_v49 }
 0x409   : > { %v2269_v36 = vsel %vm2163_vm4, %v12708_v27, 0.0  ;;  %v2199_v30 = vpop.xlane.xlu1 %2198 }
 0x40a   : > { %2270 = vadd.xlane.f32.xlu1 %v2269_v36  ;;  %v2223_v12 = vsub.f32 %v12645_v34, %v2199_v30  ;;  %11367 = vpow2.f32 %v2246_v9 }
 0x40b   : > { %11369 = vpow2.f32 %v2256_v33 }
 0x40c   : > { %v2250_v7 = vmul.f32 1.442695, %v2223_v12  ;;  %v12724_v29 = vpop.eup %11365 }
 0x40d   : > { %v2205_v36 = vpop.xlane.xlu1 %2204  ;;  %v2275_v34 = vsel %vm2163_vm4, %v12724_v29, 0.0 }
 0x40e   : > { %11371 = vpow2.f32 %v2250_v7 }
 0x40f   : > { %11373 = vpow2.f32 %v2242_v35 }
 0x411   : > { %v2211_v46 = vpop.xlane.xlu1 %2210 }
 0x412   : > { %v2227_v35 = vsub.f32 %v12657_v6, %v2211_v46 }
 0x414   : > { %v12726_v53 = vpop.eup %11367 }
 0x415   : > { %v12730_v3 = vpop.eup %11369  ;;  %v2287_v31 = vsel %vm2163_vm4, %v12726_v53, 0.0 }
 0x41b   : > { %2686 = vrot.lane.b32.xlu1 %v12142_v0, %s11724_s28 }
 0x41e   : > { %2733 = vrot.lane.b32.xlu0 %v12269_v13, %s11724_s28 }
 0x422   : > { %2921 = vrot.lane.b32.xlu0 %v12335_v43, %s11724_s28  ;;  %v2225_v43 = vsub.f32 %v12651_v2, %v2205_v36  ;;  %v12734_v2 = vpop.eup %11371 }
 0x423   : > { %v12738_v7 = vpop.eup %11373  ;;  %v2293_v58 = vsel %vm2163_vm4, %v12734_v2, 0.0 }
 0x424   : > { %v2254_v16 = vmul.f32 1.442695, %v2225_v43  ;;  %v2302_v43 = vsel %vm2163_vm4, %v12730_v3, 0.0  ;;  %v2281_v60 = vsel %vm2163_vm4, %v12738_v7, 0.0 }
 0x426   : > { %11375 = vpow2.f32 %v2254_v16 }
 0x430   : > { %v12742_v33 = vpop.eup %11375 }
 0x431   : > { %v2299_v15 = vsel %vm2163_vm4, %v12742_v33, 0.0 }
 0x437   : > { %v2280_v49 = vpop.xlane.xlu0 %2279 }
 0x43f   : > { %2276 = vadd.xlane.f32.xlu1 %v2275_v34 }
 0x440   : > { %v12748_v30 = vpop.xlane.xlu1 %2285 }
 0x441   : > { %2288 = vadd.xlane.f32.xlu0 %v2287_v31  ;;  %v2258_v31 = vmul.f32 1.442695, %v2227_v35 }
 0x443   : > { %2303 = vadd.xlane.f32.xlu1 %v2302_v43 }
 0x445   : > { %2294 = vadd.xlane.f32.xlu0 %v2293_v58  ;;  %v15006_v58 = vmov 0.0  }
 0x447   : > { %2282 = vadd.xlane.f32.xlu1 %v2281_v60 }
 0x448   : > { %v12752_v22 = vpop.xlane.xlu1 %2291 }
 0x449   : > { %2300 = vadd.xlane.f32.xlu0 %v2299_v15 }
 0x450   : > { %v12756_v9 = vpop.xlane.xlu1 %2297 }
 0x458   : > { %2780 = vrot.lane.b32.xlu1 %v12263_v57, %s11724_s28 }
 0x45c   : > { %2827 = vrot.lane.b32.xlu1 %v12304_v21, %s11724_s28  ;;  %v2262_v47 = vpop.xlane.xlu0 %2261 }
 0x45d   : > { %11377 = vrcp.f32 %v2262_v47 }
 0x45f   : > { %3015 = vrot.lane.b32.xlu0 %v12354_v32, %s11724_s28 }
 0x460   : > { %2874 = vrot.lane.b32.xlu1 %v12300_v23, %s11724_s28 }
 0x462   : > { %v2265_v12 = vpop.xlane.xlu1 %2264 }
 0x463   : > { %11379 = vrcp.f32 %v2265_v12 }
 0x464   : > { %2968 = vrot.lane.b32.xlu1 %v12331_v40, %s11724_s28  ;;  %11381 = vpow2.f32 %v2258_v31 }
 0x467   : > { %v11378_v36 = vpop.eup %11377 }
 0x468   : > { %3062 = vrot.lane.b32.xlu1 %v12350_v54, %s11724_s28  ;;  %v2324_v16 = vmul.f32 %v11378_v36, %v12685_v26  ;;  %s11732_s28 = smov 72  }
 0x46a   : > { %v2340_v34 = vpack.c.bf16 %v2324_v16, %v2324_v16 }
 0x46c   : > { %3178 = vrot.lane.b32.xlu1 %v12442_v45, %s11727_s18  ;;  %10544 = vmatmul.mubr.msk.bf16.vlgmr.msra.gmra.mrb[48].mxu1 %vm2163_vm4, %v2340_v34 }
 0x46d   : > { %v11380_v43 = vpop.eup %11379  ;;  %10554 = vmatpush3.bf16.msra.mxu1 %v12587_v50  ;;  %10555 = vmatprep.mubr.msk.bf16.mxu1 %vm11726_vm3, %v15006_v58 }
 0x46e   : > { %v2325_v6 = vmul.f32 %v11380_v43, %v12689_v25  ;;  %10565 = vmatprep.subr.bf16.mxu1 %v15006_v58  ;;  %v12787_v50 = vpop.eup %11381  ;;  %v15008_v43 = vld [vmem:[#allocation4_spill] sm:$0xff] }
 0x46f   : > { %v2305_v25 = vsel %vm2163_vm4, %v12787_v50, 0.0 }
 0x470   : > { %3176 = vrot.lane.b32.xlu1 %v12483_v17, %s11727_s18  ;;  %v2341_v26 = vpack.c.bf16 %v2325_v6, %v2325_v6 }
 0x472   : > { %10550 = vmatmul.mubr.msk.bf16.vlgmr.msra.gmra.mrb[64].mxu0 %vm2163_vm4, %v2341_v26 }
 0x473   : > { %10560 = vmatpush3.bf16.msra.mxu0 %v12589_v18  ;;  %10561 = vmatprep.mubr.msk.bf16.mxu0 %vm11726_vm3, %v15006_v58 }
 0x474   : > { %3280 = vrot.lane.b32.xlu1 %v12105_v14, %s11727_s18  ;;  %10571 = vmatprep.subr.bf16.mxu0 %v15006_v58 }
 0x478   : > { %3278 = vrot.lane.b32.xlu1 %v12504_v55, %s11727_s18 }
 0x47c   : > { %3382 = vrot.lane.b32.xlu1 %v12125_v41, %s11727_s18 }
 0x47e   : > { %2306 = vadd.xlane.f32.xlu0 %v2305_v25  ;;  %v15009_v25 = vld [vmem:[#allocation5_spill] sm:$0xff] }
 0x480   : > { %3380 = vrot.lane.b32.xlu1 %v12526_v52, %s11727_s18 }
 0x484   : > { %3484 = vrot.lane.b32.xlu1 %v12142_v0, %s11727_s18 }
 0x488   : > { %3482 = vrot.lane.b32.xlu1 %v12537_v5, %s11727_s18 }
 0x48c   : > { %3586 = vrot.lane.b32.xlu1 %v12263_v57, %s11727_s18 }
 0x490   : > { %3584 = vrot.lane.b32.xlu1 %v12548_v59, %s11727_s18 }
 0x491   : > { %v2268_v18 = vpop.xlane.xlu0 %2267 }
 0x492   : > { %11383 = vrcp.f32 %v2268_v18 }
 0x494   : > { %3688 = vrot.lane.b32.xlu1 %v12300_v23, %s11727_s18  ;;  %3127 = vrot.lane.b32.xlu0 %v12447_v20, %s11727_s18 }
 0x495   : > { %v2274_v60 = vpop.xlane.xlu0 %2273 }
 0x496   : > { %11385 = vrcp.f32 %v2274_v60 }
 0x497   : > { %v2271_v15 = vpop.xlane.xlu1 %2270 }
 0x498   : > { %11387 = vrcp.f32 %v2271_v15  ;;  %3686 = vrot.lane.b32.xlu1 %v12559_v1, %s11727_s18  ;;  %3125 = vrot.lane.b32.xlu0 %v12467_v38, %s11727_s18 }
 0x499   : > { %11389 = vrcp.f32 %v2280_v49 }
 0x49a   : > { %11391 = vrcp.f32 %v12748_v30 }
 0x49b   : > { %v2687_v31 = vpop.permute.xlu1 %2686 }
 0x49c   : > { %v11384_v46 = vpop.eup %11383  ;;  %3790 = vrot.lane.b32.xlu1 %v12331_v40, %s11727_s18  ;;  %3229 = vrot.lane.b32.xlu0 %v12109_v24, %s11727_s18 }
 0x49d   : > { %v2326_v47 = vmul.f32 %v11384_v46, %v12700_v62 }
 0x49f   : > { %v2342_v12 = vpack.c.bf16 %v2326_v47, %v2326_v47 }
 0x4a0   : > { %v11386_v36 = vpop.eup %11385  ;;  %3788 = vrot.lane.b32.xlu1 %v12570_v10, %s11727_s18  ;;  %3227 = vrot.lane.b32.xlu0 %v12493_v4, %s11727_s18 }
 0x4a1   : > { %10556 = vmatmul.mubr.msk.bf16.vlgmr.msra.gmra.mrb[52].mxu1 %vm2163_vm4, %v2342_v12  ;;  %v2328_v62 = vmul.f32 %v11386_v36, %v12704_v56 }
 0x4a2   : > { %v11388_v35 = vpop.eup %11387  ;;  %10566 = vmatpush3.bf16.msra.mxu1 %v12591_v44  ;;  %10567 = vmatprep.mubr.msk.bf16.mxu1 %vm11726_vm3, %v15006_v58 }
 0x4a3   : > { %v2327_v16 = vmul.f32 %v11388_v35, %v12708_v27  ;;  %10577 = vmatprep.subr.bf16.mxu1 %v15006_v58  ;;  %v2344_v44 = vpack.c.bf16 %v2328_v62, %v2328_v62  ;;  %v11390_v34 = vpop.eup %11389  ;;  %v2734_v27 = vpop.permute.xlu0 %2733  ;;  %v15010_v35 = vld [vmem:[#allocation6_spill] sm:$0xff] }
 0x4a4   : > { %3892 = vrot.lane.b32.xlu1 %v12350_v54, %s11727_s18  ;;  %3331 = vrot.lane.b32.xlu0 %v12129_v42, %s11727_s18  ;;  %v2330_v56 = vmul.f32 %v11390_v34, %v12665_v37 }
 0x4a5   : > { %v2343_v49 = vpack.c.bf16 %v2327_v16, %v2327_v16 }
 0x4a7   : > { %10562 = vmatmul.mubr.msk.bf16.vlgmr.msra.gmra.mrb[68].mxu0 %vm2163_vm4, %v2343_v49  ;;  %v2922_v18 = vpop.permute.xlu0 %2921 }
 0x4a8   : > { %10572 = vmatpush3.bf16.msra.mxu0 %v12696_v61  ;;  %3890 = vrot.lane.b32.xlu1 %v12581_v11, %s11727_s18  ;;  %v11392_v61 = vpop.eup %11391 }
 0x4a9   : > { %3329 = vrot.lane.b32.xlu0 %v12515_v51, %s11727_s18  ;;  %10568 = vmatmul.mubr.msk.bf16.vlgmr.msra.gmra.mrb[56].mxu1 %vm2163_vm4, %v2344_v44  ;;  %v2332_v37 = vmul.f32 %v11392_v61, %v12670_v63  ;;  %v15007_v63 = vld [vmem:[#allocation3_spill] sm:$0xff] }
 0x4aa   : > { %10578 = vmatpush3.bf16.msra.mxu1 %v12693_v39  ;;  %10579 = vmatprep.mubr.msk.bf16.mxu1 %vm11726_vm3, %v15006_v58  ;;  %v2346_v39 = vpack.c.bf16 %v2330_v56, %v2330_v56 }
 0x4ab   : > { %10589 = vmatprep.subr.bf16.mxu1 %v15006_v58  ;;  %10573 = vmatprep.mubr.msk.bf16.mxu0 %vm11726_vm3, %v15006_v58  ;;  %v2348_v30 = vpack.c.bf16 %v2332_v37, %v2332_v37 }
 0x4ac   : > { %4178 = vrot.lane.b32.xlu1 %v12442_v45, %s11728_s15  ;;  %10583 = vmatprep.subr.bf16.mxu0 %v15006_v58 }
 0x4ad   : > { %3433 = vrot.lane.b32.xlu0 %v12148_v28, %s11727_s18 }
 0x4b0   : > { %4270 = vrot.lane.b32.xlu1 %v12105_v14, %s11728_s15 }
 0x4b1   : > { %3431 = vrot.lane.b32.xlu0 %v12372_v19, %s11727_s18  ;;  %10580 = vmatmul.mubr.msk.bf16.vlgmr.msra.gmra.mrb[60].mxu1 %vm2163_vm4, %v2346_v39 }
 0x4b2   : > { %10590 = vmatpush3.bf16.msra.mxu1 %v2734_v27  ;;  %10591 = vmatprep.mubr.msk.bf16.mxu1 %vm11726_vm3, %v15006_v58  ;;  %v15011_v27 = vld [vmem:[#allocation7_spill] sm:$0xff] }
 0x4b3   : > { %10601 = vmatprep.subr.bf16.mxu1 %v15006_v58 }
 0x4b4   : > { %4362 = vrot.lane.b32.xlu1 %v12125_v41, %s11728_s15 }
 0x4b5   : > { %3535 = vrot.lane.b32.xlu0 %v12269_v13, %s11727_s18 }
 0x4b8   : > { %4454 = vrot.lane.b32.xlu1 %v12142_v0, %s11728_s15 }
 0x4b9   : > { %3533 = vrot.lane.b32.xlu0 %v12396_v8, %s11727_s18  ;;  %10592 = vmatmul.mubr.msk.bf16.vlgmr.msra.gmra.mrb[64].mxu1 %vm2163_vm4, %v2348_v30 }
 0x4ba   : > { %10603 = vmatprep.mubr.msk.bf16.mxu1 %vm11726_vm3, %v15006_v58 }
 0x4bc   : > { %4546 = vrot.lane.b32.xlu1 %v12263_v57, %s11728_s15 }
 0x4bd   : > { %3637 = vrot.lane.b32.xlu0 %v12304_v21, %s11727_s18 }
 0x4c0   : > { %4592 = vrot.lane.b32.xlu1 %v12304_v21, %s11728_s15 }
 0x4c1   : > { %3635 = vrot.lane.b32.xlu0 %v12414_v48, %s11727_s18 }
 0x4c4   : > { %4638 = vrot.lane.b32.xlu1 %v12300_v23, %s11728_s15 }
 0x4c5   : > { %3739 = vrot.lane.b32.xlu0 %v15007_v63, %s11727_s18 }
 0x4c9   : > { %3737 = vrot.lane.b32.xlu0 %v15008_v43, %s11727_s18 }
 0x4cc   : > { %v2277_v6 = vpop.xlane.xlu1 %2276 }
 0x4cd   : > { %11393 = vrcp.f32 %v2277_v6  ;;  %3841 = vrot.lane.b32.xlu0 %v12354_v32, %s11727_s18 }
 0x4ce   : > { %11395 = vrcp.f32 %v12752_v22  ;;  %v2289_v15 = vpop.xlane.xlu0 %2288 }
 0x4d0   : > { %v2304_v26 = vpop.xlane.xlu1 %2303 }
 0x4d1   : > { %3839 = vrot.lane.b32.xlu0 %v15009_v25, %s11727_s18 }
 0x4d2   : > { %v2295_v49 = vpop.xlane.xlu0 %2294 }
 0x4d4   : > { %v2283_v60 = vpop.xlane.xlu1 %2282 }
 0x4d5   : > { %11397 = vrcp.f32 %v2283_v60  ;;  %4132 = vrot.lane.b32.xlu0 %v12447_v20, %s11728_s15 }
 0x4d6   : > { %11399 = vrcp.f32 %v12756_v9  ;;  %v2301_v61 = vpop.xlane.xlu0 %2300 }
 0x4d7   : > { %v11394_v46 = vpop.eup %11393  ;;  %11401 = vrcp.f32 %v2289_v15 }
 0x4d8   : > { %v11396_v47 = vpop.eup %11395  ;;  %v2781_v12 = vpop.permute.xlu1 %2780  ;;  %v2329_v36 = vmul.f32 %v11394_v46, %v12724_v29  ;;  %11403 = vrcp.f32 %v2304_v26 }
 0x4d9   : > { %4224 = vrot.lane.b32.xlu0 %v12109_v24, %s11728_s15  ;;  %v2334_v16 = vmul.f32 %v11396_v47, %v15010_v35  ;;  %11405 = vrcp.f32 %v2295_v49 }
 0x4da   : > { %v2345_v22 = vpack.c.bf16 %v2329_v36, %v2329_v36  ;;  %11407 = vrcp.f32 %v2301_v61  ;;  %v3016_v6 = vpop.permute.xlu0 %3015 }
 0x4db   : > { %v2350_v9 = vpack.c.bf16 %v2334_v16, %v2334_v16 }
 0x4dc   : > { %10574 = vmatmul.mubr.msk.bf16.vlgmr.msra.gmra.mrb[72].mxu0 %vm2163_vm4, %v2345_v22  ;;  %v2828_v62 = vpop.permute.xlu1 %2827 }
 0x4dd   : > { %10584 = vmatpush3.bf16.msra.mxu0 %v2687_v31  ;;  %4316 = vrot.lane.b32.xlu0 %v12129_v42, %s11728_s15 }
 0x4de   : > { %10602 = vmatpush3.bf16.msra.mxu1 %v2828_v62  ;;  %10585 = vmatprep.mubr.msk.bf16.mxu0 %vm11726_vm3, %v15006_v58 }
 0x4df   : > { %v11398_v29 = vpop.eup %11397  ;;  %10613 = vmatprep.subr.bf16.mxu1 %v15006_v58  ;;  %10595 = vmatprep.subr.bf16.mxu0 %v15006_v58 }
 0x4e0   : > { %v11400_v44 = vpop.eup %11399  ;;  %v2331_v34 = vmul.f32 %v11398_v29, %v12738_v7  ;;  %v2875_v26 = vpop.permute.xlu1 %2874 }
 0x4e1   : > { %4408 = vrot.lane.b32.xlu0 %v12148_v28, %s11728_s15  ;;  %10604 = vmatmul.mubr.msk.bf16.vlgmr.msra.gmra.mrb[68].mxu1 %vm2163_vm4, %v2350_v9  ;;  %v11402_v39 = vpop.eup %11401  ;;  %v2336_v37 = vmul.f32 %v11400_v44, %v15011_v27 }
 0x4e2   : > { %10614 = vmatpush3.bf16.msra.mxu1 %v2922_v18  ;;  %v2347_v56 = vpack.c.bf16 %v2331_v34, %v2331_v34  ;;  %10615 = vmatprep.mubr.msk.bf16.mxu1 %vm11726_vm3, %v15006_v58  ;;  %v2333_v7 = vmul.f32 %v11402_v39, %v12726_v53  ;;  %v11404_v31 = vpop.eup %11403 }
 0x4e3   : > { %10625 = vmatprep.subr.bf16.mxu1 %v15006_v58  ;;  %v2352_v30 = vpack.c.bf16 %v2336_v37, %v2336_v37  ;;  %v11406_v60 = vpop.eup %11405  ;;  %v2338_v15 = vmul.f32 %v11404_v31, %v12730_v3 }
 0x4e4   : > { %10586 = vmatmul.mubr.msk.bf16.vlgmr.msra.gmra.mrb[76].mxu0 %vm2163_vm4, %v2347_v56  ;;  %v2349_v18 = vpack.c.bf16 %v2333_v7, %v2333_v7  ;;  %v2335_v53 = vmul.f32 %v11406_v60, %v12734_v2  ;;  %v2969_v46 = vpop.permute.xlu1 %2968  ;;  %v11408_v3 = vpop.eup %11407 }
 0x4e5   : > { %10596 = vmatpush3.bf16.msra.mxu0 %v2781_v12  ;;  %4500 = vrot.lane.b32.xlu0 %v12269_v13, %s11728_s15  ;;  %v2354_v47 = vpack.c.bf16 %v2338_v15, %v2338_v15  ;;  %v2337_v2 = vmul.f32 %v11408_v3, %v12742_v33 }
 0x4e6   : > { %10597 = vmatprep.mubr.msk.bf16.mxu0 %vm11726_vm3, %v15006_v58  ;;  %10607 = vmatprep.subr.bf16.mxu0 %v15006_v58  ;;  %v2351_v12 = vpack.c.bf16 %v2335_v53, %v2335_v53 }
 0x4e7   : > { %v2353_v22 = vpack.c.bf16 %v2337_v2, %v2337_v2 }
 0x4e8   : > { %v3063_v36 = vpop.permute.xlu1 %3062 }
 0x4e9   : > { %10616 = vmatmul.mubr.msk.bf16.vlgmr.msra.gmra.mrb[72].mxu1 %vm2163_vm4, %v2352_v30 }
 0x4ea   : > { %10626 = vmatpush3.bf16.msra.mxu1 %v3016_v6  ;;  %10627 = vmatprep.mubr.msk.bf16.mxu1 %vm11726_vm3, %v15006_v58 }
 0x4eb   : > { %10637 = vmatprep.subr.bf16.mxu1 %v15006_v58 }
 0x4ec   : > { %10598 = vmatmul.mubr.msk.bf16.vlgmr.msra.gmra.mrb[80].mxu0 %vm2163_vm4, %v2349_v18  ;;  %v3179_v35 = vpop.permute.xlu1 %3178 }
 0x4ed   : > { %10608 = vmatpush3.bf16.msra.mxu0 %v2875_v26  ;;  %10609 = vmatprep.mubr.msk.bf16.mxu0 %vm11726_vm3, %v15006_v58  ;;  %v3184_v30 = vsel %vm1426_vm2, %v3179_v35, 0 }
 0x4ee   : > { %10619 = vmatprep.subr.bf16.mxu0 %v15006_v58 }
 0x4f0   : > { %v3177_v16 = vpop.permute.xlu1 %3176 }
 0x4f1   : > { %10628 = vmatmul.mubr.msk.bf16.vlgmr.msra.gmra.mrb[76].mxu1 %vm2163_vm4, %v2354_v47 }
 0x4f2   : > { %10639 = vmatprep.mubr.msk.bf16.mxu1 %vm11726_vm3, %v15006_v58 }
 0x4f4   : > { %10610 = vmatmul.mubr.msk.bf16.vlgmr.msra.gmra.mrb[84].mxu0 %vm2163_vm4, %v2351_v12  ;;  %v3281_v62 = vpop.permute.xlu1 %3280 }
 0x4f5   : > { %10620 = vmatpush3.bf16.msra.mxu0 %v2969_v46  ;;  %10621 = vmatprep.mubr.msk.bf16.mxu0 %vm11726_vm3, %v15006_v58  ;;  %v3286_v18 = vsel %vm1426_vm2, %v3281_v62, 0 }
 0x4f6   : > { %10631 = vmatprep.subr.bf16.mxu0 %v15006_v58 }
 0x4f8   : > { %v3279_v29 = vpop.permute.xlu1 %3278 }
 0x4fc   : > { %10622 = vmatmul.mubr.msk.bf16.vlgmr.msra.gmra.mrb[88].mxu0 %vm2163_vm4, %v2353_v22  ;;  %v3383_v33 = vpop.permute.xlu1 %3382 }
 0x4fd   : > { %10632 = vmatpush3.bf16.msra.mxu0 %v3063_v36  ;;  %10633 = vmatprep.mubr.msk.bf16.mxu0 %vm11726_vm3, %v15006_v58  ;;  %v3388_v47 = vsel %vm1426_vm2, %v3383_v33, 0 }
 0x4fe   : > { %10643 = vmatprep.subr.bf16.mxu0 %v15006_v58 }
 0x500   : > { %v3381_v37 = vpop.permute.xlu1 %3380 }
 0x50b   : > { %v2307_v49 = vpop.xlane.xlu0 %2306 }
 0x50c   : > { %11409 = vrcp.f32 %v2307_v49 }
 0x50f   : > { %v3128_v9 = vpop.permute.xlu0 %3127 }
 0x510   : > { %v3133_v44 = vsel %vm1426_vm2, %v3128_v9, 0 }
 0x511   : > { %10638 = vmatpush3.bf16.xpose.msra.mxu1 %v3133_v44 }
 0x512   : > { %10649 = vmatprep.subr.bf16.mxu1 %v15006_v58 }
 0x513   : > { %v3126_v34 = vpop.permute.xlu0 %3125 }
 0x516   : > { %v11410_v56 = vpop.eup %11409 }
 0x517   : > { %v3230_v39 = vpop.permute.xlu0 %3229  ;;  %v2339_v61 = vmul.f32 %v11410_v56, %v12787_v50  ;;  %v3485_v50 = vpop.permute.xlu1 %3484 }
 0x518   : > { %v3235_v27 = vsel %vm1426_vm2, %v3230_v39, 0  ;;  %10640 = vmatmul.mubr.msk.bf16.vlgmr.msra.gmra.mrb[80].mxu1 %vm1426_vm2, %v3126_v34  ;;  %v3490_v35 = vsel %vm1426_vm2, %v3485_v50, 0 }
 0x519   : > { %10650 = vmatpush3.bf16.xpose.msra.mxu1 %v3235_v27  ;;  %v2355_v7 = vpack.c.bf16 %v2339_v61, %v2339_v61  ;;  %10651 = vmatprep.mubr.msk.bf16.mxu1 %vm11726_vm3, %v15006_v58 }
 0x51a   : > { %10661 = vmatprep.subr.bf16.mxu1 %v15006_v58 }
 0x51b   : > { %10634 = vmatmul.mubr.msk.bf16.vlgmr.msra.gmra.mrb[92].mxu0 %vm2163_vm4, %v2355_v7  ;;  %v3228_v31 = vpop.permute.xlu0 %3227  ;;  %v3483_v15 = vpop.permute.xlu1 %3482 }
 0x51c   : > { %10644 = vmatpush3.bf16.xpose.msra.mxu0 %v3184_v30  ;;  %10645 = vmatprep.mubr.msk.bf16.mxu0 %vm11726_vm3, %v15006_v58 }
 0x51d   : > { %10655 = vmatprep.subr.bf16.mxu0 %v15006_v58 }
 0x51f   : > { %v3332_v6 = vpop.permute.xlu0 %3331  ;;  %v3587_v12 = vpop.permute.xlu1 %3586 }
 0x520   : > { %v3337_v26 = vsel %vm1426_vm2, %v3332_v6, 0  ;;  %10652 = vmatmul.mubr.msk.bf16.vlgmr.msra.gmra.mrb[84].mxu1 %vm1426_vm2, %v3228_v31  ;;  %v3592_v9 = vsel %vm1426_vm2, %v3587_v12, 0 }
 0x521   : > { %10662 = vmatpush3.bf16.xpose.msra.mxu1 %v3337_v26  ;;  %10663 = vmatprep.mubr.msk.bf16.mxu1 %vm11726_vm3, %v15006_v58 }
 0x522   : > { %10673 = vmatprep.subr.bf16.mxu1 %v15006_v58 }
 0x523   : > { %10646 = vmatmul.mubr.msk.bf16.vlgmr.msra.gmra.mrb[96].mxu0 %vm1426_vm2, %v3177_v16  ;;  %v3330_v60 = vpop.permute.xlu0 %3329  ;;  %v3585_v22 = vpop.permute.xlu1 %3584 }
 0x524   : > { %10656 = vmatpush3.bf16.xpose.msra.mxu0 %v3286_v18  ;;  %10657 = vmatprep.mubr.msk.bf16.mxu0 %vm11726_vm3, %v15006_v58 }
 0x525   : > { %10667 = vmatprep.subr.bf16.mxu0 %v15006_v58 }
 0x527   : > { %v3434_v53 = vpop.permute.xlu0 %3433  ;;  %v3689_v62 = vpop.permute.xlu1 %3688 }
 0x528   : > { %v3439_v46 = vsel %vm1426_vm2, %v3434_v53, 0  ;;  %10664 = vmatmul.mubr.msk.bf16.vlgmr.msra.gmra.mrb[88].mxu1 %vm1426_vm2, %v3330_v60  ;;  %v3694_v7 = vsel %vm1426_vm2, %v3689_v62, 0 }
 0x529   : > { %10674 = vmatpush3.bf16.xpose.msra.mxu1 %v3439_v46  ;;  %10675 = vmatprep.mubr.msk.bf16.mxu1 %vm11726_vm3, %v15006_v58 }
 0x52a   : > { %10685 = vmatprep.subr.bf16.mxu1 %v15006_v58 }
 0x52b   : > { %10658 = vmatmul.mubr.msk.bf16.vlgmr.msra.gmra.mrb[100].mxu0 %vm1426_vm2, %v3279_v29  ;;  %v3432_v3 = vpop.permute.xlu0 %3431  ;;  %v3687_v33 = vpop.permute.xlu1 %3686 }
 0x52c   : > { %10668 = vmatpush3.bf16.xpose.msra.mxu0 %v3388_v47  ;;  %10669 = vmatprep.mubr.msk.bf16.mxu0 %vm11726_vm3, %v15006_v58 }
 0x52d   : > { %10679 = vmatprep.subr.bf16.mxu0 %v15006_v58 }
 0x52f   : > { %v3536_v36 = vpop.permute.xlu0 %3535  ;;  %v3791_v30 = vpop.permute.xlu1 %3790 }
 0x530   : > { %v3541_v2 = vsel %vm1426_vm2, %v3536_v36, 0  ;;  %10676 = vmatmul.mubr.msk.bf16.vlgmr.msra.gmra.mrb[92].mxu1 %vm1426_vm2, %v3432_v3  ;;  %v3796_v46 = vsel %vm1426_vm2, %v3791_v30, 0 }
 0x531   : > { %10686 = vmatpush3.bf16.xpose.msra.mxu1 %v3541_v2  ;;  %10687 = vmatprep.mubr.msk.bf16.mxu1 %vm11726_vm3, %v15006_v58 }
 0x532   : > { %10697 = vmatprep.subr.bf16.mxu1 %v15006_v58 }
 0x533   : > { %10670 = vmatmul.mubr.msk.bf16.vlgmr.msra.gmra.mrb[104].mxu0 %vm1426_vm2, %v3381_v37  ;;  %v3534_v16 = vpop.permute.xlu0 %3533  ;;  %v3789_v53 = vpop.permute.xlu1 %3788 }
 0x534   : > { %10680 = vmatpush3.bf16.xpose.msra.mxu0 %v3490_v35  ;;  %10681 = vmatprep.mubr.msk.bf16.mxu0 %vm11726_vm3, %v15006_v58 }
 0x535   : > { %10691 = vmatprep.subr.bf16.mxu0 %v15006_v58 }
 0x537   : > { %v3638_v49 = vpop.permute.xlu0 %3637  ;;  %v3893_v12 = vpop.permute.xlu1 %3892 }
 0x538   : > { %v3643_v29 = vsel %vm1426_vm2, %v3638_v49, 0  ;;  %10688 = vmatmul.mubr.msk.bf16.vlgmr.msra.gmra.mrb[96].mxu1 %vm1426_vm2, %v3534_v16  ;;  %v3898_v36 = vsel %vm1426_vm2, %v3893_v12, 0 }
 0x539   : > { %10698 = vmatpush3.bf16.xpose.msra.mxu1 %v3643_v29  ;;  %10699 = vmatprep.mubr.msk.bf16.mxu1 %vm11726_vm3, %v15006_v58 }
 0x53a   : > { %10709 = vmatprep.subr.bf16.mxu1 %v15006_v58 }
 0x53b   : > { %10682 = vmatmul.mubr.msk.bf16.vlgmr.msra.gmra.mrb[108].mxu0 %vm1426_vm2, %v3483_v15  ;;  %v3636_v44 = vpop.permute.xlu0 %3635  ;;  %v3891_v2 = vpop.permute.xlu1 %3890 }
 0x53c   : > { %10692 = vmatpush3.bf16.xpose.msra.mxu0 %v3592_v9  ;;  %10693 = vmatprep.mubr.msk.bf16.mxu0 %vm11726_vm3, %v15006_v58 }
 0x53d   : > { %10703 = vmatprep.subr.bf16.mxu0 %v15006_v58 }
 0x53f   : > { %v2397_v34 = vpop.f32.mrb[48].mxu1  ;;  %v3740_v56 = vpop.permute.xlu0 %3739 }
 0x540   : > { %3108 = vst.msk [vmem:[#allocation2] sm:$0xff] %vm1426_vm2, %v2397_v34  ;;  %v3745_v39 = vsel %vm1426_vm2, %v3740_v56, 0  ;;  %v10545_v61 = vpop.f32.mrb[49].mxu1  ;;  %10700 = vmatmul.mubr.msk.bf16.vlgmr.msra.gmra.mrb[100].mxu1 %vm1426_vm2, %v3636_v44 }
 0x541   : > { %v2400_v27 = vpop.f32.mrb[50].mxu1  ;;  %10710 = vmatpush3.bf16.xpose.msra.mxu1 %v3745_v39  ;;  %10711 = vmatprep.mubr.msk.bf16.mxu1 %vm11726_vm3, %v15006_v58 }
 0x542   : > { %v10546_v37 = vpop.f32.mrb[51].mxu1  ;;  %10721 = vmatprep.subr.bf16.mxu1 %v15006_v58 }
 0x543   : > { %10694 = vmatmul.mubr.msk.bf16.vlgmr.msra.gmra.mrb[112].mxu0 %vm1426_vm2, %v3585_v22  ;;  %v3738_v31 = vpop.permute.xlu0 %3737  ;;  %v4179_v22 = vpop.permute.xlu1 %4178 }
 0x544   : > { %10704 = vmatpush3.bf16.xpose.msra.mxu0 %v3694_v7  ;;  %10705 = vmatprep.mubr.msk.bf16.mxu0 %vm11726_vm3, %v15006_v58 }
 0x545   : > { %v2444_v50 = vpop.f32.mrb[64].mxu0  ;;  %10715 = vmatprep.subr.bf16.mxu0 %v15006_v58 }
 0x546   : > { %3109 = vst.msk [vmem:[#allocation2 + $0x8] sm:$0xff] %vm1426_vm2, %v2444_v50  ;;  %v10551_v6 = vpop.f32.mrb[65].mxu0 }
 0x547   : > { %v2447_v26 = vpop.f32.mrb[66].mxu0  ;;  %v3842_v18 = vpop.permute.xlu0 %3841 }
 0x548   : > { %v3847_v60 = vsel %vm1426_vm2, %v3842_v18, 0  ;;  %v10552_v15 = vpop.f32.mrb[67].mxu0  ;;  %10712 = vmatmul.mubr.msk.bf16.vlgmr.msra.gmra.mrb[104].mxu1 %vm1426_vm2, %v3738_v31 }
 0x549   : > { %10722 = vmatpush3.bf16.xpose.msra.mxu1 %v3847_v60  ;;  %10723 = vmatprep.mubr.msk.bf16.mxu1 %vm11726_vm3, %v15006_v58 }
 0x54a   : > { %10733 = vmatprep.subr.bf16.mxu1 %v15006_v58 }
 0x54b   : > { %10706 = vmatmul.mubr.msk.bf16.vlgmr.msra.gmra.mrb[116].mxu0 %vm1426_vm2, %v3687_v33  ;;  %v3840_v47 = vpop.permute.xlu0 %3839 }
 0x54c   : > { %10716 = vmatpush3.bf16.xpose.msra.mxu0 %v3796_v46  ;;  %10717 = vmatprep.mubr.msk.bf16.mxu0 %vm11726_vm3, %v15006_v58 }
 0x54d   : > { %10727 = vmatprep.subr.bf16.mxu0 %v15006_v58 }
 0x54f   : > { %v4133_v3 = vpop.permute.xlu0 %4132 }
 0x550   : > { %10724 = vmatmul.mubr.msk.bf16.vlgmr.msra.gmra.mrb[108].mxu1 %vm1426_vm2, %v3840_v47 }
 0x551   : > { %10734 = vmatpush3.bf16.msra.mxu1 %v4133_v3  ;;  %10735 = vmatprep.mubr.msk.bf16.mxu1 %vm11726_vm3, %v15006_v58 }
 0x552   : > { %10745 = vmatprep.subr.bf16.mxu1 %v15006_v58 }
 0x553   : > { %10718 = vmatmul.mubr.msk.bf16.vlgmr.msra.gmra.mrb[120].mxu0 %vm1426_vm2, %v3789_v53 }
 0x554   : > { %10728 = vmatpush3.bf16.xpose.msra.mxu0 %v3898_v36  ;;  %10729 = vmatprep.mubr.msk.bf16.mxu0 %vm11726_vm3, %v15006_v58 }
 0x555   : > { %10739 = vmatprep.subr.bf16.mxu0 %v15006_v58 }
 0x55b   : > { %10730 = vmatmul.mubr.msk.bf16.vlgmr.msra.gmra.mrb[124].mxu0 %vm1426_vm2, %v3891_v2 }
 0x55c   : > { %10740 = vmatpush3.bf16.msra.mxu0 %v4179_v22  ;;  %10741 = vmatprep.mubr.msk.bf16.mxu0 %vm11726_vm3, %v15006_v58 }
 0x55d   : > { %10751 = vmatprep.subr.bf16.mxu0 %v15006_v58 }
 0x574   : > { %v2491_v35 = vpop.f32.mrb[52].mxu1 }
 0x575   : > { %3110 = vst.msk [vmem:[#allocation2 + $0x10] sm:$0xff] %vm1426_vm2, %v2491_v35  ;;  %v10557_v16 = vpop.f32.mrb[53].mxu1 }
 0x576   : > { %v2494_v62 = vpop.f32.mrb[54].mxu1 }
 0x577   : > { %v10558_v49 = vpop.f32.mrb[55].mxu1 }
 0x57a   : > { %v2538_v29 = vpop.f32.mrb[68].mxu0 }
 0x57b   : > { %3111 = vst.msk [vmem:[#allocation2 + $0x18] sm:$0xff] %vm1426_vm2, %v2538_v29  ;;  %v10563_v9 = vpop.f32.mrb[69].mxu0 }
 0x57c   : > { %v2541_v44 = vpop.f32.mrb[70].mxu0  ;;  %v2585_v33 = vpop.f32.mrb[56].mxu1 }
 0x57d   : > { %3112 = vst.msk [vmem:[#allocation2 + $0x20] sm:$0xff] %vm1426_vm2, %v2585_v33  ;;  %v10564_v34 = vpop.f32.mrb[71].mxu0  ;;  %v10569_v56 = vpop.f32.mrb[57].mxu1 }
 0x57e   : > { %v2588_v39 = vpop.f32.mrb[58].mxu1 }
 0x57f   : > { %v10570_v61 = vpop.f32.mrb[59].mxu1 }
 0x584   : > { %v2679_v27 = vpop.f32.mrb[60].mxu1 }
 0x585   : > { %3114 = vst.msk [vmem:[#allocation2 + $0x30] sm:$0xff] %vm1426_vm2, %v2679_v27  ;;  %v10581_v37 = vpop.f32.mrb[61].mxu1 }
 0x586   : > { %v2682_v7 = vpop.f32.mrb[62].mxu1 }
 0x587   : > { %v10582_v30 = vpop.f32.mrb[63].mxu1 }
 0x58c   : > { %v2773_v31 = vpop.f32.mrb[64].mxu1 }
 0x58d   : > { %3116 = vst.msk [vmem:[#allocation2 + $0x40] sm:$0xff] %vm1426_vm2, %v2773_v31  ;;  %v10593_v50 = vpop.f32.mrb[65].mxu1 }
 0x58e   : > { %v2776_v6 = vpop.f32.mrb[66].mxu1 }
 0x58f   : > { %v10594_v26 = vpop.f32.mrb[67].mxu1 }
 0x5af   : > { %v2632_v18 = vpop.f32.mrb[72].mxu0 }
 0x5b0   : > { %3113 = vst.msk [vmem:[#allocation2 + $0x28] sm:$0xff] %vm1426_vm2, %v2632_v18  ;;  %v10575_v60 = vpop.f32.mrb[73].mxu0 }
 0x5b1   : > { %v2635_v15 = vpop.f32.mrb[74].mxu0 }
 0x5b2   : > { %v10576_v53 = vpop.f32.mrb[75].mxu0 }
 0x5b4   : > { %v2867_v46 = vpop.f32.mrb[68].mxu1 }
 0x5b5   : > { %3118 = vst.msk [vmem:[#allocation2 + $0x50] sm:$0xff] %vm1426_vm2, %v2867_v46  ;;  %v10605_v47 = vpop.f32.mrb[69].mxu1 }
 0x5b6   : > { %v2870_v12 = vpop.f32.mrb[70].mxu1 }
 0x5b7   : > { %v10606_v3 = vpop.f32.mrb[71].mxu1  ;;  %v2726_v36 = vpop.f32.mrb[76].mxu0 }
 0x5b8   : > { %3115 = vst.msk [vmem:[#allocation2 + $0x38] sm:$0xff] %vm1426_vm2, %v2726_v36  ;;  %v10587_v2 = vpop.f32.mrb[77].mxu0 }
 0x5b9   : > { %v2729_v22 = vpop.f32.mrb[78].mxu0 }
 0x5ba   : > { %v10588_v35 = vpop.f32.mrb[79].mxu0 }
 0x5bc   : > { %v2961_v16 = vpop.f32.mrb[72].mxu1 }
 0x5bd   : > { %3120 = vst.msk [vmem:[#allocation2 + $0x60] sm:$0xff] %vm1426_vm2, %v2961_v16  ;;  %v10617_v62 = vpop.f32.mrb[73].mxu1 }
 0x5be   : > { %v2964_v49 = vpop.f32.mrb[74].mxu1 }
 0x5bf   : > { %v10618_v29 = vpop.f32.mrb[75].mxu1  ;;  %v2820_v9 = vpop.f32.mrb[80].mxu0 }
 0x5c0   : > { %3117 = vst.msk [vmem:[#allocation2 + $0x48] sm:$0xff] %vm1426_vm2, %v2820_v9  ;;  %v10599_v44 = vpop.f32.mrb[81].mxu0 }
 0x5c1   : > { %v2823_v33 = vpop.f32.mrb[82].mxu0 }
 0x5c2   : > { %v10600_v34 = vpop.f32.mrb[83].mxu0 }
 0x5c4   : > { %v3055_v56 = vpop.f32.mrb[76].mxu1 }
 0x5c5   : > { %3122 = vst.msk [vmem:[#allocation2 + $0x70] sm:$0xff] %vm1426_vm2, %v3055_v56  ;;  %v10629_v39 = vpop.f32.mrb[77].mxu1 }
 0x5c6   : > { %v3058_v61 = vpop.f32.mrb[78].mxu1 }
 0x5c7   : > { %v10630_v27 = vpop.f32.mrb[79].mxu1  ;;  %v2914_v37 = vpop.f32.mrb[84].mxu0 }
 0x5c8   : > { %3119 = vst.msk [vmem:[#allocation2 + $0x58] sm:$0xff] %vm1426_vm2, %v2914_v37  ;;  %v10611_v7 = vpop.f32.mrb[85].mxu0 }
 0x5c9   : > { %v2917_v30 = vpop.f32.mrb[86].mxu0 }
 0x5ca   : > { %v10612_v31 = vpop.f32.mrb[87].mxu0 }
 0x5cf   : > { %v3008_v50 = vpop.f32.mrb[88].mxu0 }
 0x5d0   : > { %3121 = vst.msk [vmem:[#allocation2 + $0x68] sm:$0xff] %vm1426_vm2, %v3008_v50  ;;  %v10623_v6 = vpop.f32.mrb[89].mxu0 }
 0x5d1   : > { %v3011_v26 = vpop.f32.mrb[90].mxu0 }
 0x5d2   : > { %v10624_v18 = vpop.f32.mrb[91].mxu0 }
 0x5eb   : > { %v13042_v60 = vpop.f32.mrb[80].mxu1 }
 0x5ec   : > { %v10641_v15 = vpop.f32.mrb[81].mxu1  ;;  %v3940_v53 = vsel %vm2163_vm4, %v13042_v60, -inf }
 0x5ed   : > { %3941 = vmax.xlane.f32.xlu0 %v3940_v53  ;;  %v3172_v46 = vpop.f32.mrb[82].mxu1 }
 0x5ee   : > { %v3102_v47 = vpop.f32.mrb[92].mxu0  ;;  %v10642_v12 = vpop.f32.mrb[83].mxu1 }
 0x5ef   : > { %3123 = vst.msk [vmem:[#allocation2 + $0x78] sm:$0xff] %vm1426_vm2, %v3102_v47  ;;  %v10635_v3 = vpop.f32.mrb[93].mxu0 }
 0x5f0   : > { %v3105_v36 = vpop.f32.mrb[94].mxu0 }
 0x5f1   : > { %v10636_v2 = vpop.f32.mrb[95].mxu0 }
 0x5f3   : > { %v13047_v22 = vpop.f32.mrb[84].mxu1 }
 0x5f4   : > { %v10653_v35 = vpop.f32.mrb[85].mxu1  ;;  %v3946_v16 = vsel %vm2163_vm4, %v13047_v22, -inf }
 0x5f5   : > { %3947 = vmax.xlane.f32.xlu0 %v3946_v16  ;;  %v3274_v62 = vpop.f32.mrb[86].mxu1 }
 0x5f6   : > { %v13051_v49 = vpop.f32.mrb[96].mxu0  ;;  %v10654_v29 = vpop.f32.mrb[87].mxu1 }
 0x5f7   : > { %v10647_v9 = vpop.f32.mrb[97].mxu0  ;;  %v3943_v44 = vsel %vm2163_vm4, %v13051_v49, -inf }
 0x5f8   : > { %3944 = vmax.xlane.f32.xlu1 %v3943_v44  ;;  %v3223_v33 = vpop.f32.mrb[98].mxu0 }
 0x5f9   : > { %v10648_v34 = vpop.f32.mrb[99].mxu0 }
 0x5fb   : > { %v13055_v56 = vpop.f32.mrb[88].mxu1 }
 0x5fc   : > { %v10665_v39 = vpop.f32.mrb[89].mxu1  ;;  %v3952_v26 = vsel %vm2163_vm4, %v13055_v56, -inf }
 0x5fd   : > { %v3376_v61 = vpop.f32.mrb[90].mxu1 }
 0x5fe   : > { %v13057_v27 = vpop.f32.mrb[100].mxu0  ;;  %v10666_v37 = vpop.f32.mrb[91].mxu1 }
 0x5ff   : > { %v10659_v7 = vpop.f32.mrb[101].mxu0  ;;  %v3949_v30 = vsel %vm2163_vm4, %v13057_v27, -inf }
 0x600   : > { %v3325_v31 = vpop.f32.mrb[102].mxu0  ;;  %3950 = vmax.xlane.f32.xlu0 %v3949_v30 }
 0x601   : > { %v10660_v50 = vpop.f32.mrb[103].mxu0 }
 0x603   : > { %v13061_v6 = vpop.f32.mrb[92].mxu1 }
 0x604   : > { %3953 = vmax.xlane.f32.xlu0 %v3952_v26  ;;  %v10677_v18 = vpop.f32.mrb[93].mxu1  ;;  %v3958_v3 = vsel %vm2163_vm4, %v13061_v6, -inf }
 0x605   : > { %v3478_v15 = vpop.f32.mrb[94].mxu1 }
 0x606   : > { %v13065_v53 = vpop.f32.mrb[104].mxu0  ;;  %v10678_v46 = vpop.f32.mrb[95].mxu1 }
 0x607   : > { %v10671_v47 = vpop.f32.mrb[105].mxu0  ;;  %v3955_v12 = vsel %vm2163_vm4, %v13065_v53, -inf }
 0x608   : > { %3956 = vmax.xlane.f32.xlu1 %v3955_v12  ;;  %v3427_v36 = vpop.f32.mrb[106].mxu0  ;;  %3959 = vmax.xlane.f32.xlu0 %v3958_v3 }
 0x609   : > { %v10672_v2 = vpop.f32.mrb[107].mxu0 }
 0x60b   : > { %v13071_v35 = vpop.f32.mrb[96].mxu1 }
 0x60c   : > { %v10689_v16 = vpop.f32.mrb[97].mxu1  ;;  %v3964_v62 = vsel %vm2163_vm4, %v13071_v35, -inf }
 0x60d   : > { %3965 = vmax.xlane.f32.xlu0 %v3964_v62  ;;  %v3580_v29 = vpop.f32.mrb[98].mxu1 }
 0x60e   : > { %v13075_v9 = vpop.f32.mrb[108].mxu0  ;;  %v10690_v44 = vpop.f32.mrb[99].mxu1 }
 0x60f   : > { %v10683_v33 = vpop.f32.mrb[109].mxu0  ;;  %v3961_v34 = vsel %vm2163_vm4, %v13075_v9, -inf }
 0x610   : > { %3962 = vmax.xlane.f32.xlu1 %v3961_v34  ;;  %v3529_v39 = vpop.f32.mrb[110].mxu0 }
 0x611   : > { %v10684_v61 = vpop.f32.mrb[111].mxu0 }
 0x613   : > { %v13079_v37 = vpop.f32.mrb[100].mxu1 }
 0x614   : > { %v10701_v7 = vpop.f32.mrb[101].mxu1  ;;  %v3970_v30 = vsel %vm2163_vm4, %v13079_v37, -inf }
 0x615   : > { %3971 = vmax.xlane.f32.xlu0 %v3970_v30  ;;  %v3682_v31 = vpop.f32.mrb[102].mxu1 }
 0x616   : > { %v13083_v50 = vpop.f32.mrb[112].mxu0  ;;  %v10702_v26 = vpop.f32.mrb[103].mxu1 }
 0x617   : > { %v10695_v18 = vpop.f32.mrb[113].mxu0  ;;  %v3967_v15 = vsel %vm2163_vm4, %v13083_v50, -inf }
 0x618   : > { %3968 = vmax.xlane.f32.xlu1 %v3967_v15  ;;  %v3631_v46 = vpop.f32.mrb[114].mxu0 }
 0x619   : > { %v10696_v47 = vpop.f32.mrb[115].mxu0 }
 0x61b   : > { %v13087_v12 = vpop.f32.mrb[104].mxu1 }
 0x61c   : > { %v10713_v3 = vpop.f32.mrb[105].mxu1  ;;  %v3976_v36 = vsel %vm2163_vm4, %v13087_v12, -inf }
 0x61d   : > { %3977 = vmax.xlane.f32.xlu0 %v3976_v36  ;;  %v3784_v2 = vpop.f32.mrb[106].mxu1 }
 0x61e   : > { %v13091_v16 = vpop.f32.mrb[116].mxu0  ;;  %v10714_v62 = vpop.f32.mrb[107].mxu1 }
 0x61f   : > { %v10707_v29 = vpop.f32.mrb[117].mxu0  ;;  %v3973_v44 = vsel %vm2163_vm4, %v13091_v16, -inf }
 0x620   : > { %3974 = vmax.xlane.f32.xlu1 %v3973_v44  ;;  %v3733_v33 = vpop.f32.mrb[118].mxu0  ;;  %v13111_v44 = vpop.permute.xlu1 %4270 }
 0x621   : > { %v10708_v34 = vpop.f32.mrb[119].mxu0  ;;  %v13113_v33 = vpop.permute.xlu0 %4224 }
 0x623   : > { %v13095_v39 = vpop.f32.mrb[108].mxu1 }
 0x624   : > { %v10725_v61 = vpop.f32.mrb[109].mxu1  ;;  %v3982_v7 = vsel %vm2163_vm4, %v13095_v39, -inf  ;;  %v13115_v34 = vpop.permute.xlu1 %4362 }
 0x625   : > { %3983 = vmax.xlane.f32.xlu0 %v3982_v7  ;;  %v3886_v30 = vpop.f32.mrb[110].mxu1  ;;  %v13117_v61 = vpop.permute.xlu0 %4316 }
 0x626   : > { %v13099_v31 = vpop.f32.mrb[120].mxu0  ;;  %v10726_v26 = vpop.f32.mrb[111].mxu1 }
 0x627   : > { %v10719_v18 = vpop.f32.mrb[121].mxu0  ;;  %v3979_v15 = vsel %vm2163_vm4, %v13099_v31, -inf }
 0x628   : > { %3980 = vmax.xlane.f32.xlu1 %v3979_v15  ;;  %v3835_v46 = vpop.f32.mrb[122].mxu0  ;;  %v13119_v7 = vpop.permute.xlu1 %4454 }
 0x629   : > { %v10720_v47 = vpop.f32.mrb[123].mxu0  ;;  %15012 = vst [vmem:[#allocation6_spill] sm:$0xff] %v13119_v7  ;;  %v13121_v30 = vpop.permute.xlu0 %4408 }
 0x62c   : > { %v13123_v26 = vpop.permute.xlu1 %4546 }
 0x62d   : > { %15013 = vst [vmem:[#allocation7_spill] sm:$0xff] %v13123_v26  ;;  %v13125_v18 = vpop.permute.xlu0 %4500 }
 0x62e   : > { %v13103_v3 = vpop.f32.mrb[124].mxu0 }
 0x62f   : > { %v10731_v36 = vpop.f32.mrb[125].mxu0  ;;  %v3985_v29 = vsel %vm2163_vm4, %v13103_v3, -inf }
 0x630   : > { %v3937_v2 = vpop.f32.mrb[126].mxu0  ;;  %v13127_v46 = vpop.permute.xlu1 %4592 }
 0x631   : > { %v10732_v62 = vpop.f32.mrb[127].mxu0  ;;  %15014 = vst [vmem:[#allocation8_spill] sm:$0xff] %v13127_v46 }
 0x634   : > { %v13130_v2 = vpop.permute.xlu1 %4638 }
 0x639   : > { %4730 = vrot.lane.b32.xlu1 %v12331_v40, %s11728_s15 }
 0x63b   : > { %4684 = vrot.lane.b32.xlu0 %v15007_v63, %s11728_s15 }
 0x65d   : > { %3986 = vmax.xlane.f32.xlu1 %v3985_v29 }
 0x67a   : > { %v3942_v15 = vpop.xlane.xlu0 %3941 }
 0x67b   : > { %v3988_v47 = vsub.f32 %v13042_v60, %v3942_v15 }
 0x67d   : > { %v4004_v36 = vmul.f32 1.442695, %v3988_v47 }
 0x67f   : > { %11411 = vpow2.f32 %v4004_v36 }
 0x682   : > { %v3948_v62 = vpop.xlane.xlu0 %3947 }
 0x683   : > { %v3990_v29 = vsub.f32 %v13047_v22, %v3948_v62 }
 0x685   : > { %v4008_v25 = vmul.f32 1.442695, %v3990_v29  ;;  %v3945_v43 = vpop.xlane.xlu1 %3944 }
 0x686   : > { %v3989_v7 = vsub.f32 %v13051_v49, %v3945_v43 }
 0x687   : > { %11413 = vpow2.f32 %v4008_v25 }
 0x688   : > { %v4006_v26 = vmul.f32 1.442695, %v3989_v7 }
 0x689   : > { %v13134_v63 = vpop.eup %11411 }
 0x68a   : > { %11415 = vpow2.f32 %v4006_v26  ;;  %v4036_v46 = vsel %vm2163_vm4, %v13134_v63, 0.0 }
 0x68b   : > { %4037 = vadd.xlane.f32.xlu0 %v4036_v46 }
 0x68d   : > { %v3951_v60 = vpop.xlane.xlu0 %3950 }
 0x68e   : > { %v3991_v15 = vsub.f32 %v13057_v27, %v3951_v60 }
 0x690   : > { %v4010_v47 = vmul.f32 1.442695, %v3991_v15 }
 0x691   : > { %v13139_v36 = vpop.eup %11413  ;;  %v3954_v22 = vpop.xlane.xlu0 %3953 }
 0x692   : > { %11417 = vpow2.f32 %v4010_v47  ;;  %v3992_v62 = vsub.f32 %v13055_v56, %v3954_v22  ;;  %v4042_v43 = vsel %vm2163_vm4, %v13139_v36, 0.0 }
 0x693   : > { %4043 = vadd.xlane.f32.xlu0 %v4042_v43 }
 0x694   : > { %v13144_v25 = vpop.eup %11415  ;;  %v4012_v49 = vmul.f32 1.442695, %v3992_v62 }
 0x695   : > { %v3957_v7 = vpop.xlane.xlu1 %3956  ;;  %v3960_v26 = vpop.xlane.xlu0 %3959  ;;  %v4039_v46 = vsel %vm2163_vm4, %v13144_v25, 0.0 }
 0x696   : > { %11419 = vpow2.f32 %v4012_v49  ;;  %v3993_v27 = vsub.f32 %v13065_v53, %v3957_v7  ;;  %v3994_v29 = vsub.f32 %v13061_v6, %v3960_v26  ;;  %4040 = vadd.xlane.f32.xlu1 %v4039_v46 }
 0x698   : > { %v4014_v60 = vmul.f32 1.442695, %v3993_v27  ;;  %v4016_v56 = vmul.f32 1.442695, %v3994_v29 }
 0x69a   : > { %11421 = vpow2.f32 %v4014_v60  ;;  %v3966_v15 = vpop.xlane.xlu0 %3965 }
 0x69b   : > { %11423 = vpow2.f32 %v4016_v56  ;;  %v3996_v22 = vsub.f32 %v13071_v35, %v3966_v15 }
 0x69c   : > { %v13150_v47 = vpop.eup %11417 }
 0x69d   : > { %v3963_v62 = vpop.xlane.xlu1 %3962  ;;  %v4045_v43 = vsel %vm2163_vm4, %v13150_v47, 0.0  ;;  %v4020_v6 = vmul.f32 1.442695, %v3996_v22 }
 0x69e   : > { %v3995_v49 = vsub.f32 %v13075_v9, %v3963_v62  ;;  %4046 = vadd.xlane.f32.xlu1 %v4045_v43 }
 0x6a0   : > { %v13156_v53 = vpop.eup %11419  ;;  %v4018_v7 = vmul.f32 1.442695, %v3995_v49 }
 0x6a1   : > { %v4048_v26 = vsel %vm2163_vm4, %v13156_v53, 0.0 }
 0x6a2   : > { %11425 = vpow2.f32 %v4018_v7  ;;  %4049 = vadd.xlane.f32.xlu0 %v4048_v26  ;;  %v3972_v46 = vpop.xlane.xlu0 %3971 }
 0x6a3   : > { %v3998_v27 = vsub.f32 %v13079_v37, %v3972_v46  ;;  %11427 = vpow2.f32 %v4020_v6 }
 0x6a4   : > { %v13161_v35 = vpop.eup %11421 }
 0x6a5   : > { %v13163_v29 = vpop.eup %11423  ;;  %v4024_v60 = vmul.f32 1.442695, %v3998_v27  ;;  %v3969_v9 = vpop.xlane.xlu1 %3968  ;;  %v4051_v56 = vsel %vm2163_vm4, %v13161_v35, 0.0 }
 0x6a6   : > { %v3997_v15 = vsub.f32 %v13083_v50, %v3969_v9  ;;  %4052 = vadd.xlane.f32.xlu1 %v4051_v56  ;;  %v4054_v22 = vsel %vm2163_vm4, %v13163_v29, 0.0 }
 0x6a7   : > { %4055 = vadd.xlane.f32.xlu0 %v4054_v22  ;;  %11429 = vpow2.f32 %v4024_v60 }
 0x6a8   : > { %v4022_v62 = vmul.f32 1.442695, %v3997_v15 }
 0x6aa   : > { %11431 = vpow2.f32 %v4022_v62  ;;  %v3978_v37 = vpop.xlane.xlu0 %3977 }
 0x6ab   : > { %v4000_v43 = vsub.f32 %v13087_v12, %v3978_v37 }
 0x6ac   : > { %v13171_v49 = vpop.eup %11425 }
 0x6ad   : > { %v4028_v6 = vmul.f32 1.442695, %v4000_v43  ;;  %v3975_v7 = vpop.xlane.xlu1 %3974  ;;  %v4057_v26 = vsel %vm2163_vm4, %v13171_v49, 0.0  ;;  %v13175_v46 = vpop.eup %11427 }
 0x6ae   : > { %v3999_v50 = vsub.f32 %v13091_v16, %v3975_v7  ;;  %4058 = vadd.xlane.f32.xlu1 %v4057_v26  ;;  %v4060_v60 = vsel %vm2163_vm4, %v13175_v46, 0.0 }
 0x6af   : > { %11433 = vpow2.f32 %v4028_v6 }
 0x6b0   : > { %v4026_v27 = vmul.f32 1.442695, %v3999_v50 }
 0x6b1   : > { %v13180_v9 = vpop.eup %11429 }
 0x6b2   : > { %11435 = vpow2.f32 %v4026_v27  ;;  %4061 = vadd.xlane.f32.xlu1 %v4060_v60  ;;  %v4066_v22 = vsel %vm2163_vm4, %v13180_v9, 0.0  ;;  %v3984_v50 = vpop.xlane.xlu0 %3983 }
 0x6b3   : > { %v4002_v27 = vsub.f32 %v13095_v39, %v3984_v50 }
 0x6b4   : > { %v13182_v12 = vpop.eup %11431 }
 0x6b5   : > { %v3981_v56 = vpop.xlane.xlu1 %3980  ;;  %v4063_v15 = vsel %vm2163_vm4, %v13182_v12, 0.0  ;;  %v4032_v60 = vmul.f32 1.442695, %v4002_v27 }
 0x6b6   : > { %v4001_v16 = vsub.f32 %v13099_v31, %v3981_v56  ;;  %4064 = vadd.xlane.f32.xlu0 %v4063_v15  ;;  %4067 = vadd.xlane.f32.xlu1 %v4066_v22 }
 0x6b8   : > { %v4030_v62 = vmul.f32 1.442695, %v4001_v16 }
 0x6b9   : > { %v13189_v37 = vpop.eup %11433  ;;  %v13206_v56 = vpop.permute.xlu1 %4730 }
 0x6ba   : > { %11437 = vpow2.f32 %v4030_v62  ;;  %v4072_v43 = vsel %vm2163_vm4, %v13189_v37, 0.0 }
 0x6bb   : > { %4073 = vadd.xlane.f32.xlu1 %v4072_v43  ;;  %11439 = vpow2.f32 %v4032_v60 }
 0x6bc   : > { %v13193_v6 = vpop.eup %11435 }
 0x6bd   : > { %v4069_v7 = vsel %vm2163_vm4, %v13193_v6, 0.0 }
 0x6be   : > { %4070 = vadd.xlane.f32.xlu0 %v4069_v7 }
 0x6c4   : > { %v13197_v26 = vpop.eup %11437 }
 0x6c5   : > { %v4075_v31 = vsel %vm2163_vm4, %v13197_v26, 0.0  ;;  %v13209_v16 = vpop.eup %11439 }
 0x6c6   : > { %4076 = vadd.xlane.f32.xlu0 %v4075_v31  ;;  %v4078_v43 = vsel %vm2163_vm4, %v13209_v16, 0.0 }
 0x6cc   : > { %4822 = vrot.lane.b32.xlu1 %v12350_v54, %s11728_s15 }
 0x6dc   : > { %4776 = vrot.lane.b32.xlu0 %v12354_v32, %s11728_s15  ;;  %s14919_s15 = scalar_lea.vmem %s14982_s10, %s9862_s20 }
 0x6ea   : > { %v3987_v15 = vpop.xlane.xlu1 %3986 }
 0x6eb   : > { %v4003_v22 = vsub.f32 %v13103_v3, %v3987_v15  ;;  %v13229_v3 = vpop.permute.xlu0 %4684 }
 0x6ed   : > { %v4034_v62 = vmul.f32 1.442695, %v4003_v22 }
 0x6ef   : > { %11441 = vpow2.f32 %v4034_v62 }
 0x6f0   : > { %4079 = vadd.xlane.f32.xlu1 %v4078_v43 }
 0x6f9   : > { %v13213_v7 = vpop.eup %11441 }
 0x6fa   : > { %v4081_v39 = vsel %vm2163_vm4, %v13213_v7, 0.0 }
 0x6fb   : > { %4082 = vadd.xlane.f32.xlu0 %v4081_v39 }
 0x701   : > { %5001 = vrot.lane.b32.xlu1 %v12442_v45, %s11729_s30 }
 0x705   : > { %4999 = vrot.lane.b32.xlu1 %v12483_v17, %s11729_s30 }
 0x709   : > { %5101 = vrot.lane.b32.xlu1 %v12105_v14, %s11729_s30 }
 0x70d   : > { %5099 = vrot.lane.b32.xlu1 %v12504_v55, %s11729_s30 }
 0x711   : > { %4951 = vrot.lane.b32.xlu0 %v12447_v20, %s11729_s30  ;;  %5201 = vrot.lane.b32.xlu1 %v12125_v41, %s11729_s30 }
 0x715   : > { %4949 = vrot.lane.b32.xlu0 %v12467_v38, %s11729_s30  ;;  %5199 = vrot.lane.b32.xlu1 %v12526_v52, %s11729_s30 }
 0x718   : > { %v4038_v31 = vpop.xlane.xlu0 %4037 }
 0x719   : > { %11443 = vrcp.f32 %v4038_v31  ;;  %5051 = vrot.lane.b32.xlu0 %v12109_v24, %s11729_s30  ;;  %5301 = vrot.lane.b32.xlu1 %v12142_v0, %s11729_s30 }
 0x71d   : > { %5049 = vrot.lane.b32.xlu0 %v12493_v4, %s11729_s30  ;;  %5299 = vrot.lane.b32.xlu1 %v12537_v5, %s11729_s30 }
 0x720   : > { %v4044_v50 = vpop.xlane.xlu0 %4043 }
 0x721   : > { %11445 = vrcp.f32 %v4044_v50  ;;  %5151 = vrot.lane.b32.xlu0 %v12129_v42, %s11729_s30  ;;  %5401 = vrot.lane.b32.xlu1 %v12263_v57, %s11729_s30 }
 0x723   : > { %v11444_v27 = vpop.eup %11443  ;;  %v4041_v60 = vpop.xlane.xlu1 %4040 }
 0x724   : > { %11447 = vrcp.f32 %v4041_v60  ;;  %v4100_v15 = vmul.f32 %v11444_v27, %v13134_v63 }
 0x725   : > { %5149 = vrot.lane.b32.xlu0 %v12515_v51, %s11729_s30  ;;  %5399 = vrot.lane.b32.xlu1 %v12548_v59, %s11729_s30 }
 0x726   : > { %v4116_v22 = vpack.c.bf16 %v4100_v15, %v4100_v15 }
 0x728   : > { %10736 = vmatmul.mubr.msk.bf16.vlgmr.msra.gmra.mrb[112].mxu1 %vm2163_vm4, %v4116_v22 }
 0x729   : > { %10746 = vmatpush3.bf16.msra.mxu1 %v13113_v33  ;;  %5251 = vrot.lane.b32.xlu0 %v12148_v28, %s11729_s30 }
 0x72a   : > { %5501 = vrot.lane.b32.xlu1 %v12300_v23, %s11729_s30  ;;  %10747 = vmatprep.mubr.msk.bf16.mxu1 %vm11726_vm3, %v15006_v58 }
 0x72b   : > { %v11446_v63 = vpop.eup %11445  ;;  %v4047_v62 = vpop.xlane.xlu1 %4046  ;;  %10757 = vmatprep.subr.bf16.mxu1 %v15006_v58 }
 0x72c   : > { %11449 = vrcp.f32 %v4047_v62  ;;  %v4102_v43 = vmul.f32 %v11446_v63, %v13139_v36 }
 0x72d   : > { %5249 = vrot.lane.b32.xlu0 %v12372_v19, %s11729_s30 }
 0x72e   : > { %v11448_v33 = vpop.eup %11447  ;;  %5499 = vrot.lane.b32.xlu1 %v12559_v1, %s11729_s30  ;;  %v4118_v39 = vpack.c.bf16 %v4102_v43, %v4102_v43 }
 0x72f   : > { %v4050_v31 = vpop.xlane.xlu0 %4049  ;;  %v4101_v50 = vmul.f32 %v11448_v33, %v13144_v25 }
 0x730   : > { %11451 = vrcp.f32 %v4050_v31  ;;  %10748 = vmatmul.mubr.msk.bf16.vlgmr.msra.gmra.mrb[116].mxu1 %vm2163_vm4, %v4118_v39 }
 0x731   : > { %10758 = vmatpush3.bf16.msra.mxu1 %v13117_v61  ;;  %5351 = vrot.lane.b32.xlu0 %v12269_v13, %s11729_s30  ;;  %v4117_v36 = vpack.c.bf16 %v4101_v50, %v4101_v50 }
 0x732   : > { %5601 = vrot.lane.b32.xlu1 %v12331_v40, %s11729_s30  ;;  %10759 = vmatprep.mubr.msk.bf16.mxu1 %vm11726_vm3, %v15006_v58 }
 0x733   : > { %10742 = vmatmul.mubr.msk.bf16.vlgmr.msra.gmra.mrb[128].mxu0 %vm2163_vm4, %v4117_v36  ;;  %v4053_v27 = vpop.xlane.xlu1 %4052  ;;  %10769 = vmatprep.subr.bf16.mxu1 %v15006_v58  ;;  %v15017_v36 = vld [vmem:[#allocation4_spill] sm:$0xff] }
 0x734   : > { %10752 = vmatpush3.bf16.msra.mxu0 %v13111_v44  ;;  %11453 = vrcp.f32 %v4053_v27  ;;  %v4056_v25 = vpop.xlane.xlu0 %4055  ;;  %10753 = vmatprep.mubr.msk.bf16.mxu0 %vm11726_vm3, %v15006_v58 }
 0x735   : > { %11455 = vrcp.f32 %v4056_v25  ;;  %5349 = vrot.lane.b32.xlu0 %v12396_v8, %s11729_s30  ;;  %10763 = vmatprep.subr.bf16.mxu0 %v15006_v58 }
 0x736   : > { %v11450_v61 = vpop.eup %11449  ;;  %5599 = vrot.lane.b32.xlu1 %v12570_v10, %s11729_s30 }
 0x737   : > { %v4103_v60 = vmul.f32 %v11450_v61, %v13150_v47 }
 0x739   : > { %5451 = vrot.lane.b32.xlu0 %v12304_v21, %s11729_s30  ;;  %v4119_v44 = vpack.c.bf16 %v4103_v60, %v4103_v60 }
 0x73a   : > { %v11452_v15 = vpop.eup %11451  ;;  %5701 = vrot.lane.b32.xlu1 %v12350_v54, %s11729_s30 }
 0x73b   : > { %10754 = vmatmul.mubr.msk.bf16.vlgmr.msra.gmra.mrb[132].mxu0 %vm2163_vm4, %v4119_v44  ;;  %v4059_v22 = vpop.xlane.xlu1 %4058  ;;  %v4104_v63 = vmul.f32 %v11452_v15, %v13156_v53  ;;  %v15015_v53 = vld [vmem:[#allocation3_spill] sm:$0xff] }
 0x73c   : > { %10764 = vmatpush3.bf16.msra.mxu0 %v13115_v34  ;;  %11457 = vrcp.f32 %v4059_v22  ;;  %10765 = vmatprep.mubr.msk.bf16.mxu0 %vm11726_vm3, %v15006_v58  ;;  %v15018_v15 = vld [vmem:[#allocation7_spill] sm:$0xff]  ;;  %v15019_v22 = vld [vmem:[#allocation5_spill] sm:$0xff] }
 0x73d   : > { %5449 = vrot.lane.b32.xlu0 %v12414_v48, %s11729_s30  ;;  %v4120_v47 = vpack.c.bf16 %v4104_v63, %v4104_v63  ;;  %10775 = vmatprep.subr.bf16.mxu0 %v15006_v58 }
 0x73e   : > { %v11454_v62 = vpop.eup %11453  ;;  %5699 = vrot.lane.b32.xlu1 %v12581_v11, %s11729_s30 }
 0x73f   : > { %v11456_v43 = vpop.eup %11455  ;;  %v4062_v33 = vpop.xlane.xlu1 %4061  ;;  %10760 = vmatmul.mubr.msk.bf16.vlgmr.msra.gmra.mrb[120].mxu1 %vm2163_vm4, %v4120_v47  ;;  %v4105_v34 = vmul.f32 %v11454_v62, %v13161_v35 }
 0x740   : > { %11459 = vrcp.f32 %v4062_v33  ;;  %10770 = vmatpush3.bf16.msra.mxu1 %v13121_v30  ;;  %10771 = vmatprep.mubr.msk.bf16.mxu1 %vm11726_vm3, %v15006_v58  ;;  %v4106_v31 = vmul.f32 %v11456_v43, %v13163_v29  ;;  %v15016_v30 = vld [vmem:[#allocation6_spill] sm:$0xff] }
 0x741   : > { %5551 = vrot.lane.b32.xlu0 %v15015_v53, %s11729_s30  ;;  %v4121_v39 = vpack.c.bf16 %v4105_v34, %v4105_v34  ;;  %10781 = vmatprep.subr.bf16.mxu1 %v15006_v58 }
 0x742   : > { %5987 = vrot.lane.b32.xlu1 %v12442_v45, %s11730_s13  ;;  %v4122_v27 = vpack.c.bf16 %v4106_v31, %v4106_v31 }
 0x743   : > { %10766 = vmatmul.mubr.msk.bf16.vlgmr.msra.gmra.mrb[136].mxu0 %vm2163_vm4, %v4121_v39  ;;  %v4068_v35 = vpop.xlane.xlu1 %4067  ;;  %v4065_v50 = vpop.xlane.xlu0 %4064 }
 0x744   : > { %10776 = vmatpush3.bf16.msra.mxu0 %v15016_v30  ;;  %11461 = vrcp.f32 %v4068_v35  ;;  %10777 = vmatprep.mubr.msk.bf16.mxu0 %vm11726_vm3, %v15006_v58 }
 0x745   : > { %11463 = vrcp.f32 %v4065_v50  ;;  %5549 = vrot.lane.b32.xlu0 %v15017_v36, %s11729_s30  ;;  %10787 = vmatprep.subr.bf16.mxu0 %v15006_v58 }
 0x746   : > { %v11458_v29 = vpop.eup %11457  ;;  %6079 = vrot.lane.b32.xlu1 %v12105_v14, %s11730_s13 }
 0x747   : > { %10772 = vmatmul.mubr.msk.bf16.vlgmr.msra.gmra.mrb[124].mxu1 %vm2163_vm4, %v4122_v27  ;;  %v4107_v25 = vmul.f32 %v11458_v29, %v13171_v49 }
 0x748   : > { %10782 = vmatpush3.bf16.msra.mxu1 %v13125_v18  ;;  %v4074_v61 = vpop.xlane.xlu1 %4073  ;;  %10783 = vmatprep.mubr.msk.bf16.mxu1 %vm11726_vm3, %v15006_v58 }
 0x749   : > { %5651 = vrot.lane.b32.xlu0 %v12354_v32, %s11729_s30  ;;  %v4123_v60 = vpack.c.bf16 %v4107_v25, %v4107_v25  ;;  %10793 = vmatprep.subr.bf16.mxu1 %v15006_v58  ;;  %11465 = vrcp.f32 %v4074_v61 }
 0x74a   : > { %v11460_v44 = vpop.eup %11459  ;;  %6171 = vrot.lane.b32.xlu1 %v12125_v41, %s11730_s13 }
 0x74b   : > { %10778 = vmatmul.mubr.msk.bf16.vlgmr.msra.gmra.mrb[140].mxu0 %vm2163_vm4, %v4123_v60  ;;  %v4071_v49 = vpop.xlane.xlu0 %4070  ;;  %v4108_v18 = vmul.f32 %v11460_v44, %v13175_v46  ;;  %v15020_v46 = vld [vmem:[#allocation8_spill] sm:$0xff] }
 0x74c   : > { %10788 = vmatpush3.bf16.msra.mxu0 %v15018_v15  ;;  %11467 = vrcp.f32 %v4071_v49  ;;  %10789 = vmatprep.mubr.msk.bf16.mxu0 %vm11726_vm3, %v15006_v58  ;;  %v4823_v27 = vpop.permute.xlu1 %4822 }
 0x74d   : > { %5649 = vrot.lane.b32.xlu0 %v15019_v22, %s11729_s30  ;;  %v4124_v63 = vpack.c.bf16 %v4108_v18, %v4108_v18  ;;  %10799 = vmatprep.subr.bf16.mxu0 %v15006_v58 }
 0x74e   : > { %v11462_v47 = vpop.eup %11461  ;;  %6263 = vrot.lane.b32.xlu1 %v12142_v0, %s11730_s13 }
 0x74f   : > { %v11464_v62 = vpop.eup %11463  ;;  %10784 = vmatmul.mubr.msk.bf16.vlgmr.msra.gmra.mrb[128].mxu1 %vm2163_vm4, %v4124_v63  ;;  %v4110_v33 = vmul.f32 %v11462_v47, %v13180_v9 }
 0x750   : > { %10794 = vmatpush3.bf16.msra.mxu1 %v15020_v46  ;;  %v4109_v43 = vmul.f32 %v11464_v62, %v13182_v12  ;;  %10795 = vmatprep.mubr.msk.bf16.mxu1 %vm11726_vm3, %v15006_v58 }
 0x751   : > { %5941 = vrot.lane.b32.xlu0 %v12447_v20, %s11730_s13  ;;  %10805 = vmatprep.subr.bf16.mxu1 %v15006_v58  ;;  %v4126_v12 = vpack.c.bf16 %v4110_v33, %v4110_v33 }
 0x752   : > { %6355 = vrot.lane.b32.xlu1 %v12263_v57, %s11730_s13  ;;  %v4125_v34 = vpack.c.bf16 %v4109_v43, %v4109_v43 }
 0x753   : > { %v4077_v39 = vpop.xlane.xlu0 %4076  ;;  %v11466_v31 = vpop.eup %11465 }
 0x754   : > { %10790 = vmatmul.mubr.msk.bf16.vlgmr.msra.gmra.mrb[144].mxu0 %vm2163_vm4, %v4125_v34  ;;  %11469 = vrcp.f32 %v4077_v39  ;;  %v4112_v50 = vmul.f32 %v11466_v31, %v13189_v37 }
 0x755   : > { %10800 = vmatpush3.bf16.msra.mxu0 %v13130_v2  ;;  %6033 = vrot.lane.b32.xlu0 %v12109_v24, %s11730_s13 }
 0x756   : > { %v11468_v35 = vpop.eup %11467  ;;  %6401 = vrot.lane.b32.xlu1 %v12304_v21, %s11730_s13  ;;  %10801 = vmatprep.mubr.msk.bf16.mxu0 %vm11726_vm3, %v15006_v58 }
 0x757   : > { %10796 = vmatmul.mubr.msk.bf16.vlgmr.msra.gmra.mrb[132].mxu1 %vm2163_vm4, %v4126_v12  ;;  %10811 = vmatprep.subr.bf16.mxu0 %v15006_v58  ;;  %v4111_v9 = vmul.f32 %v11468_v35, %v13193_v6  ;;  %v4128_v6 = vpack.c.bf16 %v4112_v50, %v4112_v50  ;;  %v4777_v30 = vpop.permute.xlu0 %4776 }
 0x758   : > { %10806 = vmatpush3.bf16.msra.mxu1 %v13229_v3  ;;  %10807 = vmatprep.mubr.msk.bf16.mxu1 %vm11726_vm3, %v15006_v58 }
 0x759   : > { %6125 = vrot.lane.b32.xlu0 %v12129_v42, %s11730_s13  ;;  %v4127_v2 = vpack.c.bf16 %v4111_v9, %v4111_v9  ;;  %10817 = vmatprep.subr.bf16.mxu1 %v15006_v58 }
 0x75a   : > { %6447 = vrot.lane.b32.xlu1 %v12300_v23, %s11730_s13 }
 0x75c   : > { %10802 = vmatmul.mubr.msk.bf16.vlgmr.msra.gmra.mrb[148].mxu0 %vm2163_vm4, %v4127_v2 }
 0x75d   : > { %10812 = vmatpush3.bf16.msra.mxu0 %v13206_v56  ;;  %6217 = vrot.lane.b32.xlu0 %v12148_v28, %s11730_s13 }
 0x75e   : > { %v11470_v3 = vpop.eup %11469  ;;  %10813 = vmatprep.mubr.msk.bf16.mxu0 %vm11726_vm3, %v15006_v58  ;;  %10823 = vmatprep.subr.bf16.mxu0 %v15006_v58 }
 0x75f   : > { %10808 = vmatmul.mubr.msk.bf16.vlgmr.msra.gmra.mrb[136].mxu1 %vm2163_vm4, %v4128_v6  ;;  %v4113_v37 = vmul.f32 %v11470_v3, %v13197_v26 }
 0x760   : > { %10818 = vmatpush3.bf16.msra.mxu1 %v4777_v30  ;;  %10819 = vmatprep.mubr.msk.bf16.mxu1 %vm11726_vm3, %v15006_v58 }
 0x761   : > { %6309 = vrot.lane.b32.xlu0 %v12269_v13, %s11730_s13  ;;  %v4129_v56 = vpack.c.bf16 %v4113_v37, %v4113_v37  ;;  %10829 = vmatprep.subr.bf16.mxu1 %v15006_v58 }
 0x764   : > { %10814 = vmatmul.mubr.msk.bf16.vlgmr.msra.gmra.mrb[152].mxu0 %vm2163_vm4, %v4129_v56 }
 0x765   : > { %10824 = vmatpush3.bf16.msra.mxu0 %v4823_v27  ;;  %10825 = vmatprep.mubr.msk.bf16.mxu0 %vm11726_vm3, %v15006_v58 }
 0x766   : > { %10835 = vmatprep.subr.bf16.mxu0 %v15006_v58 }
 0x77d   : > { %v4080_v26 = vpop.xlane.xlu1 %4079 }
 0x77e   : > { %11471 = vrcp.f32 %v4080_v26 }
 0x781   : > { %v5002_v29 = vpop.permute.xlu1 %5001 }
 0x782   : > { %v5007_v12 = vsel %vm1426_vm2, %v5002_v29, 0 }
 0x785   : > { %v5000_v25 = vpop.permute.xlu1 %4999 }
 0x788   : > { %v11472_v61 = vpop.eup %11471  ;;  %v4083_v60 = vpop.xlane.xlu0 %4082 }
 0x789   : > { %11473 = vrcp.f32 %v4083_v60  ;;  %v5102_v44 = vpop.permute.xlu1 %5101  ;;  %v4114_v49 = vmul.f32 %v11472_v61, %v13209_v16 }
 0x78a   : > { %v5107_v50 = vsel %vm1426_vm2, %v5102_v44, 0 }
 0x78b   : > { %v4130_v18 = vpack.c.bf16 %v4114_v49, %v4114_v49 }
 0x78c   : > { %v4952_v15 = vpop.permute.xlu0 %4951 }
 0x78d   : > { %v4957_v63 = vsel %vm1426_vm2, %v4952_v15, 0  ;;  %v5100_v47 = vpop.permute.xlu1 %5099  ;;  %10820 = vmatmul.mubr.msk.bf16.vlgmr.msra.gmra.mrb[140].mxu1 %vm2163_vm4, %v4130_v18 }
 0x78e   : > { %10830 = vmatpush3.bf16.xpose.msra.mxu1 %v4957_v63  ;;  %10831 = vmatprep.mubr.msk.bf16.mxu1 %vm11726_vm3, %v15006_v58 }
 0x78f   : > { %10841 = vmatprep.subr.bf16.mxu1 %v15006_v58 }
 0x790   : > { %v4950_v62 = vpop.permute.xlu0 %4949 }
 0x791   : > { %v5202_v46 = vpop.permute.xlu1 %5201 }
 0x792   : > { %v5207_v56 = vsel %vm1426_vm2, %v5202_v46, 0 }
 0x793   : > { %v11474_v43 = vpop.eup %11473 }
 0x794   : > { %v5052_v33 = vpop.permute.xlu0 %5051  ;;  %v4115_v34 = vmul.f32 %v11474_v43, %v13213_v7 }
 0x795   : > { %v5057_v16 = vsel %vm1426_vm2, %v5052_v33, 0  ;;  %10832 = vmatmul.mubr.msk.bf16.vlgmr.msra.gmra.mrb[144].mxu1 %vm1426_vm2, %v4950_v62  ;;  %v5200_v39 = vpop.permute.xlu1 %5199 }
 0x796   : > { %10842 = vmatpush3.bf16.xpose.msra.mxu1 %v5057_v16  ;;  %v4131_v31 = vpack.c.bf16 %v4115_v34, %v4115_v34  ;;  %10843 = vmatprep.mubr.msk.bf16.mxu1 %vm11726_vm3, %v15006_v58 }
 0x797   : > { %10853 = vmatprep.subr.bf16.mxu1 %v15006_v58 }
 0x798   : > { %10826 = vmatmul.mubr.msk.bf16.vlgmr.msra.gmra.mrb[156].mxu0 %vm2163_vm4, %v4131_v31  ;;  %v5050_v35 = vpop.permute.xlu0 %5049 }
 0x799   : > { %10836 = vmatpush3.bf16.xpose.msra.mxu0 %v5007_v12  ;;  %10837 = vmatprep.mubr.msk.bf16.mxu0 %vm11726_vm3, %v15006_v58  ;;  %v5302_v7 = vpop.permute.xlu1 %5301 }
 0x79a   : > { %10847 = vmatprep.subr.bf16.mxu0 %v15006_v58  ;;  %v5307_v60 = vsel %vm1426_vm2, %v5302_v7, 0 }
 0x79c   : > { %v5152_v9 = vpop.permute.xlu0 %5151 }
 0x79d   : > { %v5157_v2 = vsel %vm1426_vm2, %v5152_v9, 0  ;;  %10844 = vmatmul.mubr.msk.bf16.vlgmr.msra.gmra.mrb[148].mxu1 %vm1426_vm2, %v5050_v35  ;;  %v5300_v3 = vpop.permute.xlu1 %5299 }
 0x79e   : > { %10854 = vmatpush3.bf16.xpose.msra.mxu1 %v5157_v2  ;;  %10855 = vmatprep.mubr.msk.bf16.mxu1 %vm11726_vm3, %v15006_v58 }
 0x79f   : > { %10865 = vmatprep.subr.bf16.mxu1 %v15006_v58 }
 0x7a0   : > { %10838 = vmatmul.mubr.msk.bf16.vlgmr.msra.gmra.mrb[160].mxu0 %vm1426_vm2, %v5000_v25  ;;  %v5150_v6 = vpop.permute.xlu0 %5149 }
 0x7a1   : > { %10848 = vmatpush3.bf16.xpose.msra.mxu0 %v5107_v50  ;;  %10849 = vmatprep.mubr.msk.bf16.mxu0 %vm11726_vm3, %v15006_v58  ;;  %v5402_v27 = vpop.permute.xlu1 %5401 }
 0x7a2   : > { %10859 = vmatprep.subr.bf16.mxu0 %v15006_v58  ;;  %v5407_v63 = vsel %vm1426_vm2, %v5402_v27, 0 }
 0x7a4   : > { %v5252_v30 = vpop.permute.xlu0 %5251 }
 0x7a5   : > { %v5257_v37 = vsel %vm1426_vm2, %v5252_v30, 0  ;;  %10856 = vmatmul.mubr.msk.bf16.vlgmr.msra.gmra.mrb[152].mxu1 %vm1426_vm2, %v5150_v6  ;;  %v5400_v61 = vpop.permute.xlu1 %5399 }
 0x7a6   : > { %10866 = vmatpush3.bf16.xpose.msra.mxu1 %v5257_v37  ;;  %10867 = vmatprep.mubr.msk.bf16.mxu1 %vm11726_vm3, %v15006_v58 }
 0x7a7   : > { %10877 = vmatprep.subr.bf16.mxu1 %v15006_v58 }
 0x7a8   : > { %10850 = vmatmul.mubr.msk.bf16.vlgmr.msra.gmra.mrb[164].mxu0 %vm1426_vm2, %v5100_v47  ;;  %v5250_v26 = vpop.permute.xlu0 %5249 }
 0x7a9   : > { %10860 = vmatpush3.bf16.xpose.msra.mxu0 %v5207_v56  ;;  %10861 = vmatprep.mubr.msk.bf16.mxu0 %vm11726_vm3, %v15006_v58  ;;  %v5502_v49 = vpop.permute.xlu1 %5501 }
 0x7aa   : > { %10871 = vmatprep.subr.bf16.mxu0 %v15006_v58  ;;  %v5507_v33 = vsel %vm1426_vm2, %v5502_v49, 0 }
 0x7ac   : > { %v5352_v29 = vpop.permute.xlu0 %5351 }
 0x7ad   : > { %v5357_v25 = vsel %vm1426_vm2, %v5352_v29, 0  ;;  %10868 = vmatmul.mubr.msk.bf16.vlgmr.msra.gmra.mrb[156].mxu1 %vm1426_vm2, %v5250_v26  ;;  %v5500_v62 = vpop.permute.xlu1 %5499 }
 0x7ae   : > { %10878 = vmatpush3.bf16.xpose.msra.mxu1 %v5357_v25  ;;  %10879 = vmatprep.mubr.msk.bf16.mxu1 %vm11726_vm3, %v15006_v58 }
 0x7af   : > { %10889 = vmatprep.subr.bf16.mxu1 %v15006_v58 }
 0x7b0   : > { %10862 = vmatmul.mubr.msk.bf16.vlgmr.msra.gmra.mrb[168].mxu0 %vm1426_vm2, %v5200_v39  ;;  %v5350_v44 = vpop.permute.xlu0 %5349 }
 0x7b1   : > { %10872 = vmatpush3.bf16.xpose.msra.mxu0 %v5307_v60  ;;  %10873 = vmatprep.mubr.msk.bf16.mxu0 %vm11726_vm3, %v15006_v58  ;;  %v5602_v34 = vpop.permute.xlu1 %5601 }
 0x7b2   : > { %10883 = vmatprep.subr.bf16.mxu0 %v15006_v58  ;;  %v5607_v35 = vsel %vm1426_vm2, %v5602_v34, 0 }
 0x7b4   : > { %v5452_v18 = vpop.permute.xlu0 %5451 }
 0x7b5   : > { %v5457_v15 = vsel %vm1426_vm2, %v5452_v18, 0  ;;  %10880 = vmatmul.mubr.msk.bf16.vlgmr.msra.gmra.mrb[160].mxu1 %vm1426_vm2, %v5350_v44  ;;  %v5600_v12 = vpop.permute.xlu1 %5599 }
 0x7b6   : > { %10890 = vmatpush3.bf16.xpose.msra.mxu1 %v5457_v15  ;;  %10891 = vmatprep.mubr.msk.bf16.mxu1 %vm11726_vm3, %v15006_v58 }
 0x7b7   : > { %10901 = vmatprep.subr.bf16.mxu1 %v15006_v58 }
 0x7b8   : > { %10874 = vmatmul.mubr.msk.bf16.vlgmr.msra.gmra.mrb[172].mxu0 %vm1426_vm2, %v5300_v3  ;;  %v5450_v47 = vpop.permute.xlu0 %5449 }
 0x7b9   : > { %10884 = vmatpush3.bf16.xpose.msra.mxu0 %v5407_v63  ;;  %10885 = vmatprep.mubr.msk.bf16.mxu0 %vm11726_vm3, %v15006_v58  ;;  %v5702_v9 = vpop.permute.xlu1 %5701 }
 0x7ba   : > { %10895 = vmatprep.subr.bf16.mxu0 %v15006_v58  ;;  %v5707_v50 = vsel %vm1426_vm2, %v5702_v9, 0 }
 0x7bc   : > { %v5552_v46 = vpop.permute.xlu0 %5551 }
 0x7bd   : > { %v5557_v43 = vsel %vm1426_vm2, %v5552_v46, 0  ;;  %10892 = vmatmul.mubr.msk.bf16.vlgmr.msra.gmra.mrb[164].mxu1 %vm1426_vm2, %v5450_v47  ;;  %v5700_v6 = vpop.permute.xlu1 %5699 }
 0x7be   : > { %10902 = vmatpush3.bf16.xpose.msra.mxu1 %v5557_v43  ;;  %10903 = vmatprep.mubr.msk.bf16.mxu1 %vm11726_vm3, %v15006_v58 }
 0x7bf   : > { %10913 = vmatprep.subr.bf16.mxu1 %v15006_v58 }
 0x7c0   : > { %10886 = vmatmul.mubr.msk.bf16.vlgmr.msra.gmra.mrb[176].mxu0 %vm1426_vm2, %v5400_v61  ;;  %v5550_v16 = vpop.permute.xlu0 %5549 }
 0x7c1   : > { %10896 = vmatpush3.bf16.xpose.msra.mxu0 %v5507_v33  ;;  %10897 = vmatprep.mubr.msk.bf16.mxu0 %vm11726_vm3, %v15006_v58  ;;  %v5988_v3 = vpop.permute.xlu1 %5987 }
 0x7c2   : > { %10907 = vmatprep.subr.bf16.mxu0 %v15006_v58 }
 0x7c4   : > { %v5652_v39 = vpop.permute.xlu0 %5651 }
 0x7c5   : > { %v5657_v31 = vsel %vm1426_vm2, %v5652_v39, 0  ;;  %10904 = vmatmul.mubr.msk.bf16.vlgmr.msra.gmra.mrb[168].mxu1 %vm1426_vm2, %v5550_v16 }
 0x7c6   : > { %10914 = vmatpush3.bf16.xpose.msra.mxu1 %v5657_v31  ;;  %10915 = vmatprep.mubr.msk.bf16.mxu1 %vm11726_vm3, %v15006_v58 }
 0x7c7   : > { %10925 = vmatprep.subr.bf16.mxu1 %v15006_v58 }
 0x7c8   : > { %10898 = vmatmul.mubr.msk.bf16.vlgmr.msra.gmra.mrb[180].mxu0 %vm1426_vm2, %v5500_v62  ;;  %v5650_v7 = vpop.permute.xlu0 %5649 }
 0x7c9   : > { %10908 = vmatpush3.bf16.xpose.msra.mxu0 %v5607_v35  ;;  %10909 = vmatprep.mubr.msk.bf16.mxu0 %vm11726_vm3, %v15006_v58 }
 0x7ca   : > { %10919 = vmatprep.subr.bf16.mxu0 %v15006_v58 }
 0x7cc   : > { %v5942_v2 = vpop.permute.xlu0 %5941 }
 0x7cd   : > { %10916 = vmatmul.mubr.msk.bf16.vlgmr.msra.gmra.mrb[172].mxu1 %vm1426_vm2, %v5650_v7 }
 0x7ce   : > { %10926 = vmatpush3.bf16.msra.mxu1 %v5942_v2  ;;  %10927 = vmatprep.mubr.msk.bf16.mxu1 %vm11726_vm3, %v15006_v58 }
 0x7cf   : > { %10937 = vmatprep.subr.bf16.mxu1 %v15006_v58 }
 0x7d0   : > { %10910 = vmatmul.mubr.msk.bf16.vlgmr.msra.gmra.mrb[184].mxu0 %vm1426_vm2, %v5600_v12 }
 0x7d1   : > { %10920 = vmatpush3.bf16.xpose.msra.mxu0 %v5707_v50  ;;  %10921 = vmatprep.mubr.msk.bf16.mxu0 %vm11726_vm3, %v15006_v58 }
 0x7d2   : > { %10931 = vmatprep.subr.bf16.mxu0 %v15006_v58 }
 0x7d8   : > { %10922 = vmatmul.mubr.msk.bf16.vlgmr.msra.gmra.mrb[188].mxu0 %vm1426_vm2, %v5700_v6 }
 0x7d9   : > { %10932 = vmatpush3.bf16.msra.mxu0 %v5988_v3  ;;  %10933 = vmatprep.mubr.msk.bf16.mxu0 %vm11726_vm3, %v15006_v58 }
 0x7da   : > { %10943 = vmatprep.subr.bf16.mxu0 %v15006_v58 }
 0x7fb   : > { %v13479_v30 = vpop.f32.mrb[112].mxu1 }
 0x7fc   : > { %15021 = vst [vmem:[#allocation6_spill] sm:$0xff] %v13479_v30  ;;  %v10737_v37 = vpop.f32.mrb[113].mxu1 }
 0x7fd   : > { %v4175_v56 = vpop.f32.mrb[114].mxu1 }
 0x7fe   : > { %v10738_v27 = vpop.f32.mrb[115].mxu1 }
 0x803   : > { %v13481_v26 = vpop.f32.mrb[116].mxu1 }
 0x804   : > { %15022 = vst [vmem:[#allocation7_spill] sm:$0xff] %v13481_v26  ;;  %v10749_v29 = vpop.f32.mrb[117].mxu1 }
 0x805   : > { %v4267_v25 = vpop.f32.mrb[118].mxu1 }
 0x806   : > { %v13483_v61 = vpop.f32.mrb[128].mxu0  ;;  %v10750_v60 = vpop.f32.mrb[119].mxu1 }
 0x807   : > { %15023 = vst [vmem:[#allocation8_spill] sm:$0xff] %v13483_v61  ;;  %v10743_v44 = vpop.f32.mrb[129].mxu0 }
 0x808   : > { %v4221_v49 = vpop.f32.mrb[130].mxu0 }
 0x809   : > { %v10744_v18 = vpop.f32.mrb[131].mxu0 }
 0x80e   : > { %v13485_v15 = vpop.f32.mrb[132].mxu0 }
 0x80f   : > { %15024 = vst [vmem:[#allocation9_spill] sm:$0xff] %v13485_v15  ;;  %v10755_v63 = vpop.f32.mrb[133].mxu0 }
 0x810   : > { %v4313_v47 = vpop.f32.mrb[134].mxu0 }
 0x811   : > { %v10756_v62 = vpop.f32.mrb[135].mxu0 }
 0x812   : > { %v13487_v46 = vpop.f32.mrb[120].mxu1 }
 0x813   : > { %15025 = vst [vmem:[#allocation10_spill] sm:$0xff] %v13487_v46  ;;  %v10761_v43 = vpop.f32.mrb[121].mxu1 }
 0x814   : > { %v4359_v33 = vpop.f32.mrb[122].mxu1 }
 0x815   : > { %v10762_v34 = vpop.f32.mrb[123].mxu1 }
 0x816   : > { %v13489_v16 = vpop.f32.mrb[136].mxu0 }
 0x817   : > { %15026 = vst [vmem:[#allocation11_spill] sm:$0xff] %v13489_v16  ;;  %v10767_v39 = vpop.f32.mrb[137].mxu0 }
 0x818   : > { %v4405_v31 = vpop.f32.mrb[138].mxu0 }
 0x819   : > { %v10768_v12 = vpop.f32.mrb[139].mxu0 }
 0x81a   : > { %v13491_v35 = vpop.f32.mrb[124].mxu1 }
 0x81b   : > { %15027 = vst [vmem:[#allocation12_spill] sm:$0xff] %v13491_v35  ;;  %v10773_v7 = vpop.f32.mrb[125].mxu1 }
 0x81c   : > { %v4451_v9 = vpop.f32.mrb[126].mxu1 }
 0x81d   : > { %v10774_v2 = vpop.f32.mrb[127].mxu1 }
 0x81e   : > { %v13493_v50 = vpop.f32.mrb[140].mxu0 }
 0x81f   : > { %15028 = vst [vmem:[#allocation13_spill] sm:$0xff] %v13493_v50  ;;  %v10779_v6 = vpop.f32.mrb[141].mxu0 }
 0x820   : > { %v4497_v3 = vpop.f32.mrb[142].mxu0 }
 0x821   : > { %v10780_v37 = vpop.f32.mrb[143].mxu0 }
 0x822   : > { %v13495_v56 = vpop.f32.mrb[128].mxu1 }
 0x823   : > { %15029 = vst [vmem:[#allocation14_spill] sm:$0xff] %v13495_v56  ;;  %v10785_v27 = vpop.f32.mrb[129].mxu1 }
 0x824   : > { %v4543_v29 = vpop.f32.mrb[130].mxu1 }
 0x825   : > { %v10786_v25 = vpop.f32.mrb[131].mxu1 }
 0x827   : > { %v13497_v60 = vpop.f32.mrb[144].mxu0 }
 0x828   : > { %15030 = vst [vmem:[#allocation15_spill] sm:$0xff] %v13497_v60  ;;  %v10791_v44 = vpop.f32.mrb[145].mxu0 }
 0x829   : > { %v4589_v49 = vpop.f32.mrb[146].mxu0 }
 0x82a   : > { %v10792_v18 = vpop.f32.mrb[147].mxu0  ;;  %v13499_v63 = vpop.f32.mrb[132].mxu1 }
 0x82b   : > { %15031 = vst [vmem:[#allocation16_spill] sm:$0xff] %v13499_v63  ;;  %v10797_v47 = vpop.f32.mrb[133].mxu1 }
 0x82c   : > { %v4635_v62 = vpop.f32.mrb[134].mxu1 }
 0x82d   : > { %v10798_v43 = vpop.f32.mrb[135].mxu1 }
 0x82f   : > { %v13501_v33 = vpop.f32.mrb[148].mxu0 }
 0x830   : > { %15032 = vst [vmem:[#allocation17_spill] sm:$0xff] %v13501_v33  ;;  %v10803_v34 = vpop.f32.mrb[149].mxu0 }
 0x831   : > { %v4681_v39 = vpop.f32.mrb[150].mxu0 }
 0x832   : > { %v10804_v31 = vpop.f32.mrb[151].mxu0  ;;  %v13503_v12 = vpop.f32.mrb[136].mxu1 }
 0x833   : > { %15033 = vst [vmem:[#allocation18_spill] sm:$0xff] %v13503_v12  ;;  %v10809_v7 = vpop.f32.mrb[137].mxu1 }
 0x834   : > { %v4727_v9 = vpop.f32.mrb[138].mxu1 }
 0x835   : > { %v10810_v2 = vpop.f32.mrb[139].mxu1 }
 0x837   : > { %v13505_v6 = vpop.f32.mrb[152].mxu0 }
 0x838   : > { %15034 = vst [vmem:[#allocation19_spill] sm:$0xff] %v13505_v6  ;;  %v10815_v3 = vpop.f32.mrb[153].mxu0 }
 0x839   : > { %v4773_v37 = vpop.f32.mrb[154].mxu0 }
 0x83a   : > { %v10816_v27 = vpop.f32.mrb[155].mxu0 }
 0x860   : > { %v13507_v29 = vpop.f32.mrb[140].mxu1 }
 0x861   : > { %15035 = vst [vmem:[#allocation20_spill] sm:$0xff] %v13507_v29  ;;  %v10821_v25 = vpop.f32.mrb[141].mxu1 }
 0x862   : > { %v4819_v44 = vpop.f32.mrb[142].mxu1 }
 0x863   : > { %v10822_v49 = vpop.f32.mrb[143].mxu1 }
 0x868   : > { %v13509_v18 = vpop.f32.mrb[144].mxu1 }
 0x869   : > { %v10833_v47 = vpop.f32.mrb[145].mxu1  ;;  %v5749_v62 = vsel %vm2163_vm4, %v13509_v18, -inf }
 0x86a   : > { %5750 = vmax.xlane.f32.xlu0 %v5749_v62  ;;  %v4996_v43 = vpop.f32.mrb[146].mxu1 }
 0x86b   : > { %v13513_v34 = vpop.f32.mrb[156].mxu0  ;;  %v10834_v39 = vpop.f32.mrb[147].mxu1 }
 0x86c   : > { %15036 = vst [vmem:[#allocation21_spill] sm:$0xff] %v13513_v34  ;;  %v10827_v31 = vpop.f32.mrb[157].mxu0 }
 0x86d   : > { %v4865_v7 = vpop.f32.mrb[158].mxu0 }
 0x86e   : > { %v10828_v9 = vpop.f32.mrb[159].mxu0 }
 0x870   : > { %v13515_v2 = vpop.f32.mrb[148].mxu1 }
 0x871   : > { %v10845_v3 = vpop.f32.mrb[149].mxu1  ;;  %v5755_v37 = vsel %vm2163_vm4, %v13515_v2, -inf }
 0x872   : > { %5756 = vmax.xlane.f32.xlu0 %v5755_v37  ;;  %v5096_v27 = vpop.f32.mrb[150].mxu1 }
 0x873   : > { %v13519_v25 = vpop.f32.mrb[160].mxu0  ;;  %v10846_v44 = vpop.f32.mrb[151].mxu1 }
 0x874   : > { %v10839_v49 = vpop.f32.mrb[161].mxu0  ;;  %v5752_v47 = vsel %vm2163_vm4, %v13519_v25, -inf }
 0x875   : > { %5753 = vmax.xlane.f32.xlu1 %v5752_v47  ;;  %v5046_v62 = vpop.f32.mrb[162].mxu0 }
 0x876   : > { %v10840_v43 = vpop.f32.mrb[163].mxu0 }
 0x878   : > { %v13523_v39 = vpop.f32.mrb[152].mxu1 }
 0x879   : > { %v10857_v31 = vpop.f32.mrb[153].mxu1  ;;  %v5761_v47 = vsel %vm2163_vm4, %v13523_v39, -inf }
 0x87a   : > { %v5196_v7 = vpop.f32.mrb[154].mxu1 }
 0x87b   : > { %v13525_v9 = vpop.f32.mrb[164].mxu0  ;;  %v10858_v3 = vpop.f32.mrb[155].mxu1 }
 0x87c   : > { %v10851_v29 = vpop.f32.mrb[165].mxu0  ;;  %v5758_v37 = vsel %vm2163_vm4, %v13525_v9, -inf }
 0x87d   : > { %v5146_v27 = vpop.f32.mrb[166].mxu0  ;;  %5759 = vmax.xlane.f32.xlu0 %v5758_v37 }
 0x87e   : > { %v10852_v44 = vpop.f32.mrb[167].mxu0 }
 0x880   : > { %v13529_v49 = vpop.f32.mrb[156].mxu1 }
 0x881   : > { %5762 = vmax.xlane.f32.xlu0 %v5761_v47  ;;  %v10869_v62 = vpop.f32.mrb[157].mxu1  ;;  %v5767_v3 = vsel %vm2163_vm4, %v13529_v49, -inf }
 0x882   : > { %v5296_v43 = vpop.f32.mrb[158].mxu1 }
 0x883   : > { %v13533_v31 = vpop.f32.mrb[168].mxu0  ;;  %v10870_v7 = vpop.f32.mrb[159].mxu1 }
 0x884   : > { %v10863_v12 = vpop.f32.mrb[169].mxu0  ;;  %v5764_v29 = vsel %vm2163_vm4, %v13533_v31, -inf }
 0x885   : > { %5765 = vmax.xlane.f32.xlu1 %v5764_v29  ;;  %v5246_v37 = vpop.f32.mrb[170].mxu0  ;;  %5768 = vmax.xlane.f32.xlu0 %v5767_v3 }
 0x886   : > { %v10864_v27 = vpop.f32.mrb[171].mxu0 }
 0x888   : > { %v13539_v44 = vpop.f32.mrb[160].mxu1 }
 0x889   : > { %v10881_v63 = vpop.f32.mrb[161].mxu1  ;;  %v5773_v47 = vsel %vm2163_vm4, %v13539_v44, -inf }
 0x88a   : > { %5774 = vmax.xlane.f32.xlu0 %v5773_v47  ;;  %v5396_v62 = vpop.f32.mrb[162].mxu1 }
 0x88b   : > { %v13543_v43 = vpop.f32.mrb[172].mxu0  ;;  %v10882_v12 = vpop.f32.mrb[163].mxu1 }
 0x88c   : > { %v10875_v7 = vpop.f32.mrb[173].mxu0  ;;  %v5770_v56 = vsel %vm2163_vm4, %v13543_v43, -inf }
 0x88d   : > { %5771 = vmax.xlane.f32.xlu1 %v5770_v56  ;;  %v5346_v29 = vpop.f32.mrb[174].mxu0 }
 0x88e   : > { %v10876_v37 = vpop.f32.mrb[175].mxu0 }
 0x890   : > { %v13547_v3 = vpop.f32.mrb[164].mxu1 }
 0x891   : > { %v10893_v27 = vpop.f32.mrb[165].mxu1  ;;  %v5779_v63 = vsel %vm2163_vm4, %v13547_v3, -inf }
 0x892   : > { %5780 = vmax.xlane.f32.xlu0 %v5779_v63  ;;  %v5496_v34 = vpop.f32.mrb[166].mxu1 }
 0x893   : > { %v13551_v47 = vpop.f32.mrb[176].mxu0  ;;  %v10894_v62 = vpop.f32.mrb[167].mxu1 }
 0x894   : > { %v10887_v6 = vpop.f32.mrb[177].mxu0  ;;  %v5776_v12 = vsel %vm2163_vm4, %v13551_v47, -inf }
 0x895   : > { %5777 = vmax.xlane.f32.xlu1 %v5776_v12  ;;  %v5446_v7 = vpop.f32.mrb[178].mxu0 }
 0x896   : > { %v10888_v56 = vpop.f32.mrb[179].mxu0 }
 0x898   : > { %v13555_v29 = vpop.f32.mrb[168].mxu1 }
 0x899   : > { %v10905_v37 = vpop.f32.mrb[169].mxu1  ;;  %v5785_v27 = vsel %vm2163_vm4, %v13555_v29, -inf }
 0x89a   : > { %5786 = vmax.xlane.f32.xlu0 %v5785_v27  ;;  %v5596_v35 = vpop.f32.mrb[170].mxu1 }
 0x89b   : > { %v13559_v63 = vpop.f32.mrb[180].mxu0  ;;  %v10906_v34 = vpop.f32.mrb[171].mxu1 }
 0x89c   : > { %v10899_v46 = vpop.f32.mrb[181].mxu0  ;;  %v5782_v6 = vsel %vm2163_vm4, %v13559_v63, -inf }
 0x89d   : > { %5783 = vmax.xlane.f32.xlu1 %v5782_v6  ;;  %v5546_v62 = vpop.f32.mrb[182].mxu0 }
 0x89e   : > { %v10900_v12 = vpop.f32.mrb[183].mxu0 }
 0x8a0   : > { %v13563_v7 = vpop.f32.mrb[172].mxu1 }
 0x8a1   : > { %v10917_v56 = vpop.f32.mrb[173].mxu1  ;;  %v5791_v37 = vsel %vm2163_vm4, %v13563_v7, -inf }
 0x8a2   : > { %5792 = vmax.xlane.f32.xlu0 %v5791_v37  ;;  %v5696_v33 = vpop.f32.mrb[174].mxu1  ;;  %v13581_v37 = vpop.permute.xlu0 %6033 }
 0x8a3   : > { %v13567_v27 = vpop.f32.mrb[184].mxu0  ;;  %v10918_v35 = vpop.f32.mrb[175].mxu1 }
 0x8a4   : > { %v10911_v60 = vpop.f32.mrb[185].mxu0  ;;  %v5788_v46 = vsel %vm2163_vm4, %v13567_v27, -inf  ;;  %v13579_v33 = vpop.permute.xlu1 %6079 }
 0x8a5   : > { %5789 = vmax.xlane.f32.xlu1 %v5788_v46  ;;  %v5646_v34 = vpop.f32.mrb[186].mxu0 }
 0x8a6   : > { %v10912_v6 = vpop.f32.mrb[187].mxu0  ;;  %v13585_v46 = vpop.permute.xlu0 %6125 }
 0x8a8   : > { %v13583_v35 = vpop.permute.xlu1 %6171 }
 0x8aa   : > { %v13589_v34 = vpop.permute.xlu0 %6217 }
 0x8ab   : > { %v13571_v62 = vpop.f32.mrb[188].mxu0 }
 0x8ac   : > { %v10923_v12 = vpop.f32.mrb[189].mxu0  ;;  %v5794_v60 = vsel %vm2163_vm4, %v13571_v62, -inf }
 0x8ad   : > { %v5746_v26 = vpop.f32.mrb[190].mxu0 }
 0x8ae   : > { %v10924_v56 = vpop.f32.mrb[191].mxu0  ;;  %v13587_v26 = vpop.permute.xlu1 %6263 }
 0x8af   : > { %15037 = vst [vmem:[#allocation22_spill] sm:$0xff] %v13587_v26  ;;  %v13593_v12 = vpop.permute.xlu0 %6309 }
 0x8b2   : > { %v13591_v6 = vpop.permute.xlu1 %6355 }
 0x8b3   : > { %15038 = vst [vmem:[#allocation23_spill] sm:$0xff] %v13591_v6 }
 0x8b6   : > { %6539 = vrot.lane.b32.xlu1 %v12331_v40, %s11730_s13  ;;  %v13595_v30 = vpop.permute.xlu1 %6401 }
 0x8b7   : > { %15039 = vst [vmem:[#allocation24_spill] sm:$0xff] %v13595_v30 }
 0x8b8   : > { %6493 = vrot.lane.b32.xlu0 %v15015_v53, %s11730_s13 }
 0x8ba   : > { %v13598_v16 = vpop.permute.xlu1 %6447 }
 0x8da   : > { %5795 = vmax.xlane.f32.xlu1 %v5794_v60 }
 0x8f7   : > { %v5751_v56 = vpop.xlane.xlu0 %5750 }
 0x8f8   : > { %v5797_v60 = vsub.f32 %v13509_v18, %v5751_v56 }
 0x8fa   : > { %v5813_v50 = vmul.f32 1.442695, %v5797_v60 }
 0x8fc   : > { %11475 = vpow2.f32 %v5813_v50 }
 0x8ff   : > { %v5757_v15 = vpop.xlane.xlu0 %5756 }
 0x900   : > { %v5799_v61 = vsub.f32 %v13515_v2, %v5757_v15 }
 0x902   : > { %v5817_v22 = vmul.f32 1.442695, %v5799_v61  ;;  %v5754_v36 = vpop.xlane.xlu1 %5753 }
 0x903   : > { %v5798_v26 = vsub.f32 %v13519_v25, %v5754_v36 }
 0x904   : > { %11477 = vpow2.f32 %v5817_v22 }
 0x905   : > { %v5815_v6 = vmul.f32 1.442695, %v5798_v26 }
 0x906   : > { %v13602_v53 = vpop.eup %11475 }
 0x907   : > { %11479 = vpow2.f32 %v5815_v6  ;;  %v5845_v30 = vsel %vm2163_vm4, %v13602_v53, 0.0 }
 0x908   : > { %5846 = vadd.xlane.f32.xlu0 %v5845_v30 }
 0x90a   : > { %v5760_v18 = vpop.xlane.xlu0 %5759 }
 0x90b   : > { %v5800_v50 = vsub.f32 %v13525_v9, %v5760_v18 }
 0x90d   : > { %v5819_v56 = vmul.f32 1.442695, %v5800_v50 }
 0x90e   : > { %v13607_v60 = vpop.eup %11477  ;;  %v5763_v15 = vpop.xlane.xlu0 %5762 }
 0x90f   : > { %11481 = vpow2.f32 %v5819_v56  ;;  %v5801_v61 = vsub.f32 %v13523_v39, %v5763_v15  ;;  %v5851_v36 = vsel %vm2163_vm4, %v13607_v60, 0.0 }
 0x910   : > { %5852 = vadd.xlane.f32.xlu0 %v5851_v36 }
 0x911   : > { %v13612_v22 = vpop.eup %11479  ;;  %v5821_v2 = vmul.f32 1.442695, %v5801_v61 }
 0x912   : > { %v5766_v25 = vpop.xlane.xlu1 %5765  ;;  %v5769_v26 = vpop.xlane.xlu0 %5768  ;;  %v5848_v30 = vsel %vm2163_vm4, %v13612_v22, 0.0 }
 0x913   : > { %11483 = vpow2.f32 %v5821_v2  ;;  %v5802_v9 = vsub.f32 %v13533_v31, %v5766_v25  ;;  %v5803_v6 = vsub.f32 %v13529_v49, %v5769_v26  ;;  %5849 = vadd.xlane.f32.xlu1 %v5848_v30 }
 0x915   : > { %v5823_v18 = vmul.f32 1.442695, %v5802_v9  ;;  %v5825_v39 = vmul.f32 1.442695, %v5803_v6 }
 0x917   : > { %11485 = vpow2.f32 %v5823_v18  ;;  %v5775_v50 = vpop.xlane.xlu0 %5774 }
 0x918   : > { %11487 = vpow2.f32 %v5825_v39  ;;  %v5805_v15 = vsub.f32 %v13539_v44, %v5775_v50 }
 0x919   : > { %v13618_v56 = vpop.eup %11481 }
 0x91a   : > { %v5772_v61 = vpop.xlane.xlu1 %5771  ;;  %v5854_v36 = vsel %vm2163_vm4, %v13618_v56, 0.0  ;;  %v5829_v49 = vmul.f32 1.442695, %v5805_v15 }
 0x91b   : > { %v5804_v2 = vsub.f32 %v13543_v43, %v5772_v61  ;;  %5855 = vadd.xlane.f32.xlu1 %v5854_v36 }
 0x91d   : > { %v13624_v31 = vpop.eup %11483  ;;  %v5827_v25 = vmul.f32 1.442695, %v5804_v2 }
 0x91e   : > { %v5857_v26 = vsel %vm2163_vm4, %v13624_v31, 0.0 }
 0x91f   : > { %11489 = vpow2.f32 %v5827_v25  ;;  %5858 = vadd.xlane.f32.xlu0 %v5857_v26  ;;  %v5781_v30 = vpop.xlane.xlu0 %5780 }
 0x920   : > { %v5807_v9 = vsub.f32 %v13547_v3, %v5781_v30  ;;  %11491 = vpow2.f32 %v5829_v49 }
 0x921   : > { %v13629_v44 = vpop.eup %11485 }
 0x922   : > { %v13631_v6 = vpop.eup %11487  ;;  %v5833_v18 = vmul.f32 1.442695, %v5807_v9  ;;  %v5778_v43 = vpop.xlane.xlu1 %5777  ;;  %v5860_v39 = vsel %vm2163_vm4, %v13629_v44, 0.0 }
 0x923   : > { %v5806_v50 = vsub.f32 %v13551_v47, %v5778_v43  ;;  %5861 = vadd.xlane.f32.xlu1 %v5860_v39  ;;  %v5863_v15 = vsel %vm2163_vm4, %v13631_v6, 0.0 }
 0x924   : > { %5864 = vadd.xlane.f32.xlu0 %v5863_v15  ;;  %11493 = vpow2.f32 %v5833_v18 }
 0x925   : > { %v5831_v61 = vmul.f32 1.442695, %v5806_v50 }
 0x927   : > { %11495 = vpow2.f32 %v5831_v61  ;;  %v5787_v3 = vpop.xlane.xlu0 %5786 }
 0x928   : > { %v5809_v36 = vsub.f32 %v13555_v29, %v5787_v3 }
 0x929   : > { %v13639_v2 = vpop.eup %11489 }
 0x92a   : > { %v5837_v49 = vmul.f32 1.442695, %v5809_v36  ;;  %v5784_v25 = vpop.xlane.xlu1 %5783  ;;  %v5866_v26 = vsel %vm2163_vm4, %v13639_v2, 0.0  ;;  %v13643_v30 = vpop.eup %11491 }
 0x92b   : > { %v5808_v47 = vsub.f32 %v13559_v63, %v5784_v25  ;;  %5867 = vadd.xlane.f32.xlu1 %v5866_v26  ;;  %v5869_v18 = vsel %vm2163_vm4, %v13643_v30, 0.0 }
 0x92c   : > { %11497 = vpow2.f32 %v5837_v49 }
 0x92d   : > { %v5835_v9 = vmul.f32 1.442695, %v5808_v47 }
 0x92e   : > { %v13648_v43 = vpop.eup %11493 }
 0x92f   : > { %11499 = vpow2.f32 %v5835_v9  ;;  %5870 = vadd.xlane.f32.xlu1 %v5869_v18  ;;  %v5875_v15 = vsel %vm2163_vm4, %v13648_v43, 0.0  ;;  %v5793_v47 = vpop.xlane.xlu0 %5792 }
 0x930   : > { %v5811_v9 = vsub.f32 %v13563_v7, %v5793_v47 }
 0x931   : > { %v13650_v29 = vpop.eup %11495 }
 0x932   : > { %v5790_v39 = vpop.xlane.xlu1 %5789  ;;  %v5872_v50 = vsel %vm2163_vm4, %v13650_v29, 0.0  ;;  %v5841_v18 = vmul.f32 1.442695, %v5811_v9 }
 0x933   : > { %v5810_v63 = vsub.f32 %v13567_v27, %v5790_v39  ;;  %5873 = vadd.xlane.f32.xlu0 %v5872_v50  ;;  %5876 = vadd.xlane.f32.xlu1 %v5875_v15 }
 0x935   : > { %v5839_v61 = vmul.f32 1.442695, %v5810_v63 }
 0x936   : > { %v13657_v3 = vpop.eup %11497  ;;  %v13674_v39 = vpop.permute.xlu1 %6539 }
 0x937   : > { %11501 = vpow2.f32 %v5839_v61  ;;  %v5881_v36 = vsel %vm2163_vm4, %v13657_v3, 0.0 }
 0x938   : > { %5882 = vadd.xlane.f32.xlu1 %v5881_v36  ;;  %11503 = vpow2.f32 %v5841_v18 }
 0x939   : > { %v13661_v49 = vpop.eup %11499 }
 0x93a   : > { %v5878_v25 = vsel %vm2163_vm4, %v13661_v49, 0.0 }
 0x93b   : > { %5879 = vadd.xlane.f32.xlu0 %v5878_v25 }
 0x941   : > { %v13665_v26 = vpop.eup %11501 }
 0x942   : > { %v5884_v27 = vsel %vm2163_vm4, %v13665_v26, 0.0  ;;  %v13677_v63 = vpop.eup %11503 }
 0x943   : > { %5885 = vadd.xlane.f32.xlu0 %v5884_v27  ;;  %v5887_v36 = vsel %vm2163_vm4, %v13677_v63, 0.0 }
 0x949   : > { %6631 = vrot.lane.b32.xlu1 %v12350_v54, %s11730_s13 }
 0x959   : > { %6585 = vrot.lane.b32.xlu0 %v12354_v32, %s11730_s13 }
 0x967   : > { %v5796_v50 = vpop.xlane.xlu1 %5795 }
 0x968   : > { %v5812_v15 = vsub.f32 %v13571_v62, %v5796_v50  ;;  %v13697_v62 = vpop.permute.xlu0 %6493 }
 0x96a   : > { %v5843_v61 = vmul.f32 1.442695, %v5812_v15 }
 0x96c   : > { %11505 = vpow2.f32 %v5843_v61 }
 0x96d   : > { %5888 = vadd.xlane.f32.xlu1 %v5887_v36 }
 0x976   : > { %v13681_v25 = vpop.eup %11505 }
 0x977   : > { %v5890_v7 = vsel %vm2163_vm4, %v13681_v25, 0.0 }
 0x978   : > { %5891 = vadd.xlane.f32.xlu0 %v5890_v7  ;;  %v15042_v7 = vld [vmem:[#allocation4_spill] sm:$0xff] }
 0x97e   : > { %6810 = vrot.lane.b32.xlu1 %v12442_v45, %s11731_s14 }
 0x982   : > { %6808 = vrot.lane.b32.xlu1 %v12483_v17, %s11731_s14 }
 0x986   : > { %6910 = vrot.lane.b32.xlu1 %v12105_v14, %s11731_s14 }
 0x98a   : > { %6908 = vrot.lane.b32.xlu1 %v12504_v55, %s11731_s14 }
 0x98e   : > { %6760 = vrot.lane.b32.xlu0 %v12447_v20, %s11731_s14  ;;  %7010 = vrot.lane.b32.xlu1 %v12125_v41, %s11731_s14 }
 0x992   : > { %6758 = vrot.lane.b32.xlu0 %v12467_v38, %s11731_s14  ;;  %7008 = vrot.lane.b32.xlu1 %v12526_v52, %s11731_s14 }
 0x995   : > { %v5847_v17 = vpop.xlane.xlu0 %5846 }
 0x996   : > { %11507 = vrcp.f32 %v5847_v17  ;;  %6860 = vrot.lane.b32.xlu0 %v12109_v24, %s11731_s14  ;;  %7110 = vrot.lane.b32.xlu1 %v12142_v0, %s11731_s14 }
 0x99a   : > { %6858 = vrot.lane.b32.xlu0 %v12493_v4, %s11731_s14  ;;  %7108 = vrot.lane.b32.xlu1 %v12537_v5, %s11731_s14 }
 0x99d   : > { %v5853_v55 = vpop.xlane.xlu0 %5852 }
 0x99e   : > { %11509 = vrcp.f32 %v5853_v55  ;;  %6960 = vrot.lane.b32.xlu0 %v12129_v42, %s11731_s14  ;;  %7210 = vrot.lane.b32.xlu1 %v12263_v57, %s11731_s14 }
 0x9a0   : > { %v11508_v38 = vpop.eup %11507  ;;  %v5850_v52 = vpop.xlane.xlu1 %5849 }
 0x9a1   : > { %11511 = vrcp.f32 %v5850_v52  ;;  %v5909_v27 = vmul.f32 %v11508_v38, %v13602_v53 }
 0x9a2   : > { %6958 = vrot.lane.b32.xlu0 %v12515_v51, %s11731_s14  ;;  %7208 = vrot.lane.b32.xlu1 %v12548_v59, %s11731_s14 }
 0x9a3   : > { %v5925_v4 = vpack.c.bf16 %v5909_v27, %v5909_v27  ;;  %v15044_v27 = vld [vmem:[#allocation5_spill] sm:$0xff] }
 0x9a5   : > { %10928 = vmatmul.mubr.msk.bf16.vlgmr.msra.gmra.mrb[176].mxu1 %vm2163_vm4, %v5925_v4 }
 0x9a6   : > { %10938 = vmatpush3.bf16.msra.mxu1 %v13581_v37  ;;  %7060 = vrot.lane.b32.xlu0 %v12148_v28, %s11731_s14 }
 0x9a7   : > { %7310 = vrot.lane.b32.xlu1 %v12300_v23, %s11731_s14  ;;  %10939 = vmatprep.mubr.msk.bf16.mxu1 %vm11726_vm3, %v15006_v58 }
 0x9a8   : > { %v11510_v5 = vpop.eup %11509  ;;  %v5856_v53 = vpop.xlane.xlu1 %5855  ;;  %10949 = vmatprep.subr.bf16.mxu1 %v15006_v58 }
 0x9a9   : > { %11513 = vrcp.f32 %v5856_v53  ;;  %v5911_v51 = vmul.f32 %v11510_v5, %v13607_v60 }
 0x9aa   : > { %7058 = vrot.lane.b32.xlu0 %v12372_v19, %s11731_s14 }
 0x9ab   : > { %v11512_v59 = vpop.eup %11511  ;;  %7308 = vrot.lane.b32.xlu1 %v12559_v1, %s11731_s14  ;;  %v5927_v37 = vpack.c.bf16 %v5911_v51, %v5911_v51 }
 0x9ac   : > { %v5859_v47 = vpop.xlane.xlu0 %5858  ;;  %v5910_v9 = vmul.f32 %v11512_v59, %v13612_v22 }
 0x9ad   : > { %11515 = vrcp.f32 %v5859_v47  ;;  %10940 = vmatmul.mubr.msk.bf16.vlgmr.msra.gmra.mrb[180].mxu1 %vm2163_vm4, %v5927_v37 }
 0x9ae   : > { %10950 = vmatpush3.bf16.msra.mxu1 %v13585_v46  ;;  %7160 = vrot.lane.b32.xlu0 %v12269_v13, %s11731_s14  ;;  %v5926_v60 = vpack.c.bf16 %v5910_v9, %v5910_v9 }
 0x9af   : > { %7410 = vrot.lane.b32.xlu1 %v12331_v40, %s11731_s14  ;;  %10951 = vmatprep.mubr.msk.bf16.mxu1 %vm11726_vm3, %v15006_v58 }
 0x9b0   : > { %10934 = vmatmul.mubr.msk.bf16.vlgmr.msra.gmra.mrb[192].mxu0 %vm2163_vm4, %v5926_v60  ;;  %v5862_v19 = vpop.xlane.xlu1 %5861  ;;  %10961 = vmatprep.subr.bf16.mxu1 %v15006_v58 }
 0x9b1   : > { %10944 = vmatpush3.bf16.msra.mxu0 %v13579_v33  ;;  %11517 = vrcp.f32 %v5862_v19  ;;  %v5865_v1 = vpop.xlane.xlu0 %5864  ;;  %10945 = vmatprep.mubr.msk.bf16.mxu0 %vm11726_vm3, %v15006_v58 }
 0x9b2   : > { %11519 = vrcp.f32 %v5865_v1  ;;  %7158 = vrot.lane.b32.xlu0 %v12396_v8, %s11731_s14  ;;  %10955 = vmatprep.subr.bf16.mxu0 %v15006_v58 }
 0x9b3   : > { %v11514_v46 = vpop.eup %11513  ;;  %7408 = vrot.lane.b32.xlu1 %v12570_v10, %s11731_s14 }
 0x9b4   : > { %v5912_v22 = vmul.f32 %v11514_v46, %v13618_v56 }
 0x9b6   : > { %7260 = vrot.lane.b32.xlu0 %v12304_v21, %s11731_s14  ;;  %v5928_v33 = vpack.c.bf16 %v5912_v22, %v5912_v22 }
 0x9b7   : > { %v11516_v18 = vpop.eup %11515  ;;  %7510 = vrot.lane.b32.xlu1 %v12350_v54, %s11731_s14 }
 0x9b8   : > { %10946 = vmatmul.mubr.msk.bf16.vlgmr.msra.gmra.mrb[196].mxu0 %vm2163_vm4, %v5928_v33  ;;  %v5868_v50 = vpop.xlane.xlu1 %5867  ;;  %v5913_v8 = vmul.f32 %v11516_v18, %v13624_v31 }
 0x9b9   : > { %10956 = vmatpush3.bf16.msra.mxu0 %v13583_v35  ;;  %11521 = vrcp.f32 %v5868_v50  ;;  %10957 = vmatprep.mubr.msk.bf16.mxu0 %vm11726_vm3, %v15006_v58 }
 0x9ba   : > { %7258 = vrot.lane.b32.xlu0 %v12414_v48, %s11731_s14  ;;  %v5929_v10 = vpack.c.bf16 %v5913_v8, %v5913_v8  ;;  %10967 = vmatprep.subr.bf16.mxu0 %v15006_v58  ;;  %v15040_v48 = vld [vmem:[#allocation3_spill] sm:$0xff] }
 0x9bb   : > { %v11518_v56 = vpop.eup %11517  ;;  %7508 = vrot.lane.b32.xlu1 %v12581_v11, %s11731_s14 }
 0x9bc   : > { %v11520_v15 = vpop.eup %11519  ;;  %v5871_v61 = vpop.xlane.xlu1 %5870  ;;  %10952 = vmatmul.mubr.msk.bf16.vlgmr.msra.gmra.mrb[184].mxu1 %vm2163_vm4, %v5929_v10  ;;  %v5914_v35 = vmul.f32 %v11518_v56, %v13629_v44 }
 0x9bd   : > { %11523 = vrcp.f32 %v5871_v61  ;;  %10962 = vmatpush3.bf16.msra.mxu1 %v13589_v34  ;;  %10963 = vmatprep.mubr.msk.bf16.mxu1 %vm11726_vm3, %v15006_v58  ;;  %v5915_v11 = vmul.f32 %v11520_v15, %v13631_v6  ;;  %v15041_v34 = vld [vmem:[#allocation22_spill] sm:$0xff] }
 0x9be   : > { %7360 = vrot.lane.b32.xlu0 %v15040_v48, %s11731_s14  ;;  %v5930_v31 = vpack.c.bf16 %v5914_v35, %v5914_v35  ;;  %10973 = vmatprep.subr.bf16.mxu1 %v15006_v58 }
 0x9bf   : > { %7796 = vrot.lane.b32.xlu1 %v12442_v45, %s11732_s28  ;;  %v5931_v17 = vpack.c.bf16 %v5915_v11, %v5915_v11 }
 0x9c0   : > { %10958 = vmatmul.mubr.msk.bf16.vlgmr.msra.gmra.mrb[200].mxu0 %vm2163_vm4, %v5930_v31  ;;  %v5877_v44 = vpop.xlane.xlu1 %5876  ;;  %v5874_v36 = vpop.xlane.xlu0 %5873 }
 0x9c1   : > { %10968 = vmatpush3.bf16.msra.mxu0 %v15041_v34  ;;  %11525 = vrcp.f32 %v5877_v44  ;;  %10969 = vmatprep.mubr.msk.bf16.mxu0 %vm11726_vm3, %v15006_v58 }
 0x9c2   : > { %11527 = vrcp.f32 %v5874_v36  ;;  %7358 = vrot.lane.b32.xlu0 %v15042_v7, %s11731_s14  ;;  %10979 = vmatprep.subr.bf16.mxu0 %v15006_v58 }
 0x9c3   : > { %v11522_v6 = vpop.eup %11521  ;;  %7888 = vrot.lane.b32.xlu1 %v12105_v14, %s11732_s28 }
 0x9c4   : > { %10964 = vmatmul.mubr.msk.bf16.vlgmr.msra.gmra.mrb[188].mxu1 %vm2163_vm4, %v5931_v17  ;;  %v5916_v45 = vmul.f32 %v11522_v6, %v13639_v2  ;;  %v15043_v2 = vld [vmem:[#allocation23_spill] sm:$0xff] }
 0x9c5   : > { %10974 = vmatpush3.bf16.msra.mxu1 %v13593_v12  ;;  %v5883_v55 = vpop.xlane.xlu1 %5882  ;;  %10975 = vmatprep.mubr.msk.bf16.mxu1 %vm11726_vm3, %v15006_v58 }
 0x9c6   : > { %7460 = vrot.lane.b32.xlu0 %v12354_v32, %s11731_s14  ;;  %v5932_v38 = vpack.c.bf16 %v5916_v45, %v5916_v45  ;;  %10985 = vmatprep.subr.bf16.mxu1 %v15006_v58  ;;  %11529 = vrcp.f32 %v5883_v55 }
 0x9c7   : > { %v11524_v52 = vpop.eup %11523  ;;  %7980 = vrot.lane.b32.xlu1 %v12125_v41, %s11732_s28 }
 0x9c8   : > { %10970 = vmatmul.mubr.msk.bf16.vlgmr.msra.gmra.mrb[204].mxu0 %vm2163_vm4, %v5932_v38  ;;  %v5880_v14 = vpop.xlane.xlu0 %5879  ;;  %v5917_v12 = vmul.f32 %v11524_v52, %v13643_v30  ;;  %v15045_v30 = vld [vmem:[#allocation24_spill] sm:$0xff] }
 0x9c9   : > { %10980 = vmatpush3.bf16.msra.mxu0 %v15043_v2  ;;  %11531 = vrcp.f32 %v5880_v14  ;;  %10981 = vmatprep.mubr.msk.bf16.mxu0 %vm11726_vm3, %v15006_v58 }
 0x9ca   : > { %7458 = vrot.lane.b32.xlu0 %v15044_v27, %s11731_s14  ;;  %v5933_v4 = vpack.c.bf16 %v5917_v12, %v5917_v12  ;;  %10991 = vmatprep.subr.bf16.mxu0 %v15006_v58 }
 0x9cb   : > { %v11526_v5 = vpop.eup %11525  ;;  %8072 = vrot.lane.b32.xlu1 %v12142_v0, %s11732_s28 }
 0x9cc   : > { %v11528_v41 = vpop.eup %11527  ;;  %10976 = vmatmul.mubr.msk.bf16.vlgmr.msra.gmra.mrb[192].mxu1 %vm2163_vm4, %v5933_v4  ;;  %v5919_v51 = vmul.f32 %v11526_v5, %v13648_v43 }
 0x9cd   : > { %10986 = vmatpush3.bf16.msra.mxu1 %v15045_v30  ;;  %v5918_v53 = vmul.f32 %v11528_v41, %v13650_v29  ;;  %10987 = vmatprep.mubr.msk.bf16.mxu1 %vm11726_vm3, %v15006_v58 }
 0x9ce   : > { %7750 = vrot.lane.b32.xlu0 %v12447_v20, %s11732_s28  ;;  %10997 = vmatprep.subr.bf16.mxu1 %v15006_v58  ;;  %v5935_v29 = vpack.c.bf16 %v5919_v51, %v5919_v51 }
 0x9cf   : > { %v5934_v59 = vpack.c.bf16 %v5918_v53, %v5918_v53 }
 0x9d0   : > { %v5886_v37 = vpop.xlane.xlu0 %5885  ;;  %v11530_v0 = vpop.eup %11529 }
 0x9d1   : > { %10982 = vmatmul.mubr.msk.bf16.vlgmr.msra.gmra.mrb[208].mxu0 %vm2163_vm4, %v5934_v59  ;;  %11533 = vrcp.f32 %v5886_v37 }
 0x9d2   : > { %10992 = vmatpush3.bf16.msra.mxu0 %v13598_v16  ;;  %7842 = vrot.lane.b32.xlu0 %v12109_v24, %s11732_s28  ;;  %v5921_v16 = vmul.f32 %v11530_v0, %v13657_v3 }
 0x9d3   : > { %v11532_v47 = vpop.eup %11531  ;;  %10993 = vmatprep.mubr.msk.bf16.mxu0 %vm11726_vm3, %v15006_v58  ;;  %11003 = vmatprep.subr.bf16.mxu0 %v15006_v58 }
 0x9d4   : > { %10988 = vmatmul.mubr.msk.bf16.vlgmr.msra.gmra.mrb[196].mxu1 %vm2163_vm4, %v5935_v29  ;;  %v5920_v20 = vmul.f32 %v11532_v47, %v13661_v49  ;;  %v5937_v43 = vpack.c.bf16 %v5921_v16, %v5921_v16 }
 0x9d5   : > { %10998 = vmatpush3.bf16.msra.mxu1 %v13697_v62  ;;  %10999 = vmatprep.mubr.msk.bf16.mxu1 %vm11726_vm3, %v15006_v58 }
 0x9d6   : > { %7934 = vrot.lane.b32.xlu0 %v12129_v42, %s11732_s28  ;;  %v5936_v24 = vpack.c.bf16 %v5920_v20, %v5920_v20  ;;  %11009 = vmatprep.subr.bf16.mxu1 %v15006_v58  ;;  %v6586_v42 = vpop.permute.xlu0 %6585 }
 0x9d9   : > { %10994 = vmatmul.mubr.msk.bf16.vlgmr.msra.gmra.mrb[212].mxu0 %vm2163_vm4, %v5936_v24 }
 0x9da   : > { %11004 = vmatpush3.bf16.msra.mxu0 %v13674_v39  ;;  %8026 = vrot.lane.b32.xlu0 %v12148_v28, %s11732_s28  ;;  %v6632_v28 = vpop.permute.xlu1 %6631 }
 0x9db   : > { %v11534_v49 = vpop.eup %11533  ;;  %11005 = vmatprep.mubr.msk.bf16.mxu0 %vm11726_vm3, %v15006_v58  ;;  %11015 = vmatprep.subr.bf16.mxu0 %v15006_v58 }
 0x9dc   : > { %11000 = vmatmul.mubr.msk.bf16.vlgmr.msra.gmra.mrb[200].mxu1 %vm2163_vm4, %v5937_v43  ;;  %v5922_v62 = vmul.f32 %v11534_v49, %v13665_v26 }
 0x9dd   : > { %11010 = vmatpush3.bf16.msra.mxu1 %v6586_v42  ;;  %11011 = vmatprep.mubr.msk.bf16.mxu1 %vm11726_vm3, %v15006_v58 }
 0x9de   : > { %v5938_v3 = vpack.c.bf16 %v5922_v62, %v5922_v62  ;;  %11021 = vmatprep.subr.bf16.mxu1 %v15006_v58 }
 0x9e1   : > { %11006 = vmatmul.mubr.msk.bf16.vlgmr.msra.gmra.mrb[216].mxu0 %vm2163_vm4, %v5938_v3 }
 0x9e2   : > { %11016 = vmatpush3.bf16.msra.mxu0 %v6632_v28  ;;  %11017 = vmatprep.mubr.msk.bf16.mxu0 %vm11726_vm3, %v15006_v58 }
 0x9e3   : > { %11027 = vmatprep.subr.bf16.mxu0 %v15006_v58 }
 0x9fa   : > { %v5889_v39 = vpop.xlane.xlu1 %5888 }
 0x9fb   : > { %11535 = vrcp.f32 %v5889_v39 }
 0x9fe   : > { %v6811_v9 = vpop.permute.xlu1 %6810 }
 0x9ff   : > { %v6816_v11 = vsel %vm1426_vm2, %v6811_v9, 0 }
 0xa02   : > { %v6809_v26 = vpop.permute.xlu1 %6808 }
 0xa05   : > { %v11536_v60 = vpop.eup %11535  ;;  %v5892_v19 = vpop.xlane.xlu0 %5891 }
 0xa06   : > { %11537 = vrcp.f32 %v5892_v19  ;;  %v6911_v1 = vpop.permute.xlu1 %6910  ;;  %v5923_v46 = vmul.f32 %v11536_v60, %v13677_v63 }
 0xa07   : > { %v6916_v7 = vsel %vm1426_vm2, %v6911_v1, 0 }
 0xa08   : > { %v5939_v22 = vpack.c.bf16 %v5923_v46, %v5923_v46 }
 0xa09   : > { %v6761_v33 = vpop.permute.xlu0 %6760 }
 0xa0a   : > { %v6766_v18 = vsel %vm1426_vm2, %v6761_v33, 0  ;;  %v6909_v50 = vpop.permute.xlu1 %6908  ;;  %11012 = vmatmul.mubr.msk.bf16.vlgmr.msra.gmra.mrb[204].mxu1 %vm2163_vm4, %v5939_v22 }
 0xa0b   : > { %11022 = vmatpush3.bf16.xpose.msra.mxu1 %v6766_v18  ;;  %11023 = vmatprep.mubr.msk.bf16.mxu1 %vm11726_vm3, %v15006_v58 }
 0xa0c   : > { %11033 = vmatprep.subr.bf16.mxu1 %v15006_v58 }
 0xa0d   : > { %v6759_v8 = vpop.permute.xlu0 %6758 }
 0xa0e   : > { %v7011_v10 = vpop.permute.xlu1 %7010 }
 0xa0f   : > { %v7016_v38 = vsel %vm1426_vm2, %v7011_v10, 0 }
 0xa10   : > { %v11538_v56 = vpop.eup %11537 }
 0xa11   : > { %v6861_v15 = vpop.permute.xlu0 %6860  ;;  %v5924_v61 = vmul.f32 %v11538_v56, %v13681_v25 }
 0xa12   : > { %v6866_v63 = vsel %vm1426_vm2, %v6861_v15, 0  ;;  %11024 = vmatmul.mubr.msk.bf16.vlgmr.msra.gmra.mrb[208].mxu1 %vm1426_vm2, %v6759_v8  ;;  %v7009_v35 = vpop.permute.xlu1 %7008 }
 0xa13   : > { %11034 = vmatpush3.bf16.xpose.msra.mxu1 %v6866_v63  ;;  %v5940_v31 = vpack.c.bf16 %v5924_v61, %v5924_v61  ;;  %11035 = vmatprep.mubr.msk.bf16.mxu1 %vm11726_vm3, %v15006_v58 }
 0xa14   : > { %11045 = vmatprep.subr.bf16.mxu1 %v15006_v58 }
 0xa15   : > { %11018 = vmatmul.mubr.msk.bf16.vlgmr.msra.gmra.mrb[220].mxu0 %vm2163_vm4, %v5940_v31  ;;  %v6859_v44 = vpop.permute.xlu0 %6858 }
 0xa16   : > { %11028 = vmatpush3.bf16.xpose.msra.mxu0 %v6816_v11  ;;  %11029 = vmatprep.mubr.msk.bf16.mxu0 %vm11726_vm3, %v15006_v58  ;;  %v7111_v25 = vpop.permute.xlu1 %7110 }
 0xa17   : > { %11039 = vmatprep.subr.bf16.mxu0 %v15006_v58  ;;  %v7116_v4 = vsel %vm1426_vm2, %v7111_v25, 0 }
 0xa19   : > { %v6961_v36 = vpop.permute.xlu0 %6960 }
 0xa1a   : > { %v6966_v34 = vsel %vm1426_vm2, %v6961_v36, 0  ;;  %11036 = vmatmul.mubr.msk.bf16.vlgmr.msra.gmra.mrb[212].mxu1 %vm1426_vm2, %v6859_v44  ;;  %v7109_v6 = vpop.permute.xlu1 %7108 }
 0xa1b   : > { %11046 = vmatpush3.bf16.xpose.msra.mxu1 %v6966_v34  ;;  %11047 = vmatprep.mubr.msk.bf16.mxu1 %vm11726_vm3, %v15006_v58 }
 0xa1c   : > { %11057 = vmatprep.subr.bf16.mxu1 %v15006_v58 }
 0xa1d   : > { %11030 = vmatmul.mubr.msk.bf16.vlgmr.msra.gmra.mrb[224].mxu0 %vm1426_vm2, %v6809_v26  ;;  %v6959_v17 = vpop.permute.xlu0 %6958 }
 0xa1e   : > { %11040 = vmatpush3.bf16.xpose.msra.mxu0 %v6916_v7  ;;  %11041 = vmatprep.mubr.msk.bf16.mxu0 %vm11726_vm3, %v15006_v58  ;;  %v7211_v52 = vpop.permute.xlu1 %7210 }
 0xa1f   : > { %11051 = vmatprep.subr.bf16.mxu0 %v15006_v58  ;;  %v7216_v51 = vsel %vm1426_vm2, %v7211_v52, 0 }
 0xa21   : > { %v7061_v45 = vpop.permute.xlu0 %7060 }
 0xa22   : > { %v7066_v55 = vsel %vm1426_vm2, %v7061_v45, 0  ;;  %11048 = vmatmul.mubr.msk.bf16.vlgmr.msra.gmra.mrb[216].mxu1 %vm1426_vm2, %v6959_v17  ;;  %v7209_v27 = vpop.permute.xlu1 %7208 }
 0xa23   : > { %11058 = vmatpush3.bf16.xpose.msra.mxu1 %v7066_v55  ;;  %11059 = vmatprep.mubr.msk.bf16.mxu1 %vm11726_vm3, %v15006_v58 }
 0xa24   : > { %11069 = vmatprep.subr.bf16.mxu1 %v15006_v58 }
 0xa25   : > { %11042 = vmatmul.mubr.msk.bf16.vlgmr.msra.gmra.mrb[228].mxu0 %vm1426_vm2, %v6909_v50  ;;  %v7059_v14 = vpop.permute.xlu0 %7058 }
 0xa26   : > { %11052 = vmatpush3.bf16.xpose.msra.mxu0 %v7016_v38  ;;  %11053 = vmatprep.mubr.msk.bf16.mxu0 %vm11726_vm3, %v15006_v58  ;;  %v7311_v41 = vpop.permute.xlu1 %7310 }
 0xa27   : > { %11063 = vmatprep.subr.bf16.mxu0 %v15006_v58  ;;  %v7316_v47 = vsel %vm1426_vm2, %v7311_v41, 0 }
 0xa29   : > { %v7161_v12 = vpop.permute.xlu0 %7160 }
 0xa2a   : > { %v7166_v2 = vsel %vm1426_vm2, %v7161_v12, 0  ;;  %11060 = vmatmul.mubr.msk.bf16.vlgmr.msra.gmra.mrb[220].mxu1 %vm1426_vm2, %v7059_v14  ;;  %v7309_v37 = vpop.permute.xlu1 %7308 }
 0xa2b   : > { %11070 = vmatpush3.bf16.xpose.msra.mxu1 %v7166_v2  ;;  %11071 = vmatprep.mubr.msk.bf16.mxu1 %vm11726_vm3, %v15006_v58 }
 0xa2c   : > { %11081 = vmatprep.subr.bf16.mxu1 %v15006_v58 }
 0xa2d   : > { %11054 = vmatmul.mubr.msk.bf16.vlgmr.msra.gmra.mrb[232].mxu0 %vm1426_vm2, %v7009_v35  ;;  %v7159_v5 = vpop.permute.xlu0 %7158 }
 0xa2e   : > { %11064 = vmatpush3.bf16.xpose.msra.mxu0 %v7116_v4  ;;  %11065 = vmatprep.mubr.msk.bf16.mxu0 %vm11726_vm3, %v15006_v58  ;;  %v7411_v20 = vpop.permute.xlu1 %7410 }
 0xa2f   : > { %11075 = vmatprep.subr.bf16.mxu0 %v15006_v58  ;;  %v7416_v42 = vsel %vm1426_vm2, %v7411_v20, 0 }
 0xa31   : > { %v7261_v30 = vpop.permute.xlu0 %7260 }
 0xa32   : > { %v7266_v53 = vsel %vm1426_vm2, %v7261_v30, 0  ;;  %11072 = vmatmul.mubr.msk.bf16.vlgmr.msra.gmra.mrb[224].mxu1 %vm1426_vm2, %v7159_v5  ;;  %v7409_v49 = vpop.permute.xlu1 %7408 }
 0xa33   : > { %11082 = vmatpush3.bf16.xpose.msra.mxu1 %v7266_v53  ;;  %11083 = vmatprep.mubr.msk.bf16.mxu1 %vm11726_vm3, %v15006_v58 }
 0xa34   : > { %11093 = vmatprep.subr.bf16.mxu1 %v15006_v58 }
 0xa35   : > { %11066 = vmatmul.mubr.msk.bf16.vlgmr.msra.gmra.mrb[236].mxu0 %vm1426_vm2, %v7109_v6  ;;  %v7259_v59 = vpop.permute.xlu0 %7258 }
 0xa36   : > { %11076 = vmatpush3.bf16.xpose.msra.mxu0 %v7216_v51  ;;  %11077 = vmatprep.mubr.msk.bf16.mxu0 %vm11726_vm3, %v15006_v58  ;;  %v7511_v3 = vpop.permute.xlu1 %7510 }
 0xa37   : > { %11087 = vmatprep.subr.bf16.mxu0 %v15006_v58  ;;  %v7516_v39 = vsel %vm1426_vm2, %v7511_v3, 0 }
 0xa39   : > { %v7361_v0 = vpop.permute.xlu0 %7360 }
 0xa3a   : > { %v7366_v29 = vsel %vm1426_vm2, %v7361_v0, 0  ;;  %11084 = vmatmul.mubr.msk.bf16.vlgmr.msra.gmra.mrb[228].mxu1 %vm1426_vm2, %v7259_v59  ;;  %v7509_v9 = vpop.permute.xlu1 %7508 }
 0xa3b   : > { %11094 = vmatpush3.bf16.xpose.msra.mxu1 %v7366_v29  ;;  %11095 = vmatprep.mubr.msk.bf16.mxu1 %vm11726_vm3, %v15006_v58 }
 0xa3c   : > { %11105 = vmatprep.subr.bf16.mxu1 %v15006_v58 }
 0xa3d   : > { %11078 = vmatmul.mubr.msk.bf16.vlgmr.msra.gmra.mrb[240].mxu0 %vm1426_vm2, %v7209_v27  ;;  %v7359_v24 = vpop.permute.xlu0 %7358 }
 0xa3e   : > { %11088 = vmatpush3.bf16.xpose.msra.mxu0 %v7316_v47  ;;  %11089 = vmatprep.mubr.msk.bf16.mxu0 %vm11726_vm3, %v15006_v58  ;;  %v7797_v26 = vpop.permute.xlu1 %7796 }
 0xa3f   : > { %11099 = vmatprep.subr.bf16.mxu0 %v15006_v58 }
 0xa41   : > { %v7461_v16 = vpop.permute.xlu0 %7460 }
 0xa42   : > { %v7466_v43 = vsel %vm1426_vm2, %v7461_v16, 0  ;;  %11096 = vmatmul.mubr.msk.bf16.vlgmr.msra.gmra.mrb[232].mxu1 %vm1426_vm2, %v7359_v24 }
 0xa43   : > { %11106 = vmatpush3.bf16.xpose.msra.mxu1 %v7466_v43  ;;  %11107 = vmatprep.mubr.msk.bf16.mxu1 %vm11726_vm3, %v15006_v58 }
 0xa44   : > { %11117 = vmatprep.subr.bf16.mxu1 %v15006_v58 }
 0xa45   : > { %11090 = vmatmul.mubr.msk.bf16.vlgmr.msra.gmra.mrb[244].mxu0 %vm1426_vm2, %v7309_v37  ;;  %v7459_v62 = vpop.permute.xlu0 %7458 }
 0xa46   : > { %11100 = vmatpush3.bf16.xpose.msra.mxu0 %v7416_v42  ;;  %11101 = vmatprep.mubr.msk.bf16.mxu0 %vm11726_vm3, %v15006_v58 }
 0xa47   : > { %11111 = vmatprep.subr.bf16.mxu0 %v15006_v58 }
 0xa49   : > { %v7751_v28 = vpop.permute.xlu0 %7750 }
 0xa4a   : > { %11108 = vmatmul.mubr.msk.bf16.vlgmr.msra.gmra.mrb[236].mxu1 %vm1426_vm2, %v7459_v62 }
 0xa4b   : > { %11118 = vmatpush3.bf16.msra.mxu1 %v7751_v28  ;;  %11119 = vmatprep.mubr.msk.bf16.mxu1 %vm11726_vm3, %v15006_v58 }
 0xa4c   : > { %11129 = vmatprep.subr.bf16.mxu1 %v15006_v58 }
 0xa4d   : > { %11102 = vmatmul.mubr.msk.bf16.vlgmr.msra.gmra.mrb[248].mxu0 %vm1426_vm2, %v7409_v49 }
 0xa4e   : > { %11112 = vmatpush3.bf16.xpose.msra.mxu0 %v7516_v39  ;;  %11113 = vmatprep.mubr.msk.bf16.mxu0 %vm11726_vm3, %v15006_v58 }
 0xa4f   : > { %11123 = vmatprep.subr.bf16.mxu0 %v15006_v58 }
 0xa55   : > { %11114 = vmatmul.mubr.msk.bf16.vlgmr.msra.gmra.mrb[252].mxu0 %vm1426_vm2, %v7509_v9 }
 0xa56   : > { %11124 = vmatpush3.bf16.msra.mxu0 %v7797_v26  ;;  %11125 = vmatprep.mubr.msk.bf16.mxu0 %vm11726_vm3, %v15006_v58 }
 0xa57   : > { %11135 = vmatprep.subr.bf16.mxu0 %v15006_v58 }
 0xa78   : > { %v13939_v60 = vpop.f32.mrb[176].mxu1 }
 0xa79   : > { %v10929_v19 = vpop.f32.mrb[177].mxu1 }
 0xa7a   : > { %v5984_v1 = vpop.f32.mrb[178].mxu1 }
 0xa7b   : > { %v10930_v46 = vpop.f32.mrb[179].mxu1 }
 0xa80   : > { %v13941_v22 = vpop.f32.mrb[180].mxu1 }
 0xa81   : > { %v10941_v33 = vpop.f32.mrb[181].mxu1 }
 0xa82   : > { %v6076_v18 = vpop.f32.mrb[182].mxu1 }
 0xa83   : > { %v13943_v50 = vpop.f32.mrb[192].mxu0  ;;  %v10942_v8 = vpop.f32.mrb[183].mxu1 }
 0xa84   : > { %v10935_v10 = vpop.f32.mrb[193].mxu0 }
 0xa85   : > { %v6030_v56 = vpop.f32.mrb[194].mxu0 }
 0xa86   : > { %v10936_v15 = vpop.f32.mrb[195].mxu0 }
 0xa8b   : > { %v13945_v61 = vpop.f32.mrb[196].mxu0 }
 0xa8c   : > { %v10947_v63 = vpop.f32.mrb[197].mxu0 }
 0xa8d   : > { %v6122_v35 = vpop.f32.mrb[198].mxu0 }
 0xa8e   : > { %v10948_v31 = vpop.f32.mrb[199].mxu0 }
 0xa8f   : > { %v13947_v11 = vpop.f32.mrb[184].mxu1 }
 0xa90   : > { %v10953_v44 = vpop.f32.mrb[185].mxu1 }
 0xa91   : > { %v6168_v25 = vpop.f32.mrb[186].mxu1 }
 0xa92   : > { %v10954_v36 = vpop.f32.mrb[187].mxu1 }
 0xa93   : > { %v13949_v34 = vpop.f32.mrb[200].mxu0 }
 0xa94   : > { %v10959_v7 = vpop.f32.mrb[201].mxu0 }
 0xa95   : > { %v6214_v17 = vpop.f32.mrb[202].mxu0 }
 0xa96   : > { %v10960_v6 = vpop.f32.mrb[203].mxu0 }
 0xa97   : > { %v13951_v45 = vpop.f32.mrb[188].mxu1 }
 0xa98   : > { %v10965_v55 = vpop.f32.mrb[189].mxu1 }
 0xa99   : > { %v6260_v38 = vpop.f32.mrb[190].mxu1 }
 0xa9a   : > { %v10966_v52 = vpop.f32.mrb[191].mxu1 }
 0xa9b   : > { %v13953_v14 = vpop.f32.mrb[204].mxu0 }
 0xa9c   : > { %v10971_v12 = vpop.f32.mrb[205].mxu0 }
 0xa9d   : > { %v6306_v2 = vpop.f32.mrb[206].mxu0 }
 0xa9e   : > { %v10972_v27 = vpop.f32.mrb[207].mxu0 }
 0xa9f   : > { %v13955_v4 = vpop.f32.mrb[192].mxu1 }
 0xaa0   : > { %v10977_v5 = vpop.f32.mrb[193].mxu1 }
 0xaa1   : > { %v6352_v41 = vpop.f32.mrb[194].mxu1 }
 0xaa2   : > { %v10978_v30 = vpop.f32.mrb[195].mxu1 }
 0xaa4   : > { %v13957_v53 = vpop.f32.mrb[208].mxu0 }
 0xaa5   : > { %v10983_v51 = vpop.f32.mrb[209].mxu0 }
 0xaa6   : > { %v6398_v59 = vpop.f32.mrb[210].mxu0 }
 0xaa7   : > { %v10984_v37 = vpop.f32.mrb[211].mxu0  ;;  %v13959_v0 = vpop.f32.mrb[196].mxu1 }
 0xaa8   : > { %v10989_v29 = vpop.f32.mrb[197].mxu1 }
 0xaa9   : > { %v6444_v47 = vpop.f32.mrb[198].mxu1 }
 0xaaa   : > { %v10990_v20 = vpop.f32.mrb[199].mxu1 }
 0xaac   : > { %v13961_v24 = vpop.f32.mrb[212].mxu0 }
 0xaad   : > { %v10995_v16 = vpop.f32.mrb[213].mxu0 }
 0xaae   : > { %v6490_v43 = vpop.f32.mrb[214].mxu0 }
 0xaaf   : > { %v10996_v49 = vpop.f32.mrb[215].mxu0  ;;  %v13963_v42 = vpop.f32.mrb[200].mxu1 }
 0xab0   : > { %v11001_v62 = vpop.f32.mrb[201].mxu1 }
 0xab1   : > { %v6536_v3 = vpop.f32.mrb[202].mxu1 }
 0xab2   : > { %v11002_v28 = vpop.f32.mrb[203].mxu1 }
 0xab4   : > { %v13965_v39 = vpop.f32.mrb[216].mxu0 }
 0xab5   : > { %v11007_v9 = vpop.f32.mrb[217].mxu0 }
 0xab6   : > { %v6582_v26 = vpop.f32.mrb[218].mxu0 }
 0xab7   : > { %v11008_v19 = vpop.f32.mrb[219].mxu0 }
 0xadd   : > { %v13967_v1 = vpop.f32.mrb[204].mxu1 }
 0xade   : > { %v11013_v46 = vpop.f32.mrb[205].mxu1 }
 0xadf   : > { %v6628_v33 = vpop.f32.mrb[206].mxu1 }
 0xae0   : > { %v11014_v18 = vpop.f32.mrb[207].mxu1 }
 0xae5   : > { %v13969_v8 = vpop.f32.mrb[208].mxu1 }
 0xae6   : > { %v11025_v10 = vpop.f32.mrb[209].mxu1  ;;  %v7558_v56 = vsel %vm2163_vm4, %v13969_v8, -inf }
 0xae7   : > { %7559 = vmax.xlane.f32.xlu0 %v7558_v56  ;;  %v6805_v15 = vpop.f32.mrb[210].mxu1 }
 0xae8   : > { %v13973_v63 = vpop.f32.mrb[220].mxu0  ;;  %v11026_v35 = vpop.f32.mrb[211].mxu1 }
 0xae9   : > { %v11019_v31 = vpop.f32.mrb[221].mxu0 }
 0xaea   : > { %v6674_v44 = vpop.f32.mrb[222].mxu0 }
 0xaeb   : > { %v11020_v25 = vpop.f32.mrb[223].mxu0 }
 0xaed   : > { %v13975_v36 = vpop.f32.mrb[212].mxu1 }
 0xaee   : > { %v11037_v7 = vpop.f32.mrb[213].mxu1  ;;  %v7564_v17 = vsel %vm2163_vm4, %v13975_v36, -inf }
 0xaef   : > { %7565 = vmax.xlane.f32.xlu0 %v7564_v17  ;;  %v6905_v6 = vpop.f32.mrb[214].mxu1 }
 0xaf0   : > { %v13979_v55 = vpop.f32.mrb[224].mxu0  ;;  %v11038_v38 = vpop.f32.mrb[215].mxu1 }
 0xaf1   : > { %v11031_v52 = vpop.f32.mrb[225].mxu0  ;;  %v7561_v12 = vsel %vm2163_vm4, %v13979_v55, -inf }
 0xaf2   : > { %7562 = vmax.xlane.f32.xlu1 %v7561_v12  ;;  %v6855_v2 = vpop.f32.mrb[226].mxu0 }
 0xaf3   : > { %v11032_v27 = vpop.f32.mrb[227].mxu0 }
 0xaf5   : > { %v13983_v5 = vpop.f32.mrb[216].mxu1 }
 0xaf6   : > { %v11049_v41 = vpop.f32.mrb[217].mxu1  ;;  %v7570_v43 = vsel %vm2163_vm4, %v13983_v5, -inf }
 0xaf7   : > { %v7005_v30 = vpop.f32.mrb[218].mxu1 }
 0xaf8   : > { %v13985_v51 = vpop.f32.mrb[228].mxu0  ;;  %v11050_v59 = vpop.f32.mrb[219].mxu1 }
 0xaf9   : > { %v11043_v37 = vpop.f32.mrb[229].mxu0  ;;  %v7567_v29 = vsel %vm2163_vm4, %v13985_v51, -inf }
 0xafa   : > { %v6955_v47 = vpop.f32.mrb[230].mxu0  ;;  %7568 = vmax.xlane.f32.xlu0 %v7567_v29 }
 0xafb   : > { %v11044_v20 = vpop.f32.mrb[231].mxu0 }
 0xafd   : > { %v13989_v16 = vpop.f32.mrb[220].mxu1 }
 0xafe   : > { %7571 = vmax.xlane.f32.xlu0 %v7570_v43  ;;  %v11061_v49 = vpop.f32.mrb[221].mxu1  ;;  %v7576_v19 = vsel %vm2163_vm4, %v13989_v16, -inf }
 0xaff   : > { %v7105_v62 = vpop.f32.mrb[222].mxu1 }
 0xb00   : > { %v13993_v3 = vpop.f32.mrb[232].mxu0  ;;  %v11062_v28 = vpop.f32.mrb[223].mxu1 }
 0xb01   : > { %v11055_v9 = vpop.f32.mrb[233].mxu0  ;;  %v7573_v26 = vsel %vm2163_vm4, %v13993_v3, -inf }
 0xb02   : > { %7574 = vmax.xlane.f32.xlu1 %v7573_v26  ;;  %v7055_v46 = vpop.f32.mrb[234].mxu0  ;;  %7577 = vmax.xlane.f32.xlu0 %v7576_v19 }
 0xb03   : > { %v11056_v33 = vpop.f32.mrb[235].mxu0 }
 0xb05   : > { %v13999_v18 = vpop.f32.mrb[224].mxu1 }
 0xb06   : > { %v11073_v10 = vpop.f32.mrb[225].mxu1  ;;  %v7582_v56 = vsel %vm2163_vm4, %v13999_v18, -inf }
 0xb07   : > { %7583 = vmax.xlane.f32.xlu0 %v7582_v56  ;;  %v7205_v15 = vpop.f32.mrb[226].mxu1 }
 0xb08   : > { %v14003_v35 = vpop.f32.mrb[236].mxu0  ;;  %v11074_v31 = vpop.f32.mrb[227].mxu1 }
 0xb09   : > { %v11067_v44 = vpop.f32.mrb[237].mxu0  ;;  %v7579_v25 = vsel %vm2163_vm4, %v14003_v35, -inf }
 0xb0a   : > { %7580 = vmax.xlane.f32.xlu1 %v7579_v25  ;;  %v7155_v7 = vpop.f32.mrb[238].mxu0 }
 0xb0b   : > { %v11068_v17 = vpop.f32.mrb[239].mxu0 }
 0xb0d   : > { %v14007_v6 = vpop.f32.mrb[228].mxu1 }
 0xb0e   : > { %v11085_v38 = vpop.f32.mrb[229].mxu1  ;;  %v7588_v52 = vsel %vm2163_vm4, %v14007_v6, -inf }
 0xb0f   : > { %7589 = vmax.xlane.f32.xlu0 %v7588_v52  ;;  %v7305_v12 = vpop.f32.mrb[230].mxu1 }
 0xb10   : > { %v14011_v2 = vpop.f32.mrb[240].mxu0  ;;  %v11086_v27 = vpop.f32.mrb[231].mxu1 }
 0xb11   : > { %v11079_v41 = vpop.f32.mrb[241].mxu0  ;;  %v7585_v30 = vsel %vm2163_vm4, %v14011_v2, -inf }
 0xb12   : > { %7586 = vmax.xlane.f32.xlu1 %v7585_v30  ;;  %v7255_v59 = vpop.f32.mrb[242].mxu0  ;;  %v14043_v30 = vpop.permute.xlu0 %7842 }
 0xb13   : > { %v11080_v37 = vpop.f32.mrb[243].mxu0 }
 0xb14   : > { %v14047_v37 = vpop.permute.xlu1 %7888 }
 0xb15   : > { %v14015_v29 = vpop.f32.mrb[232].mxu1 }
 0xb16   : > { %v11097_v47 = vpop.f32.mrb[233].mxu1  ;;  %v7594_v20 = vsel %vm2163_vm4, %v14015_v29, -inf  ;;  %v14045_v59 = vpop.permute.xlu0 %7934 }
 0xb17   : > { %7595 = vmax.xlane.f32.xlu0 %v7594_v20  ;;  %v7405_v43 = vpop.f32.mrb[234].mxu1 }
 0xb18   : > { %v14019_v49 = vpop.f32.mrb[244].mxu0  ;;  %v11098_v62 = vpop.f32.mrb[235].mxu1 }
 0xb19   : > { %v11091_v28 = vpop.f32.mrb[245].mxu0  ;;  %v7591_v9 = vsel %vm2163_vm4, %v14019_v49, -inf }
 0xb1a   : > { %7592 = vmax.xlane.f32.xlu1 %v7591_v9  ;;  %v7355_v26 = vpop.f32.mrb[246].mxu0 }
 0xb1b   : > { %v11092_v19 = vpop.f32.mrb[247].mxu0 }
 0xb1d   : > { %v14023_v46 = vpop.f32.mrb[236].mxu1 }
 0xb1e   : > { %v11109_v33 = vpop.f32.mrb[237].mxu1  ;;  %v7600_v10 = vsel %vm2163_vm4, %v14023_v46, -inf }
 0xb1f   : > { %7601 = vmax.xlane.f32.xlu0 %v7600_v10  ;;  %v7505_v56 = vpop.f32.mrb[238].mxu1 }
 0xb20   : > { %v14027_v15 = vpop.f32.mrb[248].mxu0  ;;  %v11110_v31 = vpop.f32.mrb[239].mxu1 }
 0xb21   : > { %v11103_v44 = vpop.f32.mrb[249].mxu0  ;;  %v7597_v25 = vsel %vm2163_vm4, %v14027_v15, -inf }
 0xb22   : > { %7598 = vmax.xlane.f32.xlu1 %v7597_v25  ;;  %v7455_v7 = vpop.f32.mrb[250].mxu0 }
 0xb23   : > { %v11104_v17 = vpop.f32.mrb[251].mxu0 }
 0xb28   : > { %v14031_v38 = vpop.f32.mrb[252].mxu0 }
 0xb29   : > { %v11115_v52 = vpop.f32.mrb[253].mxu0  ;;  %v7603_v41 = vsel %vm2163_vm4, %v14031_v38, -inf }
 0xb2a   : > { %v7555_v12 = vpop.f32.mrb[254].mxu0 }
 0xb2b   : > { %v11116_v27 = vpop.f32.mrb[255].mxu0 }
 0xb33   : > { %8164 = vrot.lane.b32.xlu1 %v12263_v57, %s11732_s28  ;;  %v14049_v57 = vpop.permute.xlu0 %8026 }
 0xb35   : > { %8118 = vrot.lane.b32.xlu0 %v12269_v13, %s11732_s28  ;;  %v14051_v13 = vpop.permute.xlu1 %7980 }
 0xb37   : > { %8210 = vrot.lane.b32.xlu1 %v12304_v21, %s11732_s28 }
 0xb3b   : > { %8256 = vrot.lane.b32.xlu1 %v12300_v23, %s11732_s28  ;;  %v14054_v23 = vpop.permute.xlu1 %8072 }
 0xb5f   : > { %7604 = vmax.xlane.f32.xlu1 %v7603_v41 }
 0xb74   : > { %v7560_v47 = vpop.xlane.xlu0 %7559 }
 0xb75   : > { %v7606_v21 = vsub.f32 %v13969_v8, %v7560_v47 }
 0xb77   : > { %v7622_v20 = vmul.f32 1.442695, %v7606_v21 }
 0xb79   : > { %11539 = vpow2.f32 %v7622_v20 }
 0xb7c   : > { %v7566_v43 = vpop.xlane.xlu0 %7565 }
 0xb7d   : > { %v7608_v62 = vsub.f32 %v13975_v36, %v7566_v43 }
 0xb7f   : > { %v7626_v28 = vmul.f32 1.442695, %v7608_v62  ;;  %v7563_v9 = vpop.xlane.xlu1 %7562 }
 0xb80   : > { %v7607_v26 = vsub.f32 %v13979_v55, %v7563_v9 }
 0xb81   : > { %11541 = vpow2.f32 %v7626_v28 }
 0xb82   : > { %v7624_v19 = vmul.f32 1.442695, %v7607_v26 }
 0xb83   : > { %v14058_v33 = vpop.eup %11539 }
 0xb84   : > { %11543 = vpow2.f32 %v7624_v19  ;;  %v7654_v10 = vsel %vm2163_vm4, %v14058_v33, 0.0 }
 0xb85   : > { %7655 = vadd.xlane.f32.xlu0 %v7654_v10 }
 0xb87   : > { %v7569_v8 = vpop.xlane.xlu0 %7568 }
 0xb88   : > { %v7609_v56 = vsub.f32 %v13985_v51, %v7569_v8 }
 0xb8a   : > { %v7628_v31 = vmul.f32 1.442695, %v7609_v56 }
 0xb8b   : > { %v14063_v44 = vpop.eup %11541  ;;  %v7572_v36 = vpop.xlane.xlu0 %7571 }
 0xb8c   : > { %11545 = vpow2.f32 %v7628_v31  ;;  %v7610_v25 = vsub.f32 %v13983_v5, %v7572_v36  ;;  %v7660_v55 = vsel %vm2163_vm4, %v14063_v44, 0.0 }
 0xb8d   : > { %7661 = vadd.xlane.f32.xlu0 %v7660_v55 }
 0xb8e   : > { %v14068_v7 = vpop.eup %11543  ;;  %v7630_v17 = vmul.f32 1.442695, %v7610_v25 }
 0xb8f   : > { %v7575_v52 = vpop.xlane.xlu1 %7574  ;;  %v7578_v12 = vpop.xlane.xlu0 %7577  ;;  %v7657_v27 = vsel %vm2163_vm4, %v14068_v7, 0.0 }
 0xb90   : > { %11547 = vpow2.f32 %v7630_v17  ;;  %v7611_v51 = vsub.f32 %v13993_v3, %v7575_v52  ;;  %v7612_v41 = vsub.f32 %v13989_v16, %v7578_v12  ;;  %7658 = vadd.xlane.f32.xlu1 %v7657_v27 }
 0xb92   : > { %v7632_v47 = vmul.f32 1.442695, %v7611_v51  ;;  %v7634_v5 = vmul.f32 1.442695, %v7612_v41 }
 0xb94   : > { %11549 = vpow2.f32 %v7632_v47  ;;  %v7584_v21 = vpop.xlane.xlu0 %7583 }
 0xb95   : > { %11551 = vpow2.f32 %v7634_v5  ;;  %v7614_v43 = vsub.f32 %v13999_v18, %v7584_v21 }
 0xb96   : > { %v14074_v20 = vpop.eup %11545 }
 0xb97   : > { %v7581_v62 = vpop.xlane.xlu1 %7580  ;;  %v7663_v28 = vsel %vm2163_vm4, %v14074_v20, 0.0  ;;  %v7638_v16 = vmul.f32 1.442695, %v7614_v43 }
 0xb98   : > { %v7613_v9 = vsub.f32 %v14003_v35, %v7581_v62  ;;  %7664 = vadd.xlane.f32.xlu1 %v7663_v28 }
 0xb9a   : > { %v14080_v3 = vpop.eup %11547  ;;  %v7636_v26 = vmul.f32 1.442695, %v7613_v9 }
 0xb9b   : > { %v7666_v19 = vsel %vm2163_vm4, %v14080_v3, 0.0 }
 0xb9c   : > { %11553 = vpow2.f32 %v7636_v26  ;;  %7667 = vadd.xlane.f32.xlu0 %v7666_v19  ;;  %v7590_v10 = vpop.xlane.xlu0 %7589 }
 0xb9d   : > { %v7616_v8 = vsub.f32 %v14007_v6, %v7590_v10  ;;  %11555 = vpow2.f32 %v7638_v16 }
 0xb9e   : > { %v14085_v18 = vpop.eup %11549 }
 0xb9f   : > { %v14087_v56 = vpop.eup %11551  ;;  %v7642_v31 = vmul.f32 1.442695, %v7616_v8  ;;  %v7587_v35 = vpop.xlane.xlu1 %7586  ;;  %v7669_v36 = vsel %vm2163_vm4, %v14085_v18, 0.0 }
 0xba0   : > { %v7615_v25 = vsub.f32 %v14011_v2, %v7587_v35  ;;  %7670 = vadd.xlane.f32.xlu1 %v7669_v36  ;;  %v7672_v55 = vsel %vm2163_vm4, %v14087_v56, 0.0 }
 0xba1   : > { %7673 = vadd.xlane.f32.xlu0 %v7672_v55  ;;  %11557 = vpow2.f32 %v7642_v31 }
 0xba2   : > { %v7640_v17 = vmul.f32 1.442695, %v7615_v25 }
 0xba4   : > { %11559 = vpow2.f32 %v7640_v17  ;;  %v7596_v28 = vpop.xlane.xlu0 %7595 }
 0xba5   : > { %v7618_v9 = vsub.f32 %v14015_v29, %v7596_v28 }
 0xba6   : > { %v14094_v6 = vpop.eup %11553 }
 0xba7   : > { %v7593_v52 = vpop.xlane.xlu1 %7592  ;;  %v7675_v12 = vsel %vm2163_vm4, %v14094_v6, 0.0  ;;  %v14098_v27 = vpop.eup %11555  ;;  %v7646_v26 = vmul.f32 1.442695, %v7618_v9  ;;  %v15051_v9 = vld [vmem:[#allocation7_spill] sm:$0xff] }
 0xba8   : > { %v7617_v51 = vsub.f32 %v14019_v49, %v7593_v52  ;;  %7676 = vadd.xlane.f32.xlu1 %v7675_v12  ;;  %v7678_v41 = vsel %vm2163_vm4, %v14098_v27, 0.0 }
 0xbaa   : > { %v7644_v2 = vmul.f32 1.442695, %v7617_v51 }
 0xbab   : > { %v14103_v47 = vpop.eup %11557 }
 0xbac   : > { %11561 = vpow2.f32 %v7644_v2  ;;  %7679 = vadd.xlane.f32.xlu1 %v7678_v41  ;;  %v7684_v43 = vsel %vm2163_vm4, %v14103_v47, 0.0  ;;  %v7602_v16 = vpop.xlane.xlu0 %7601 }
 0xbad   : > { %v7620_v19 = vsub.f32 %v14023_v46, %v7602_v16  ;;  %11563 = vpow2.f32 %v7646_v26 }
 0xbae   : > { %v14105_v5 = vpop.eup %11559 }
 0xbaf   : > { %v7681_v21 = vsel %vm2163_vm4, %v14105_v5, 0.0  ;;  %v7599_v10 = vpop.xlane.xlu1 %7598  ;;  %v7650_v8 = vmul.f32 1.442695, %v7620_v19  ;;  %v15052_v19 = vld [vmem:[#allocation15_spill] sm:$0xff] }
 0xbb0   : > { %7682 = vadd.xlane.f32.xlu0 %v7681_v21  ;;  %7685 = vadd.xlane.f32.xlu1 %v7684_v43  ;;  %v7619_v31 = vsub.f32 %v14027_v15, %v7599_v10  ;;  %v15046_v21 = vld [vmem:[#allocation8_spill] sm:$0xff]  ;;  %v15047_v43 = vld [vmem:[#allocation9_spill] sm:$0xff] }
 0xbb1   : > { %11565 = vpow2.f32 %v7650_v8  ;;  %v15053_v10 = vld [vmem:[#allocation17_spill] sm:$0xff]  ;;  %v15054_v8 = vld [vmem:[#allocation10_spill] sm:$0xff] }
 0xbb2   : > { %v7648_v35 = vmul.f32 1.442695, %v7619_v31 }
 0xbb3   : > { %v14122_v36 = vpop.permute.xlu1 %8164 }
 0xbb4   : > { %11567 = vpow2.f32 %v7648_v35 }
 0xbb6   : > { %v14111_v49 = vpop.eup %11561 }
 0xbb7   : > { %v7687_v62 = vsel %vm2163_vm4, %v14111_v49, 0.0  ;;  %v14126_v25 = vpop.permute.xlu1 %8210 }
 0xbb8   : > { %7688 = vadd.xlane.f32.xlu0 %v7687_v62  ;;  %v15049_v62 = vld [vmem:[#allocation13_spill] sm:$0xff] }
 0xbbb   : > { %v14132_v46 = vpop.permute.xlu1 %8256 }
 0xbc1   : > { %8348 = vrot.lane.b32.xlu1 %v12331_v40, %s11732_s28  ;;  %v14124_v40 = vpop.eup %11563 }
 0xbc2   : > { %v14130_v29 = vpop.eup %11565 }
 0xbc3   : > { %v7696_v15 = vsel %vm2163_vm4, %v14130_v29, 0.0  ;;  %v14136_v55 = vpop.eup %11567 }
 0xbc4   : > { %v7693_v52 = vsel %vm2163_vm4, %v14136_v55, 0.0 }
 0xbce   : > { %8302 = vrot.lane.b32.xlu0 %v15040_v48, %s11732_s28  ;;  %v7690_v48 = vsel %vm2163_vm4, %v14124_v40, 0.0 }
 0xbe5   : > { %7691 = vadd.xlane.f32.xlu1 %v7690_v48 }
 0xbe9   : > { %7697 = vadd.xlane.f32.xlu1 %v7696_v15 }
 0xbec   : > { %v7605_v17 = vpop.xlane.xlu1 %7604 }
 0xbed   : > { %v7621_v12 = vsub.f32 %v14031_v38, %v7605_v17  ;;  %7694 = vadd.xlane.f32.xlu0 %v7693_v52  ;;  %v15048_v38 = vld [vmem:[#allocation11_spill] sm:$0xff]  ;;  %v15057_v17 = vld [vmem:[#allocation21_spill] sm:$0xff] }
 0xbef   : > { %v7652_v51 = vmul.f32 1.442695, %v7621_v12 }
 0xbf1   : > { %11569 = vpow2.f32 %v7652_v51 }
 0xbfa   : > { %8440 = vrot.lane.b32.xlu1 %v12350_v54, %s11732_s28  ;;  %v14155_v54 = vpop.permute.xlu0 %8118 }
 0xbfb   : > { %v14143_v2 = vpop.eup %11569 }
 0xbfc   : > { %v7699_v41 = vsel %vm2163_vm4, %v14143_v2, 0.0 }
 0xbfd   : > { %7700 = vadd.xlane.f32.xlu0 %v7699_v41 }
 0xbfe   : > { %4886 = vrot.lane.b32.xlu1 %v15046_v21, %s11733_s12 }
 0xc02   : > { %4890 = vrot.lane.b32.xlu1 %v15047_v43, %s11733_s12  ;;  %v15059_v43 = vld [vmem:[#allocation16_spill] sm:$0xff] }
 0xc06   : > { %6695 = vrot.lane.b32.xlu1 %v13943_v50, %s11734_s16  ;;  %v15050_v50 = vld [vmem:[#allocation6_spill] sm:$0xff] }
 0xc0a   : > { %6699 = vrot.lane.b32.xlu1 %v13945_v61, %s11734_s16 }
 0xc0e   : > { %4894 = vrot.lane.b32.xlu1 %v15048_v38, %s11733_s12 }
 0xc12   : > { %4898 = vrot.lane.b32.xlu1 %v15049_v62, %s11733_s12  ;;  %v7656_v28 = vpop.xlane.xlu0 %7655 }
 0xc13   : > { %11571 = vrcp.f32 %v7656_v28  ;;  %8394 = vrot.lane.b32.xlu0 %v12354_v32, %s11732_s28 }
 0xc16   : > { %6703 = vrot.lane.b32.xlu1 %v13949_v34, %s11734_s16 }
 0xc17   : > { %4884 = vrot.lane.b32.xlu0 %v15050_v50, %s11733_s12 }
 0xc1a   : > { %6707 = vrot.lane.b32.xlu1 %v13953_v14, %s11734_s16  ;;  %v7662_v61 = vpop.xlane.xlu0 %7661 }
 0xc1b   : > { %11573 = vrcp.f32 %v7662_v61  ;;  %4888 = vrot.lane.b32.xlu0 %v15051_v9, %s11733_s12  ;;  %v15061_v61 = vld [vmem:[#allocation20_spill] sm:$0xff] }
 0xc1d   : > { %v11572_v16 = vpop.eup %11571  ;;  %v7659_v26 = vpop.xlane.xlu1 %7658 }
 0xc1e   : > { %11575 = vrcp.f32 %v7659_v26  ;;  %4902 = vrot.lane.b32.xlu1 %v15052_v19, %s11733_s12  ;;  %v7718_v32 = vmul.f32 %v11572_v16, %v14058_v33 }
 0xc1f   : > { %6693 = vrot.lane.b32.xlu0 %v13939_v60, %s11734_s16 }
 0xc20   : > { %v7734_v34 = vpack.c.bf16 %v7718_v32, %v7718_v32 }
 0xc22   : > { %4906 = vrot.lane.b32.xlu1 %v15053_v10, %s11733_s12  ;;  %11120 = vmatmul.mubr.msk.bf16.vlgmr.msra.gmra.mrb[240].mxu1 %vm2163_vm4, %v7734_v34 }
 0xc23   : > { %11130 = vmatpush3.bf16.msra.mxu1 %v14043_v30  ;;  %6697 = vrot.lane.b32.xlu0 %v13941_v22, %s11734_s16 }
 0xc24   : > { %11131 = vmatprep.mubr.msk.bf16.mxu1 %vm11726_vm3, %v15006_v58  ;;  %11141 = vmatprep.subr.bf16.mxu1 %v15006_v58 }
 0xc25   : > { %v11574_v14 = vpop.eup %11573  ;;  %v7665_v33 = vpop.xlane.xlu1 %7664 }
 0xc26   : > { %11577 = vrcp.f32 %v7665_v33  ;;  %6711 = vrot.lane.b32.xlu1 %v13957_v53, %s11734_s16  ;;  %v7720_v60 = vmul.f32 %v11574_v14, %v14063_v44  ;;  %v15055_v53 = vld [vmem:[#allocation12_spill] sm:$0xff] }
 0xc27   : > { %4892 = vrot.lane.b32.xlu0 %v15054_v8, %s11733_s12 }
 0xc28   : > { %v11576_v30 = vpop.eup %11575  ;;  %v7736_v31 = vpack.c.bf16 %v7720_v60, %v7720_v60 }
 0xc29   : > { %v7719_v22 = vmul.f32 %v11576_v30, %v14068_v7  ;;  %v7668_v35 = vpop.xlane.xlu0 %7667  ;;  %v15056_v7 = vld [vmem:[#allocation19_spill] sm:$0xff] }
 0xc2a   : > { %11579 = vrcp.f32 %v7668_v35  ;;  %6715 = vrot.lane.b32.xlu1 %v13961_v24, %s11734_s16  ;;  %11132 = vmatmul.mubr.msk.bf16.vlgmr.msra.gmra.mrb[244].mxu1 %vm2163_vm4, %v7736_v31 }
 0xc2b   : > { %v7735_v48 = vpack.c.bf16 %v7719_v22, %v7719_v22  ;;  %11142 = vmatpush3.bf16.msra.mxu1 %v14045_v59  ;;  %4896 = vrot.lane.b32.xlu0 %v15055_v53, %s11733_s12 }
 0xc2c   : > { %11143 = vmatprep.mubr.msk.bf16.mxu1 %vm11726_vm3, %v15006_v58  ;;  %11153 = vmatprep.subr.bf16.mxu1 %v15006_v58 }
 0xc2d   : > { %11126 = vmatmul.mubr.msk.bf16.vlgmr.msra.gmra.mrb[0].mxu0 %vm2163_vm4, %v7735_v48  ;;  %v7671_v44 = vpop.xlane.xlu1 %7670 }
 0xc2e   : > { %11136 = vmatpush3.bf16.msra.mxu0 %v14047_v37  ;;  %11581 = vrcp.f32 %v7671_v44  ;;  %v7674_v24 = vpop.xlane.xlu0 %7673  ;;  %4910 = vrot.lane.b32.xlu1 %v15056_v7, %s11733_s12 }
 0xc2f   : > { %11583 = vrcp.f32 %v7674_v24  ;;  %6701 = vrot.lane.b32.xlu0 %v13947_v11, %s11734_s16  ;;  %11137 = vmatprep.mubr.msk.bf16.mxu0 %vm11726_vm3, %v15006_v58 }
 0xc30   : > { %v11578_v59 = vpop.eup %11577  ;;  %11147 = vmatprep.subr.bf16.mxu0 %v15006_v58 }
 0xc31   : > { %v7721_v15 = vmul.f32 %v11578_v59, %v14074_v20  ;;  %v15058_v20 = vld [vmem:[#allocation14_spill] sm:$0xff] }
 0xc32   : > { %4914 = vrot.lane.b32.xlu1 %v15057_v17, %s11733_s12 }
 0xc33   : > { %v7737_v37 = vpack.c.bf16 %v7721_v15, %v7721_v15  ;;  %6705 = vrot.lane.b32.xlu0 %v13951_v45, %s11734_s16 }
 0xc34   : > { %v11580_v52 = vpop.eup %11579 }
 0xc35   : > { %v7722_v12 = vmul.f32 %v11580_v52, %v14080_v3  ;;  %11138 = vmatmul.mubr.msk.bf16.vlgmr.msra.gmra.mrb[4].mxu0 %vm2163_vm4, %v7737_v37  ;;  %v7677_v11 = vpop.xlane.xlu1 %7676 }
 0xc36   : > { %11148 = vmatpush3.bf16.msra.mxu0 %v14051_v13  ;;  %11585 = vrcp.f32 %v7677_v11  ;;  %6719 = vrot.lane.b32.xlu1 %v13965_v39, %s11734_s16 }
 0xc37   : > { %4900 = vrot.lane.b32.xlu0 %v15058_v20, %s11733_s12  ;;  %v7738_v51 = vpack.c.bf16 %v7722_v12, %v7722_v12  ;;  %11149 = vmatprep.mubr.msk.bf16.mxu0 %vm11726_vm3, %v15006_v58 }
 0xc38   : > { %v11582_v45 = vpop.eup %11581  ;;  %11159 = vmatprep.subr.bf16.mxu0 %v15006_v58 }
 0xc39   : > { %v11584_v3 = vpop.eup %11583  ;;  %v7723_v41 = vmul.f32 %v11582_v45, %v14085_v18  ;;  %v7680_v21 = vpop.xlane.xlu1 %7679  ;;  %11144 = vmatmul.mubr.msk.bf16.vlgmr.msra.gmra.mrb[248].mxu1 %vm2163_vm4, %v7738_v51 }
 0xc3a   : > { %11587 = vrcp.f32 %v7680_v21  ;;  %11154 = vmatpush3.bf16.msra.mxu1 %v14049_v57  ;;  %6723 = vrot.lane.b32.xlu1 %v13973_v63, %s11734_s16  ;;  %v7724_v13 = vmul.f32 %v11584_v3, %v14087_v56 }
 0xc3b   : > { %v7739_v39 = vpack.c.bf16 %v7723_v41, %v7723_v41  ;;  %4904 = vrot.lane.b32.xlu0 %v15059_v43, %s11733_s12  ;;  %11155 = vmatprep.mubr.msk.bf16.mxu1 %vm11726_vm3, %v15006_v58 }
 0xc3c   : > { %11165 = vmatprep.subr.bf16.mxu1 %v15006_v58  ;;  %v7740_v63 = vpack.c.bf16 %v7724_v13, %v7724_v13 }
 0xc3d   : > { %11150 = vmatmul.mubr.msk.bf16.vlgmr.msra.gmra.mrb[8].mxu0 %vm2163_vm4, %v7739_v39  ;;  %v7686_v18 = vpop.xlane.xlu1 %7685  ;;  %v7683_v38 = vpop.xlane.xlu0 %7682 }
 0xc3e   : > { %11160 = vmatpush3.bf16.msra.mxu0 %v14054_v23  ;;  %11589 = vrcp.f32 %v7686_v18  ;;  %11161 = vmatprep.mubr.msk.bf16.mxu0 %vm11726_vm3, %v15006_v58 }
 0xc3f   : > { %11591 = vrcp.f32 %v7683_v38  ;;  %6709 = vrot.lane.b32.xlu0 %v13955_v4, %s11734_s16  ;;  %11171 = vmatprep.subr.bf16.mxu0 %v15006_v58 }
 0xc40   : > { %v11586_v57 = vpop.eup %11585 }
 0xc41   : > { %v7725_v56 = vmul.f32 %v11586_v57, %v14094_v6  ;;  %11156 = vmatmul.mubr.msk.bf16.vlgmr.msra.gmra.mrb[252].mxu1 %vm2163_vm4, %v7740_v63 }
 0xc42   : > { %11166 = vmatpush3.bf16.msra.mxu1 %v14155_v54  ;;  %11167 = vmatprep.mubr.msk.bf16.mxu1 %vm11726_vm3, %v15006_v58  ;;  %v15060_v54 = vld [vmem:[#allocation18_spill] sm:$0xff] }
 0xc43   : > { %v7741_v23 = vpack.c.bf16 %v7725_v56, %v7725_v56  ;;  %6713 = vrot.lane.b32.xlu0 %v13959_v0, %s11734_s16  ;;  %11177 = vmatprep.subr.bf16.mxu1 %v15006_v58 }
 0xc44   : > { %v11588_v4 = vpop.eup %11587 }
 0xc45   : > { %v7726_v62 = vmul.f32 %v11588_v4, %v14098_v27  ;;  %11162 = vmatmul.mubr.msk.bf16.vlgmr.msra.gmra.mrb[12].mxu0 %vm2163_vm4, %v7741_v23  ;;  %v7689_v28 = vpop.xlane.xlu0 %7688 }
 0xc46   : > { %11172 = vmatpush3.bf16.msra.mxu0 %v14122_v36  ;;  %11593 = vrcp.f32 %v7689_v28  ;;  %11173 = vmatprep.mubr.msk.bf16.mxu0 %vm11726_vm3, %v15006_v58 }
 0xc47   : > { %v7742_v6 = vpack.c.bf16 %v7726_v62, %v7726_v62  ;;  %4908 = vrot.lane.b32.xlu0 %v15060_v54, %s11733_s12  ;;  %11183 = vmatprep.subr.bf16.mxu0 %v15006_v58 }
 0xc48   : > { %v11590_v0 = vpop.eup %11589 }
 0xc49   : > { %v11592_v50 = vpop.eup %11591  ;;  %11168 = vmatmul.mubr.msk.bf16.vlgmr.msra.gmra.mrb[0].mxu1 %vm2163_vm4, %v7742_v6  ;;  %v7728_v36 = vmul.f32 %v11590_v0, %v14103_v47 }
 0xc4a   : > { %v7727_v27 = vmul.f32 %v11592_v50, %v14105_v5  ;;  %11178 = vmatpush3.bf16.msra.mxu1 %v14126_v25  ;;  %11179 = vmatprep.mubr.msk.bf16.mxu1 %vm11726_vm3, %v15006_v58  ;;  %v8303_v25 = vpop.permute.xlu0 %8302 }
 0xc4b   : > { %4912 = vrot.lane.b32.xlu0 %v15061_v61, %s11733_s12  ;;  %11189 = vmatprep.subr.bf16.mxu1 %v15006_v58  ;;  %v7744_v16 = vpack.c.bf16 %v7728_v36, %v7728_v36  ;;  %v11309_v61 = vld [vmem:[%s14979_s7] sm:$0xff]  }
 0xc4c   : > { %v7743_v9 = vpack.c.bf16 %v7727_v27, %v7727_v27 }
 0xc4e   : > { %11174 = vmatmul.mubr.msk.bf16.vlgmr.msra.gmra.mrb[16].mxu0 %vm2163_vm4, %v7743_v9 }
 0xc4f   : > { %11184 = vmatpush3.bf16.msra.mxu0 %v14132_v46  ;;  %6717 = vrot.lane.b32.xlu0 %v13963_v42, %s11734_s16  ;;  %v8349_v42 = vpop.permute.xlu1 %8348 }
 0xc50   : > { %v11594_v5 = vpop.eup %11593  ;;  %11185 = vmatprep.mubr.msk.bf16.mxu0 %vm11726_vm3, %v15006_v58  ;;  %11195 = vmatprep.subr.bf16.mxu0 %v15006_v58 }
 0xc51   : > { %v7729_v47 = vmul.f32 %v11594_v5, %v14111_v49  ;;  %11180 = vmatmul.mubr.msk.bf16.vlgmr.msra.gmra.mrb[4].mxu1 %vm2163_vm4, %v7744_v16 }
 0xc52   : > { %11190 = vmatpush3.bf16.msra.mxu1 %v8303_v25  ;;  %11191 = vmatprep.mubr.msk.bf16.mxu1 %vm11726_vm3, %v15006_v58 }
 0xc53   : > { %v7745_v26 = vpack.c.bf16 %v7729_v47, %v7729_v47  ;;  %6721 = vrot.lane.b32.xlu0 %v13967_v1, %s11734_s16  ;;  %11201 = vmatprep.subr.bf16.mxu1 %v15006_v58 }
 0xc56   : > { %11186 = vmatmul.mubr.msk.bf16.vlgmr.msra.gmra.mrb[20].mxu0 %vm2163_vm4, %v7745_v26  ;;  %v11310_v26 = vld [vmem:[%s14979_s7 + $0x8] sm:$0xff]  }
 0xc57   : > { %11196 = vmatpush3.bf16.msra.mxu0 %v8349_v42  ;;  %11197 = vmatprep.mubr.msk.bf16.mxu0 %vm11726_vm3, %v15006_v58 }
 0xc58   : > { %11207 = vmatprep.subr.bf16.mxu0 %v15006_v58 }
 0xc72   : > { %v7692_v49 = vpop.xlane.xlu1 %7691 }
 0xc73   : > { %11595 = vrcp.f32 %v7692_v49 }
 0xc76   : > { %v7698_v46 = vpop.xlane.xlu1 %7697 }
 0xc7a   : > { %v8441_v19 = vpop.permute.xlu1 %8440  ;;  %v7695_v32 = vpop.xlane.xlu0 %7694 }
 0xc7b   : > { %11597 = vrcp.f32 %v7695_v32 }
 0xc7c   : > { %11599 = vrcp.f32 %v7698_v46 }
 0xc7d   : > { %v11596_v34 = vpop.eup %11595 }
 0xc7e   : > { %v7730_v1 = vmul.f32 %v11596_v34, %v14124_v40  ;;  %v4887_v10 = vpop.permute.xlu1 %4886 }
 0xc7f   : > { %4934 = vst.msk [vmem:[#allocation2 + $0x8] sm:$0xff] %vm4932_vm5, %v4887_v10 }
 0xc80   : > { %v7746_v14 = vpack.c.bf16 %v7730_v1, %v7730_v1 }
 0xc82   : > { %v4891_v33 = vpop.permute.xlu1 %4890  ;;  %11192 = vmatmul.mubr.msk.bf16.vlgmr.msra.gmra.mrb[8].mxu1 %vm2163_vm4, %v7746_v14 }
 0xc83   : > { %4936 = vst.msk [vmem:[#allocation2 + $0x18] sm:$0xff] %vm4932_vm5, %v4891_v33  ;;  %11203 = vmatprep.mubr.msk.bf16.mxu1 %vm11726_vm3, %v15006_v58 }
 0xc85   : > { %v11598_v60 = vpop.eup %11597 }
 0xc86   : > { %v7731_v8 = vmul.f32 %v11598_v60, %v14136_v55  ;;  %v6696_v30 = vpop.permute.xlu1 %6695  ;;  %v11600_v31 = vpop.eup %11599 }
 0xc87   : > { %6743 = vst.msk [vmem:[#allocation2 + $0x8] sm:$0xff] %vm6741_vm6, %v6696_v30  ;;  %v7732_v48 = vmul.f32 %v11600_v31, %v14130_v29 }
 0xc88   : > { %v7747_v40 = vpack.c.bf16 %v7731_v8, %v7731_v8 }
 0xc89   : > { %v7748_v44 = vpack.c.bf16 %v7732_v48, %v7732_v48 }
 0xc8a   : > { %v6700_v22 = vpop.permute.xlu1 %6699  ;;  %11198 = vmatmul.mubr.msk.bf16.vlgmr.msra.gmra.mrb[24].mxu0 %vm2163_vm4, %v7747_v40  ;;  %v7701_v35 = vpop.xlane.xlu0 %7700 }
 0xc8b   : > { %6745 = vst.msk [vmem:[#allocation2 + $0x18] sm:$0xff] %vm6741_vm6, %v6700_v22  ;;  %11208 = vmatpush3.bf16.msra.mxu0 %v8441_v19  ;;  %11601 = vrcp.f32 %v7701_v35  ;;  %11209 = vmatprep.mubr.msk.bf16.mxu0 %vm11726_vm3, %v15006_v58 }
 0xc8e   : > { %v4895_v53 = vpop.permute.xlu1 %4894  ;;  %v8395_v55 = vpop.permute.xlu0 %8394 }
 0xc8f   : > { %4938 = vst.msk [vmem:[#allocation2 + $0x28] sm:$0xff] %vm4932_vm5, %v4895_v53  ;;  %11202 = vmatpush3.bf16.msra.mxu1 %v8395_v55 }
 0xc90   : > { %11213 = vmatprep.subr.bf16.mxu1 %v11309_v61 }
 0xc92   : > { %v4899_v24 = vpop.permute.xlu1 %4898  ;;  %11204 = vmatmul.mubr.msk.bf16.vlgmr.msra.gmra.mrb[12].mxu1 %vm2163_vm4, %v7748_v44  ;;  %v4885_v7 = vpop.permute.xlu0 %4884 }
 0xc93   : > { %4940 = vst.msk [vmem:[#allocation2 + $0x38] sm:$0xff] %vm4932_vm5, %v4899_v24  ;;  %4933 = vst.msk [vmem:[#allocation2] sm:$0xff] %vm4932_vm5, %v4885_v7  ;;  %11214 = vmatpush3.bf16.msra.mxu1 %v11309_v61 }
 0xc94   : > { %11215 = vmatprep.subr.bf16.mxu1 %v11310_v26 }
 0xc95   : > { %v11602_v59 = vpop.eup %11601 }
 0xc96   : > { %v7733_v15 = vmul.f32 %v11602_v59, %v14143_v2  ;;  %v6704_v58 = vpop.permute.xlu1 %6703  ;;  %v4889_v17 = vpop.permute.xlu0 %4888 }
 0xc97   : > { %6747 = vst.msk [vmem:[#allocation2 + $0x28] sm:$0xff] %vm6741_vm6, %v6704_v58  ;;  %11216 = vmatpush3.bf16.msra.mxu1 %v11310_v26 }
 0xc98   : > { %4935 = vst.msk [vmem:[#allocation2 + $0x10] sm:$0xff] %vm4932_vm5, %v4889_v17  ;;  %v7749_v29 = vpack.c.bf16 %v7733_v15, %v7733_v15 }
 0xc9a   : > { %v6708_v37 = vpop.permute.xlu1 %6707  ;;  %11210 = vmatmul.mubr.msk.bf16.vlgmr.msra.gmra.mrb[28].mxu0 %vm2163_vm4, %v7749_v29  ;;  %v6694_v52 = vpop.permute.xlu0 %6693 }
 0xc9b   : > { %6749 = vst.msk [vmem:[#allocation2 + $0x38] sm:$0xff] %vm6741_vm6, %v6708_v37  ;;  %6742 = vst.msk [vmem:[#allocation2] sm:$0xff] %vm6741_vm6, %v6694_v52 }
 0xc9e   : > { %v4903_v12 = vpop.permute.xlu1 %4902  ;;  %v6698_v11 = vpop.permute.xlu0 %6697 }
 0xc9f   : > { %4942 = vst.msk [vmem:[#allocation2 + $0x48] sm:$0xff] %vm4932_vm5, %v4903_v12 }
 0xca0   : > { %6744 = vst.msk [vmem:[#allocation2 + $0x10] sm:$0xff] %vm6741_vm6, %v6698_v11 }
 0xca2   : > { %v4907_v2 = vpop.permute.xlu1 %4906  ;;  %v4893_v20 = vpop.permute.xlu0 %4892 }
 0xca3   : > { %4944 = vst.msk [vmem:[#allocation2 + $0x58] sm:$0xff] %vm4932_vm5, %v4907_v2  ;;  %4937 = vst.msk [vmem:[#allocation2 + $0x20] sm:$0xff] %vm4932_vm5, %v4893_v20 }
 0xca6   : > { %v6712_v51 = vpop.permute.xlu1 %6711  ;;  %v4897_v45 = vpop.permute.xlu0 %4896 }
 0xca7   : > { %6751 = vst.msk [vmem:[#allocation2 + $0x48] sm:$0xff] %vm6741_vm6, %v6712_v51 }
 0xca8   : > { %4939 = vst.msk [vmem:[#allocation2 + $0x30] sm:$0xff] %vm4932_vm5, %v4897_v45 }
 0xcaa   : > { %v6716_v3 = vpop.permute.xlu1 %6715  ;;  %v6702_v41 = vpop.permute.xlu0 %6701 }
 0xcab   : > { %6753 = vst.msk [vmem:[#allocation2 + $0x58] sm:$0xff] %vm6741_vm6, %v6716_v3  ;;  %6746 = vst.msk [vmem:[#allocation2 + $0x20] sm:$0xff] %vm6741_vm6, %v6702_v41 }
 0xcae   : > { %v4911_v21 = vpop.permute.xlu1 %4910  ;;  %v6706_v39 = vpop.permute.xlu0 %6705 }
 0xcaf   : > { %4946 = vst.msk [vmem:[#allocation2 + $0x68] sm:$0xff] %vm4932_vm5, %v4911_v21 }
 0xcb0   : > { %6748 = vst.msk [vmem:[#allocation2 + $0x30] sm:$0xff] %vm6741_vm6, %v6706_v39 }
 0xcb2   : > { %v4915_v13 = vpop.permute.xlu1 %4914  ;;  %v4901_v43 = vpop.permute.xlu0 %4900 }
 0xcb3   : > { %4948 = vst.msk [vmem:[#allocation2 + $0x78] sm:$0xff] %vm4932_vm5, %v4915_v13  ;;  %4941 = vst.msk [vmem:[#allocation2 + $0x40] sm:$0xff] %vm4932_vm5, %v4901_v43 }
 0xcb6   : > { %v6720_v18 = vpop.permute.xlu1 %6719  ;;  %v4905_v38 = vpop.permute.xlu0 %4904 }
 0xcb7   : > { %6755 = vst.msk [vmem:[#allocation2 + $0x68] sm:$0xff] %vm6741_vm6, %v6720_v18 }
 0xcb8   : > { %4943 = vst.msk [vmem:[#allocation2 + $0x50] sm:$0xff] %vm4932_vm5, %v4905_v38 }
 0xcba   : > { %v6724_v63 = vpop.permute.xlu1 %6723  ;;  %v6710_v57 = vpop.permute.xlu0 %6709 }
 0xcbb   : > { %6757 = vst.msk [vmem:[#allocation2 + $0x78] sm:$0xff] %vm6741_vm6, %v6724_v63  ;;  %6750 = vst.msk [vmem:[#allocation2 + $0x40] sm:$0xff] %vm6741_vm6, %v6710_v57 }
 0xcbe   : > { %v6714_v56 = vpop.permute.xlu0 %6713 }
 0xcbf   : > { %6752 = vst.msk [vmem:[#allocation2 + $0x50] sm:$0xff] %vm6741_vm6, %v6714_v56 }
 0xcc2   : > { %v4909_v23 = vpop.permute.xlu0 %4908 }
 0xcc3   : > { %4945 = vst.msk [vmem:[#allocation2 + $0x60] sm:$0xff] %vm4932_vm5, %v4909_v23 }
 0xcc6   : > { %v4913_v4 = vpop.permute.xlu0 %4912 }
 0xcc7   : > { %4947 = vst.msk [vmem:[#allocation2 + $0x70] sm:$0xff] %vm4932_vm5, %v4913_v4 }
 0xcca   : > { %v6718_v62 = vpop.permute.xlu0 %6717 }
 0xccb   : > { %6754 = vst.msk [vmem:[#allocation2 + $0x60] sm:$0xff] %vm6741_vm6, %v6718_v62 }
 0xcce   : > { %v6722_v28 = vpop.permute.xlu0 %6721 }
 0xccf   : > { %6756 = vst.msk [vmem:[#allocation2 + $0x70] sm:$0xff] %vm6741_vm6, %v6722_v28 }
 0xcf5   : > { %v7790_v6 = vpop.f32.mrb[240].mxu1 }
 0xcf6   : > { %8502 = vrot.lane.b32.xlu0 %v7790_v6, %s11735_s21  ;;  %v11121_v54 = vpop.f32.mrb[241].mxu1 }
 0xcf7   : > { %v7793_v0 = vpop.f32.mrb[242].mxu1 }
 0xcf8   : > { %v11122_v50 = vpop.f32.mrb[243].mxu1 }
 0xcfd   : > { %v7882_v27 = vpop.f32.mrb[244].mxu1 }
 0xcfe   : > { %8506 = vrot.lane.b32.xlu0 %v7882_v27, %s11735_s21  ;;  %v11133_v36 = vpop.f32.mrb[245].mxu1 }
 0xcff   : > { %v7885_v9 = vpop.f32.mrb[246].mxu1 }
 0xd00   : > { %v7836_v16 = vpop.f32.mrb[0].mxu0  ;;  %v11134_v5 = vpop.f32.mrb[247].mxu1 }
 0xd01   : > { %v11127_v47 = vpop.f32.mrb[1].mxu0  ;;  %8504 = vrot.lane.b32.xlu1 %v7836_v16, %s11735_s21 }
 0xd02   : > { %v7839_v25 = vpop.f32.mrb[2].mxu0 }
 0xd03   : > { %v11128_v42 = vpop.f32.mrb[3].mxu0 }
 0xd08   : > { %v7928_v49 = vpop.f32.mrb[4].mxu0 }
 0xd09   : > { %v11139_v46 = vpop.f32.mrb[5].mxu0  ;;  %8508 = vrot.lane.b32.xlu1 %v7928_v49, %s11735_s21 }
 0xd0a   : > { %v7931_v19 = vpop.f32.mrb[6].mxu0 }
 0xd0b   : > { %v11140_v32 = vpop.f32.mrb[7].mxu0 }
 0xd0c   : > { %v7974_v34 = vpop.f32.mrb[248].mxu1 }
 0xd0d   : > { %8510 = vrot.lane.b32.xlu0 %v7974_v34, %s11735_s21  ;;  %v11145_v1 = vpop.f32.mrb[249].mxu1 }
 0xd0e   : > { %v7977_v10 = vpop.f32.mrb[250].mxu1 }
 0xd0f   : > { %v11146_v14 = vpop.f32.mrb[251].mxu1 }
 0xd10   : > { %v8020_v33 = vpop.f32.mrb[8].mxu0 }
 0xd11   : > { %v11151_v60 = vpop.f32.mrb[9].mxu0  ;;  %8512 = vrot.lane.b32.xlu1 %v8020_v33, %s11735_s21 }
 0xd12   : > { %v8023_v8 = vpop.f32.mrb[10].mxu0 }
 0xd13   : > { %v11152_v30 = vpop.f32.mrb[11].mxu0 }
 0xd14   : > { %v8066_v40 = vpop.f32.mrb[252].mxu1 }
 0xd15   : > { %8514 = vrot.lane.b32.xlu0 %v8066_v40, %s11735_s21  ;;  %v11157_v31 = vpop.f32.mrb[253].mxu1 }
 0xd16   : > { %v8069_v22 = vpop.f32.mrb[254].mxu1 }
 0xd17   : > { %v11158_v35 = vpop.f32.mrb[255].mxu1 }
 0xd18   : > { %v8112_v48 = vpop.f32.mrb[12].mxu0 }
 0xd19   : > { %v11163_v53 = vpop.f32.mrb[13].mxu0  ;;  %8516 = vrot.lane.b32.xlu1 %v8112_v48, %s11735_s21 }
 0xd1a   : > { %v8115_v55 = vpop.f32.mrb[14].mxu0 }
 0xd1b   : > { %v11164_v44 = vpop.f32.mrb[15].mxu0 }
 0xd1c   : > { %v8158_v24 = vpop.f32.mrb[0].mxu1 }
 0xd1d   : > { %8518 = vrot.lane.b32.xlu0 %v8158_v24, %s11735_s21  ;;  %v11169_v7 = vpop.f32.mrb[1].mxu1 }
 0xd1e   : > { %v8161_v59 = vpop.f32.mrb[2].mxu1 }
 0xd1f   : > { %v11170_v15 = vpop.f32.mrb[3].mxu1 }
 0xd21   : > { %v8204_v58 = vpop.f32.mrb[16].mxu0 }
 0xd22   : > { %8520 = vrot.lane.b32.xlu1 %v8204_v58, %s11735_s21  ;;  %v11175_v17 = vpop.f32.mrb[17].mxu0 }
 0xd23   : > { %v8207_v29 = vpop.f32.mrb[18].mxu0 }
 0xd24   : > { %v11176_v37 = vpop.f32.mrb[19].mxu0  ;;  %v8250_v52 = vpop.f32.mrb[4].mxu1 }
 0xd25   : > { %8522 = vrot.lane.b32.xlu0 %v8250_v52, %s11735_s21  ;;  %v11181_v12 = vpop.f32.mrb[5].mxu1  ;;  %v14378_v52 = vld [vmem:[%s14975_s3 + $0x2] ss:$0 sm:$0xff] }
 0xd26   : > { %v8253_v11 = vpop.f32.mrb[6].mxu1 }
 0xd27   : > { %v11182_v2 = vpop.f32.mrb[7].mxu1 }
 0xd29   : > { %v8296_v20 = vpop.f32.mrb[20].mxu0 }
 0xd2a   : > { %8524 = vrot.lane.b32.xlu1 %v8296_v20, %s11735_s21  ;;  %v11187_v51 = vpop.f32.mrb[21].mxu0 }
 0xd2b   : > { %v8299_v45 = vpop.f32.mrb[22].mxu0 }
 0xd2c   : > { %v11188_v3 = vpop.f32.mrb[23].mxu0 }
 0xd2d   : > { %v11699_v3 = vld [vmem:[%s11816_s23] sm:$0xff] }
 0xd55   : > { %v8342_v41 = vpop.f32.mrb[8].mxu1 }
 0xd56   : > { %8526 = vrot.lane.b32.xlu0 %v8342_v41, %s11735_s21  ;;  %v11193_v21 = vpop.f32.mrb[9].mxu1 }
 0xd57   : > { %v8345_v39 = vpop.f32.mrb[10].mxu1 }
 0xd58   : > { %v11194_v13 = vpop.f32.mrb[11].mxu1  ;;  %v11700_v39 = vld [vmem:[%s11816_s23 + $0x10] sm:$0xff] }
 0xd5d   : > { %v8388_v43 = vpop.f32.mrb[24].mxu0 }
 0xd5e   : > { %8528 = vrot.lane.b32.xlu1 %v8388_v43, %s11735_s21  ;;  %v11199_v18 = vpop.f32.mrb[25].mxu0 }
 0xd5f   : > { %v8391_v38 = vpop.f32.mrb[26].mxu0  ;;  %v11701_v18 = vld [vmem:[%s11816_s23 + $0x8] sm:$0xff] }
 0xd60   : > { %v11200_v63 = vpop.f32.mrb[27].mxu0 }
 0xd65   : > { %v8434_v57 = vpop.f32.mrb[12].mxu1 }
 0xd66   : > { %8530 = vrot.lane.b32.xlu0 %v8434_v57, %s11735_s21  ;;  %v11205_v56 = vpop.f32.mrb[13].mxu1 }
 0xd67   : > { %v8437_v23 = vpop.f32.mrb[14].mxu1  ;;  %v11702_v56 = vld [vmem:[%s11816_s23 + $0x18] sm:$0xff] }
 0xd68   : > { %v11206_v4 = vpop.f32.mrb[15].mxu1  ;;  %v8503_v62 = vpop.permute.xlu0 %8502 }
 0xd69   : > { %8551 = vst.msk [vmem:[#allocation2] sm:$0xff] %vm8550_vm7, %v8503_v62 }
 0xd6d   : > { %v8480_v28 = vpop.f32.mrb[28].mxu0 }
 0xd6e   : > { %8532 = vrot.lane.b32.xlu1 %v8480_v28, %s11735_s21  ;;  %v11211_v6 = vpop.f32.mrb[29].mxu0 }
 0xd6f   : > { %v8483_v54 = vpop.f32.mrb[30].mxu0 }
 0xd70   : > { %v11212_v0 = vpop.f32.mrb[31].mxu0  ;;  %v8507_v50 = vpop.permute.xlu0 %8506  ;;  %v8567_v61 = vld [vmem:[#allocation2] sm:$0xff] }
 0xd71   : > { %8553 = vst.msk [vmem:[#allocation2 + $0x10] sm:$0xff] %vm8550_vm7, %v8507_v50 }
 0xd73   : > { %v8505_v27 = vpop.permute.xlu1 %8504 }
 0xd74   : > { %8552 = vst.msk [vmem:[#allocation2 + $0x8] sm:$0xff] %vm8550_vm7, %v8505_v27 }
 0xd78   : > { %v8569_v47 = vld [vmem:[#allocation2 + $0x10] sm:$0xff] }
 0xd7b   : > { %v8509_v36 = vpop.permute.xlu1 %8508  ;;  %v8568_v9 = vld [vmem:[#allocation2 + $0x8] sm:$0xff] }
 0xd7c   : > { %8554 = vst.msk [vmem:[#allocation2 + $0x18] sm:$0xff] %vm8550_vm7, %v8509_v36  ;;  %v8583_v16 = vpack.c.bf16 %v8568_v9, %v8567_v61  ;;  %v11703_v36 = vld [vmem:[%s11816_s23 + $0x20] sm:$0xff] }
 0xd7e   : > { %11217 = vmatprep.mubr.msk.bf16.mxu1 %vm504_vm0, %v8583_v16 }
 0xd7f   : > { %v8511_v5 = vpop.permute.xlu0 %8510 }
 0xd80   : > { %8555 = vst.msk [vmem:[#allocation2 + $0x20] sm:$0xff] %vm8550_vm7, %v8511_v5  ;;  %v11704_v5 = vld [vmem:[%s11816_s23 + $0x30] sm:$0xff] }
 0xd83   : > { %v8570_v25 = vld [vmem:[#allocation2 + $0x18] sm:$0xff]  ;;  %v8513_v26 = vpop.permute.xlu1 %8512 }
 0xd84   : > { %v8584_v42 = vpack.c.bf16 %v8570_v25, %v8569_v47  ;;  %8556 = vst.msk [vmem:[#allocation2 + $0x28] sm:$0xff] %vm8550_vm7, %v8513_v26  ;;  %v11705_v25 = vld [vmem:[%s11816_s23 + $0x28] sm:$0xff] }
 0xd86   : > { %11218 = vmatmul.mubr.msk.bf16.vlgmr.msra.gmra.mrb[16].mxu1 %vm504_vm0, %v8584_v42 }
 0xd87   : > { %v8515_v49 = vpop.permute.xlu0 %8514  ;;  %v8571_v19 = vld [vmem:[#allocation2 + $0x20] sm:$0xff] }
 0xd88   : > { %8557 = vst.msk [vmem:[#allocation2 + $0x30] sm:$0xff] %vm8550_vm7, %v8515_v49  ;;  %v11706_v49 = vld [vmem:[%s11816_s23 + $0x38] sm:$0xff] }
 0xd8b   : > { %v8517_v46 = vpop.permute.xlu1 %8516  ;;  %v8572_v32 = vld [vmem:[#allocation2 + $0x28] sm:$0xff] }
 0xd8c   : > { %8558 = vst.msk [vmem:[#allocation2 + $0x38] sm:$0xff] %vm8550_vm7, %v8517_v46  ;;  %v8585_v34 = vpack.c.bf16 %v8572_v32, %v8571_v19 }
 0xd8e   : > { %11221 = vmatprep.mubr.msk.bf16.mxu1 %vm504_vm0, %v8585_v34 }
 0xd8f   : > { %v8519_v1 = vpop.permute.xlu0 %8518  ;;  %v8573_v10 = vld [vmem:[#allocation2 + $0x30] sm:$0xff] }
 0xd90   : > { %8559 = vst.msk [vmem:[#allocation2 + $0x40] sm:$0xff] %vm8550_vm7, %v8519_v1 }
 0xd93   : > { %v8574_v14 = vld [vmem:[#allocation2 + $0x38] sm:$0xff] }
 0xd94   : > { %v8521_v33 = vpop.permute.xlu1 %8520  ;;  %v8586_v60 = vpack.c.bf16 %v8574_v14, %v8573_v10 }
 0xd95   : > { %8560 = vst.msk [vmem:[#allocation2 + $0x48] sm:$0xff] %vm8550_vm7, %v8521_v33 }
 0xd96   : > { %11222 = vmatmul.mubr.msk.bf16.gmra.mrb[20].mxu1 %vm504_vm0, %v8586_v60 }
 0xd97   : > { %v8523_v8 = vpop.permute.xlu0 %8522  ;;  %v8575_v40 = vld [vmem:[#allocation2 + $0x40] sm:$0xff] }
 0xd98   : > { %8561 = vst.msk [vmem:[#allocation2 + $0x50] sm:$0xff] %vm8550_vm7, %v8523_v8 }
 0xd9c   : > { %v8525_v30 = vpop.permute.xlu1 %8524  ;;  %v8576_v31 = vld [vmem:[#allocation2 + $0x48] sm:$0xff] }
 0xd9d   : > { %8562 = vst.msk [vmem:[#allocation2 + $0x58] sm:$0xff] %vm8550_vm7, %v8525_v30  ;;  %v8587_v22 = vpack.c.bf16 %v8576_v31, %v8575_v40  ;;  %v11707_v30 = vld [vmem:[%s11816_s23 + $0x40] sm:$0xff] }
 0xd9f   : > { %11225 = vmatprep.mubr.msk.bf16.mxu1 %vm504_vm0, %v8587_v22  ;;  %v8577_v35 = vld [vmem:[#allocation2 + $0x50] sm:$0xff] }
 0xda4   : > { %v8578_v48 = vld [vmem:[#allocation2 + $0x58] sm:$0xff] }
 0xda5   : > { %v8588_v53 = vpack.c.bf16 %v8578_v48, %v8577_v35  ;;  %v11708_v35 = vld [vmem:[%s11816_s23 + $0x50] sm:$0xff] }
 0xda7   : > { %11226 = vmatmul.mubr.msk.bf16.gmra.mrb[24].mxu1 %vm504_vm0, %v8588_v53  ;;  %v11709_v53 = vld [vmem:[%s11816_s23 + $0x48] sm:$0xff] }
 0xdc8   : > { %v8527_v55 = vpop.permute.xlu0 %8526 }
 0xdc9   : > { %8563 = vst.msk [vmem:[#allocation2 + $0x60] sm:$0xff] %vm8550_vm7, %v8527_v55 }
 0xdd0   : > { %v8529_v44 = vpop.permute.xlu1 %8528  ;;  %v8579_v7 = vld [vmem:[#allocation2 + $0x60] sm:$0xff] }
 0xdd1   : > { %8564 = vst.msk [vmem:[#allocation2 + $0x68] sm:$0xff] %vm8550_vm7, %v8529_v44 }
 0xdd8   : > { %v8531_v24 = vpop.permute.xlu0 %8530  ;;  %v8580_v59 = vld [vmem:[#allocation2 + $0x68] sm:$0xff] }
 0xdd9   : > { %8565 = vst.msk [vmem:[#allocation2 + $0x70] sm:$0xff] %vm8550_vm7, %v8531_v24  ;;  %v8589_v15 = vpack.c.bf16 %v8580_v59, %v8579_v7  ;;  %v11710_v24 = vld [vmem:[%s11816_s23 + $0x58] sm:$0xff] }
 0xddb   : > { %11229 = vmatprep.mubr.msk.bf16.mxu1 %vm504_vm0, %v8589_v15 }
 0xde0   : > { %v8533_v58 = vpop.permute.xlu1 %8532  ;;  %v8581_v17 = vld [vmem:[#allocation2 + $0x70] sm:$0xff] }
 0xde1   : > { %8566 = vst.msk [vmem:[#allocation2 + $0x78] sm:$0xff] %vm8550_vm7, %v8533_v58 }
 0xde8   : > { %v8582_v29 = vld [vmem:[#allocation2 + $0x78] sm:$0xff] }
 0xde9   : > { %v8590_v37 = vpack.c.bf16 %v8582_v29, %v8581_v17 }
 0xdeb   : > { %11230 = vmatmul.mubr.msk.bf16.gmra.mrb[28].mxu1 %vm504_vm0, %v8590_v37 }
 0xe59   : > { %v11219_v12 = vpop.f32.mrb[16].mxu1 }
 0xe5a   : > { %v8669_v11 = vpop.f32.mrb[17].mxu1  ;;  %v8678_v2 = vadd.f32 %v11219_v12, %v14378_v52 }
 0xe5b   : > { %v8670_v20 = vadd.f32 %v14378_v52, %v8669_v11  ;;  %v11220_v51 = vpop.f32.mrb[18].mxu1 }
 0xe5c   : > { %v8672_v45 = vpop.f32.mrb[19].mxu1  ;;  %v14387_v13 = vadd.f32 %v11700_v39, %v8678_v2  ;;  %v8681_v43 = vadd.f32 %v11220_v51, %v14378_v52 }
 0xe5d   : > { %v14383_v41 = vadd.f32 %v11699_v3, %v8670_v20  ;;  %v8673_v21 = vadd.f32 %v14378_v52, %v8672_v45  ;;  %v11711_v20 = vld [vmem:[%s11816_s23 + $0x60] sm:$0xff] }
 0xe5e   : > { %v14398_v23 = vadd.f32 %v11702_v56, %v8681_v43  ;;  %v8754_v4 = vsel %vm504_vm0, %v14387_v13, 0.0  ;;  %v11713_v43 = vld [vmem:[%s11816_s23 + $0x68] sm:$0xff] }
 0xe5f   : > { %v14391_v38 = vadd.f32 %v11701_v18, %v8673_v21  ;;  %v8748_v63 = vsel %vm504_vm0, %v14383_v41, 0.0  ;;  %v11712_v21 = vld [vmem:[%s11816_s23 + $0x70] sm:$0xff] }
 0xe60   : > { %8749 = vadd.xlane.f32.xlu0 %v8748_v63  ;;  %v8757_v62 = vsel %vm504_vm0, %v14398_v23, 0.0 }
 0xe61   : > { %v8751_v57 = vsel %vm504_vm0, %v14391_v38, 0.0 }
 0xe62   : > { %8752 = vadd.xlane.f32.xlu1 %v8751_v57  ;;  %v11714_v57 = vld [vmem:[%s11816_s23 + $0x78] sm:$0xff] }
 0xe64   : > { %8755 = vadd.xlane.f32.xlu0 %v8754_v4 }
 0xe68   : > { %8758 = vadd.xlane.f32.xlu0 %v8757_v62 }
 0xe69   : > { %v11223_v28 = vpop.f32.mrb[20].mxu1 }
 0xe6a   : > { %v8685_v6 = vpop.f32.mrb[21].mxu1  ;;  %v8694_v54 = vadd.f32 %v11223_v28, %v14378_v52 }
 0xe6b   : > { %v8686_v0 = vadd.f32 %v14378_v52, %v8685_v6  ;;  %v11224_v50 = vpop.f32.mrb[22].mxu1 }
 0xe6c   : > { %v8688_v27 = vpop.f32.mrb[23].mxu1  ;;  %v8697_v9 = vadd.f32 %v11224_v50, %v14378_v52  ;;  %v14412_v47 = vadd.f32 %v11704_v5, %v8694_v54 }
 0xe6d   : > { %v14407_v61 = vadd.f32 %v11703_v36, %v8686_v0  ;;  %v8689_v16 = vadd.f32 %v14378_v52, %v8688_v27 }
 0xe6e   : > { %v14420_v46 = vadd.f32 %v11706_v49, %v8697_v9  ;;  %v8766_v32 = vsel %vm504_vm0, %v14412_v47, 0.0 }
 0xe6f   : > { %v14415_v26 = vadd.f32 %v11705_v25, %v8689_v16  ;;  %v8760_v42 = vsel %vm504_vm0, %v14407_v61, 0.0 }
 0xe70   : > { %8761 = vadd.xlane.f32.xlu0 %v8760_v42  ;;  %v8769_v34 = vsel %vm504_vm0, %v14420_v46, 0.0 }
 0xe71   : > { %v8763_v19 = vsel %vm504_vm0, %v14415_v26, 0.0 }
 0xe72   : > { %8764 = vadd.xlane.f32.xlu1 %v8763_v19 }
 0xe74   : > { %8767 = vadd.xlane.f32.xlu0 %v8766_v32 }
 0xe76   : > { %8770 = vadd.xlane.f32.xlu1 %v8769_v34 }
 0xe7a   : > { %v11227_v1 = vpop.f32.mrb[24].mxu1 }
 0xe7b   : > { %v8701_v10 = vpop.f32.mrb[25].mxu1  ;;  %v8710_v14 = vadd.f32 %v11227_v1, %v14378_v52 }
 0xe7c   : > { %v8702_v33 = vadd.f32 %v14378_v52, %v8701_v10  ;;  %v11228_v60 = vpop.f32.mrb[26].mxu1 }
 0xe7d   : > { %v8704_v8 = vpop.f32.mrb[27].mxu1  ;;  %v8713_v31 = vadd.f32 %v11228_v60, %v14378_v52  ;;  %v14436_v48 = vadd.f32 %v11708_v35, %v8710_v14 }
 0xe7e   : > { %v14431_v40 = vadd.f32 %v11707_v30, %v8702_v33  ;;  %v8705_v22 = vadd.f32 %v14378_v52, %v8704_v8 }
 0xe7f   : > { %v14444_v7 = vadd.f32 %v11710_v24, %v8713_v31  ;;  %v8778_v15 = vsel %vm504_vm0, %v14436_v48, 0.0 }
 0xe80   : > { %v14439_v55 = vadd.f32 %v11709_v53, %v8705_v22  ;;  %v8772_v44 = vsel %vm504_vm0, %v14431_v40, 0.0 }
 0xe81   : > { %8773 = vadd.xlane.f32.xlu0 %v8772_v44  ;;  %v8781_v58 = vsel %vm504_vm0, %v14444_v7, 0.0 }
 0xe82   : > { %v8775_v59 = vsel %vm504_vm0, %v14439_v55, 0.0 }
 0xe83   : > { %8776 = vadd.xlane.f32.xlu1 %v8775_v59 }
 0xe85   : > { %8779 = vadd.xlane.f32.xlu0 %v8778_v15 }
 0xe87   : > { %8782 = vadd.xlane.f32.xlu1 %v8781_v58 }
 0xebe   : > { %v11231_v17 = vpop.f32.mrb[28].mxu1 }
 0xebf   : > { %v8717_v29 = vpop.f32.mrb[29].mxu1  ;;  %v8726_v37 = vadd.f32 %v11231_v17, %v14378_v52 }
 0xec0   : > { %v8718_v12 = vadd.f32 %v14378_v52, %v8717_v29  ;;  %v11232_v11 = vpop.f32.mrb[30].mxu1 }
 0xec1   : > { %v8720_v2 = vpop.f32.mrb[31].mxu1  ;;  %v8729_v45 = vadd.f32 %v11232_v11, %v14378_v52  ;;  %v14460_v39 = vadd.f32 %v11712_v21, %v8726_v37 }
 0xec2   : > { %v14455_v51 = vadd.f32 %v11711_v20, %v8718_v12  ;;  %v8721_v3 = vadd.f32 %v14378_v52, %v8720_v2 }
 0xec3   : > { %v14468_v56 = vadd.f32 %v11714_v57, %v8729_v45  ;;  %v8790_v52 = vsel %vm504_vm0, %v14460_v39, 0.0 }
 0xec4   : > { %15062 = vst [vmem:[#allocation3_spill] sm:$0xff] %v14455_v51  ;;  %v14463_v18 = vadd.f32 %v11713_v43, %v8721_v3  ;;  %v8784_v63 = vsel %vm504_vm0, %v14455_v51, 0.0 }
 0xec5   : > { %8785 = vadd.xlane.f32.xlu0 %v8784_v63  ;;  %15064 = vst [vmem:[#allocation4_spill] sm:$0xff] %v14468_v56  ;;  %v8793_v62 = vsel %vm504_vm0, %v14468_v56, 0.0 }
 0xec6   : > { %15063 = vst [vmem:[#allocation22_spill] sm:$0xff] %v14463_v18  ;;  %v8787_v4 = vsel %vm504_vm0, %v14463_v18, 0.0 }
 0xec7   : > { %8788 = vadd.xlane.f32.xlu1 %v8787_v4 }
 0xec9   : > { %8791 = vadd.xlane.f32.xlu0 %v8790_v52 }
 0xecb   : > { %8794 = vadd.xlane.f32.xlu1 %v8793_v62 }
 0xeed   : > { %v8750_v28 = vpop.xlane.xlu0 %8749 }
 0xeee   : > { %v8796_v6 = vmul.f32 0.03125, %v8750_v28 }
 0xeef   : > { %v8753_v54 = vpop.xlane.xlu1 %8752 }
 0xef0   : > { %v14477_v0 = vsub.f32 %v14383_v41, %v8796_v6  ;;  %v8797_v50 = vmul.f32 0.03125, %v8753_v54 }
 0xef1   : > { %v8756_v27 = vpop.xlane.xlu0 %8755 }
 0xef2   : > { %v14480_v36 = vsub.f32 %v14391_v38, %v8797_v50  ;;  %v8798_v9 = vmul.f32 0.03125, %v8756_v27  ;;  %v8828_v16 = vmul.f32 %v14477_v0, %v14477_v0 }
 0xef4   : > { %v14485_v5 = vsub.f32 %v14387_v13, %v8798_v9  ;;  %v8844_v25 = vsel %vm504_vm0, %v8828_v16, 0.0  ;;  %v8829_v42 = vmul.f32 %v14480_v36, %v14480_v36 }
 0xef5   : > { %8845 = vadd.xlane.f32.xlu0 %v8844_v25  ;;  %v8759_v49 = vpop.xlane.xlu0 %8758 }
 0xef6   : > { %v8799_v19 = vmul.f32 0.03125, %v8759_v49  ;;  %v8847_v32 = vsel %vm504_vm0, %v8829_v42, 0.0  ;;  %v8830_v34 = vmul.f32 %v14485_v5, %v14485_v5 }
 0xef7   : > { %8848 = vadd.xlane.f32.xlu1 %v8847_v32  ;;  %v11311_v32 = vld [vmem:[%s14980_s8] sm:$0xff]  }
 0xef8   : > { %v14494_v1 = vsub.f32 %v14398_v23, %v8799_v19  ;;  %v8850_v10 = vsel %vm504_vm0, %v8830_v34, 0.0  ;;  %11233 = vmatprep.subr.bf16.mxu0 %v11311_v32 }
 0xef9   : > { %8851 = vadd.xlane.f32.xlu0 %v8850_v10  ;;  %11234 = vmatpush3.bf16.msra.mxu0 %v11311_v32  ;;  %v11312_v10 = vld [vmem:[%s14980_s8 + $0x8] sm:$0xff]   ;;  %v14581_v32 = vld [vmem:[%s14975_s3 + $0x3] ss:$0 sm:$0xff] }
 0xefa   : > { %v8831_v14 = vmul.f32 %v14494_v1, %v14494_v1  ;;  %11235 = vmatprep.subr.bf16.mxu0 %v11312_v10 }
 0xefc   : > { %v8853_v33 = vsel %vm504_vm0, %v8831_v14, 0.0 }
 0xefd   : > { %8854 = vadd.xlane.f32.xlu1 %v8853_v33  ;;  %v8762_v60 = vpop.xlane.xlu0 %8761  ;;  %11236 = vmatpush3.bf16.msra.mxu0 %v11312_v10 }
 0xefe   : > { %v8800_v8 = vmul.f32 0.03125, %v8762_v60 }
 0xeff   : > { %v8765_v30 = vpop.xlane.xlu1 %8764 }
 0xf00   : > { %v14501_v31 = vsub.f32 %v14407_v61, %v8800_v8  ;;  %v8801_v22 = vmul.f32 0.03125, %v8765_v30 }
 0xf01   : > { %v8768_v35 = vpop.xlane.xlu0 %8767 }
 0xf02   : > { %v14504_v53 = vsub.f32 %v14415_v26, %v8801_v22  ;;  %v8802_v44 = vmul.f32 0.03125, %v8768_v35  ;;  %v8832_v24 = vmul.f32 %v14501_v31, %v14501_v31 }
 0xf03   : > { %v8771_v59 = vpop.xlane.xlu1 %8770 }
 0xf04   : > { %v14509_v15 = vsub.f32 %v14412_v47, %v8802_v44  ;;  %v8803_v58 = vmul.f32 0.03125, %v8771_v59  ;;  %v8856_v17 = vsel %vm504_vm0, %v8832_v24, 0.0  ;;  %v8833_v29 = vmul.f32 %v14504_v53, %v14504_v53 }
 0xf05   : > { %8857 = vadd.xlane.f32.xlu0 %v8856_v17 }
 0xf06   : > { %v14515_v37 = vsub.f32 %v14420_v46, %v8803_v58  ;;  %v8859_v12 = vsel %vm504_vm0, %v8833_v29, 0.0  ;;  %v8834_v11 = vmul.f32 %v14509_v15, %v14509_v15 }
 0xf07   : > { %8860 = vadd.xlane.f32.xlu1 %v8859_v12 }
 0xf08   : > { %v8862_v2 = vsel %vm504_vm0, %v8834_v11, 0.0  ;;  %v8835_v20 = vmul.f32 %v14515_v37, %v14515_v37 }
 0xf09   : > { %8863 = vadd.xlane.f32.xlu0 %v8862_v2 }
 0xf0a   : > { %v8865_v45 = vsel %vm504_vm0, %v8835_v20, 0.0 }
 0xf0b   : > { %8866 = vadd.xlane.f32.xlu1 %v8865_v45 }
 0xf0e   : > { %v8774_v3 = vpop.xlane.xlu0 %8773 }
 0xf0f   : > { %v8804_v21 = vmul.f32 0.03125, %v8774_v3 }
 0xf10   : > { %v8777_v43 = vpop.xlane.xlu1 %8776 }
 0xf11   : > { %v14525_v63 = vsub.f32 %v14431_v40, %v8804_v21  ;;  %v8805_v57 = vmul.f32 0.03125, %v8777_v43 }
 0xf12   : > { %v8780_v4 = vpop.xlane.xlu0 %8779 }
 0xf13   : > { %v14528_v52 = vsub.f32 %v14439_v55, %v8805_v57  ;;  %v8806_v62 = vmul.f32 0.03125, %v8780_v4  ;;  %v8836_v28 = vmul.f32 %v14525_v63, %v14525_v63 }
 0xf14   : > { %v8783_v6 = vpop.xlane.xlu1 %8782 }
 0xf15   : > { %v14533_v54 = vsub.f32 %v14436_v48, %v8806_v62  ;;  %v8807_v50 = vmul.f32 0.03125, %v8783_v6  ;;  %v8868_v27 = vsel %vm504_vm0, %v8836_v28, 0.0  ;;  %v8837_v9 = vmul.f32 %v14528_v52, %v14528_v52 }
 0xf16   : > { %8869 = vadd.xlane.f32.xlu0 %v8868_v27 }
 0xf17   : > { %v14539_v16 = vsub.f32 %v14444_v7, %v8807_v50  ;;  %v8871_v25 = vsel %vm504_vm0, %v8837_v9, 0.0  ;;  %v8838_v42 = vmul.f32 %v14533_v54, %v14533_v54 }
 0xf18   : > { %8872 = vadd.xlane.f32.xlu1 %v8871_v25 }
 0xf19   : > { %v8874_v49 = vsel %vm504_vm0, %v8838_v42, 0.0  ;;  %v8839_v19 = vmul.f32 %v14539_v16, %v14539_v16 }
 0xf1a   : > { %8875 = vadd.xlane.f32.xlu0 %v8874_v49 }
 0xf1b   : > { %v8877_v34 = vsel %vm504_vm0, %v8839_v19, 0.0 }
 0xf1c   : > { %8878 = vadd.xlane.f32.xlu1 %v8877_v34 }
 0xf52   : > { %v8786_v14 = vpop.xlane.xlu0 %8785 }
 0xf53   : > { %v8808_v33 = vmul.f32 0.03125, %v8786_v14 }
 0xf54   : > { %v8789_v60 = vpop.xlane.xlu1 %8788 }
 0xf55   : > { %v14555_v8 = vsub.f32 %v14455_v51, %v8808_v33  ;;  %v8809_v30 = vmul.f32 0.03125, %v8789_v60 }
 0xf56   : > { %v8792_v22 = vpop.xlane.xlu0 %8791 }
 0xf57   : > { %v14558_v35 = vsub.f32 %v14463_v18, %v8809_v30  ;;  %v8810_v44 = vmul.f32 0.03125, %v8792_v22  ;;  %v8840_v24 = vmul.f32 %v14555_v8, %v14555_v8 }
 0xf58   : > { %v8795_v59 = vpop.xlane.xlu1 %8794 }
 0xf59   : > { %v14563_v58 = vsub.f32 %v14460_v39, %v8810_v44  ;;  %v8811_v17 = vmul.f32 0.03125, %v8795_v59  ;;  %v8880_v29 = vsel %vm504_vm0, %v8840_v24, 0.0  ;;  %v8841_v12 = vmul.f32 %v14558_v35, %v14558_v35  ;;  %v14589_v24 = vld [vmem:[%s14975_s3 + $0x4] ss:$0 sm:$0xff] }
 0xf5a   : > { %8881 = vadd.xlane.f32.xlu0 %v8880_v29 }
 0xf5b   : > { %v14569_v11 = vsub.f32 %v14468_v56, %v8811_v17  ;;  %v8883_v2 = vsel %vm504_vm0, %v8841_v12, 0.0  ;;  %v8842_v20 = vmul.f32 %v14563_v58, %v14563_v58 }
 0xf5c   : > { %8884 = vadd.xlane.f32.xlu1 %v8883_v2 }
 0xf5d   : > { %v8886_v45 = vsel %vm504_vm0, %v8842_v20, 0.0  ;;  %v8843_v3 = vmul.f32 %v14569_v11, %v14569_v11 }
 0xf5e   : > { %8887 = vadd.xlane.f32.xlu0 %v8886_v45 }
 0xf5f   : > { %v8889_v21 = vsel %vm504_vm0, %v8843_v3, 0.0 }
 0xf60   : > { %8890 = vadd.xlane.f32.xlu1 %v8889_v21 }
 0xf82   : > { %v8846_v43 = vpop.xlane.xlu0 %8845 }
 0xf83   : > { %v8892_v57 = vmul.f32 0.03125, %v8846_v43 }
 0xf84   : > { %v8849_v4 = vpop.xlane.xlu1 %8848 }
 0xf85   : > { %v8908_v62 = vadd.f32 1e-05, %v8892_v57  ;;  %v8893_v28 = vmul.f32 0.03125, %v8849_v4 }
 0xf86   : > { %v8852_v6 = vpop.xlane.xlu0 %8851 }
 0xf87   : > { %11603 = vrsqrt.f32 %v8908_v62  ;;  %v8909_v50 = vadd.f32 1e-05, %v8893_v28  ;;  %v8894_v27 = vmul.f32 0.03125, %v8852_v6 }
 0xf89   : > { %11605 = vrsqrt.f32 %v8909_v50  ;;  %v8910_v9 = vadd.f32 1e-05, %v8894_v27 }
 0xf8a   : > { %v8855_v25 = vpop.xlane.xlu1 %8854 }
 0xf8b   : > { %11607 = vrsqrt.f32 %v8910_v9  ;;  %v8895_v42 = vmul.f32 0.03125, %v8855_v25 }
 0xf8d   : > { %v8911_v49 = vadd.f32 1e-05, %v8895_v42 }
 0xf8f   : > { %11609 = vrsqrt.f32 %v8911_v49 }
 0xf91   : > { %v11604_v19 = vpop.eup %11603 }
 0xf92   : > { %v8940_v34 = vmul.f32 %v11604_v19, %v14477_v0  ;;  %v8858_v10 = vpop.xlane.xlu0 %8857 }
 0xf93   : > { %v11606_v14 = vpop.eup %11605  ;;  %v8896_v33 = vmul.f32 0.03125, %v8858_v10 }
 0xf94   : > { %v8941_v60 = vmul.f32 %v11606_v14, %v14480_v36  ;;  %v8861_v30 = vpop.xlane.xlu1 %8860  ;;  %v8960_v22 = vmul.f32 %v14581_v32, %v8940_v34 }
 0xf95   : > { %v11608_v44 = vpop.eup %11607  ;;  %v8912_v59 = vadd.f32 1e-05, %v8896_v33  ;;  %v8897_v17 = vmul.f32 0.03125, %v8861_v30 }
 0xf96   : > { %v8942_v29 = vmul.f32 %v11608_v44, %v14485_v5  ;;  %v8864_v12 = vpop.xlane.xlu0 %8863  ;;  %v8961_v0 = vmul.f32 %v14581_v32, %v8941_v60  ;;  %v8980_v45 = vadd.f32 %v14589_v24, %v8960_v22 }
 0xf97   : > { %11611 = vrsqrt.f32 %v8912_v59  ;;  %v8913_v2 = vadd.f32 1e-05, %v8897_v17  ;;  %v8898_v20 = vmul.f32 0.03125, %v8864_v12 }
 0xf98   : > { %v8867_v36 = vpop.xlane.xlu1 %8866  ;;  %v8981_v3 = vadd.f32 %v14589_v24, %v8961_v0  ;;  %v8962_v4 = vmul.f32 %v14581_v32, %v8942_v29 }
 0xf99   : > { %v11610_v21 = vpop.eup %11609  ;;  %11613 = vrsqrt.f32 %v8913_v2  ;;  %v8914_v43 = vadd.f32 1e-05, %v8898_v20  ;;  %v8899_v57 = vmul.f32 0.03125, %v8867_v36 }
 0xf9a   : > { %v8943_v62 = vmul.f32 %v11610_v21, %v14494_v1  ;;  %v8996_v5 = vpack.c.bf16 %v8981_v3, %v8980_v45  ;;  %v8982_v50 = vadd.f32 %v14589_v24, %v8962_v4 }
 0xf9b   : > { %11615 = vrsqrt.f32 %v8914_v43  ;;  %v8915_v28 = vadd.f32 1e-05, %v8899_v57 }
 0xf9c   : > { %v8963_v6 = vmul.f32 %v14581_v32, %v8943_v62  ;;  %11237 = vmatprep.mubr.msk.bf16.mxu0 %vm504_vm0, %v8996_v5 }
 0xf9d   : > { %11617 = vrsqrt.f32 %v8915_v28 }
 0xf9e   : > { %v8983_v27 = vadd.f32 %v14589_v24, %v8963_v6 }
 0xfa0   : > { %v8997_v9 = vpack.c.bf16 %v8983_v27, %v8982_v50 }
 0xfa1   : > { %v11612_v25 = vpop.eup %11611 }
 0xfa2   : > { %v8944_v42 = vmul.f32 %v11612_v25, %v14501_v31  ;;  %11238 = vmatmul.mubr.msk.bf16.vlgmr.msra.gmra.mrb[32].mxu0 %vm504_vm0, %v8997_v9 }
 0xfa3   : > { %v11614_v49 = vpop.eup %11613  ;;  %v8870_v1 = vpop.xlane.xlu0 %8869 }
 0xfa4   : > { %v8945_v19 = vmul.f32 %v11614_v49, %v14504_v53  ;;  %v8900_v34 = vmul.f32 0.03125, %v8870_v1  ;;  %v8964_v33 = vmul.f32 %v14581_v32, %v8944_v42 }
 0xfa5   : > { %v11616_v10 = vpop.eup %11615  ;;  %v8873_v14 = vpop.xlane.xlu1 %8872 }
 0xfa6   : > { %v8946_v60 = vmul.f32 %v11616_v10, %v14509_v15  ;;  %v8916_v30 = vadd.f32 1e-05, %v8900_v34  ;;  %v8901_v22 = vmul.f32 0.03125, %v8873_v14  ;;  %v8965_v44 = vmul.f32 %v14581_v32, %v8945_v19 }
 0xfa7   : > { %v11618_v59 = vpop.eup %11617  ;;  %v8876_v17 = vpop.xlane.xlu0 %8875  ;;  %v8984_v2 = vadd.f32 %v14589_v24, %v8964_v33 }
 0xfa8   : > { %v8966_v31 = vmul.f32 %v14581_v32, %v8946_v60  ;;  %v8947_v29 = vmul.f32 %v11618_v59, %v14515_v37  ;;  %11619 = vrsqrt.f32 %v8916_v30  ;;  %v8917_v12 = vadd.f32 1e-05, %v8901_v22 }
 0xfa9   : > { %v8902_v53 = vmul.f32 0.03125, %v8876_v17  ;;  %v8879_v0 = vpop.xlane.xlu1 %8878  ;;  %v8985_v20 = vadd.f32 %v14589_v24, %v8965_v44 }
 0xfaa   : > { %v8967_v15 = vmul.f32 %v14581_v32, %v8947_v29  ;;  %11621 = vrsqrt.f32 %v8917_v12  ;;  %v8903_v36 = vmul.f32 0.03125, %v8879_v0  ;;  %v8986_v21 = vadd.f32 %v14589_v24, %v8966_v31 }
 0xfab   : > { %v8918_v45 = vadd.f32 1e-05, %v8902_v53  ;;  %v8998_v3 = vpack.c.bf16 %v8985_v20, %v8984_v2 }
 0xfac   : > { %v8987_v43 = vadd.f32 %v14589_v24, %v8967_v15  ;;  %v8919_v57 = vadd.f32 1e-05, %v8903_v36 }
 0xfad   : > { %11623 = vrsqrt.f32 %v8918_v45  ;;  %11241 = vmatprep.mubr.msk.bf16.mxu0 %vm504_vm0, %v8998_v3 }
 0xfae   : > { %v8999_v37 = vpack.c.bf16 %v8987_v43, %v8986_v21  ;;  %11625 = vrsqrt.f32 %v8919_v57 }
 0xfb0   : > { %11242 = vmatmul.mubr.msk.bf16.gmra.mrb[36].mxu0 %vm504_vm0, %v8999_v37 }
 0xfb2   : > { %v11620_v4 = vpop.eup %11619 }
 0xfb3   : > { %v8948_v62 = vmul.f32 %v11620_v4, %v14525_v63 }
 0xfb4   : > { %v11622_v5 = vpop.eup %11621 }
 0xfb5   : > { %v8949_v28 = vmul.f32 %v11622_v5, %v14528_v52  ;;  %v8968_v6 = vmul.f32 %v14581_v32, %v8948_v62 }
 0xfb7   : > { %v11624_v50 = vpop.eup %11623  ;;  %v8969_v27 = vmul.f32 %v14581_v32, %v8949_v28  ;;  %v8988_v49 = vadd.f32 %v14589_v24, %v8968_v6 }
 0xfb8   : > { %v11626_v9 = vpop.eup %11625  ;;  %v8950_v25 = vmul.f32 %v11624_v50, %v14533_v54 }
 0xfb9   : > { %v8951_v42 = vmul.f32 %v11626_v9, %v14539_v16  ;;  %v8989_v1 = vadd.f32 %v14589_v24, %v8969_v27 }
 0xfba   : > { %v8970_v19 = vmul.f32 %v14581_v32, %v8950_v25 }
 0xfbb   : > { %v8971_v63 = vmul.f32 %v14581_v32, %v8951_v42  ;;  %v9000_v34 = vpack.c.bf16 %v8989_v1, %v8988_v49 }
 0xfbc   : > { %v8990_v52 = vadd.f32 %v14589_v24, %v8970_v19 }
 0xfbd   : > { %v8991_v10 = vadd.f32 %v14589_v24, %v8971_v63  ;;  %11245 = vmatprep.mubr.msk.bf16.mxu0 %vm504_vm0, %v9000_v34 }
 0xfbf   : > { %v9001_v14 = vpack.c.bf16 %v8991_v10, %v8990_v52 }
 0xfc1   : > { %11246 = vmatmul.mubr.msk.bf16.gmra.mrb[40].mxu0 %vm504_vm0, %v9001_v14 }
 0xfe7   : > { %v8882_v54 = vpop.xlane.xlu0 %8881 }
 0xfe8   : > { %v8904_v16 = vmul.f32 0.03125, %v8882_v54 }
 0xfe9   : > { %v8885_v33 = vpop.xlane.xlu1 %8884 }
 0xfea   : > { %v8920_v60 = vadd.f32 1e-05, %v8904_v16  ;;  %v8905_v30 = vmul.f32 0.03125, %v8885_v33 }
 0xfeb   : > { %v8888_v22 = vpop.xlane.xlu0 %8887 }
 0xfec   : > { %11627 = vrsqrt.f32 %v8920_v60  ;;  %v8921_v44 = vadd.f32 1e-05, %v8905_v30  ;;  %v8906_v59 = vmul.f32 0.03125, %v8888_v22 }
 0xfed   : > { %v8891_v17 = vpop.xlane.xlu1 %8890 }
 0xfee   : > { %11629 = vrsqrt.f32 %v8921_v44  ;;  %v8922_v31 = vadd.f32 1e-05, %v8906_v59  ;;  %v8907_v29 = vmul.f32 0.03125, %v8891_v17 }
 0xff0   : > { %11631 = vrsqrt.f32 %v8922_v31  ;;  %v8923_v12 = vadd.f32 1e-05, %v8907_v29 }
 0xff2   : > { %11633 = vrsqrt.f32 %v8923_v12 }
 0xff6   : > { %v11628_v53 = vpop.eup %11627 }
 0xff7   : > { %v8952_v0 = vmul.f32 %v11628_v53, %v14555_v8 }
 0xff8   : > { %v11630_v2 = vpop.eup %11629 }
 0xff9   : > { %v8953_v20 = vmul.f32 %v11630_v2, %v14558_v35  ;;  %v8972_v15 = vmul.f32 %v14581_v32, %v8952_v0 }
 0xffa   : > { %v11632_v36 = vpop.eup %11631 }
 0xffb   : > { %v8954_v45 = vmul.f32 %v11632_v36, %v14563_v58  ;;  %v8973_v3 = vmul.f32 %v14581_v32, %v8953_v20  ;;  %v8992_v37 = vadd.f32 %v14589_v24, %v8972_v15 }
 0xffc   : > { %v11634_v21 = vpop.eup %11633 }
 0xffd   : > { %v8974_v43 = vmul.f32 %v14581_v32, %v8954_v45  ;;  %v8955_v57 = vmul.f32 %v11634_v21, %v14569_v11  ;;  %v8993_v4 = vadd.f32 %v14589_v24, %v8973_v3  ;;  %v11313_v11 = vld [vmem:[%s14981_s9] sm:$0xff]  }
 0xffe   : > { %11253 = vmatprep.subr.bf16.mxu1 %v11313_v11 }
 0xfff   : > { %v8975_v8 = vmul.f32 %v14581_v32, %v8955_v57  ;;  %v9002_v62 = vpack.c.bf16 %v8993_v4, %v8992_v37  ;;  %v8994_v35 = vadd.f32 %v14589_v24, %v8974_v43  ;;  %11254 = vmatpush3.bf16.msra.mxu1 %v11313_v11  ;;  %v11314_v32 = vld [vmem:[%s14981_s9 + $0x8] sm:$0xff]   ;;  %v14998_v37 = vmov -1.0  }
0x1000   : > { %11255 = vmatprep.subr.bf16.mxu1 %v11314_v32 }
0x1001   : > { %v8995_v5 = vadd.f32 %v14589_v24, %v8975_v8  ;;  %11249 = vmatprep.mubr.msk.bf16.mxu0 %vm504_vm0, %v9002_v62  ;;  %v14653_v24 = vld [vmem:[%s14975_s3 + $0x5] ss:$0 sm:$0xff] }
0x1003   : > { %v9003_v58 = vpack.c.bf16 %v8995_v5, %v8994_v35  ;;  %11256 = vmatpush3.bf16.msra.mxu1 %v11314_v32 }
0x1005   : > { %11250 = vmatmul.mubr.msk.bf16.gmra.mrb[44].mxu0 %vm504_vm0, %v9003_v58 }
0x1075   : > { %v11239_v28 = vpop.f32.mrb[32].mxu0 }
0x1076   : > { %v9091_v6 = vadd.f32 %v11239_v28, %v14653_v24  ;;  %v9082_v50 = vpop.f32.mrb[33].mxu0 }
0x1077   : > { %v9083_v27 = vadd.f32 %v14653_v24, %v9082_v50  ;;  %v11240_v9 = vpop.f32.mrb[34].mxu0 }
0x1078   : > { %v9163_v25 = vmul.f32 0.70710677, %v9091_v6  ;;  %v9094_v42 = vadd.f32 %v11240_v9, %v14653_v24  ;;  %v9085_v49 = vpop.f32.mrb[35].mxu0  ;;  %v14665_v2 = vmul.f32 0.5, %v9091_v6 }
0x1079   : > { %v9161_v1 = vmul.f32 0.70710677, %v9083_v27  ;;  %v9086_v34 = vadd.f32 %v14653_v24, %v9085_v49  ;;  %v14670_v3 = vmul.f32 0.5, %v9083_v27 }
0x107a   : > { %v9211_v19 = vand.u32 2147483647, %v9163_v25  ;;  %v9164_v63 = vmul.f32 0.70710677, %v9094_v42  ;;  %vm9179_vm8 = vcmp.ge.f32.partialorder %v9163_v25, 0.0  ;;  %v14679_v8 = vmul.f32 0.5, %v9094_v42 }
0x107b   : > { %v9209_v52 = vand.u32 2147483647, %v9161_v1  ;;  %v14659_v33 = vmul.f32 0.70710677, %v9086_v34  ;;  %v14677_v4 = vsel %vm9179_vm8, 1.0, %v14998_v37  ;;  %vm9177_vm9 = vcmp.ge.f32.partialorder %v9161_v1, 0.0 }
0x107c   : > { %v9227_v10 = vmul.f32 0.3275911, %v9211_v19  ;;  %v9212_v54 = vand.u32 2147483647, %v9164_v63  ;;  %v9419_v44 = vsub.f32 0.0, %v9211_v19  ;;  %v14687_v5 = vmul.f32 0.5, %v9086_v34 }
0x107d   : > { %v9225_v14 = vmul.f32 0.3275911, %v9209_v52  ;;  %v9210_v22 = vand.u32 2147483647, %v14659_v33  ;;  %v9417_v17 = vsub.f32 0.0, %v9209_v52  ;;  %vm9180_vm10 = vcmp.ge.f32.partialorder %v9164_v63, 0.0 }
0x107e   : > { %v9243_v16 = vadd.f32 1.0, %v9227_v10  ;;  %v9228_v30 = vmul.f32 0.3275911, %v9212_v54  ;;  %v9435_v20 = vmul.f32 %v9419_v44, %v9211_v19  ;;  %v9420_v15 = vsub.f32 0.0, %v9212_v54 }
0x107f   : > { %v9241_v60 = vadd.f32 1.0, %v9225_v14  ;;  %v9226_v31 = vmul.f32 0.3275911, %v9210_v22  ;;  %v9433_v21 = vmul.f32 %v9417_v17, %v9209_v52  ;;  %v9418_v58 = vsub.f32 0.0, %v9210_v22 }
0x1080   : > { %11635 = vrcp.f32 %v9243_v16  ;;  %v9244_v59 = vadd.f32 1.0, %v9228_v30  ;;  %v9453_v32 = vmul.f32 1.442695, %v9435_v20  ;;  %v9436_v28 = vmul.f32 %v9420_v15, %v9212_v54 }
0x1081   : > { %11637 = vrcp.f32 %v9241_v60  ;;  %v9242_v12 = vadd.f32 1.0, %v9226_v31  ;;  %v9449_v27 = vmul.f32 1.442695, %v9433_v21  ;;  %v14700_v1 = vsel %vm9177_vm9, 1.0, %v14998_v37 }
0x1082   : > { %11639 = vrcp.f32 %v9244_v59  ;;  %v9434_v10 = vmul.f32 %v9418_v58, %v9210_v22  ;;  %v14705_v60 = vsel %vm9180_vm10, 1.0, %v14998_v37  ;;  %v9455_v30 = vmul.f32 1.442695, %v9436_v28 }
0x1083   : > { %v11243_v29 = vpop.f32.mrb[36].mxu0  ;;  %11641 = vrcp.f32 %v9242_v12  ;;  %vm9178_vm11 = vcmp.ge.f32.partialorder %v14659_v33, 0.0 }
0x1084   : > { %v14663_v53 = vadd.f32 %v11243_v29, %v14653_v24  ;;  %v9098_v0 = vpop.f32.mrb[37].mxu0  ;;  %v9451_v15 = vmul.f32 1.442695, %v9434_v10 }
0x1085   : > { %v14668_v36 = vadd.f32 %v14653_v24, %v9098_v0  ;;  %v11244_v45 = vpop.f32.mrb[38].mxu0 }
0x1086   : > { %v14673_v43 = vmul.f32 0.70710677, %v14663_v53  ;;  %v9101_v57 = vpop.f32.mrb[39].mxu0  ;;  %v14685_v35 = vadd.f32 %v11244_v45, %v14653_v24 }
0x1087   : > { %v14682_v62 = vmul.f32 0.70710677, %v14668_v36  ;;  %v14711_v29 = vadd.f32 %v14653_v24, %v9101_v57 }
0x1088   : > { %v9215_v11 = vand.u32 2147483647, %v14673_v43  ;;  %v14694_v25 = vmul.f32 0.70710677, %v14685_v35  ;;  %vm9183_vm12 = vcmp.ge.f32.partialorder %v14673_v43, 0.0 }
0x1089   : > { %v9213_v6 = vand.u32 2147483647, %v14682_v62  ;;  %vm9181_vm14 = vcmp.ge.f32.partialorder %v14682_v62, 0.0 }
0x108a   : > { %v14691_v50 = vpop.eup %11635  ;;  %v9231_v9 = vmul.f32 0.3275911, %v9215_v11  ;;  %v9423_v19 = vsub.f32 0.0, %v9215_v11  ;;  %v9216_v31 = vand.u32 2147483647, %v14694_v25  ;;  %vm9184_vm13 = vcmp.ge.f32.partialorder %v14694_v25, 0.0 }
0x108b   : > { %v14696_v42 = vpop.eup %11637  ;;  %v9275_v49 = vmul.f32 1.0614054, %v14691_v50  ;;  %v9229_v34 = vmul.f32 0.3275911, %v9213_v6  ;;  %v9421_v54 = vsub.f32 0.0, %v9213_v6 }
0x108c   : > { %v9273_v52 = vmul.f32 1.0614054, %v14696_v42  ;;  %v9247_v14 = vadd.f32 1.0, %v9231_v9  ;;  %v14707_v59 = vpop.eup %11639  ;;  %v9439_v0 = vmul.f32 %v9423_v19, %v9215_v11  ;;  %v9232_v21 = vmul.f32 0.3275911, %v9216_v31 }
0x108d   : > { %v9291_v16 = vadd.f32 -1.4531521, %v9275_v49  ;;  %v9245_v44 = vadd.f32 1.0, %v9229_v34  ;;  %v9276_v12 = vmul.f32 1.0614054, %v14707_v59  ;;  %v14715_v63 = vpop.eup %11641  ;;  %v9437_v45 = vmul.f32 %v9421_v54, %v9213_v6 }
0x108e   : > { %v9289_v17 = vadd.f32 -1.4531521, %v9273_v52  ;;  %11643 = vrcp.f32 %v9247_v14  ;;  %v9274_v9 = vmul.f32 1.0614054, %v14715_v63  ;;  %v9248_v49 = vadd.f32 1.0, %v9232_v21 }
0x108f   : > { %v9307_v22 = vmul.f32 %v14691_v50, %v9291_v16  ;;  %11645 = vrcp.f32 %v9245_v44  ;;  %v9292_v28 = vadd.f32 -1.4531521, %v9276_v12  ;;  %v14720_v34 = vmul.f32 0.70710677, %v14711_v29 }
0x1090   : > { %v9305_v20 = vmul.f32 %v14696_v42, %v9289_v17  ;;  %11647 = vpow2.f32 %v9453_v32  ;;  %v9290_v52 = vadd.f32 -1.4531521, %v9274_v9  ;;  %v9461_v14 = vmul.f32 1.442695, %v9439_v0 }
0x1091   : > { %v9323_v58 = vadd.f32 1.4214138, %v9307_v22  ;;  %11649 = vpow2.f32 %v9449_v27  ;;  %v9308_v19 = vmul.f32 %v14707_v59, %v9292_v28  ;;  %v9457_v10 = vmul.f32 1.442695, %v9437_v45 }
0x1092   : > { %v9321_v57 = vadd.f32 1.4214138, %v9305_v20  ;;  %11651 = vrcp.f32 %v9248_v49  ;;  %v9424_v32 = vsub.f32 0.0, %v9216_v31  ;;  %v9306_v27 = vmul.f32 %v14715_v63, %v9290_v52 }
0x1093   : > { %v9339_v11 = vmul.f32 %v14691_v50, %v9323_v58  ;;  %v9324_v44 = vadd.f32 1.4214138, %v9308_v19  ;;  %11653 = vpow2.f32 %v9455_v30  ;;  %v14730_v12 = vand.u32 2147483647, %v14720_v34 }
0x1094   : > { %v9337_v6 = vmul.f32 %v14696_v42, %v9321_v57  ;;  %v11247_v54 = vpop.f32.mrb[40].mxu0  ;;  %11655 = vpow2.f32 %v9451_v15  ;;  %v9322_v21 = vadd.f32 1.4214138, %v9306_v27  ;;  %v9440_v9 = vmul.f32 %v9424_v32, %v9216_v31 }
0x1095   : > { %v9355_v16 = vadd.f32 -0.28449672, %v9339_v11  ;;  %v14726_v17 = vpop.f32.mrb[41].mxu0  ;;  %v9340_v45 = vmul.f32 %v14707_v59, %v9324_v44  ;;  %11657 = vpow2.f32 %v9461_v14  ;;  %v9230_v15 = vmul.f32 0.3275911, %v14730_v12 }
0x1096   : > { %v9353_v22 = vadd.f32 -0.28449672, %v9337_v6  ;;  %v14732_v0 = vpop.f32.mrb[42].mxu0  ;;  %11659 = vpow2.f32 %v9457_v10  ;;  %v9338_v19 = vmul.f32 %v14715_v63, %v9322_v21  ;;  %v14748_v44 = vadd.f32 %v11247_v54, %v14653_v24 }
0x1097   : > { %v9371_v20 = vmul.f32 %v14691_v50, %v9355_v16  ;;  %v14736_v30 = vpop.f32.mrb[43].mxu0  ;;  %v9356_v11 = vadd.f32 -0.28449672, %v9340_v45  ;;  %v9246_v16 = vadd.f32 1.0, %v9230_v15  ;;  %v9194_v21 = vsel %vm9178_vm11, 1.0, %v14998_v37 }
0x1098   : > { %v14738_v58 = vpop.eup %11643  ;;  %v9369_v28 = vmul.f32 %v14696_v42, %v9353_v22  ;;  %v9354_v32 = vadd.f32 -0.28449672, %v9338_v19  ;;  %v9463_v19 = vmul.f32 1.442695, %v9440_v9  ;;  %v14774_v51 = vadd.f32 %v14653_v24, %v14726_v17 }
0x1099   : > { %v14742_v57 = vpop.eup %11645  ;;  %v9387_v49 = vadd.f32 0.2548296, %v9371_v20  ;;  %v9279_v52 = vmul.f32 1.0614054, %v14738_v58  ;;  %v9372_v10 = vmul.f32 %v14707_v59, %v9356_v11  ;;  %11661 = vrcp.f32 %v9246_v16 }
0x109a   : > { %v9385_v6 = vadd.f32 0.2548296, %v9369_v28  ;;  %v9277_v14 = vmul.f32 1.0614054, %v14742_v57  ;;  %v11648_v27 = vpop.eup %11647  ;;  %v9370_v54 = vmul.f32 %v14715_v63, %v9354_v32  ;;  %11663 = vpow2.f32 %v9463_v19 }
0x109b   : > { %v9403_v31 = vmul.f32 %v14691_v50, %v9387_v49  ;;  %v9295_v22 = vadd.f32 -1.4531521, %v9279_v52  ;;  %v11650_v20 = vpop.eup %11649  ;;  %v9388_v18 = vadd.f32 0.2548296, %v9372_v10  ;;  %vm9182_vm15 = vcmp.ge.f32.partialorder %v14720_v34, 0.0 }
0x109c   : > { %v9401_v45 = vmul.f32 %v14696_v42, %v9385_v6  ;;  %v9293_v28 = vadd.f32 -1.4531521, %v9277_v14  ;;  %v14758_v50 = vpop.eup %11651  ;;  %v14762_v42 = vmul.f32 0.70710677, %v14748_v44  ;;  %v9386_v14 = vadd.f32 0.2548296, %v9370_v54 }
0x109d   : > { %v9483_v15 = vmul.f32 %v11648_v27, %v9403_v31  ;;  %v9311_v56 = vmul.f32 %v14738_v58, %v9295_v22  ;;  %v11654_v52 = vpop.eup %11653  ;;  %v9404_v6 = vmul.f32 %v14707_v59, %v9388_v18  ;;  %v9280_v32 = vmul.f32 1.0614054, %v14758_v50 }
0x109e   : > { %v9481_v49 = vmul.f32 %v11650_v20, %v9401_v45  ;;  %v9309_v11 = vmul.f32 %v14742_v57, %v9293_v28  ;;  %v11656_v27 = vpop.eup %11655  ;;  %v9422_v22 = vsub.f32 0.0, %v14730_v12  ;;  %v9402_v28 = vmul.f32 %v14715_v63, %v9386_v14 }
0x109f   : > { %v9499_v33 = vsub.f32 1.0, %v9483_v15  ;;  %v9327_v16 = vadd.f32 1.4214138, %v9311_v56  ;;  %v11658_v20 = vpop.eup %11657  ;;  %v9484_v9 = vmul.f32 %v11654_v52, %v9404_v6  ;;  %v9296_v59 = vadd.f32 -1.4531521, %v9280_v32 }
0x10a0   : > { %v9497_v31 = vsub.f32 1.0, %v9481_v49  ;;  %v9325_v10 = vadd.f32 1.4214138, %v9309_v11  ;;  %v11660_v15 = vpop.eup %11659  ;;  %v9482_v49 = vmul.f32 %v11656_v27, %v9402_v28  ;;  %v9438_v19 = vmul.f32 %v9422_v22, %v14730_v12 }
0x10a1   : > { %v9515_v45 = vmul.f32 %v9499_v33, %v14677_v4  ;;  %v9343_v37 = vmul.f32 %v14738_v58, %v9327_v16  ;;  %v9500_v54 = vsub.f32 1.0, %v9484_v9  ;;  %v9312_v63 = vmul.f32 %v14758_v50, %v9296_v59 }
0x10a2   : > { %v9513_v18 = vmul.f32 %v9497_v31, %v14700_v1  ;;  %v9341_v56 = vmul.f32 %v14742_v57, %v9325_v10  ;;  %v14778_v33 = vand.u32 2147483647, %v14762_v42  ;;  %v9498_v6 = vsub.f32 1.0, %v9482_v49 }
0x10a3   : > { %v9359_v11 = vadd.f32 -0.28449672, %v9343_v37  ;;  %v9531_v4 = vadd.f32 1.0, %v9515_v45  ;;  %v9516_v1 = vmul.f32 %v9500_v54, %v14705_v60  ;;  %v14783_v16 = vpop.eup %11661  ;;  %v9328_v27 = vadd.f32 1.4214138, %v9312_v63 }
0x10a4   : > { %v9357_v52 = vadd.f32 -0.28449672, %v9341_v56  ;;  %v9529_v37 = vadd.f32 1.0, %v9513_v18  ;;  %v9235_v31 = vmul.f32 0.3275911, %v14778_v33  ;;  %v9514_v32 = vmul.f32 %v9498_v6, %v9194_v21 }
0x10a5   : > { %v9375_v14 = vmul.f32 %v14738_v58, %v9359_v11  ;;  %v9532_v10 = vadd.f32 1.0, %v9516_v1  ;;  %v9278_v9 = vmul.f32 1.0614054, %v14783_v16  ;;  %v9547_v60 = vmul.f32 %v9531_v4, %v14665_v2  ;;  %v11664_v4 = vpop.eup %11663 }
0x10a6   : > { %v9373_v17 = vmul.f32 %v14742_v57, %v9357_v52  ;;  %v9344_v56 = vmul.f32 %v14758_v50, %v9328_v27  ;;  %v9251_v59 = vadd.f32 1.0, %v9235_v31  ;;  %v9530_v22 = vadd.f32 1.0, %v9514_v32 }
0x10a7   : > { %v9391_v45 = vadd.f32 0.2548296, %v9375_v14  ;;  %v9548_v12 = vmul.f32 %v9532_v10, %v14679_v8  ;;  %v9294_v54 = vadd.f32 -1.4531521, %v9278_v9  ;;  %v9545_v49 = vmul.f32 %v9529_v37, %v14670_v3 }
0x10a8   : > { %v9389_v28 = vadd.f32 0.2548296, %v9373_v17  ;;  %v9360_v11 = vadd.f32 -0.28449672, %v9344_v56  ;;  %v9459_v52 = vmul.f32 1.442695, %v9438_v19  ;;  %11665 = vrcp.f32 %v9251_v59 }
0x10a9   : > { %v9407_v18 = vmul.f32 %v14738_v58, %v9391_v45  ;;  %v9562_v21 = vpack.c.bf16 %v9548_v12, %v9547_v60  ;;  %v9546_v63 = vmul.f32 %v9530_v22, %v14687_v5  ;;  %v9310_v2 = vmul.f32 %v14783_v16, %v9294_v54 }
0x10aa   : > { %v9376_v8 = vmul.f32 %v14758_v50, %v9360_v11  ;;  %v9405_v58 = vmul.f32 %v14742_v57, %v9389_v28  ;;  %v14799_v3 = vmul.f32 0.70710677, %v14774_v51  ;;  %11667 = vpow2.f32 %v9459_v52 }
0x10ab   : > { %v9487_v1 = vmul.f32 %v11658_v20, %v9407_v18  ;;  %v9561_v6 = vpack.c.bf16 %v9546_v63, %v9545_v49  ;;  %v9326_v14 = vadd.f32 1.4214138, %v9310_v2  ;;  %v14803_v5 = vadd.f32 %v14732_v0, %v14653_v24 }
0x10ac   : > { %v9392_v37 = vadd.f32 0.2548296, %v9376_v8  ;;  %v14807_v43 = vand.u32 2147483647, %v14799_v3  ;;  %v15065_v17 = vmov -1.0   ;;  %v9485_v31 = vmul.f32 %v11660_v15, %v9405_v58 }
0x10ad   : > { %v9503_v19 = vsub.f32 1.0, %v9487_v1  ;;  %v9342_v20 = vmul.f32 %v14783_v16, %v9326_v14  ;;  %11257 = vmatprep.mubr.msk.bf16.mxu1 %vm504_vm0, %v9561_v6  ;;  %v9199_v57 = vsel %vm9183_vm12, 1.0, %v15065_v17  ;;  %v14816_v9 = vmul.f32 0.70710677, %v14803_v5 }
0x10ae   : > { %v9408_v27 = vmul.f32 %v14758_v50, %v9392_v37  ;;  %11258 = vmatmul.mubr.msk.bf16.vlgmr.msra.gmra.mrb[32].mxu1 %vm504_vm0, %v9562_v21  ;;  %v9233_v0 = vmul.f32 0.3275911, %v14807_v43  ;;  %v9200_v50 = vsel %vm9184_vm13, 1.0, %v15065_v17  ;;  %v14826_v59 = vadd.f32 %v14653_v24, %v14736_v30 }
0x10af   : > { %v9358_v10 = vadd.f32 -0.28449672, %v9342_v20  ;;  %v9519_v32 = vmul.f32 %v9503_v19, %v9199_v57  ;;  %v9220_v25 = vand.u32 2147483647, %v14816_v9  ;;  %v9501_v12 = vsub.f32 1.0, %v9485_v31 }
0x10b0   : > { %v9488_v45 = vmul.f32 %v11664_v4, %v9408_v27  ;;  %v9249_v28 = vadd.f32 1.0, %v9233_v0  ;;  %v9151_v54 = vmul.f32 0.5, %v14663_v53  ;;  %v9197_v21 = vsel %vm9181_vm14, 1.0, %v15065_v17 }
0x10b1   : > { %v9374_v60 = vmul.f32 %v14783_v16, %v9358_v10  ;;  %v9535_v49 = vadd.f32 1.0, %v9519_v32  ;;  %v9236_v52 = vmul.f32 0.3275911, %v9220_v25  ;;  %v9152_v63 = vmul.f32 0.5, %v14685_v35 }
0x10b2   : > { %v14820_v56 = vpop.eup %11665  ;;  %v9504_v15 = vsub.f32 1.0, %v9488_v45  ;;  %11669 = vrcp.f32 %v9249_v28  ;;  %v9427_v8 = vsub.f32 0.0, %v14778_v33  ;;  %v14837_v58 = vmul.f32 0.70710677, %v14826_v59 }
0x10b3   : > { %v9390_v22 = vadd.f32 0.2548296, %v9374_v60  ;;  %v9283_v18 = vmul.f32 1.0614054, %v14820_v56  ;;  %v9252_v6 = vadd.f32 1.0, %v9236_v52  ;;  %v9517_v53 = vmul.f32 %v9501_v12, %v9197_v21 }
0x10b4   : > { %v9520_v11 = vmul.f32 %v9504_v15, %v9200_v50  ;;  %v11668_v2 = vpop.eup %11667  ;;  %v9551_v19 = vmul.f32 %v9535_v49, %v9151_v54  ;;  %v9218_v20 = vand.u32 2147483647, %v14837_v58  ;;  %v9198_v27 = vsel %vm9182_vm15, 1.0, %v15065_v17 }
0x10b5   : > { %v9406_v1 = vmul.f32 %v14783_v16, %v9390_v22  ;;  %v9299_v30 = vadd.f32 -1.4531521, %v9283_v18  ;;  %11671 = vrcp.f32 %v9252_v6  ;;  %v9443_v31 = vmul.f32 %v9427_v8, %v14778_v33 }
0x10b6   : > { %v9536_v4 = vadd.f32 1.0, %v9520_v11  ;;  %v9533_v10 = vadd.f32 1.0, %v9517_v53  ;;  %v9234_v34 = vmul.f32 0.3275911, %v9218_v20  ;;  %v9149_v45 = vmul.f32 0.5, %v14668_v36 }
0x10b7   : > { %v9486_v14 = vmul.f32 %v11668_v2, %v9406_v1  ;;  %v9315_v62 = vmul.f32 %v14820_v56, %v9299_v30  ;;  %v9425_v60 = vsub.f32 0.0, %v14807_v43  ;;  %v9150_v50 = vmul.f32 0.5, %v14711_v29 }
0x10b8   : > { %v9552_v37 = vmul.f32 %v9536_v4, %v9152_v63  ;;  %v9250_v22 = vadd.f32 1.0, %v9234_v34  ;;  %v9469_v18 = vmul.f32 1.442695, %v9443_v31  ;;  %v9428_v49 = vsub.f32 0.0, %v9220_v25 }
0x10b9   : > { %v9502_v35 = vsub.f32 1.0, %v9486_v14  ;;  %v9331_v16 = vadd.f32 1.4214138, %v9315_v62  ;;  %v9549_v11 = vmul.f32 %v9533_v10, %v9149_v45  ;;  %v9441_v21 = vmul.f32 %v9425_v60, %v14807_v43 }
0x10ba   : > { %v9564_v57 = vpack.c.bf16 %v9552_v37, %v9551_v19  ;;  %11673 = vrcp.f32 %v9250_v22  ;;  %v9444_v2 = vmul.f32 %v9428_v49, %v9220_v25  ;;  %v9426_v14 = vsub.f32 0.0, %v9218_v20 }
0x10bb   : > { %v9518_v0 = vmul.f32 %v9502_v35, %v9198_v27  ;;  %v9347_v32 = vmul.f32 %v14820_v56, %v9331_v16  ;;  %11675 = vpow2.f32 %v9469_v18  ;;  %v9465_v8 = vmul.f32 1.442695, %v9441_v21 }
0x10bc   : > { %v11670_v28 = vpop.eup %11669  ;;  %v9471_v19 = vmul.f32 1.442695, %v9444_v2  ;;  %v9442_v25 = vmul.f32 %v9426_v14, %v9218_v20  ;;  %vm9187_vm1 = vcmp.ge.f32.partialorder %v14762_v42, 0.0  ;;  %vm9188_vm2 = vcmp.ge.f32.partialorder %v14816_v9, 0.0 }
0x10bd   : > { %v9534_v15 = vadd.f32 1.0, %v9518_v0  ;;  %v9363_v12 = vadd.f32 -0.28449672, %v9347_v32  ;;  %v9281_v54 = vmul.f32 1.0614054, %v11670_v28  ;;  %11677 = vpow2.f32 %v9465_v8 }
0x10be   : > { %11679 = vpow2.f32 %v9471_v19  ;;  %vm9185_vm3 = vcmp.ge.f32.partialorder %v14799_v3, 0.0  ;;  %vm9186_vm4 = vcmp.ge.f32.partialorder %v14837_v58, 0.0 }
0x10bf   : > { %v9550_v33 = vmul.f32 %v9534_v15, %v9150_v50  ;;  %v9297_v52 = vadd.f32 -1.4531521, %v9281_v54  ;;  %v9379_v36 = vmul.f32 %v14820_v56, %v9363_v12  ;;  %v11672_v1 = vpop.eup %11671  ;;  %v9467_v50 = vmul.f32 1.442695, %v9442_v25 }
0x10c0   : > { %v9284_v29 = vmul.f32 1.0614054, %v11672_v1 }
0x10c1   : > { %v9563_v63 = vpack.c.bf16 %v9550_v33, %v9549_v11  ;;  %v9313_v30 = vmul.f32 %v11670_v28, %v9297_v52  ;;  %v9395_v6 = vadd.f32 0.2548296, %v9379_v36  ;;  %11681 = vpow2.f32 %v9467_v50 }
0x10c2   : > { %v9300_v53 = vadd.f32 -1.4531521, %v9284_v29  ;;  %v9203_v52 = vsel %vm9187_vm1, 1.0, %v15065_v17 }
0x10c3   : > { %11261 = vmatprep.mubr.msk.bf16.mxu1 %vm504_vm0, %v9563_v63  ;;  %v9329_v4 = vadd.f32 1.4214138, %v9313_v30  ;;  %v9411_v16 = vmul.f32 %v14820_v56, %v9395_v6 }
0x10c4   : > { %11262 = vmatmul.mubr.msk.bf16.gmra.mrb[36].mxu1 %vm504_vm0, %v9564_v57  ;;  %v9316_v43 = vmul.f32 %v11672_v1, %v9300_v53  ;;  %v11674_v35 = vpop.eup %11673 }
0x10c5   : > { %v9345_v62 = vmul.f32 %v11670_v28, %v9329_v4  ;;  %v9282_v10 = vmul.f32 1.0614054, %v11674_v35  ;;  %v11676_v32 = vpop.eup %11675 }
0x10c6   : > { %v9332_v27 = vadd.f32 1.4214138, %v9316_v43  ;;  %v9491_v45 = vmul.f32 %v11676_v32, %v9411_v16 }
0x10c7   : > { %v9361_v37 = vadd.f32 -0.28449672, %v9345_v62  ;;  %v9298_v57 = vadd.f32 -1.4531521, %v9282_v10  ;;  %v11678_v49 = vpop.eup %11677  ;;  %v9201_v10 = vsel %vm9185_vm3, 1.0, %v15065_v17 }
0x10c8   : > { %v9348_v0 = vmul.f32 %v11672_v1, %v9332_v27  ;;  %v9507_v56 = vsub.f32 1.0, %v9491_v45  ;;  %v11680_v33 = vpop.eup %11679 }
0x10c9   : > { %v9377_v31 = vmul.f32 %v11670_v28, %v9361_v37  ;;  %v9314_v15 = vmul.f32 %v11674_v35, %v9298_v57  ;;  %v9155_v37 = vmul.f32 0.5, %v14748_v44 }
0x10ca   : > { %v9364_v60 = vadd.f32 -0.28449672, %v9348_v0  ;;  %v9523_v36 = vmul.f32 %v9507_v56, %v9203_v52  ;;  %v9156_v0 = vmul.f32 0.5, %v14803_v5 }
0x10cb   : > { %v9393_v34 = vadd.f32 0.2548296, %v9377_v31  ;;  %v9330_v18 = vadd.f32 1.4214138, %v9314_v15  ;;  %v11682_v31 = vpop.eup %11681 }
0x10cc   : > { %v9380_v12 = vmul.f32 %v11672_v1, %v9364_v60  ;;  %v9539_v62 = vadd.f32 1.0, %v9523_v36 }
0x10cd   : > { %v9409_v22 = vmul.f32 %v11670_v28, %v9393_v34  ;;  %v9346_v20 = vmul.f32 %v11674_v35, %v9330_v18  ;;  %v9202_v18 = vsel %vm9186_vm4, 1.0, %v15065_v17 }
0x10ce   : > { %v9396_v54 = vadd.f32 0.2548296, %v9380_v12  ;;  %v9555_v45 = vmul.f32 %v9539_v62, %v9155_v37 }
0x10cf   : > { %v9489_v21 = vmul.f32 %v11678_v49, %v9409_v22  ;;  %v9362_v63 = vadd.f32 -0.28449672, %v9346_v20  ;;  %v9153_v49 = vmul.f32 0.5, %v14774_v51 }
0x10d0   : > { %v9412_v11 = vmul.f32 %v11672_v1, %v9396_v54  ;;  %v9204_v1 = vsel %vm9188_vm2, 1.0, %v15065_v17 }
0x10d1   : > { %v9378_v2 = vmul.f32 %v11674_v35, %v9362_v63  ;;  %v9505_v8 = vsub.f32 1.0, %v9489_v21 }
0x10d2   : > { %v9492_v30 = vmul.f32 %v11680_v33, %v9412_v11  ;;  %v9154_v33 = vmul.f32 0.5, %v14826_v59 }
0x10d3   : > { %v9394_v6 = vadd.f32 0.2548296, %v9378_v2  ;;  %v9521_v57 = vmul.f32 %v9505_v8, %v9201_v10 }
0x10d4   : > { %v9508_v42 = vsub.f32 1.0, %v9492_v30 }
0x10d5   : > { %v9410_v16 = vmul.f32 %v11674_v35, %v9394_v6  ;;  %v9537_v54 = vadd.f32 1.0, %v9521_v57 }
0x10d6   : > { %v9524_v9 = vmul.f32 %v9508_v42, %v9204_v1 }
0x10d7   : > { %v9490_v44 = vmul.f32 %v11682_v31, %v9410_v16  ;;  %v9553_v63 = vmul.f32 %v9537_v54, %v9153_v49 }
0x10d8   : > { %v11251_v28 = vpop.f32.mrb[44].mxu0  ;;  %v9540_v32 = vadd.f32 1.0, %v9524_v9 }
0x10d9   : > { %v14858_v29 = vadd.f32 %v11251_v28, %v14653_v24  ;;  %v9130_v4 = vpop.f32.mrb[45].mxu0  ;;  %v9506_v15 = vsub.f32 1.0, %v9490_v44 }
0x10da   : > { %v14862_v53 = vadd.f32 %v14653_v24, %v9130_v4  ;;  %v11252_v14 = vpop.f32.mrb[46].mxu0  ;;  %v9556_v60 = vmul.f32 %v9540_v32, %v9156_v0 }
0x10db   : > { %v14865_v19 = vmul.f32 0.70710677, %v14858_v29  ;;  %v9133_v43 = vpop.f32.mrb[47].mxu0  ;;  %v14872_v25 = vadd.f32 %v11252_v14, %v14653_v24  ;;  %v9522_v58 = vmul.f32 %v9506_v15, %v9202_v18 }
0x10dc   : > { %v14869_v27 = vmul.f32 0.70710677, %v14862_v53  ;;  %v14885_v3 = vadd.f32 %v14653_v24, %v9133_v43  ;;  %v9566_v5 = vpack.c.bf16 %v9556_v60, %v9555_v45 }
0x10dd   : > { %v9223_v34 = vand.u32 2147483647, %v14865_v19  ;;  %v14882_v22 = vmul.f32 0.70710677, %v14872_v25  ;;  %v9538_v52 = vadd.f32 1.0, %v9522_v58  ;;  %vm9191_vm5 = vcmp.ge.f32.partialorder %v14865_v19, 0.0 }
0x10de   : > { %v9221_v35 = vand.u32 2147483647, %v14869_v27  ;;  %v14892_v21 = vmul.f32 0.70710677, %v14885_v3  ;;  %vm9189_vm6 = vcmp.ge.f32.partialorder %v14869_v27, 0.0 }
0x10df   : > { %v9239_v50 = vmul.f32 0.3275911, %v9223_v34  ;;  %v9224_v11 = vand.u32 2147483647, %v14882_v22  ;;  %v9554_v36 = vmul.f32 %v9538_v52, %v9154_v33  ;;  %v9431_v4 = vsub.f32 0.0, %v9223_v34 }
0x10e0   : > { %v9237_v12 = vmul.f32 0.3275911, %v9221_v35  ;;  %v9222_v30 = vand.u32 2147483647, %v14892_v21  ;;  %v9429_v51 = vsub.f32 0.0, %v9221_v35  ;;  %vm9192_vm7 = vcmp.ge.f32.partialorder %v14882_v22, 0.0 }
0x10e1   : > { %v9255_v56 = vadd.f32 1.0, %v9239_v50  ;;  %v9240_v24 = vmul.f32 0.3275911, %v9224_v11  ;;  %v9565_v28 = vpack.c.bf16 %v9554_v36, %v9553_v63  ;;  %v9447_v1 = vmul.f32 %v9431_v4, %v9223_v34 }
0x10e2   : > { %v9253_v20 = vadd.f32 1.0, %v9237_v12  ;;  %v9238_v42 = vmul.f32 0.3275911, %v9222_v30  ;;  %v9445_v62 = vmul.f32 %v9429_v51, %v9221_v35  ;;  %v9432_v43 = vsub.f32 0.0, %v9224_v11 }
0x10e3   : > { %11683 = vrcp.f32 %v9255_v56  ;;  %v9256_v2 = vadd.f32 1.0, %v9240_v24  ;;  %11265 = vmatprep.mubr.msk.bf16.mxu1 %vm504_vm0, %v9565_v28  ;;  %v9477_v16 = vmul.f32 1.442695, %v9447_v1  ;;  %v9430_v32 = vsub.f32 0.0, %v9222_v30 }
0x10e4   : > { %11685 = vrcp.f32 %v9253_v20  ;;  %v9254_v8 = vadd.f32 1.0, %v9238_v42  ;;  %11266 = vmatmul.mubr.msk.bf16.gmra.mrb[40].mxu1 %vm504_vm0, %v9566_v5  ;;  %v9473_v0 = vmul.f32 1.442695, %v9445_v62  ;;  %v9448_v45 = vmul.f32 %v9432_v43, %v9224_v11 }
0x10e5   : > { %11687 = vrcp.f32 %v9256_v2  ;;  %v9446_v35 = vmul.f32 %v9430_v32, %v9222_v30  ;;  %vm9190_vm8 = vcmp.ge.f32.partialorder %v14892_v21, 0.0  ;;  %v9158_v21 = vmul.f32 0.5, %v14885_v3 }
0x10e6   : > { %11689 = vrcp.f32 %v9254_v8  ;;  %v9479_v56 = vmul.f32 1.442695, %v9448_v45  ;;  %v9207_v45 = vsel %vm9191_vm5, 1.0, %v15065_v17 }
0x10e7   : > { %11691 = vpow2.f32 %v9477_v16  ;;  %v9475_v63 = vmul.f32 1.442695, %v9446_v35 }
0x10e8   : > { %11693 = vpow2.f32 %v9473_v0 }
0x10e9   : > { %11695 = vpow2.f32 %v9479_v56 }
0x10ea   : > { %11697 = vpow2.f32 %v9475_v63  ;;  %v9157_v63 = vmul.f32 0.5, %v14862_v53 }
0x10ed   : > { %v11684_v59 = vpop.eup %11683 }
0x10ee   : > { %v11686_v6 = vpop.eup %11685  ;;  %v9287_v14 = vmul.f32 1.0614054, %v11684_v59 }
0x10ef   : > { %v9285_v9 = vmul.f32 1.0614054, %v11686_v6  ;;  %v11688_v57 = vpop.eup %11687 }
0x10f0   : > { %v9303_v37 = vadd.f32 -1.4531521, %v9287_v14  ;;  %v9288_v50 = vmul.f32 1.0614054, %v11688_v57  ;;  %v11690_v12 = vpop.eup %11689 }
0x10f1   : > { %v9301_v31 = vadd.f32 -1.4531521, %v9285_v9  ;;  %v9286_v54 = vmul.f32 1.0614054, %v11690_v12  ;;  %v11692_v30 = vpop.eup %11691 }
0x10f2   : > { %v9319_v10 = vmul.f32 %v11684_v59, %v9303_v37  ;;  %v9304_v5 = vadd.f32 -1.4531521, %v9288_v50  ;;  %v11694_v62 = vpop.eup %11693 }
0x10f3   : > { %v9317_v44 = vmul.f32 %v11686_v6, %v9301_v31  ;;  %v9302_v33 = vadd.f32 -1.4531521, %v9286_v54 }
0x10f4   : > { %v9335_v60 = vadd.f32 1.4214138, %v9319_v10  ;;  %v9320_v20 = vmul.f32 %v11688_v57, %v9304_v5  ;;  %v9205_v5 = vsel %vm9189_vm6, 1.0, %v15065_v17 }
0x10f5   : > { %v9333_v15 = vadd.f32 1.4214138, %v9317_v44  ;;  %v9318_v36 = vmul.f32 %v11690_v12, %v9302_v33  ;;  %v11696_v44 = vpop.eup %11695 }
0x10f6   : > { %v9351_v34 = vmul.f32 %v11684_v59, %v9335_v60  ;;  %v9336_v24 = vadd.f32 1.4214138, %v9320_v20  ;;  %v9160_v20 = vmul.f32 0.5, %v14872_v25 }
0x10f7   : > { %v9349_v18 = vmul.f32 %v11686_v6, %v9333_v15  ;;  %v9334_v4 = vadd.f32 1.4214138, %v9318_v36 }
0x10f8   : > { %v9367_v58 = vadd.f32 -0.28449672, %v9351_v34  ;;  %v9352_v28 = vmul.f32 %v11688_v57, %v9336_v24  ;;  %v11698_v34 = vpop.eup %11697 }
0x10f9   : > { %v9365_v49 = vadd.f32 -0.28449672, %v9349_v18  ;;  %v9350_v14 = vmul.f32 %v11690_v12, %v9334_v4  ;;  %v9208_v18 = vsel %vm9192_vm7, 1.0, %v15065_v17 }
0x10fa   : > { %v9383_v52 = vmul.f32 %v11684_v59, %v9367_v58  ;;  %v9368_v8 = vadd.f32 -0.28449672, %v9352_v28  ;;  %v9159_v58 = vmul.f32 0.5, %v14858_v29 }
0x10fb   : > { %v9381_v11 = vmul.f32 %v11686_v6, %v9365_v49  ;;  %v9366_v16 = vadd.f32 -0.28449672, %v9350_v14 }
0x10fc   : > { %v9399_v2 = vadd.f32 0.2548296, %v9383_v52  ;;  %v9384_v43 = vmul.f32 %v11688_v57, %v9368_v8 }
0x10fd   : > { %v9397_v42 = vadd.f32 0.2548296, %v9381_v11  ;;  %v9382_v0 = vmul.f32 %v11690_v12, %v9366_v16 }
0x10fe   : > { %v9415_v51 = vmul.f32 %v11684_v59, %v9399_v2  ;;  %v9400_v10 = vadd.f32 0.2548296, %v9384_v43 }
0x10ff   : > { %v9413_v1 = vmul.f32 %v11686_v6, %v9397_v42  ;;  %v9398_v60 = vadd.f32 0.2548296, %v9382_v0 }
0x1100   : > { %v9495_v9 = vmul.f32 %v11692_v30, %v9415_v51  ;;  %v9416_v32 = vmul.f32 %v11688_v57, %v9400_v10 }
0x1101   : > { %v9493_v37 = vmul.f32 %v11694_v62, %v9413_v1  ;;  %v9414_v15 = vmul.f32 %v11690_v12, %v9398_v60  ;;  %v9206_v12 = vsel %vm9190_vm8, 1.0, %v15065_v17  ;;  %v10056_v17 = vld [vmem:[%s14975_s3 + $0x6] ss:$0 sm:$0xff] }
0x1102   : > { %v9511_v31 = vsub.f32 1.0, %v9495_v9  ;;  %v9496_v50 = vmul.f32 %v11696_v44, %v9416_v32 }
0x1103   : > { %v9509_v59 = vsub.f32 1.0, %v9493_v37  ;;  %v9494_v57 = vmul.f32 %v11698_v34, %v9414_v15 }
0x1104   : > { %v9527_v6 = vmul.f32 %v9511_v31, %v9207_v45  ;;  %v9512_v19 = vsub.f32 1.0, %v9496_v50 }
0x1105   : > { %v9525_v35 = vmul.f32 %v9509_v59, %v9205_v5  ;;  %v9510_v27 = vsub.f32 1.0, %v9494_v57 }
0x1106   : > { %v9543_v56 = vadd.f32 1.0, %v9527_v6  ;;  %v9528_v54 = vmul.f32 %v9512_v19, %v9208_v18 }
0x1107   : > { %v9541_v49 = vadd.f32 1.0, %v9525_v35  ;;  %v9526_v33 = vmul.f32 %v9510_v27, %v9206_v12 }
0x1108   : > { %v9544_v22 = vadd.f32 1.0, %v9528_v54  ;;  %v9559_v52 = vmul.f32 %v9543_v56, %v9159_v58  ;;  %v15066_v54 = vld [vmem:[#allocation3_spill] sm:$0xff] }
0x1109   : > { %v9542_v11 = vadd.f32 1.0, %v9526_v33  ;;  %v9557_v2 = vmul.f32 %v9541_v49, %v9157_v63 }
0x110a   : > { %v9560_v24 = vmul.f32 %v9544_v22, %v9160_v20  ;;  %v15068_v22 = vld [vmem:[#allocation22_spill] sm:$0xff] }
0x110b   : > { %v9558_v28 = vmul.f32 %v9542_v11, %v9158_v21 }
0x110c   : > { %v9568_v36 = vpack.c.bf16 %v9560_v24, %v9559_v52 }
0x110d   : > { %v9567_v42 = vpack.c.bf16 %v9558_v28, %v9557_v2 }
0x110f   : > { %11269 = vmatprep.mubr.msk.bf16.mxu1 %vm504_vm0, %v9567_v42 }
0x1110   : > { %11270 = vmatmul.mubr.msk.bf16.gmra.mrb[44].mxu1 %vm504_vm0, %v9568_v36 }
0x1181   : > { %v11259_v29 = vpop.f32.mrb[32].mxu1 }
0x1182   : > { %v9656_v25 = vadd.f32 %v11259_v29, %v10056_v17  ;;  %v9647_v4 = vpop.f32.mrb[33].mxu1 }
0x1183   : > { %v9648_v53 = vadd.f32 %v10056_v17, %v9647_v4  ;;  %v11260_v3 = vpop.f32.mrb[34].mxu1 }
0x1184   : > { %v9712_v51 = vadd.f32 %v9656_v25, %v14387_v13  ;;  %v9659_v8 = vadd.f32 %v11260_v3, %v10056_v17  ;;  %v9650_v30 = vpop.f32.mrb[35].mxu1 }
0x1185   : > { %v9710_v1 = vadd.f32 %v9648_v53, %v14383_v41  ;;  %v9651_v14 = vadd.f32 %v10056_v17, %v9650_v30 }
0x1186   : > { %9728 = vst.msk [vmem:[%s14919_s15 + $0x10] sm:$0xff] %vm504_vm0, %v9712_v51  ;;  %v9713_v62 = vadd.f32 %v9659_v8, %v14398_v23 }
0x1187   : > { %9726 = vst.msk [vmem:[%s14919_s15] sm:$0xff] %vm504_vm0, %v9710_v1  ;;  %v9711_v9 = vadd.f32 %v9651_v14, %v14391_v38 }
0x1188   : > { %9729 = vst.msk [vmem:[%s14919_s15 + $0x18] sm:$0xff] %vm504_vm0, %v9713_v62 }
0x1189   : > { %9727 = vst.msk [vmem:[%s14919_s15 + $0x8] sm:$0xff] %vm504_vm0, %v9711_v9 }
0x1197   : > { %v11263_v13 = vpop.f32.mrb[36].mxu1 }
0x1198   : > { %v9672_v43 = vadd.f32 %v11263_v13, %v10056_v17  ;;  %v9663_v41 = vpop.f32.mrb[37].mxu1 }
0x1199   : > { %v9664_v37 = vadd.f32 %v10056_v17, %v9663_v41  ;;  %v11264_v16 = vpop.f32.mrb[38].mxu1 }
0x119a   : > { %v9716_v31 = vadd.f32 %v9672_v43, %v14412_v47  ;;  %v9675_v10 = vadd.f32 %v11264_v16, %v10056_v17  ;;  %v9666_v23 = vpop.f32.mrb[39].mxu1 }
0x119b   : > { %v9714_v0 = vadd.f32 %v9664_v37, %v14407_v61  ;;  %v9667_v32 = vadd.f32 %v10056_v17, %v9666_v23 }
0x119c   : > { %9732 = vst.msk [vmem:[%s14919_s15 + $0x30] sm:$0xff] %vm504_vm0, %v9716_v31  ;;  %v9717_v38 = vadd.f32 %v9675_v10, %v14420_v46 }
0x119d   : > { %9730 = vst.msk [vmem:[%s14919_s15 + $0x20] sm:$0xff] %vm504_vm0, %v9714_v0  ;;  %v9715_v44 = vadd.f32 %v9667_v32, %v14415_v26 }
0x119e   : > { %9733 = vst.msk [vmem:[%s14919_s15 + $0x38] sm:$0xff] %vm504_vm0, %v9717_v38 }
0x119f   : > { %9731 = vst.msk [vmem:[%s14919_s15 + $0x28] sm:$0xff] %vm504_vm0, %v9715_v44 }
0x11b7   : > { %v11267_v47 = vpop.f32.mrb[40].mxu1 }
0x11b8   : > { %v9688_v45 = vadd.f32 %v11267_v47, %v10056_v17  ;;  %v9679_v61 = vpop.f32.mrb[41].mxu1 }
0x11b9   : > { %v9680_v59 = vadd.f32 %v10056_v17, %v9679_v61  ;;  %v11268_v60 = vpop.f32.mrb[42].mxu1 }
0x11ba   : > { %v9720_v6 = vadd.f32 %v9688_v45, %v14436_v48  ;;  %v9691_v50 = vadd.f32 %v11268_v60, %v10056_v17  ;;  %v9682_v46 = vpop.f32.mrb[43].mxu1 }
0x11bb   : > { %v9718_v15 = vadd.f32 %v9680_v59, %v14431_v40  ;;  %v9683_v34 = vadd.f32 %v10056_v17, %v9682_v46 }
0x11bc   : > { %9736 = vst.msk [vmem:[%s14919_s15 + $0x50] sm:$0xff] %vm504_vm0, %v9720_v6  ;;  %v9721_v26 = vadd.f32 %v9691_v50, %v14444_v7 }
0x11bd   : > { %9734 = vst.msk [vmem:[%s14919_s15 + $0x40] sm:$0xff] %vm504_vm0, %v9718_v15  ;;  %v9719_v5 = vadd.f32 %v9683_v34, %v14439_v55  ;;  %v15067_v55 = vld [vmem:[#allocation4_spill] sm:$0xff] }
0x11be   : > { %9737 = vst.msk [vmem:[%s14919_s15 + $0x58] sm:$0xff] %vm504_vm0, %v9721_v26 }
0x11bf   : > { %9735 = vst.msk [vmem:[%s14919_s15 + $0x48] sm:$0xff] %vm504_vm0, %v9719_v5 }
0x11e3   : > { %v11271_v48 = vpop.f32.mrb[44].mxu1 }
0x11e4   : > { %v9704_v19 = vadd.f32 %v11271_v48, %v10056_v17  ;;  %v9695_v40 = vpop.f32.mrb[45].mxu1 }
0x11e5   : > { %v9696_v35 = vadd.f32 %v10056_v17, %v9695_v40  ;;  %v11272_v18 = vpop.f32.mrb[46].mxu1 }
0x11e6   : > { %v9724_v57 = vadd.f32 %v9704_v19, %v14460_v39  ;;  %v9707_v56 = vadd.f32 %v11272_v18, %v10056_v17  ;;  %v9698_v7 = vpop.f32.mrb[47].mxu1 }
0x11e7   : > { %v9722_v27 = vadd.f32 %v9696_v35, %v15066_v54  ;;  %v9699_v58 = vadd.f32 %v10056_v17, %v9698_v7 }
0x11e8   : > { %9740 = vst.msk [vmem:[%s14919_s15 + $0x70] sm:$0xff] %vm504_vm0, %v9724_v57  ;;  %v9725_v20 = vadd.f32 %v9707_v56, %v15067_v55 }
0x11e9   : > { %9738 = vst.msk [vmem:[%s14919_s15 + $0x60] sm:$0xff] %vm504_vm0, %v9722_v27  ;;  %v9723_v12 = vadd.f32 %v9699_v58, %v15068_v22 }
0x11ea   : > { %9741 = vst.msk [vmem:[%s14919_s15 + $0x78] sm:$0xff] %vm504_vm0, %v9725_v20 }
0x11eb   : > { %9739 = vst.msk [vmem:[%s14919_s15 + $0x68] sm:$0xff] %vm504_vm0, %v9723_v12 }
0x11ec PF: > { %s22_s17 = sadd.s32 1, %s11721_s17  }
0x11ed   : > { %p19_p6 = scmp.ge.s32.totalorder %s22_s17, 4  }
0x11ef   :  { %21 = sbr.rel (!%p19_p6) target bundleno = 1 (0x1), region = 108 }

</bundles_post_ra>
